<compile_context>
chip_gen: v6e
topology: v6e:2x2x1
jax: 0.10.0
libtpu: 0.0.40
codegen_flags: <defaults>
</compile_context>

<pallas_src>
import jax
import jax.numpy as jnp
from jax.experimental import pallas as pl
from jax.experimental.pallas import tpu as pltpu

C_IN = 256
C_HID = 1024
C_OUT = 2


def _round_up(a, b):
    return ((a + b - 1) // b) * b


def _cdiv(a, b):
    return (a + b - 1) // b


def score_branch_pallas(x_nchw, w1, b1, w2, b2, *, t_hw=1024):
    """x_nchw: (N, 256, H, W) f32.

    Weight layout (maps 1:1 from the PyTorch module):
      w1: (1024, 256)  == conv1.weight.reshape(1024, 256)
      b1: (1024, 1)    == conv1.bias[:, None]
      w2: (2, 1024)    == conv2.weight.reshape(2, 1024)
      b2: (2, 1)       == conv2.bias[:, None]
    Returns (score (N, 2, H, W) f32, pos (2,) int32).
    """
    N, C, H, W = x_nchw.shape
    assert C == C_IN
    HW = H * W

    # Lane tile: multiple of 128, bounded by t_hw, shrunk (floor 256) until
    # the grid has >= 4 steps (v7x megacore; harmless on v5e/v6e).
    t = min(t_hw, _round_up(HW, 128))
    t = _round_up(t, 128)
    while N * _cdiv(HW, t) < 4 and t > 256:
        t = max(256, _round_up(t // 2, 128))
    HWp = _round_up(HW, t)
    T = HWp // t

    x3 = x_nchw.reshape(N, C_IN, HW).astype(jnp.float32)  # f32; cast to bf16 in-kernel
    if HWp != HW:
        x3 = jnp.pad(x3, ((0, 0), (0, 0), (0, HWp - HW)))

    w1b = w1.astype(jnp.bfloat16)        # (C_HID, C_IN)  resident MXU operand
    w2t = w2.astype(jnp.float32).T       # (C_HID, C_OUT) resident VPU operand (f32)
    b1f = b1.astype(jnp.float32)         # (C_HID, 1)
    b2f = b2.astype(jnp.float32)         # (C_OUT, 1)

    def kernel(x_ref, w1_ref, b1_ref, w2_ref, b2_ref, o_ref, m_ref):
        j = pl.program_id(1)
        x = x_ref[0].astype(jnp.bfloat16)                                 # (C_IN, t)
        # conv1 (1x1) == channel matmul on the MXU, f32 accumulation.
        h = jnp.dot(w1_ref[...], x, preferred_element_type=jnp.float32)   # (C_HID, t)
        h = jnp.maximum(h + b1_ref[...], 0.0)                             # bias + ReLU (f32)
        # conv2 (1x1, only 2 output channels): VPU broadcast-mul + sublane sum.
        # Keeps h in f32 and avoids pushing the big h operand through the MXU.
        w2c = w2_ref[...]                                                  # (C_HID, 2) f32
        s0 = jnp.sum(h * w2c[:, 0:1], axis=0, keepdims=True)              # (1, t)
        s1 = jnp.sum(h * w2c[:, 1:2], axis=0, keepdims=True)              # (1, t)
        p0 = jax.nn.sigmoid(s0 + b2_ref[0:1, :])
        p1 = jax.nn.sigmoid(s1 + b2_ref[1:2, :])
        o_ref[0, 0:1, :] = p0
        o_ref[0, 1:2, :] = p1
        # Fused, padding-masked per-tile max of channel 1 (batch selection on host).
        lane = jax.lax.broadcasted_iota(jnp.int32, (1, t), 1)
        valid = (j * t + lane) < HW
        tile_max = jnp.max(jnp.where(valid, p1, -jnp.inf), keepdims=True)  # (1, 1)
        m_ref[0, 0] = jnp.broadcast_to(tile_max, (8, 128))

    grid = (N, T)

    cost = pl.CostEstimate(
        flops=2 * N * HWp * (C_IN * C_HID + C_HID * C_OUT),
        transcendentals=N * HWp * C_OUT,
        bytes_accessed=(x3.size * 4 + w1b.size * 2 + w2t.size * 4
                        + b1f.size * 4 + b2f.size * 4
                        + N * C_OUT * HWp * 4 + N * T * 8 * 128 * 4),
    )

    # VMEM footprint: double-buffered x/score/tile-max tiles + resident weights
    # (b1 and w2 pad to 128 lanes) + f32 h and mul/reduce temporaries.
    vmem_est = (2 * C_IN * t * 4                 # x tiles (f32)
                + 2 * 8 * t * 4                  # score tiles (sublane-padded)
                + 2 * 8 * 128 * 4                # tile-max tiles
                + 2 * (C_HID * C_IN * 2 + 2 * C_HID * 128 * 4 + 8 * 128 * 4)
                + 3 * C_HID * t * 4)             # h + reduction temporaries
    vmem_limit = min(64 * 1024 * 1024,
                     max(32 * 1024 * 1024, int(1.5 * vmem_est)))

    score_p, tile_max = pl.pallas_call(
        kernel,
        out_shape=(jax.ShapeDtypeStruct((N, C_OUT, HWp), jnp.float32),
                   jax.ShapeDtypeStruct((N, T, 8, 128), jnp.float32)),
        grid_spec=pltpu.PrefetchScalarGridSpec(
            num_scalar_prefetch=0,
            grid=grid,
            in_specs=[
                pl.BlockSpec((1, C_IN, t), lambda n, jj: (n, 0, jj)),   # x tile (streamed)
                pl.BlockSpec((C_HID, C_IN), lambda n, jj: (0, 0)),      # W1 (resident)
                pl.BlockSpec((C_HID, 1), lambda n, jj: (0, 0)),         # b1
                pl.BlockSpec((C_HID, C_OUT), lambda n, jj: (0, 0)),     # W2 (resident, f32)
                pl.BlockSpec((C_OUT, 1), lambda n, jj: (0, 0)),         # b2
            ],
            out_specs=[
                pl.BlockSpec((1, C_OUT, t), lambda n, jj: (n, 0, jj)),
                pl.BlockSpec((1, 1, 8, 128), lambda n, jj: (n, jj, 0, 0)),
            ],
        ),
        compiler_params=pltpu.CompilerParams(
            dimension_semantics=("parallel", "parallel"),
            vmem_limit_bytes=vmem_limit,
        ),
        cost_estimate=cost,
    )(x3, w1b, b1f, w2t, b2f)

    # Drop spatial padding; result is already NCHW ordered.
    score = score_p[:, :, :HW].reshape(N, C_OUT, H, W)

    # PyTorch post-processing glue (exact semantics):
    #   max_value = score[0][1].max()                 -> fused per-tile maxima
    #   pos = (score == max_value).nonzero()[0][2:]   (first row-major match; keep h, w)
    max_value = jnp.max(tile_max[0])
    first_idx = jnp.argmax((score == max_value).reshape(-1))
    _, _, h_idx, w_idx = jnp.unravel_index(first_idx, score.shape)
    pos = jnp.stack([h_idx, w_idx]).astype(jnp.int32)
    return score, pos


def init_params(key):
    k1, k2, k3, k4 = jax.random.split(key, 4)
    # Conv2d(256, 1024, 1): weight (1024,256,1,1) -> (1024,256); bias (1024,) -> (1024,1)
    w1 = jax.random.normal(k1, (C_HID, C_IN), jnp.float32) * 0.02
    b1 = jax.random.normal(k2, (C_HID, 1), jnp.float32) * 0.02
    # Conv2d(1024, 2, 1): weight (2,1024,1,1) -> (2,1024); bias (2,) -> (2,1)
    w2 = jax.random.normal(k3, (C_OUT, C_HID), jnp.float32) * 0.02
    b2 = jax.random.normal(k4, (C_OUT, 1), jnp.float32) * 0.02
    return w1, b1, w2, b2


if __name__ == "__main__":
    key = jax.random.PRNGKey(0)
    kx, kp = jax.random.split(key)

    N, H, W = 2, 16, 16
    x = jax.random.normal(kx, (N, C_IN, H, W), jnp.float32)
    w1, b1, w2, b2 = init_params(kp)

    score, pos = jax.jit(score_branch_pallas)(x, w1, b1, w2, b2)
    jax.block_until_ready((score, pos))

    # Reference with the same bf16 conv1 operands + f32 accumulation; f32 conv2.
    xb = x.reshape(N, C_IN, H * W).astype(jnp.bfloat16)
    h = jnp.einsum("oc,ncs->nos", w1.astype(jnp.bfloat16), xb,
                   preferred_element_type=jnp.float32) + b1[None]
    h = jnp.maximum(h, 0.0)
    s = jnp.einsum("oc,ncs->nos", w2, h,
                   preferred_element_type=jnp.float32) + b2[None]
    ref = jax.nn.sigmoid(s).reshape(N, C_OUT, H, W)

    assert score.shape == (N, C_OUT, H, W)
    assert jnp.allclose(score, ref, atol=2e-3), "score mismatch vs reference"

    # Replicate the PyTorch max/argmax quirk directly on the kernel output and
    # check the fused per-tile-max path agrees with it.
    mv = jnp.max(score[0, 1])
    fi = jnp.argmax((score == mv).reshape(-1))
    _, _, eh, ew = jnp.unravel_index(fi, score.shape)
    assert pos.shape == (2,) and pos.dtype == jnp.int32
    assert bool(pos[0] == eh) and bool(pos[1] == ew), "pos mismatch vs reference"
    assert (pos[0] >= 0) & (pos[0] < H) & (pos[1] >= 0) & (pos[1] < W)

    print("KERNEL_OK")
</pallas_src>

<mosaic_0001>
module attributes {stable_mosaic.version = 11 : i64} {
  func.func @kernel(%arg0: i32, %arg1: i32, %arg2: memref<1x256x256xf32, #tpu.memory_space<vmem>>, %arg3: memref<1024x256xbf16, #tpu.memory_space<vmem>>, %arg4: memref<1024x1xf32, #tpu.memory_space<vmem>>, %arg5: memref<1024x2xf32, #tpu.memory_space<vmem>>, %arg6: memref<2x1xf32, #tpu.memory_space<vmem>>, %arg7: memref<1x2x256xf32, #tpu.memory_space<vmem>>, %arg8: memref<1x1x8x128xf32, #tpu.memory_space<vmem>>) attributes {dimension_semantics = [#tpu.dimension_semantics<parallel>, #tpu.dimension_semantics<parallel>], iteration_bounds = array<i64: 2, 1>, scalar_prefetch = 0 : i64, scratch_operands = 0 : i64, tpu.core_type = #tpu.core_type<tc>, window_params = [{transform_indices = @transform_0, window_bounds = array<i64: 1, 256, 256>}, {pipeline_mode = #tpu.pipeline_mode<synchronous>, transform_indices = @transform_1, window_bounds = array<i64: 1024, 256>}, {pipeline_mode = #tpu.pipeline_mode<synchronous>, transform_indices = @transform_2, window_bounds = array<i64: 1024, 1>}, {pipeline_mode = #tpu.pipeline_mode<synchronous>, transform_indices = @transform_3, window_bounds = array<i64: 1024, 2>}, {pipeline_mode = #tpu.pipeline_mode<synchronous>, transform_indices = @transform_4, window_bounds = array<i64: 2, 1>}, {transform_indices = @transform_5, window_bounds = array<i64: 1, 2, 256>}, {transform_indices = @transform_6, window_bounds = array<i64: 1, 1, 8, 128>}]} {
    %c0 = arith.constant 0 : index
    %c0_0 = arith.constant 0 : index
    %c0_1 = arith.constant 0 : index
    %0 = vector.load %arg2[%c0, %c0_0, %c0_1] : memref<1x256x256xf32, #tpu.memory_space<vmem>>, vector<1x256x256xf32>
    %1 = vector.shape_cast %0 : vector<1x256x256xf32> to vector<256x256xf32>
    %2 = arith.truncf %1 : vector<256x256xf32> to vector<256x256xbf16>
    %c0_2 = arith.constant 0 : index
    %c0_3 = arith.constant 0 : index
    %3 = vector.load %arg3[%c0_2, %c0_3] : memref<1024x256xbf16, #tpu.memory_space<vmem>>, vector<1024x256xbf16>
    %cst = arith.constant dense<0.000000e+00> : vector<1024x256xf32>
    %4 = tpu.matmul %3, %2, %cst {dimension_numbers = #tpu.dot_dimension_numbers<[1], [0], [0], [1], [0, 0, 1, 1], [], []>} : vector<1024x256xbf16>, vector<256x256xbf16>, vector<1024x256xf32> -> vector<1024x256xf32>
    %c0_4 = arith.constant 0 : index
    %c0_5 = arith.constant 0 : index
    %5 = vector.load %arg4[%c0_4, %c0_5] : memref<1024x1xf32, #tpu.memory_space<vmem>>, vector<1024x1xf32>
    %6 = vector.broadcast %5 : vector<1024x1xf32> to vector<1024x256xf32>
    %7 = arith.addf %4, %6 : vector<1024x256xf32>
    %cst_6 = arith.constant 0.000000e+00 : f32
    %8 = vector.broadcast %cst_6 : f32 to vector<1024x256xf32>
    %9 = arith.maximumf %7, %8 : vector<1024x256xf32>
    %c0_7 = arith.constant 0 : index
    %c0_8 = arith.constant 0 : index
    %10 = vector.load %arg5[%c0_7, %c0_8] : memref<1024x2xf32, #tpu.memory_space<vmem>>, vector<1024x2xf32>
    %11 = vector.extract_strided_slice %10 {offsets = [0, 0], sizes = [1024, 1], strides = [1, 1]} : vector<1024x2xf32> to vector<1024x1xf32>
    %12 = vector.broadcast %11 : vector<1024x1xf32> to vector<1024x256xf32>
    %13 = arith.mulf %9, %12 : vector<1024x256xf32>
    %cst_9 = arith.constant dense<0.000000e+00> : vector<256xf32>
    %14 = vector.multi_reduction <add>, %13, %cst_9 [0] : vector<1024x256xf32> to vector<256xf32>
    %15 = vector.shape_cast %14 : vector<256xf32> to vector<1x256xf32>
    %16 = vector.extract_strided_slice %10 {offsets = [0, 1], sizes = [1024, 1], strides = [1, 1]} : vector<1024x2xf32> to vector<1024x1xf32>
    %17 = vector.broadcast %16 : vector<1024x1xf32> to vector<1024x256xf32>
    %18 = arith.mulf %9, %17 : vector<1024x256xf32>
    %cst_10 = arith.constant dense<0.000000e+00> : vector<256xf32>
    %19 = vector.multi_reduction <add>, %18, %cst_10 [0] : vector<1024x256xf32> to vector<256xf32>
    %20 = vector.shape_cast %19 : vector<256xf32> to vector<1x256xf32>
    %c0_11 = arith.constant 0 : index
    %c0_12 = arith.constant 0 : index
    %21 = vector.load %arg6[%c0_11, %c0_12] : memref<2x1xf32, #tpu.memory_space<vmem>>, vector<1x1xf32>
    %22 = vector.broadcast %21 : vector<1x1xf32> to vector<1x256xf32>
    %23 = arith.addf %15, %22 : vector<1x256xf32>
    %24 = arith.negf %23 : vector<1x256xf32>
    %25 = math.exp %24 : vector<1x256xf32>
    %cst_13 = arith.constant 1.000000e+00 : f32
    %26 = vector.broadcast %cst_13 : f32 to vector<1x256xf32>
    %27 = arith.addf %26, %25 : vector<1x256xf32>
    %28 = arith.divf %26, %27 : vector<1x256xf32>
    %c1 = arith.constant 1 : index
    %c0_14 = arith.constant 0 : index
    %29 = vector.load %arg6[%c1, %c0_14] : memref<2x1xf32, #tpu.memory_space<vmem>>, vector<1x1xf32>
    %30 = vector.broadcast %29 : vector<1x1xf32> to vector<1x256xf32>
    %31 = arith.addf %20, %30 : vector<1x256xf32>
    %32 = arith.negf %31 : vector<1x256xf32>
    %33 = math.exp %32 : vector<1x256xf32>
    %cst_15 = arith.constant 1.000000e+00 : f32
    %34 = vector.broadcast %cst_15 : f32 to vector<1x256xf32>
    %35 = arith.addf %34, %33 : vector<1x256xf32>
    %36 = arith.divf %34, %35 : vector<1x256xf32>
    %c0_16 = arith.constant 0 : index
    %c0_17 = arith.constant 0 : index
    %c0_18 = arith.constant 0 : index
    %37 = vector.load %arg7[%c0_16, %c0_17, %c0_18] : memref<1x2x256xf32, #tpu.memory_space<vmem>>, vector<1x1x256xf32>
    %38 = vector.shape_cast %37 : vector<1x1x256xf32> to vector<1x256xf32>
    %39 = vector.shape_cast %28 : vector<1x256xf32> to vector<1x1x256xf32>
    tpu.vector_store %arg7[%c0_16, %c0_17, %c0_18], %39 {strides = array<i32>} : memref<1x2x256xf32, #tpu.memory_space<vmem>>, vector<1x1x256xf32>,
    %c0_19 = arith.constant 0 : index
    %c1_20 = arith.constant 1 : index
    %c0_21 = arith.constant 0 : index
    %40 = vector.load %arg7[%c0_19, %c1_20, %c0_21] : memref<1x2x256xf32, #tpu.memory_space<vmem>>, vector<1x1x256xf32>
    %41 = vector.shape_cast %40 : vector<1x1x256xf32> to vector<1x256xf32>
    %42 = vector.shape_cast %36 : vector<1x256xf32> to vector<1x1x256xf32>
    tpu.vector_store %arg7[%c0_19, %c1_20, %c0_21], %42 {strides = array<i32>} : memref<1x2x256xf32, #tpu.memory_space<vmem>>, vector<1x1x256xf32>,
    %43 = tpu.iota {dimensions = array<i32: 1>} : vector<1x256xi32>
    %c256_i32 = arith.constant 256 : i32
    %44 = arith.muli %arg1, %c256_i32 : i32
    %45 = vector.broadcast %44 : i32 to vector<1x256xi32>
    %46 = arith.addi %45, %43 : vector<1x256xi32>
    %c256_i32_22 = arith.constant 256 : i32
    %47 = vector.broadcast %c256_i32_22 : i32 to vector<1x256xi32>
    %48 = arith.cmpi slt, %46, %47 : vector<1x256xi32>
    %cst_23 = arith.constant 0xFF800000 : f32
    %49 = vector.broadcast %cst_23 : f32 to vector<1x256xf32>
    %50 = arith.select %48, %36, %49 : vector<1x256xi1>, vector<1x256xf32>
    %51 = vector.shape_cast %50 : vector<1x256xf32> to vector<1x1x256xf32>
    %cst_24 = arith.constant dense<0xFF800000> : vector<1xf32>
    %52 = vector.multi_reduction <maximumf>, %51, %cst_24 [1, 2] : vector<1x1x256xf32> to vector<1xf32>
    %53 = vector.shape_cast %52 : vector<1xf32> to vector<1x1x1xf32>
    %54 = vector.extract %53[0, 0, 0] : f32 from vector<1x1x1xf32>
    %55 = vector.broadcast %54 : f32 to vector<1x1xf32>
    %56 = vector.shape_cast %55 : vector<1x1xf32> to vector<1x1xf32>
    %57 = vector.broadcast %56 : vector<1x1xf32> to vector<8x128xf32>
    %c0_25 = arith.constant 0 : index
    %c0_26 = arith.constant 0 : index
    %c0_27 = arith.constant 0 : index
    %c0_28 = arith.constant 0 : index
    %58 = vector.load %arg8[%c0_25, %c0_26, %c0_27, %c0_28] : memref<1x1x8x128xf32, #tpu.memory_space<vmem>>, vector<1x1x8x128xf32>
    %59 = vector.shape_cast %58 : vector<1x1x8x128xf32> to vector<8x128xf32>
    %60 = vector.shape_cast %57 : vector<8x128xf32> to vector<1x1x8x128xf32>
    tpu.vector_store %arg8[%c0_25, %c0_26, %c0_27, %c0_28], %60 {strides = array<i32>} : memref<1x1x8x128xf32, #tpu.memory_space<vmem>>, vector<1x1x8x128xf32>,
    return
  }
  func.func @transform_0(%arg0: i32, %arg1: i32) -> (i32, i32, i32) {
    %c0_i32 = arith.constant 0 : i32
    %c0_i32_0 = arith.constant 0 : i32
    return %arg0, %c0_i32, %arg1 : i32, i32, i32
  }
  func.func @transform_1(%arg0: i32, %arg1: i32) -> (i32, i32) {
    %c0_i32 = arith.constant 0 : i32
    %c0_i32_0 = arith.constant 0 : i32
    %c0_i32_1 = arith.constant 0 : i32
    return %c0_i32, %c0_i32_0 : i32, i32
  }
  func.func @transform_2(%arg0: i32, %arg1: i32) -> (i32, i32) {
    %c0_i32 = arith.constant 0 : i32
    %c0_i32_0 = arith.constant 0 : i32
    %c0_i32_1 = arith.constant 0 : i32
    return %c0_i32, %c0_i32_0 : i32, i32
  }
  func.func @transform_3(%arg0: i32, %arg1: i32) -> (i32, i32) {
    %c0_i32 = arith.constant 0 : i32
    %c0_i32_0 = arith.constant 0 : i32
    %c0_i32_1 = arith.constant 0 : i32
    return %c0_i32, %c0_i32_0 : i32, i32
  }
  func.func @transform_4(%arg0: i32, %arg1: i32) -> (i32, i32) {
    %c0_i32 = arith.constant 0 : i32
    %c0_i32_0 = arith.constant 0 : i32
    %c0_i32_1 = arith.constant 0 : i32
    return %c0_i32, %c0_i32_0 : i32, i32
  }
  func.func @transform_5(%arg0: i32, %arg1: i32) -> (i32, i32, i32) {
    %c0_i32 = arith.constant 0 : i32
    %c0_i32_0 = arith.constant 0 : i32
    return %arg0, %c0_i32, %arg1 : i32, i32, i32
  }
  func.func @transform_6(%arg0: i32, %arg1: i32) -> (i32, i32, i32, i32) {
    %c0_i32 = arith.constant 0 : i32
    %c0_i32_0 = arith.constant 0 : i32
    %c0_i32_1 = arith.constant 0 : i32
    return %arg0, %arg1, %c0_i32, %c0_i32_0 : i32, i32, i32, i32
  }
}

</mosaic_0001>

<bundles_post_ra>
// kernel: score_branch_pallas.1
= control target key start
LH: loop header
LB: loop body
LE: loop exit
PB: predicated region body
PF: predicated region fallthrough
CT: control target
= control target key end

     0   :  { %s6044_s21 = smov 0   ;;  %s6046_s22 = smov 0   ;;  %s10971_s0 = inlined_call_operand.vmem [shape: f32[2,256,256], index: 0, kind: input, shape index: {}]   ;;  %s10972_s1 = inlined_call_operand.vmem [shape: bf16[1024,256], index: 1, kind: input, shape index: {}]   ;;  %s10973_s2 = inlined_call_operand.vmem [shape: f32[1024,1], index: 2, kind: input, shape index: {}]   ;;  %s10974_s3 = inlined_call_operand.vmem [shape: f32[1024,2], index: 3, kind: input, shape index: {}]   ;;  %s10975_s4 = inlined_call_operand.vmem [shape: f32[2,1], index: 4, kind: input, shape index: {}]   ;;  %s10976_s5 = inlined_call_operand.vmem [shape: f32[2,2,256], index: 5, kind: output, shape index: {0}]   ;;  %s10977_s6 = inlined_call_operand.vmem [shape: f32[2,1,8,128], index: 6, kind: output, shape index: {1}]  }
   0x1   :  { %s6048_s23 = smov 0  }
   0x2 LB: > { %s29_s24 = sadd.s32 1, %s6000_s22  ;;  %p5436_p0 = scmp.ge.s32.totalorder %s6004_s23, 1  ;;  %s6004_s23 = sphi %s6048_s23, %s17_s23   ;;  %s6000_s22 = sphi %s6046_s22, %s12589_s22   ;;  %s5996_s21 = sphi %s6044_s21, %s12588_s21  }
   0x3   : > { %p31_p1 = scmp.ge.s32.totalorder %s29_s24, 2  ;;  %p238_p2 = scmp.lt.s32.totalorder %s6004_s23, 3 }
   0x5   : > { %s12591_s24 = smov (%p31_p1, %s29_s24), 0  ;;  %p239_p3 = pnand %p5436_p0, %p238_p2 }
   0x7   : > { %242 = sbr.rel (%p239_p3) target bundleno = 1210 (0x4ba), region = 40 }
   0xc   : > { %v536_v0 = vld [vmem:[%s10973_s2 + $0x10] sm:$0xff]  ;;  %v534_v1 = vld [vmem:[%s10973_s2] sm:$0xff]  ;;  %p284_p4 = scmp.lt.s32.totalorder %s5996_s21, 1  ;;  %v10978_v2 = vmov 0   ;;  %v537_v3 = vld [vmem:[%s10973_s2 + $0x18] sm:$0xff]  ;;  %vm5289_vm1 = vcmask 1040384  }
   0xd   : > { %5641 = vset.pattern.permute.xlu1 %v10978_v2  ;;  %5640 = vset.pattern.permute.xlu0 %v10978_v2  ;;  %v535_v4 = vld [vmem:[%s10973_s2 + $0x8] sm:$0xff]  ;;  %v538_v6 = vld [vmem:[%s10973_s2 + $0x20] sm:$0xff]  ;;  %v541_v20 = vld [vmem:[%s10973_s2 + $0x38] sm:$0xff] }
   0xe   : > { %674 = vperm.xlu1 %5641, %v536_v0   ;;  %664 = vperm.xlu0 %5640, %v534_v1   ;;  %s12593_s21 = smov (!%p284_p4, %s5996_s21), 1  ;;  %v539_v5 = vld [vmem:[%s10973_s2 + $0x28] sm:$0xff]  ;;  %v540_v21 = vld [vmem:[%s10973_s2 + $0x30] sm:$0xff]  ;;  %v542_v29 = vld [vmem:[%s10973_s2 + $0x40] sm:$0xff] }
   0xf   : > { %s5577_s9 = sshll.u32 %s12593_s21, 9  ;;  %v543_v28 = vld [vmem:[%s10973_s2 + $0x48] sm:$0xff]  ;;  %v545_v36 = vld [vmem:[%s10973_s2 + $0x58] sm:$0xff]  ;;  %v544_v37 = vld [vmem:[%s10973_s2 + $0x50] sm:$0xff]  ;;  %s5578_s16 = sshll.u32 %s12593_s21, 2 }
  0x10   : > { %s6082_s12 = scalar_lea.vmem %s10971_s0, %s5577_s9  ;;  %v547_v44 = vld [vmem:[%s10973_s2 + $0x68] sm:$0xff]  ;;  %v546_v45 = vld [vmem:[%s10973_s2 + $0x60] sm:$0xff]  ;;  %v549_v52 = vld [vmem:[%s10973_s2 + $0x78] sm:$0xff]  ;;  %s301_s19 = scalar_lea.vmem %s10976_s5, %s5578_s16 }
  0x11   : > { %v339_v7 = vld [vmem:[%s6082_s12 + $0xe8] sm:$0xff]  ;;  %v341_v8 = vld [vmem:[%s6082_s12 + $0xf8] sm:$0xff]  ;;  %v338_v9 = vld [vmem:[%s6082_s12 + $0xe0] sm:$0xff]  ;;  %s5441_s20 = sshll.u32 %s12593_s21, 3 }
  0x12   : > { %679 = vperm.xlu1 %5641, %v537_v3   ;;  %669 = vperm.xlu0 %5640, %v535_v4   ;;  %v389_v10 = vpack.c.bf16 %v341_v8, %v339_v7  ;;  %v340_v11 = vld [vmem:[%s6082_s12 + $0xf0] sm:$0xff]  ;;  %v335_v12 = vld [vmem:[%s6082_s12 + $0xc8] sm:$0xff]  ;;  %v337_v13 = vld [vmem:[%s6082_s12 + $0xd8] sm:$0xff]  ;;  %s309_s27 = scalar_lea.vmem %s10977_s6, %s5441_s20 }
  0x13   : > { %v388_v14 = vpack.c.bf16 %v340_v11, %v338_v9  ;;  %v387_v15 = vpack.c.bf16 %v337_v13, %v335_v12  ;;  %v334_v16 = vld [vmem:[%s6082_s12 + $0xc0] sm:$0xff]  ;;  %v336_v17 = vld [vmem:[%s6082_s12 + $0xd0] sm:$0xff]  ;;  %v331_v18 = vld [vmem:[%s6082_s12 + $0xa8] sm:$0xff] }
  0x14   : > { %1942 = vmatprep.subr.bf16.mxu0 %v389_v10  ;;  %5579 = vmatprep.subr.bf16.mxu1 %v389_v10  ;;  %v333_v19 = vld [vmem:[%s6082_s12 + $0xb8] sm:$0xff]  ;;  %v386_v22 = vpack.c.bf16 %v336_v17, %v334_v16  ;;  %v330_v24 = vld [vmem:[%s6082_s12 + $0xa0] sm:$0xff]  ;;  %v332_v25 = vld [vmem:[%s6082_s12 + $0xb0] sm:$0xff] }
  0x15   : > { %1943 = vmatpush1.bf16.msra.mxu0 %v388_v14  ;;  %5595 = vmatpush1.bf16.msra.mxu1 %v388_v14  ;;  %v385_v23 = vpack.c.bf16 %v333_v19, %v331_v18  ;;  %v327_v26 = vld [vmem:[%s6082_s12 + $0x88] sm:$0xff]  ;;  %v329_v27 = vld [vmem:[%s6082_s12 + $0x98] sm:$0xff]  ;;  %v384_v30 = vpack.c.bf16 %v332_v25, %v330_v24  ;;  %v326_v32 = vld [vmem:[%s6082_s12 + $0x80] sm:$0xff] }
  0x16   : > { %689 = vperm.xlu1 %5641, %v539_v5   ;;  %684 = vperm.xlu0 %5640, %v538_v6   ;;  %v383_v31 = vpack.c.bf16 %v329_v27, %v327_v26  ;;  %v328_v33 = vld [vmem:[%s6082_s12 + $0x90] sm:$0xff]  ;;  %v323_v34 = vld [vmem:[%s6082_s12 + $0x68] sm:$0xff]  ;;  %v325_v35 = vld [vmem:[%s6082_s12 + $0x78] sm:$0xff] }
  0x17   : > { %1944 = vmatprep.subr.bf16.mxu0 %v387_v15  ;;  %5580 = vmatprep.subr.bf16.mxu1 %v387_v15  ;;  %v382_v38 = vpack.c.bf16 %v328_v33, %v326_v32  ;;  %v381_v39 = vpack.c.bf16 %v325_v35, %v323_v34  ;;  %v322_v40 = vld [vmem:[%s6082_s12 + $0x60] sm:$0xff]  ;;  %v324_v41 = vld [vmem:[%s6082_s12 + $0x70] sm:$0xff]  ;;  %v319_v42 = vld [vmem:[%s6082_s12 + $0x48] sm:$0xff] }
  0x18   : > { %v321_v43 = vld [vmem:[%s6082_s12 + $0x58] sm:$0xff]  ;;  %v380_v46 = vpack.c.bf16 %v324_v41, %v322_v40  ;;  %v318_v48 = vld [vmem:[%s6082_s12 + $0x40] sm:$0xff]  ;;  %v320_v49 = vld [vmem:[%s6082_s12 + $0x50] sm:$0xff] }
  0x19   : > { %1945 = vmatpush1.bf16.msra.mxu0 %v386_v22  ;;  %5596 = vmatpush1.bf16.msra.mxu1 %v386_v22  ;;  %v379_v47 = vpack.c.bf16 %v321_v43, %v319_v42  ;;  %v315_v50 = vld [vmem:[%s6082_s12 + $0x28] sm:$0xff]  ;;  %v317_v51 = vld [vmem:[%s6082_s12 + $0x38] sm:$0xff]  ;;  %v548_v53 = vld [vmem:[%s10973_s2 + $0x70] sm:$0xff]  ;;  %v378_v54 = vpack.c.bf16 %v320_v49, %v318_v48 }
  0x1a   : > { %699 = vperm.xlu1 %5641, %v541_v20   ;;  %694 = vperm.xlu0 %5640, %v540_v21   ;;  %v377_v55 = vpack.c.bf16 %v317_v51, %v315_v50  ;;  %v314_v56 = vld [vmem:[%s6082_s12 + $0x20] sm:$0xff]  ;;  %v316_v57 = vld [vmem:[%s6082_s12 + $0x30] sm:$0xff]  ;;  %v311_v58 = vld [vmem:[%s6082_s12 + $0x8] sm:$0xff] }
  0x1b   : > { %1946 = vmatprep.subr.bf16.mxu0 %v385_v23  ;;  %5581 = vmatprep.subr.bf16.mxu1 %v385_v23  ;;  %v313_v59 = vld [vmem:[%s6082_s12 + $0x18] sm:$0xff]  ;;  %v551_v60 = vld [vmem:[%s10973_s2 + $0x88] sm:$0xff]  ;;  %v550_v61 = vld [vmem:[%s10973_s2 + $0x80] sm:$0xff]  ;;  %v376_v62 = vpack.c.bf16 %v316_v57, %v314_v56 }
  0x1c   : > { %v375_v63 = vpack.c.bf16 %v313_v59, %v311_v58  ;;  %v310_v0 = vld [vmem:[%s6082_s12] sm:$0xff]  ;;  %v312_v1 = vld [vmem:[%s6082_s12 + $0x10] sm:$0xff]  ;;  %v371_v3 = vld [vmem:[%s6082_s12 + $0x1e8] sm:$0xff] }
  0x1d   : > { %1947 = vmatpush1.bf16.msra.mxu0 %v384_v30  ;;  %5597 = vmatpush1.bf16.msra.mxu1 %v384_v30  ;;  %v373_v4 = vld [vmem:[%s6082_s12 + $0x1f8] sm:$0xff]  ;;  %v5648_v6 = vld [vmem:[%s10972_s1 + $0x4] ss:$8 sps:$4 sm:$0xff]   ;;  %v552_v7 = vld [vmem:[%s10973_s2 + $0x90] sm:$0xff]  ;;  %v374_v8 = vpack.c.bf16 %v312_v1, %v310_v0 }
  0x1e   : > { %709 = vperm.xlu1 %5641, %v543_v28   ;;  %704 = vperm.xlu0 %5640, %v542_v29   ;;  %v553_v5 = vld [vmem:[%s10973_s2 + $0x98] sm:$0xff]  ;;  %v5651_v9 = vld [vmem:[%s10972_s1 + $0x204] ss:$8 sps:$4 sm:$0xff]   ;;  %v405_v10 = vpack.c.bf16 %v373_v4, %v371_v3  ;;  %v372_v12 = vld [vmem:[%s6082_s12 + $0x1f0] sm:$0xff] }
  0x1f   : > { %1948 = vmatprep.subr.bf16.mxu0 %v383_v31  ;;  %5582 = vmatprep.subr.bf16.mxu1 %v383_v31  ;;  %v370_v11 = vld [vmem:[%s6082_s12 + $0x1e0] sm:$0xff]  ;;  %v367_v13 = vld [vmem:[%s6082_s12 + $0x1c8] sm:$0xff]  ;;  %v369_v14 = vld [vmem:[%s6082_s12 + $0x1d8] sm:$0xff] }
  0x20   : > { %1974 = vmatprep.mubr.bf16.mxu0 %v5648_v6  ;;  %2294 = vmatprep.mubr.bf16.mxu1 %v5651_v9  ;;  %v555_v15 = vld [vmem:[%s10973_s2 + $0xa8] sm:$0xff]  ;;  %v554_v16 = vld [vmem:[%s10973_s2 + $0xa0] sm:$0xff]  ;;  %v404_v17 = vpack.c.bf16 %v372_v12, %v370_v11  ;;  %v403_v18 = vpack.c.bf16 %v369_v14, %v367_v13  ;;  %v368_v20 = vld [vmem:[%s6082_s12 + $0x1d0] sm:$0xff] }
  0x21   : > { %1949 = vmatpush1.bf16.msra.mxu0 %v382_v38  ;;  %5598 = vmatpush1.bf16.msra.mxu1 %v382_v38  ;;  %v366_v19 = vld [vmem:[%s6082_s12 + $0x1c0] sm:$0xff]  ;;  %v363_v21 = vld [vmem:[%s6082_s12 + $0x1a8] sm:$0xff]  ;;  %v365_v22 = vld [vmem:[%s6082_s12 + $0x1b8] sm:$0xff] }
  0x22   : > { %719 = vperm.xlu1 %5641, %v545_v36   ;;  %714 = vperm.xlu0 %5640, %v544_v37   ;;  %v557_v23 = vld [vmem:[%s10973_s2 + $0xb8] sm:$0xff]  ;;  %v556_v24 = vld [vmem:[%s10973_s2 + $0xb0] sm:$0xff]  ;;  %v402_v25 = vpack.c.bf16 %v368_v20, %v366_v19  ;;  %v401_v26 = vpack.c.bf16 %v365_v22, %v363_v21  ;;  %v362_v27 = vld [vmem:[%s6082_s12 + $0x1a0] sm:$0xff] }
  0x23   : > { %1950 = vmatprep.subr.bf16.mxu0 %v381_v39  ;;  %5583 = vmatprep.subr.bf16.mxu1 %v381_v39  ;;  %v364_v28 = vld [vmem:[%s6082_s12 + $0x1b0] sm:$0xff]  ;;  %v359_v29 = vld [vmem:[%s6082_s12 + $0x188] sm:$0xff]  ;;  %v361_v30 = vld [vmem:[%s6082_s12 + $0x198] sm:$0xff] }
  0x24   : > { %v559_v31 = vld [vmem:[%s10973_s2 + $0xc8] sm:$0xff]  ;;  %v558_v32 = vld [vmem:[%s10973_s2 + $0xc0] sm:$0xff]  ;;  %v400_v33 = vpack.c.bf16 %v364_v28, %v362_v27  ;;  %v399_v34 = vpack.c.bf16 %v361_v30, %v359_v29  ;;  %v360_v36 = vld [vmem:[%s6082_s12 + $0x190] sm:$0xff] }
  0x25   : > { %1951 = vmatpush1.bf16.msra.mxu0 %v380_v46  ;;  %5599 = vmatpush1.bf16.msra.mxu1 %v380_v46  ;;  %v358_v35 = vld [vmem:[%s6082_s12 + $0x180] sm:$0xff]  ;;  %v355_v37 = vld [vmem:[%s6082_s12 + $0x168] sm:$0xff]  ;;  %v357_v38 = vld [vmem:[%s6082_s12 + $0x178] sm:$0xff] }
  0x26   : > { %729 = vperm.xlu1 %5641, %v547_v44   ;;  %724 = vperm.xlu0 %5640, %v546_v45   ;;  %v561_v39 = vld [vmem:[%s10973_s2 + $0xd8] sm:$0xff]  ;;  %v560_v40 = vld [vmem:[%s10973_s2 + $0xd0] sm:$0xff]  ;;  %v398_v41 = vpack.c.bf16 %v360_v36, %v358_v35  ;;  %v397_v42 = vpack.c.bf16 %v357_v38, %v355_v37  ;;  %v354_v43 = vld [vmem:[%s6082_s12 + $0x160] sm:$0xff] }
  0x27   : > { %1952 = vmatprep.subr.bf16.mxu0 %v379_v47  ;;  %5584 = vmatprep.subr.bf16.mxu1 %v379_v47  ;;  %v356_v44 = vld [vmem:[%s6082_s12 + $0x170] sm:$0xff]  ;;  %v351_v45 = vld [vmem:[%s6082_s12 + $0x148] sm:$0xff]  ;;  %v353_v46 = vld [vmem:[%s6082_s12 + $0x158] sm:$0xff] }
  0x28   : > { %v563_v47 = vld [vmem:[%s10973_s2 + $0xe8] sm:$0xff]  ;;  %v562_v48 = vld [vmem:[%s10973_s2 + $0xe0] sm:$0xff]  ;;  %v396_v49 = vpack.c.bf16 %v356_v44, %v354_v43  ;;  %v395_v50 = vpack.c.bf16 %v353_v46, %v351_v45  ;;  %v564_v56 = vld [vmem:[%s10973_s2 + $0xf0] sm:$0xff] }
  0x29   : > { %1953 = vmatpush1.bf16.msra.mxu0 %v378_v54  ;;  %5600 = vmatpush1.bf16.msra.mxu1 %v378_v54  ;;  %v350_v51 = vld [vmem:[%s6082_s12 + $0x140] sm:$0xff]  ;;  %v349_v54 = vld [vmem:[%s6082_s12 + $0x138] sm:$0xff]  ;;  %v571_v11 = vld [vmem:[%s10973_s2 + $0x128] sm:$0xff] }
  0x2a   : > { %739 = vperm.xlu1 %5641, %v549_v52   ;;  %734 = vperm.xlu0 %5640, %v548_v53   ;;  %v352_v52 = vld [vmem:[%s6082_s12 + $0x150] sm:$0xff]  ;;  %v347_v53 = vld [vmem:[%s6082_s12 + $0x128] sm:$0xff]  ;;  %v346_v59 = vld [vmem:[%s6082_s12 + $0x120] sm:$0xff] }
  0x2b   : > { %1954 = vmatprep.subr.bf16.mxu0 %v377_v55  ;;  %5585 = vmatprep.subr.bf16.mxu1 %v377_v55  ;;  %v565_v55 = vld [vmem:[%s10973_s2 + $0xf8] sm:$0xff]  ;;  %v394_v57 = vpack.c.bf16 %v352_v52, %v350_v51  ;;  %v393_v58 = vpack.c.bf16 %v349_v54, %v347_v53  ;;  %v566_v0 = vld [vmem:[%s10973_s2 + $0x100] sm:$0xff]  ;;  %v575_v19 = vld [vmem:[%s10973_s2 + $0x148] sm:$0xff] }
  0x2c   : > { %v342_v4 = vld [vmem:[%s6082_s12 + $0x100] sm:$0xff]  ;;  %v569_v6 = vld [vmem:[%s10973_s2 + $0x118] sm:$0xff]  ;;  %v579_v27 = vld [vmem:[%s10973_s2 + $0x168] sm:$0xff] }
  0x2d   : > { %1955 = vmatpush1.bf16.msra.mxu0 %v376_v62  ;;  %5601 = vmatpush1.bf16.msra.mxu1 %v376_v62  ;;  %v345_v62 = vld [vmem:[%s6082_s12 + $0x118] sm:$0xff]  ;;  %v5646_v9 = vld [vmem:[%s10972_s1] ss:$8 sps:$4 sm:$0xff]   ;;  %v5658_v21 = vld [vmem:[%s10972_s1 + $0x24] ss:$8 sps:$4 sm:$0xff]  }
  0x2e   : > { %749 = vperm.xlu1 %5641, %v551_v60   ;;  %744 = vperm.xlu0 %5640, %v550_v61   ;;  %v348_v60 = vld [vmem:[%s6082_s12 + $0x130] sm:$0xff]  ;;  %v343_v61 = vld [vmem:[%s6082_s12 + $0x108] sm:$0xff]  ;;  %v570_v12 = vld [vmem:[%s10973_s2 + $0x120] sm:$0xff] }
  0x2f   : > { %1956 = vmatprep.subr.bf16.mxu0 %v375_v63  ;;  %5586 = vmatprep.subr.bf16.mxu1 %v375_v63  ;;  %v567_v63 = vld [vmem:[%s10973_s2 + $0x108] sm:$0xff]  ;;  %v392_v1 = vpack.c.bf16 %v348_v60, %v346_v59  ;;  %v391_v3 = vpack.c.bf16 %v345_v62, %v343_v61  ;;  %v5652_v13 = vld [vmem:[%s10972_s1 + $0x14] ss:$8 sps:$4 sm:$0xff]   ;;  %v574_v20 = vld [vmem:[%s10973_s2 + $0x140] sm:$0xff] }
  0x30   : > { %v5654_v14 = vld [vmem:[%s10972_s1 + $0x214] ss:$8 sps:$4 sm:$0xff]   ;;  %v5660_v22 = vld [vmem:[%s10972_s1 + $0x224] ss:$8 sps:$4 sm:$0xff]  }
  0x31   : > { %1957 = vmatpush1.bf16.msra.mxu0 %v374_v8  ;;  %5602 = vmatpush1.bf16.msra.mxu1 %v374_v8  ;;  %v578_v28 = vld [vmem:[%s10973_s2 + $0x160] sm:$0xff]  ;;  %v5664_v29 = vld [vmem:[%s10972_s1 + $0x34] ss:$8 sps:$4 sm:$0xff]   ;;  %v583_v35 = vld [vmem:[%s10973_s2 + $0x188] sm:$0xff] }
  0x32   : > { %759 = vperm.xlu1 %5641, %v553_v5   ;;  %754 = vperm.xlu0 %5640, %v552_v7   ;;  %v344_v5 = vld [vmem:[%s6082_s12 + $0x110] sm:$0xff]  ;;  %v582_v36 = vld [vmem:[%s10973_s2 + $0x180] sm:$0xff]  ;;  %v587_v43 = vld [vmem:[%s10973_s2 + $0x1a8] sm:$0xff] }
  0x33   : > { %1958 = vmatprep.subr.bf16.mxu0 %v405_v10  ;;  %5587 = vmatprep.subr.bf16.mxu1 %v405_v10  ;;  %v568_v7 = vld [vmem:[%s10973_s2 + $0x110] sm:$0xff]  ;;  %v390_v8 = vpack.c.bf16 %v344_v5, %v342_v4  ;;  %v5649_v10 = vld [vmem:[%s10972_s1 + $0x200] ss:$8 sps:$4 sm:$0xff]   ;;  %v5670_v37 = vld [vmem:[%s10972_s1 + $0x44] ss:$8 sps:$4 sm:$0xff]  }
  0x34   : > { %v5666_v30 = vld [vmem:[%s10972_s1 + $0x234] ss:$8 sps:$4 sm:$0xff]   ;;  %v5672_v38 = vld [vmem:[%s10972_s1 + $0x244] ss:$8 sps:$4 sm:$0xff]   ;;  %v5692_v4 = vld [vmem:[%s10972_s1 + $0x70] ss:$8 sps:$4 sm:$0xff]  }
  0x35   : > { %1959 = vmatpush2.bf16.msra.mxu0 %v404_v17  ;;  %5603 = vmatpush2.bf16.msra.mxu1 %v404_v17  ;;  %v5656_v17 = vld [vmem:[%s10972_s1 + $0x10] ss:$8 sps:$4 sm:$0xff]   ;;  %v586_v44 = vld [vmem:[%s10973_s2 + $0x1a0] sm:$0xff]  ;;  %v5676_v45 = vld [vmem:[%s10972_s1 + $0x54] ss:$8 sps:$4 sm:$0xff]  }
  0x36   : > { %769 = vperm.xlu1 %5641, %v555_v15   ;;  %764 = vperm.xlu0 %5640, %v554_v16   ;;  %v573_v15 = vld [vmem:[%s10973_s2 + $0x138] sm:$0xff]  ;;  %v572_v16 = vld [vmem:[%s10973_s2 + $0x130] sm:$0xff]  ;;  %v591_v51 = vld [vmem:[%s10973_s2 + $0x1c8] sm:$0xff] }
  0x37   : > { %1960 = vmatprep.subr.bf16.mxu0 %v403_v18  ;;  %5588 = vmatprep.subr.bf16.mxu1 %v403_v18  ;;  %v5657_v18 = vld [vmem:[%s10972_s1 + $0x210] ss:$8 sps:$4 sm:$0xff]   ;;  %v5678_v46 = vld [vmem:[%s10972_s1 + $0x254] ss:$8 sps:$4 sm:$0xff]   ;;  %v590_v52 = vld [vmem:[%s10973_s2 + $0x1c0] sm:$0xff] }
  0x38   : > { %v5682_v53 = vld [vmem:[%s10972_s1 + $0x64] ss:$8 sps:$4 sm:$0xff]   ;;  %v5688_v61 = vld [vmem:[%s10972_s1 + $0x74] ss:$8 sps:$4 sm:$0xff]   ;;  %v5693_v5 = vld [vmem:[%s10972_s1 + $0x270] ss:$8 sps:$4 sm:$0xff]  }
  0x39   : > { %1961 = vmatpush2.bf16.msra.mxu0 %v402_v25  ;;  %5604 = vmatpush2.bf16.msra.mxu1 %v402_v25  ;;  %v5662_v25 = vld [vmem:[%s10972_s1 + $0x20] ss:$8 sps:$4 sm:$0xff]   ;;  %v5684_v54 = vld [vmem:[%s10972_s1 + $0x264] ss:$8 sps:$4 sm:$0xff]   ;;  %v5690_v62 = vld [vmem:[%s10972_s1 + $0x274] ss:$8 sps:$4 sm:$0xff]  }
  0x3a   : > { %779 = vperm.xlu1 %5641, %v557_v23   ;;  %774 = vperm.xlu0 %5640, %v556_v24   ;;  %v577_v23 = vld [vmem:[%s10973_s2 + $0x158] sm:$0xff]  ;;  %v576_v24 = vld [vmem:[%s10973_s2 + $0x150] sm:$0xff]  ;;  %v595_v59 = vld [vmem:[%s10973_s2 + $0x1e8] sm:$0xff] }
  0x3b   : > { %1962 = vmatprep.subr.bf16.mxu0 %v401_v26  ;;  %5589 = vmatprep.subr.bf16.mxu1 %v401_v26  ;;  %v5663_v26 = vld [vmem:[%s10972_s1 + $0x220] ss:$8 sps:$4 sm:$0xff]   ;;  %v652_v2 = vld [vmem:[%s10973_s2 + $0x3b0] sm:$0xff] }
  0x3c   : > { %v594_v60 = vld [vmem:[%s10973_s2 + $0x1e0] sm:$0xff] }
  0x3d   : > { %1963 = vmatpush2.bf16.msra.mxu0 %v400_v33  ;;  %5605 = vmatpush2.bf16.msra.mxu1 %v400_v33  ;;  %v5668_v33 = vld [vmem:[%s10972_s1 + $0x30] ss:$8 sps:$4 sm:$0xff]  }
  0x3e   : > { %789 = vperm.xlu1 %5641, %v559_v31   ;;  %784 = vperm.xlu0 %5640, %v558_v32   ;;  %v581_v31 = vld [vmem:[%s10973_s2 + $0x178] sm:$0xff]  ;;  %v580_v32 = vld [vmem:[%s10973_s2 + $0x170] sm:$0xff] }
  0x3f   : > { %1964 = vmatprep.subr.bf16.mxu0 %v399_v34  ;;  %5590 = vmatprep.subr.bf16.mxu1 %v399_v34  ;;  %v5669_v34 = vld [vmem:[%s10972_s1 + $0x230] ss:$8 sps:$4 sm:$0xff]  }
  0x41   : > { %1965 = vmatpush2.bf16.msra.mxu0 %v398_v41  ;;  %5606 = vmatpush2.bf16.msra.mxu1 %v398_v41  ;;  %v5674_v41 = vld [vmem:[%s10972_s1 + $0x40] ss:$8 sps:$4 sm:$0xff]  }
  0x42   : > { %799 = vperm.xlu1 %5641, %v561_v39   ;;  %794 = vperm.xlu0 %5640, %v560_v40   ;;  %v585_v39 = vld [vmem:[%s10973_s2 + $0x198] sm:$0xff]  ;;  %v584_v40 = vld [vmem:[%s10973_s2 + $0x190] sm:$0xff] }
  0x43   : > { %1966 = vmatprep.subr.bf16.mxu0 %v397_v42  ;;  %5591 = vmatprep.subr.bf16.mxu1 %v397_v42  ;;  %v5675_v42 = vld [vmem:[%s10972_s1 + $0x240] ss:$8 sps:$4 sm:$0xff]  }
  0x45   : > { %1967 = vmatpush2.bf16.msra.mxu0 %v396_v49  ;;  %5607 = vmatpush2.bf16.msra.mxu1 %v396_v49  ;;  %v5680_v49 = vld [vmem:[%s10972_s1 + $0x50] ss:$8 sps:$4 sm:$0xff]  }
  0x46   : > { %809 = vperm.xlu1 %5641, %v563_v47   ;;  %804 = vperm.xlu0 %5640, %v562_v48   ;;  %v589_v47 = vld [vmem:[%s10973_s2 + $0x1b8] sm:$0xff]  ;;  %v588_v48 = vld [vmem:[%s10973_s2 + $0x1b0] sm:$0xff] }
  0x47   : > { %1968 = vmatprep.subr.bf16.mxu0 %v395_v50  ;;  %5592 = vmatprep.subr.bf16.mxu1 %v395_v50  ;;  %v5681_v50 = vld [vmem:[%s10972_s1 + $0x250] ss:$8 sps:$4 sm:$0xff]  }
  0x49   : > { %1969 = vmatpush2.bf16.msra.mxu0 %v394_v57  ;;  %5608 = vmatpush2.bf16.msra.mxu1 %v394_v57  ;;  %v5686_v57 = vld [vmem:[%s10972_s1 + $0x60] ss:$8 sps:$4 sm:$0xff]  }
  0x4a   : > { %819 = vperm.xlu1 %5641, %v565_v55   ;;  %814 = vperm.xlu0 %5640, %v564_v56   ;;  %v593_v55 = vld [vmem:[%s10973_s2 + $0x1d8] sm:$0xff]  ;;  %v592_v56 = vld [vmem:[%s10973_s2 + $0x1d0] sm:$0xff] }
  0x4b   : > { %1970 = vmatprep.subr.bf16.mxu0 %v393_v58  ;;  %5593 = vmatprep.subr.bf16.mxu1 %v393_v58  ;;  %v5687_v58 = vld [vmem:[%s10972_s1 + $0x260] ss:$8 sps:$4 sm:$0xff]  }
  0x4d   : > { %1971 = vmatpush2.bf16.msra.mxu0 %v392_v1  ;;  %5609 = vmatpush2.bf16.msra.mxu1 %v392_v1 }
  0x4e   : > { %829 = vperm.xlu1 %5641, %v567_v63   ;;  %824 = vperm.xlu0 %5640, %v566_v0   ;;  %v597_v63 = vld [vmem:[%s10973_s2 + $0x1f8] sm:$0xff]  ;;  %v596_v0 = vld [vmem:[%s10973_s2 + $0x1f0] sm:$0xff] }
  0x4f   : > { %1972 = vmatprep.subr.bf16.mxu0 %v391_v3  ;;  %5594 = vmatprep.subr.bf16.mxu1 %v391_v3 }
  0x51   : > { %1973 = vmatpush2.bf16.msra.mxu0 %v390_v8  ;;  %5610 = vmatpush2.bf16.msra.mxu1 %v390_v8  ;;  %v5694_v8 = vld [vmem:[%s10972_s1 + $0x84] ss:$8 sps:$4 sm:$0xff]  }
  0x52   : > { %839 = vperm.xlu1 %5641, %v569_v6   ;;  %834 = vperm.xlu0 %5640, %v568_v7   ;;  %v599_v6 = vld [vmem:[%s10973_s2 + $0x208] sm:$0xff]  ;;  %v598_v7 = vld [vmem:[%s10973_s2 + $0x200] sm:$0xff] }
  0x54   : > { %1975 = vmatmul.mubr.bf16.vlgmr.msra.gmra.mxu0 %v5646_v9  ;;  %2295 = vmatmul.mubr.bf16.vlgmr.msra.gmra.mxu1 %v5649_v10  ;;  %v5696_v9 = vld [vmem:[%s10972_s1 + $0x284] ss:$8 sps:$4 sm:$0xff]  }
  0x55   : > { %1984 = vmatprep.mubr.bf16.mxu0 %v5652_v13  ;;  %2304 = vmatprep.mubr.bf16.mxu1 %v5654_v14  ;;  %v600_v13 = vld [vmem:[%s10973_s2 + $0x210] sm:$0xff]  ;;  %v5698_v14 = vld [vmem:[%s10972_s1 + $0x80] ss:$8 sps:$4 sm:$0xff]  }
  0x56   : > { %849 = vperm.xlu1 %5641, %v571_v11   ;;  %844 = vperm.xlu0 %5640, %v570_v12   ;;  %v601_v12 = vld [vmem:[%s10973_s2 + $0x218] sm:$0xff] }
  0x5a   : > { %859 = vperm.xlu1 %5641, %v573_v15   ;;  %854 = vperm.xlu0 %5640, %v572_v16   ;;  %v5699_v15 = vld [vmem:[%s10972_s1 + $0x280] ss:$8 sps:$4 sm:$0xff]  }
  0x5c   : > { %1985 = vmatmul.mubr.bf16.gmra.mxu0 %v5656_v17  ;;  %2305 = vmatmul.mubr.bf16.gmra.mxu1 %v5657_v18  ;;  %v603_v18 = vld [vmem:[%s10973_s2 + $0x228] sm:$0xff] }
  0x5d   : > { %1994 = vmatprep.mubr.bf16.mxu0 %v5658_v21  ;;  %2314 = vmatprep.mubr.bf16.mxu1 %v5660_v22  ;;  %v5702_v21 = vld [vmem:[%s10972_s1 + $0x294] ss:$8 sps:$4 sm:$0xff]  }
  0x5e   : > { %869 = vperm.xlu1 %5641, %v575_v19   ;;  %864 = vperm.xlu0 %5640, %v574_v20   ;;  %v602_v19 = vld [vmem:[%s10973_s2 + $0x220] sm:$0xff]  ;;  %v5700_v20 = vld [vmem:[%s10972_s1 + $0x94] ss:$8 sps:$4 sm:$0xff]  }
  0x62   : > { %879 = vperm.xlu1 %5641, %v577_v23   ;;  %874 = vperm.xlu0 %5640, %v576_v24   ;;  %v605_v24 = vld [vmem:[%s10973_s2 + $0x238] sm:$0xff] }
  0x64   : > { %1995 = vmatmul.mubr.bf16.gmra.mxu0 %v5662_v25  ;;  %2315 = vmatmul.mubr.bf16.gmra.mxu1 %v5663_v26  ;;  %v604_v25 = vld [vmem:[%s10973_s2 + $0x230] sm:$0xff] }
  0x65   : > { %2004 = vmatprep.mubr.bf16.mxu0 %v5664_v29  ;;  %2324 = vmatprep.mubr.bf16.mxu1 %v5666_v30  ;;  %v5705_v29 = vld [vmem:[%s10972_s1 + $0x290] ss:$8 sps:$4 sm:$0xff]   ;;  %v607_v30 = vld [vmem:[%s10973_s2 + $0x248] sm:$0xff] }
  0x66   : > { %889 = vperm.xlu1 %5641, %v579_v27   ;;  %884 = vperm.xlu0 %5640, %v578_v28   ;;  %v5704_v28 = vld [vmem:[%s10972_s1 + $0x90] ss:$8 sps:$4 sm:$0xff]  }
  0x6a   : > { %899 = vperm.xlu1 %5641, %v581_v31   ;;  %894 = vperm.xlu0 %5640, %v580_v32   ;;  %v606_v31 = vld [vmem:[%s10973_s2 + $0x240] sm:$0xff] }
  0x6b   : > { %v5706_v32 = vld [vmem:[%s10972_s1 + $0xa4] ss:$8 sps:$4 sm:$0xff]  }
  0x6c   : > { %2005 = vmatmul.mubr.bf16.gmra.mxu0 %v5668_v33  ;;  %2325 = vmatmul.mubr.bf16.gmra.mxu1 %v5669_v34  ;;  %v5708_v33 = vld [vmem:[%s10972_s1 + $0x2a4] ss:$8 sps:$4 sm:$0xff]  }
  0x6d   : > { %2014 = vmatprep.mubr.bf16.mxu0 %v5670_v37  ;;  %2334 = vmatprep.mubr.bf16.mxu1 %v5672_v38  ;;  %v608_v37 = vld [vmem:[%s10973_s2 + $0x250] sm:$0xff] }
  0x6e   : > { %909 = vperm.xlu1 %5641, %v583_v35   ;;  %904 = vperm.xlu0 %5640, %v582_v36   ;;  %v609_v36 = vld [vmem:[%s10973_s2 + $0x258] sm:$0xff] }
  0x72   : > { %919 = vperm.xlu1 %5641, %v585_v39   ;;  %914 = vperm.xlu0 %5640, %v584_v40   ;;  %v5710_v40 = vld [vmem:[%s10972_s1 + $0xa0] ss:$8 sps:$4 sm:$0xff]  }
  0x74   : > { %2015 = vmatmul.mubr.bf16.gmra.mxu0 %v5674_v41  ;;  %2335 = vmatmul.mubr.bf16.gmra.mxu1 %v5675_v42  ;;  %v5711_v41 = vld [vmem:[%s10972_s1 + $0x2a0] ss:$8 sps:$4 sm:$0xff]  }
  0x75   : > { %2024 = vmatprep.mubr.bf16.mxu0 %v5676_v45  ;;  %2344 = vmatprep.mubr.bf16.mxu1 %v5678_v46  ;;  %v611_v42 = vld [vmem:[%s10973_s2 + $0x268] sm:$0xff]  ;;  %v5714_v45 = vld [vmem:[%s10972_s1 + $0x2b4] ss:$8 sps:$4 sm:$0xff]  }
  0x76   : > { %929 = vperm.xlu1 %5641, %v587_v43   ;;  %924 = vperm.xlu0 %5640, %v586_v44   ;;  %v610_v43 = vld [vmem:[%s10973_s2 + $0x260] sm:$0xff]  ;;  %v5712_v44 = vld [vmem:[%s10972_s1 + $0xb4] ss:$8 sps:$4 sm:$0xff]  }
  0x7a   : > { %939 = vperm.xlu1 %5641, %v589_v47   ;;  %934 = vperm.xlu0 %5640, %v588_v48   ;;  %v613_v48 = vld [vmem:[%s10973_s2 + $0x278] sm:$0xff] }
  0x7c   : > { %2025 = vmatmul.mubr.bf16.gmra.mxu0 %v5680_v49  ;;  %2345 = vmatmul.mubr.bf16.gmra.mxu1 %v5681_v50  ;;  %v612_v49 = vld [vmem:[%s10973_s2 + $0x270] sm:$0xff] }
  0x7d   : > { %2034 = vmatprep.mubr.bf16.mxu0 %v5682_v53  ;;  %2354 = vmatprep.mubr.bf16.mxu1 %v5684_v54  ;;  %v5717_v53 = vld [vmem:[%s10972_s1 + $0x2b0] ss:$8 sps:$4 sm:$0xff]   ;;  %v615_v54 = vld [vmem:[%s10973_s2 + $0x288] sm:$0xff] }
  0x7e   : > { %949 = vperm.xlu1 %5641, %v591_v51   ;;  %944 = vperm.xlu0 %5640, %v590_v52   ;;  %v5716_v52 = vld [vmem:[%s10972_s1 + $0xb0] ss:$8 sps:$4 sm:$0xff]  }
  0x82   : > { %959 = vperm.xlu1 %5641, %v593_v55   ;;  %954 = vperm.xlu0 %5640, %v592_v56   ;;  %v614_v55 = vld [vmem:[%s10973_s2 + $0x280] sm:$0xff] }
  0x83   : > { %v5718_v56 = vld [vmem:[%s10972_s1 + $0xc4] ss:$8 sps:$4 sm:$0xff]  }
  0x84   : > { %2035 = vmatmul.mubr.bf16.gmra.mxu0 %v5686_v57  ;;  %2355 = vmatmul.mubr.bf16.gmra.mxu1 %v5687_v58  ;;  %v5720_v57 = vld [vmem:[%s10972_s1 + $0x2c4] ss:$8 sps:$4 sm:$0xff]  }
  0x85   : > { %2044 = vmatprep.mubr.bf16.mxu0 %v5688_v61  ;;  %2364 = vmatprep.mubr.bf16.mxu1 %v5690_v62  ;;  %v616_v61 = vld [vmem:[%s10973_s2 + $0x290] sm:$0xff] }
  0x86   : > { %969 = vperm.xlu1 %5641, %v595_v59   ;;  %964 = vperm.xlu0 %5640, %v594_v60   ;;  %v617_v60 = vld [vmem:[%s10973_s2 + $0x298] sm:$0xff] }
  0x89   : > { %v6418_v1 = vpop.permute.xlu1 %674  ;;  %v6420_v3 = vpop.permute.xlu0 %664 }
  0x8a   : > { %979 = vperm.xlu1 %5641, %v597_v63   ;;  %974 = vperm.xlu0 %5640, %v596_v0   ;;  %v5722_v0 = vld [vmem:[%s10972_s1 + $0xc0] ss:$8 sps:$4 sm:$0xff]  }
  0x8c   : > { %2045 = vmatmul.mubr.bf16.gmra.mxu0 %v5692_v4  ;;  %2365 = vmatmul.mubr.bf16.gmra.mxu1 %v5693_v5  ;;  %v5723_v4 = vld [vmem:[%s10972_s1 + $0x2c0] ss:$8 sps:$4 sm:$0xff]  }
  0x8d   : > { %v6440_v10 = vpop.permute.xlu1 %679  ;;  %v6442_v11 = vpop.permute.xlu0 %669  ;;  %2054 = vmatprep.mubr.bf16.mxu0 %v5694_v8  ;;  %2374 = vmatprep.mubr.bf16.mxu1 %v5696_v9  ;;  %v619_v5 = vld [vmem:[%s10973_s2 + $0x2a8] sm:$0xff]  ;;  %v5726_v8 = vld [vmem:[%s10972_s1 + $0x2d4] ss:$8 sps:$4 sm:$0xff]  }
  0x8e   : > { %989 = vperm.xlu1 %5641, %v599_v6   ;;  %984 = vperm.xlu0 %5640, %v598_v7   ;;  %v618_v6 = vld [vmem:[%s10973_s2 + $0x2a0] sm:$0xff]  ;;  %v5724_v7 = vld [vmem:[%s10972_s1 + $0xd4] ss:$8 sps:$4 sm:$0xff]  }
  0x91   : > { %v6456_v16 = vpop.permute.xlu1 %689  ;;  %v6458_v17 = vpop.permute.xlu0 %684 }
  0x92   : > { %999 = vperm.xlu1 %5641, %v601_v12   ;;  %994 = vperm.xlu0 %5640, %v600_v13   ;;  %v621_v13 = vld [vmem:[%s10973_s2 + $0x2b8] sm:$0xff] }
  0x94   : > { %2055 = vmatmul.mubr.bf16.gmra.mxu0 %v5698_v14  ;;  %2375 = vmatmul.mubr.bf16.gmra.mxu1 %v5699_v15  ;;  %v620_v14 = vld [vmem:[%s10973_s2 + $0x2b0] sm:$0xff] }
  0x95   : > { %v6472_v22 = vpop.permute.xlu1 %699  ;;  %v6474_v23 = vpop.permute.xlu0 %694  ;;  %2064 = vmatprep.mubr.bf16.mxu0 %v5700_v20  ;;  %2384 = vmatprep.mubr.bf16.mxu1 %v5702_v21  ;;  %v5729_v20 = vld [vmem:[%s10972_s1 + $0x2d0] ss:$8 sps:$4 sm:$0xff]   ;;  %v623_v21 = vld [vmem:[%s10973_s2 + $0x2c8] sm:$0xff] }
  0x96   : > { %1009 = vperm.xlu1 %5641, %v603_v18   ;;  %1004 = vperm.xlu0 %5640, %v602_v19   ;;  %v5728_v19 = vld [vmem:[%s10972_s1 + $0xd0] ss:$8 sps:$4 sm:$0xff]  }
  0x99   : > { %v6482_v26 = vpop.permute.xlu1 %709  ;;  %v6484_v27 = vpop.permute.xlu0 %704 }
  0x9a   : > { %1019 = vperm.xlu1 %5641, %v605_v24   ;;  %1014 = vperm.xlu0 %5640, %v604_v25   ;;  %v622_v24 = vld [vmem:[%s10973_s2 + $0x2c0] sm:$0xff] }
  0x9b   : > { %v5730_v25 = vld [vmem:[%s10972_s1 + $0xe4] ss:$8 sps:$4 sm:$0xff]  }
  0x9c   : > { %2065 = vmatmul.mubr.bf16.gmra.mxu0 %v5704_v28  ;;  %2385 = vmatmul.mubr.bf16.gmra.mxu1 %v5705_v29  ;;  %v5732_v28 = vld [vmem:[%s10972_s1 + $0x2e4] ss:$8 sps:$4 sm:$0xff]  }
  0x9d   : > { %v6504_v34 = vpop.permute.xlu1 %719  ;;  %v6506_v35 = vpop.permute.xlu0 %714  ;;  %2074 = vmatprep.mubr.bf16.mxu0 %v5706_v32  ;;  %2394 = vmatprep.mubr.bf16.mxu1 %v5708_v33  ;;  %v624_v32 = vld [vmem:[%s10973_s2 + $0x2d0] sm:$0xff] }
  0x9e   : > { %1029 = vperm.xlu1 %5641, %v607_v30   ;;  %1024 = vperm.xlu0 %5640, %v606_v31   ;;  %v625_v31 = vld [vmem:[%s10973_s2 + $0x2d8] sm:$0xff] }
  0xa1   : > { %v6514_v38 = vpop.permute.xlu1 %729  ;;  %v6516_v39 = vpop.permute.xlu0 %724 }
  0xa2   : > { %1039 = vperm.xlu1 %5641, %v609_v36   ;;  %1034 = vperm.xlu0 %5640, %v608_v37   ;;  %v5734_v37 = vld [vmem:[%s10972_s1 + $0xe0] ss:$8 sps:$4 sm:$0xff]  }
  0xa4   : > { %2075 = vmatmul.mubr.bf16.gmra.mxu0 %v5710_v40  ;;  %2395 = vmatmul.mubr.bf16.gmra.mxu1 %v5711_v41  ;;  %v5735_v40 = vld [vmem:[%s10972_s1 + $0x2e0] ss:$8 sps:$4 sm:$0xff]  }
  0xa5   : > { %v6536_v46 = vpop.permute.xlu1 %739  ;;  %v6538_v47 = vpop.permute.xlu0 %734  ;;  %2084 = vmatprep.mubr.bf16.mxu0 %v5712_v44  ;;  %2404 = vmatprep.mubr.bf16.mxu1 %v5714_v45  ;;  %v627_v41 = vld [vmem:[%s10973_s2 + $0x2e8] sm:$0xff]  ;;  %v5738_v44 = vld [vmem:[%s10972_s1 + $0x2f4] ss:$8 sps:$4 sm:$0xff]  }
  0xa6   : > { %1049 = vperm.xlu1 %5641, %v611_v42   ;;  %1044 = vperm.xlu0 %5640, %v610_v43   ;;  %v626_v42 = vld [vmem:[%s10973_s2 + $0x2e0] sm:$0xff]  ;;  %v5736_v43 = vld [vmem:[%s10972_s1 + $0xf4] ss:$8 sps:$4 sm:$0xff]  }
  0xa9   : > { %v6546_v50 = vpop.permute.xlu1 %749  ;;  %v6548_v51 = vpop.permute.xlu0 %744 }
  0xaa   : > { %1059 = vperm.xlu1 %5641, %v613_v48   ;;  %1054 = vperm.xlu0 %5640, %v612_v49   ;;  %v629_v49 = vld [vmem:[%s10973_s2 + $0x2f8] sm:$0xff] }
  0xac   : > { %2085 = vmatmul.mubr.bf16.gmra.mxu0 %v5716_v52  ;;  %2405 = vmatmul.mubr.bf16.gmra.mxu1 %v5717_v53  ;;  %v628_v52 = vld [vmem:[%s10973_s2 + $0x2f0] sm:$0xff] }
  0xad   : > { %v6568_v58 = vpop.permute.xlu1 %759  ;;  %v6570_v59 = vpop.permute.xlu0 %754  ;;  %2094 = vmatprep.mubr.bf16.mxu0 %v5718_v56  ;;  %2414 = vmatprep.mubr.bf16.mxu1 %v5720_v57  ;;  %v5741_v56 = vld [vmem:[%s10972_s1 + $0x2f0] ss:$8 sps:$4 sm:$0xff]   ;;  %v631_v57 = vld [vmem:[%s10973_s2 + $0x308] sm:$0xff] }
  0xae   : > { %11391 = vst [vmem:[#allocation2_spill] sm:$0xff] %v6568_v58  ;;  %11392 = vst [vmem:[#allocation3_spill] sm:$0xff] %v6570_v59  ;;  %1069 = vperm.xlu1 %5641, %v615_v54   ;;  %1064 = vperm.xlu0 %5640, %v614_v55   ;;  %v5740_v55 = vld [vmem:[%s10972_s1 + $0xf0] ss:$8 sps:$4 sm:$0xff]  }
  0xb1   : > { %v6578_v62 = vpop.permute.xlu1 %769  ;;  %v6580_v63 = vpop.permute.xlu0 %764 }
  0xb2   : > { %11393 = vst [vmem:[#allocation4_spill] sm:$0xff] %v6578_v62  ;;  %11394 = vst [vmem:[#allocation5_spill] sm:$0xff] %v6580_v63  ;;  %1079 = vperm.xlu1 %5641, %v617_v60   ;;  %1074 = vperm.xlu0 %5640, %v616_v61   ;;  %v630_v60 = vld [vmem:[%s10973_s2 + $0x300] sm:$0xff] }
  0xb3   : > { %v5742_v61 = vld [vmem:[%s10972_s1 + $0x104] ss:$8 sps:$4 sm:$0xff]  }
  0xb4   : > { %2095 = vmatmul.mubr.bf16.gmra.mxu0 %v5722_v0  ;;  %2415 = vmatmul.mubr.bf16.gmra.mxu1 %v5723_v4  ;;  %v5744_v0 = vld [vmem:[%s10972_s1 + $0x304] ss:$8 sps:$4 sm:$0xff]  }
  0xb5   : > { %v6600_v9 = vpop.permute.xlu1 %779  ;;  %v6602_v12 = vpop.permute.xlu0 %774  ;;  %2104 = vmatprep.mubr.bf16.mxu0 %v5724_v7  ;;  %2424 = vmatprep.mubr.bf16.mxu1 %v5726_v8  ;;  %v632_v7 = vld [vmem:[%s10973_s2 + $0x310] sm:$0xff] }
  0xb6   : > { %11395 = vst [vmem:[#allocation6_spill] sm:$0xff] %v6600_v9  ;;  %11396 = vst [vmem:[#allocation7_spill] sm:$0xff] %v6602_v12  ;;  %1089 = vperm.xlu1 %5641, %v619_v5   ;;  %1084 = vperm.xlu0 %5640, %v618_v6   ;;  %v633_v6 = vld [vmem:[%s10973_s2 + $0x318] sm:$0xff] }
  0xb9   : > { %v6610_v15 = vpop.permute.xlu1 %789  ;;  %v6612_v18 = vpop.permute.xlu0 %784 }
  0xba   : > { %11397 = vst [vmem:[#allocation8_spill] sm:$0xff] %v6610_v15  ;;  %11398 = vst [vmem:[#allocation9_spill] sm:$0xff] %v6612_v18  ;;  %1099 = vperm.xlu1 %5641, %v621_v13   ;;  %1094 = vperm.xlu0 %5640, %v620_v14   ;;  %v5746_v14 = vld [vmem:[%s10972_s1 + $0x100] ss:$8 sps:$4 sm:$0xff]  }
  0xbc   : > { %2105 = vmatmul.mubr.bf16.gmra.mxu0 %v5728_v19  ;;  %2425 = vmatmul.mubr.bf16.gmra.mxu1 %v5729_v20  ;;  %v5747_v19 = vld [vmem:[%s10972_s1 + $0x300] ss:$8 sps:$4 sm:$0xff]  }
  0xbd   : > { %v6632_v29 = vpop.permute.xlu1 %799  ;;  %v6634_v30 = vpop.permute.xlu0 %794  ;;  %2114 = vmatprep.mubr.bf16.mxu0 %v5730_v25  ;;  %2434 = vmatprep.mubr.bf16.mxu1 %v5732_v28  ;;  %v635_v20 = vld [vmem:[%s10973_s2 + $0x328] sm:$0xff]  ;;  %v5750_v25 = vld [vmem:[%s10972_s1 + $0x314] ss:$8 sps:$4 sm:$0xff]  }
  0xbe   : > { %11399 = vst [vmem:[#allocation10_spill] sm:$0xff] %v6632_v29  ;;  %11400 = vst [vmem:[#allocation11_spill] sm:$0xff] %v6634_v30  ;;  %1109 = vperm.xlu1 %5641, %v623_v21   ;;  %1104 = vperm.xlu0 %5640, %v622_v24   ;;  %v634_v21 = vld [vmem:[%s10973_s2 + $0x320] sm:$0xff]  ;;  %v5748_v24 = vld [vmem:[%s10972_s1 + $0x114] ss:$8 sps:$4 sm:$0xff]  }
  0xc1   : > { %v6642_v33 = vpop.permute.xlu1 %809  ;;  %v6644_v36 = vpop.permute.xlu0 %804 }
  0xc2   : > { %11401 = vst [vmem:[#allocation12_spill] sm:$0xff] %v6642_v33  ;;  %11402 = vst [vmem:[#allocation13_spill] sm:$0xff] %v6644_v36  ;;  %1119 = vperm.xlu1 %5641, %v625_v31   ;;  %1114 = vperm.xlu0 %5640, %v624_v32   ;;  %v637_v32 = vld [vmem:[%s10973_s2 + $0x338] sm:$0xff] }
  0xc3   : > { %v2902_v33 = vld [vmem:[%s10974_s3 + $0xf8] sm:$0xff] }
  0xc4   : > { %2115 = vmatmul.mubr.bf16.gmra.mxu0 %v5734_v37  ;;  %2435 = vmatmul.mubr.bf16.gmra.mxu1 %v5735_v40  ;;  %v636_v37 = vld [vmem:[%s10973_s2 + $0x330] sm:$0xff] }
  0xc5   : > { %v6664_v45 = vpop.permute.xlu1 %819  ;;  %v6666_v48 = vpop.permute.xlu0 %814  ;;  %2124 = vmatprep.mubr.bf16.mxu0 %v5736_v43  ;;  %2444 = vmatprep.mubr.bf16.mxu1 %v5738_v44  ;;  %v5753_v43 = vld [vmem:[%s10972_s1 + $0x310] ss:$8 sps:$4 sm:$0xff]   ;;  %v639_v44 = vld [vmem:[%s10973_s2 + $0x348] sm:$0xff] }
  0xc6   : > { %11403 = vst [vmem:[#allocation14_spill] sm:$0xff] %v6664_v45  ;;  %11404 = vst [vmem:[#allocation15_spill] sm:$0xff] %v6666_v48  ;;  %1129 = vperm.xlu1 %5641, %v627_v41   ;;  %1124 = vperm.xlu0 %5640, %v626_v42   ;;  %v5752_v42 = vld [vmem:[%s10972_s1 + $0x110] ss:$8 sps:$4 sm:$0xff]  }
  0xc9   : > { %v6674_v53 = vpop.permute.xlu1 %829  ;;  %v6676_v54 = vpop.permute.xlu0 %824 }
  0xca   : > { %11405 = vst [vmem:[#allocation16_spill] sm:$0xff] %v6674_v53  ;;  %11406 = vst [vmem:[#allocation17_spill] sm:$0xff] %v6676_v54  ;;  %1139 = vperm.xlu1 %5641, %v629_v49   ;;  %1134 = vperm.xlu0 %5640, %v628_v52   ;;  %v638_v49 = vld [vmem:[%s10973_s2 + $0x340] sm:$0xff]  ;;  %v2898_v53 = vld [vmem:[%s10974_s3 + $0xd8] sm:$0xff] }
  0xcb   : > { %v5754_v52 = vld [vmem:[%s10972_s1 + $0x124] ss:$8 sps:$4 sm:$0xff]  }
  0xcc   : > { %2125 = vmatmul.mubr.bf16.gmra.mxu0 %v5740_v55  ;;  %2445 = vmatmul.mubr.bf16.gmra.mxu1 %v5741_v56  ;;  %v5756_v55 = vld [vmem:[%s10972_s1 + $0x324] ss:$8 sps:$4 sm:$0xff]  }
  0xcd   : > { %v6696_v4 = vpop.permute.xlu1 %839  ;;  %v6698_v5 = vpop.permute.xlu0 %834  ;;  %2134 = vmatprep.mubr.bf16.mxu0 %v5742_v61  ;;  %2454 = vmatprep.mubr.bf16.mxu1 %v5744_v0  ;;  %v640_v61 = vld [vmem:[%s10973_s2 + $0x350] sm:$0xff] }
  0xce   : > { %11407 = vst [vmem:[#allocation18_spill] sm:$0xff] %v6696_v4  ;;  %11408 = vst [vmem:[#allocation19_spill] sm:$0xff] %v6698_v5  ;;  %1149 = vperm.xlu1 %5641, %v631_v57   ;;  %1144 = vperm.xlu0 %5640, %v630_v60   ;;  %v641_v60 = vld [vmem:[%s10973_s2 + $0x358] sm:$0xff] }
  0xd1   : > { %v6706_v8 = vpop.permute.xlu1 %849  ;;  %v6708_v13 = vpop.permute.xlu0 %844 }
  0xd2   : > { %11409 = vst [vmem:[#allocation20_spill] sm:$0xff] %v6706_v8  ;;  %11410 = vst [vmem:[#allocation21_spill] sm:$0xff] %v6708_v13  ;;  %1159 = vperm.xlu1 %5641, %v633_v6   ;;  %1154 = vperm.xlu0 %5640, %v632_v7   ;;  %v5758_v7 = vld [vmem:[%s10972_s1 + $0x120] ss:$8 sps:$4 sm:$0xff]   ;;  %v2894_v8 = vld [vmem:[%s10974_s3 + $0xb8] sm:$0xff] }
  0xd4   : > { %2135 = vmatmul.mubr.bf16.gmra.mxu0 %v5746_v14  ;;  %2455 = vmatmul.mubr.bf16.gmra.mxu1 %v5747_v19  ;;  %v5759_v14 = vld [vmem:[%s10972_s1 + $0x320] ss:$8 sps:$4 sm:$0xff]  }
  0xd5   : > { %v6728_v28 = vpop.permute.xlu1 %859  ;;  %v6730_v31 = vpop.permute.xlu0 %854  ;;  %2144 = vmatprep.mubr.bf16.mxu0 %v5748_v24  ;;  %2464 = vmatprep.mubr.bf16.mxu1 %v5750_v25  ;;  %v643_v19 = vld [vmem:[%s10973_s2 + $0x368] sm:$0xff]  ;;  %v5762_v24 = vld [vmem:[%s10972_s1 + $0x334] ss:$8 sps:$4 sm:$0xff]  }
  0xd6   : > { %11411 = vst [vmem:[#allocation22_spill] sm:$0xff] %v6728_v28  ;;  %11412 = vst [vmem:[#allocation23_spill] sm:$0xff] %v6730_v31  ;;  %1169 = vperm.xlu1 %5641, %v635_v20   ;;  %1164 = vperm.xlu0 %5640, %v634_v21   ;;  %v642_v20 = vld [vmem:[%s10973_s2 + $0x360] sm:$0xff]  ;;  %v5760_v21 = vld [vmem:[%s10972_s1 + $0x134] ss:$8 sps:$4 sm:$0xff]  }
  0xd9   : > { %v6738_v40 = vpop.permute.xlu1 %869  ;;  %v6740_v41 = vpop.permute.xlu0 %864 }
  0xda   : > { %11413 = vst [vmem:[#allocation24_spill] sm:$0xff] %v6738_v40  ;;  %11414 = vst [vmem:[#allocation25_spill] sm:$0xff] %v6740_v41  ;;  %1179 = vperm.xlu1 %5641, %v637_v32   ;;  %1174 = vperm.xlu0 %5640, %v636_v37   ;;  %v645_v37 = vld [vmem:[%s10973_s2 + $0x378] sm:$0xff] }
  0xdb   : > { %v2890_v40 = vld [vmem:[%s10974_s3 + $0x98] sm:$0xff] }
  0xdc   : > { %2145 = vmatmul.mubr.bf16.gmra.mxu0 %v5752_v42  ;;  %2465 = vmatmul.mubr.bf16.gmra.mxu1 %v5753_v43  ;;  %v644_v42 = vld [vmem:[%s10973_s2 + $0x370] sm:$0xff] }
  0xdd   : > { %v6760_v56 = vpop.permute.xlu1 %879  ;;  %v6762_v57 = vpop.permute.xlu0 %874  ;;  %2154 = vmatprep.mubr.bf16.mxu0 %v5754_v52  ;;  %2474 = vmatprep.mubr.bf16.mxu1 %v5756_v55  ;;  %v5765_v52 = vld [vmem:[%s10972_s1 + $0x330] ss:$8 sps:$4 sm:$0xff]   ;;  %v647_v55 = vld [vmem:[%s10973_s2 + $0x388] sm:$0xff] }
  0xde   : > { %11415 = vst [vmem:[#allocation26_spill] sm:$0xff] %v6760_v56  ;;  %11416 = vst [vmem:[#allocation27_spill] sm:$0xff] %v6762_v57  ;;  %1189 = vperm.xlu1 %5641, %v639_v44   ;;  %1184 = vperm.xlu0 %5640, %v638_v49   ;;  %v5764_v49 = vld [vmem:[%s10972_s1 + $0x130] ss:$8 sps:$4 sm:$0xff]  }
  0xe1   : > { %v6770_v0 = vpop.permute.xlu1 %889  ;;  %v6772_v6 = vpop.permute.xlu0 %884 }
  0xe2   : > { %11417 = vst [vmem:[#allocation28_spill] sm:$0xff] %v6770_v0  ;;  %11418 = vst [vmem:[#allocation29_spill] sm:$0xff] %v6772_v6  ;;  %1199 = vperm.xlu1 %5641, %v641_v60   ;;  %1194 = vperm.xlu0 %5640, %v640_v61   ;;  %v646_v60 = vld [vmem:[%s10973_s2 + $0x380] sm:$0xff]  ;;  %v2886_v0 = vld [vmem:[%s10974_s3 + $0x78] sm:$0xff] }
  0xe3   : > { %v5766_v61 = vld [vmem:[%s10972_s1 + $0x144] ss:$8 sps:$4 sm:$0xff]  }
  0xe4   : > { %2155 = vmatmul.mubr.bf16.gmra.mxu0 %v5758_v7  ;;  %2475 = vmatmul.mubr.bf16.gmra.mxu1 %v5759_v14  ;;  %v5768_v7 = vld [vmem:[%s10972_s1 + $0x344] ss:$8 sps:$4 sm:$0xff]  }
  0xe5   : > { %v6792_v25 = vpop.permute.xlu1 %899  ;;  %v6794_v32 = vpop.permute.xlu0 %894  ;;  %2164 = vmatprep.mubr.bf16.mxu0 %v5760_v21  ;;  %2484 = vmatprep.mubr.bf16.mxu1 %v5762_v24  ;;  %v648_v21 = vld [vmem:[%s10973_s2 + $0x390] sm:$0xff] }
  0xe6   : > { %11419 = vst [vmem:[#allocation30_spill] sm:$0xff] %v6792_v25  ;;  %11420 = vst [vmem:[#allocation31_spill] sm:$0xff] %v6794_v32  ;;  %1209 = vperm.xlu1 %5641, %v643_v19   ;;  %1204 = vperm.xlu0 %5640, %v642_v20   ;;  %v649_v20 = vld [vmem:[%s10973_s2 + $0x398] sm:$0xff] }
  0xe9   : > { %v6802_v43 = vpop.permute.xlu1 %909  ;;  %v6804_v44 = vpop.permute.xlu0 %904 }
  0xea   : > { %11421 = vst [vmem:[#allocation32_spill] sm:$0xff] %v6802_v43  ;;  %11422 = vst [vmem:[#allocation33_spill] sm:$0xff] %v6804_v44  ;;  %1219 = vperm.xlu1 %5641, %v645_v37   ;;  %1214 = vperm.xlu0 %5640, %v644_v42   ;;  %v5770_v42 = vld [vmem:[%s10972_s1 + $0x140] ss:$8 sps:$4 sm:$0xff]   ;;  %v2882_v43 = vld [vmem:[%s10974_s3 + $0x58] sm:$0xff] }
  0xeb   : > { %v2881_v44 = vld [vmem:[%s10974_s3 + $0x50] sm:$0xff] }
  0xec   : > { %2165 = vmatmul.mubr.bf16.gmra.mxu0 %v5764_v49  ;;  %2485 = vmatmul.mubr.bf16.gmra.mxu1 %v5765_v52  ;;  %v5771_v49 = vld [vmem:[%s10972_s1 + $0x340] ss:$8 sps:$4 sm:$0xff]  }
  0xed   : > { %v6824_v14 = vpop.permute.xlu1 %919  ;;  %v6826_v19 = vpop.permute.xlu0 %914  ;;  %2174 = vmatprep.mubr.bf16.mxu0 %v5766_v61  ;;  %2494 = vmatprep.mubr.bf16.mxu1 %v5768_v7  ;;  %v651_v52 = vld [vmem:[%s10973_s2 + $0x3a8] sm:$0xff]  ;;  %v5774_v61 = vld [vmem:[%s10972_s1 + $0x354] ss:$8 sps:$4 sm:$0xff]  }
  0xee   : > { %11423 = vst [vmem:[#allocation34_spill] sm:$0xff] %v6824_v14  ;;  %11424 = vst [vmem:[#allocation35_spill] sm:$0xff] %v6826_v19  ;;  %1229 = vperm.xlu1 %5641, %v647_v55   ;;  %1224 = vperm.xlu0 %5640, %v646_v60   ;;  %v650_v55 = vld [vmem:[%s10973_s2 + $0x3a0] sm:$0xff]  ;;  %v5772_v60 = vld [vmem:[%s10972_s1 + $0x154] ss:$8 sps:$4 sm:$0xff]  }
  0xf1   : > { %v6834_v24 = vpop.permute.xlu1 %929  ;;  %v6836_v37 = vpop.permute.xlu0 %924 }
  0xf2   : > { %11425 = vst [vmem:[#allocation36_spill] sm:$0xff] %v6834_v24  ;;  %11426 = vst [vmem:[#allocation37_spill] sm:$0xff] %v6836_v37  ;;  %1239 = vperm.xlu1 %5641, %v649_v20   ;;  %1234 = vperm.xlu0 %5640, %v648_v21   ;;  %v653_v21 = vld [vmem:[%s10973_s2 + $0x3b8] sm:$0xff] }
  0xf4   : > { %2175 = vmatmul.mubr.bf16.gmra.mxu0 %v5770_v42  ;;  %2495 = vmatmul.mubr.bf16.gmra.mxu1 %v5771_v49  ;;  %v5776_v42 = vld [vmem:[%s10972_s1 + $0x150] ss:$8 sps:$4 sm:$0xff]  }
  0xf5   : > { %v6856_v7 = vpop.permute.xlu1 %939  ;;  %v6858_v20 = vpop.permute.xlu0 %934  ;;  %2184 = vmatprep.mubr.bf16.mxu0 %v5772_v60  ;;  %2504 = vmatprep.mubr.bf16.mxu1 %v5774_v61  ;;  %v5777_v49 = vld [vmem:[%s10972_s1 + $0x350] ss:$8 sps:$4 sm:$0xff]   ;;  %v5778_v60 = vld [vmem:[%s10972_s1 + $0x164] ss:$8 sps:$4 sm:$0xff]  }
  0xf6   : > { %11427 = vst [vmem:[#allocation38_spill] sm:$0xff] %v6856_v7  ;;  %11428 = vst [vmem:[#allocation39_spill] sm:$0xff] %v6858_v20  ;;  %1249 = vperm.xlu1 %5641, %v651_v52   ;;  %1244 = vperm.xlu0 %5640, %v650_v55   ;;  %v655_v52 = vld [vmem:[%s10973_s2 + $0x3c8] sm:$0xff]  ;;  %v654_v55 = vld [vmem:[%s10973_s2 + $0x3c0] sm:$0xff] }
  0xf7   : > { %v5780_v61 = vld [vmem:[%s10972_s1 + $0x364] ss:$8 sps:$4 sm:$0xff]  }
  0xf9   : > { %v6866_v24 = vpop.permute.xlu1 %949  ;;  %v6868_v37 = vpop.permute.xlu0 %944 }
  0xfa   : > { %11429 = vst [vmem:[#allocation40_spill] sm:$0xff] %v6866_v24  ;;  %11430 = vst [vmem:[#allocation41_spill] sm:$0xff] %v6868_v37  ;;  %1259 = vperm.xlu1 %5641, %v653_v21   ;;  %1254 = vperm.xlu0 %5640, %v652_v2   ;;  %v657_v2 = vld [vmem:[%s10973_s2 + $0x3d8] sm:$0xff]  ;;  %v656_v37 = vld [vmem:[%s10973_s2 + $0x3d0] sm:$0xff] }
  0xfc   : > { %2185 = vmatmul.mubr.bf16.gmra.mxu0 %v5776_v42  ;;  %2505 = vmatmul.mubr.bf16.gmra.mxu1 %v5777_v49  ;;  %v5782_v42 = vld [vmem:[%s10972_s1 + $0x160] ss:$8 sps:$4 sm:$0xff]  }
  0xfd   : > { %v6888_v24 = vpop.permute.xlu1 %959  ;;  %v6890_v21 = vpop.permute.xlu0 %954  ;;  %2194 = vmatprep.mubr.bf16.mxu0 %v5778_v60  ;;  %2514 = vmatprep.mubr.bf16.mxu1 %v5780_v61  ;;  %v5783_v49 = vld [vmem:[%s10972_s1 + $0x360] ss:$8 sps:$4 sm:$0xff]   ;;  %v5784_v60 = vld [vmem:[%s10972_s1 + $0x174] ss:$8 sps:$4 sm:$0xff]  }
  0xfe   : > { %11431 = vst [vmem:[#allocation42_spill] sm:$0xff] %v6888_v24  ;;  %11432 = vst [vmem:[#allocation43_spill] sm:$0xff] %v6890_v21  ;;  %1269 = vperm.xlu1 %5641, %v655_v52   ;;  %1264 = vperm.xlu0 %5640, %v654_v55   ;;  %v659_v52 = vld [vmem:[%s10973_s2 + $0x3e8] sm:$0xff]  ;;  %v658_v55 = vld [vmem:[%s10973_s2 + $0x3e0] sm:$0xff] }
  0xff   : > { %v5786_v61 = vld [vmem:[%s10972_s1 + $0x374] ss:$8 sps:$4 sm:$0xff]  }
 0x101   : > { %v6898_v7 = vpop.permute.xlu1 %969  ;;  %v6900_v20 = vpop.permute.xlu0 %964 }
 0x102   : > { %11433 = vst [vmem:[#allocation44_spill] sm:$0xff] %v6898_v7  ;;  %11434 = vst [vmem:[#allocation45_spill] sm:$0xff] %v6900_v20  ;;  %1279 = vperm.xlu1 %5641, %v657_v2   ;;  %1274 = vperm.xlu0 %5640, %v656_v37   ;;  %v661_v37 = vld [vmem:[%s10973_s2 + $0x3f8] sm:$0xff]  ;;  %v660_v20 = vld [vmem:[%s10973_s2 + $0x3f0] sm:$0xff] }
 0x104   : > { %2195 = vmatmul.mubr.bf16.gmra.mxu0 %v5782_v42  ;;  %2515 = vmatmul.mubr.bf16.gmra.mxu1 %v5783_v49  ;;  %v5788_v42 = vld [vmem:[%s10972_s1 + $0x170] ss:$8 sps:$4 sm:$0xff]  }
 0x105   : > { %v6920_v7 = vpop.permute.xlu1 %979  ;;  %v6922_v2 = vpop.permute.xlu0 %974  ;;  %2204 = vmatprep.mubr.bf16.mxu0 %v5784_v60  ;;  %2524 = vmatprep.mubr.bf16.mxu1 %v5786_v61  ;;  %v5789_v49 = vld [vmem:[%s10972_s1 + $0x370] ss:$8 sps:$4 sm:$0xff]   ;;  %v5790_v60 = vld [vmem:[%s10972_s1 + $0x184] ss:$8 sps:$4 sm:$0xff]  }
 0x106   : > { %11435 = vst [vmem:[#allocation46_spill] sm:$0xff] %v6920_v7  ;;  %11436 = vst [vmem:[#allocation47_spill] sm:$0xff] %v6922_v2  ;;  %1289 = vperm.xlu1 %5641, %v659_v52   ;;  %1284 = vperm.xlu0 %5640, %v658_v55   ;;  %v2872_v52 = vld [vmem:[%s10974_s3 + $0x8] sm:$0xff]  ;;  %v2871_v55 = vld [vmem:[%s10974_s3] sm:$0xff] }
 0x107   : > { %v5792_v61 = vld [vmem:[%s10972_s1 + $0x384] ss:$8 sps:$4 sm:$0xff]   ;;  %v2873_v7 = vld [vmem:[%s10974_s3 + $0x10] sm:$0xff] }
 0x109   : > { %v6930_v24 = vpop.permute.xlu1 %989  ;;  %v6932_v21 = vpop.permute.xlu0 %984 }
 0x10a   : > { %11437 = vst [vmem:[#allocation48_spill] sm:$0xff] %v6930_v24  ;;  %11438 = vst [vmem:[#allocation49_spill] sm:$0xff] %v6932_v21  ;;  %1299 = vperm.xlu1 %5641, %v661_v37   ;;  %1294 = vperm.xlu0 %5640, %v660_v20   ;;  %v2874_v20 = vld [vmem:[%s10974_s3 + $0x18] sm:$0xff] }
 0x10c   : > { %2205 = vmatmul.mubr.bf16.gmra.mxu0 %v5788_v42  ;;  %2525 = vmatmul.mubr.bf16.gmra.mxu1 %v5789_v49  ;;  %v5794_v42 = vld [vmem:[%s10972_s1 + $0x180] ss:$8 sps:$4 sm:$0xff]  }
 0x10d   : > { %v6952_v24 = vpop.permute.xlu1 %999  ;;  %v6954_v37 = vpop.permute.xlu0 %994  ;;  %2214 = vmatprep.mubr.bf16.mxu0 %v5790_v60  ;;  %2534 = vmatprep.mubr.bf16.mxu1 %v5792_v61  ;;  %v5795_v49 = vld [vmem:[%s10972_s1 + $0x380] ss:$8 sps:$4 sm:$0xff]   ;;  %v5796_v60 = vld [vmem:[%s10972_s1 + $0x194] ss:$8 sps:$4 sm:$0xff]  }
 0x10e   : > { %11439 = vst [vmem:[#allocation50_spill] sm:$0xff] %v6952_v24  ;;  %11440 = vst [vmem:[#allocation51_spill] sm:$0xff] %v6954_v37  ;;  %3006 = vperm.xlu1 %5641, %v2872_v52   ;;  %3001 = vperm.xlu0 %5640, %v2871_v55   ;;  %v2876_v52 = vld [vmem:[%s10974_s3 + $0x28] sm:$0xff]  ;;  %v2875_v55 = vld [vmem:[%s10974_s3 + $0x20] sm:$0xff] }
 0x10f   : > { %v5798_v61 = vld [vmem:[%s10972_s1 + $0x394] ss:$8 sps:$4 sm:$0xff]  }
 0x110   : > { %v2878_v24 = vld [vmem:[%s10974_s3 + $0x38] sm:$0xff]  ;;  %v2877_v37 = vld [vmem:[%s10974_s3 + $0x30] sm:$0xff] }
 0x111   : > { %v6962_v21 = vpop.permute.xlu1 %1009  ;;  %v6964_v2 = vpop.permute.xlu0 %1004 }
 0x112   : > { %11441 = vst [vmem:[#allocation52_spill] sm:$0xff] %v6962_v21  ;;  %11442 = vst [vmem:[#allocation53_spill] sm:$0xff] %v6964_v2  ;;  %3016 = vperm.xlu1 %5641, %v2874_v20   ;;  %3011 = vperm.xlu0 %5640, %v2873_v7  }
 0x114   : > { %2215 = vmatmul.mubr.bf16.gmra.mxu0 %v5794_v42  ;;  %2535 = vmatmul.mubr.bf16.gmra.mxu1 %v5795_v49  ;;  %v6988_v7 = vpop.f32.mrf.mxu0  ;;  %v6990_v2 = vpop.f32.mrf.mxu1 }
 0x115   : > { %v6984_v21 = vpop.permute.xlu1 %1019  ;;  %v6986_v20 = vpop.permute.xlu0 %1014  ;;  %11445 = vst [vmem:[#allocation56_spill] sm:$0xff] %v6990_v2  ;;  %2224 = vmatprep.mubr.bf16.mxu0 %v5796_v60  ;;  %2544 = vmatprep.mubr.bf16.mxu1 %v5798_v61  ;;  %v2880_v61 = vld [vmem:[%s10974_s3 + $0x48] sm:$0xff] }
 0x116   : > { %11443 = vst [vmem:[#allocation54_spill] sm:$0xff] %v6984_v21  ;;  %11444 = vst [vmem:[#allocation55_spill] sm:$0xff] %v6986_v20  ;;  %3026 = vperm.xlu1 %5641, %v2876_v52   ;;  %3021 = vperm.xlu0 %5640, %v2875_v55   ;;  %v6998_v21 = vpop.f32.mrf.mxu0  ;;  %v7000_v42 = vpop.f32.mrf.mxu1  ;;  %v5800_v52 = vld [vmem:[%s10972_s1 + $0x190] ss:$8 sps:$4 sm:$0xff]  }
 0x117   : > { %11446 = vst [vmem:[#allocation57_spill] sm:$0xff] %v7000_v42  ;;  %v5801_v55 = vld [vmem:[%s10972_s1 + $0x390] ss:$8 sps:$4 sm:$0xff]   ;;  %v5804_v42 = vld [vmem:[%s10972_s1 + $0x3a4] ss:$8 sps:$4 sm:$0xff]  }
 0x118   : > { %v7012_v2 = vpop.f32.mrf.mxu0  ;;  %v7014_v60 = vpop.f32.mrf.mxu1 }
 0x119   : > { %v7002_v49 = vpop.permute.xlu1 %1029  ;;  %v7004_v20 = vpop.permute.xlu0 %1024  ;;  %11449 = vst [vmem:[#allocation60_spill] sm:$0xff] %v7014_v60 }
 0x11a   : > { %11447 = vst [vmem:[#allocation58_spill] sm:$0xff] %v7002_v49  ;;  %11448 = vst [vmem:[#allocation59_spill] sm:$0xff] %v7004_v20  ;;  %3036 = vperm.xlu1 %5641, %v2878_v24   ;;  %3031 = vperm.xlu0 %5640, %v2877_v37   ;;  %v2879_v49 = vld [vmem:[%s10974_s3 + $0x40] sm:$0xff]  ;;  %v7028_v14 = vpop.f32.mrf.mxu0  ;;  %v7030_v24 = vpop.f32.mrf.mxu1 }
 0x11b   : > { %v5802_v20 = vld [vmem:[%s10972_s1 + $0x1a4] ss:$8 sps:$4 sm:$0xff]   ;;  %11450 = vst [vmem:[#allocation61_spill] sm:$0xff] %v7030_v24 }
 0x11c   : > { %2225 = vmatmul.mubr.bf16.gmra.mxu0 %v5800_v52  ;;  %2545 = vmatmul.mubr.bf16.gmra.mxu1 %v5801_v55  ;;  %v7036_v19 = vpop.f32.mrf.mxu0  ;;  %v7044_v24 = vpop.f32.mrf.mxu1 }
 0x11d   : > { %v7032_v37 = vpop.permute.xlu1 %1039  ;;  %v7034_v60 = vpop.permute.xlu0 %1034  ;;  %2234 = vmatprep.mubr.bf16.mxu0 %v5802_v20  ;;  %2554 = vmatprep.mubr.bf16.mxu1 %v5804_v42  ;;  %11453 = vst [vmem:[#allocation64_spill] sm:$0xff] %v7044_v24  ;;  %v2884_v20 = vld [vmem:[%s10974_s3 + $0x68] sm:$0xff]  ;;  %v2883_v42 = vld [vmem:[%s10974_s3 + $0x60] sm:$0xff] }
 0x11e   : > { %11451 = vst [vmem:[#allocation62_spill] sm:$0xff] %v7032_v37  ;;  %11452 = vst [vmem:[#allocation63_spill] sm:$0xff] %v7034_v60  ;;  %3046 = vperm.xlu1 %5641, %v2880_v61   ;;  %3041 = vperm.xlu0 %5640, %v2879_v49   ;;  %v7046_v37 = vpop.f32.mrf.mxu0  ;;  %v5806_v49 = vld [vmem:[%s10972_s1 + $0x1a0] ss:$8 sps:$4 sm:$0xff]   ;;  %v7072_v24 = vpop.f32.mrf.mxu1 }
 0x11f   : > { %v5807_v61 = vld [vmem:[%s10972_s1 + $0x3a0] ss:$8 sps:$4 sm:$0xff]   ;;  %11456 = vst [vmem:[#allocation67_spill] sm:$0xff] %v7072_v24  ;;  %v2885_v24 = vld [vmem:[%s10974_s3 + $0x70] sm:$0xff] }
 0x120   : > { %v7058_v60 = vpop.f32.mrf.mxu0  ;;  %v7088_v6 = vpop.f32.mrf.mxu1 }
 0x121   : > { %v7048_v52 = vpop.permute.xlu1 %1049  ;;  %v7050_v55 = vpop.permute.xlu0 %1044  ;;  %11459 = vst [vmem:[#allocation70_spill] sm:$0xff] %v7088_v6 }
 0x122   : > { %11454 = vst [vmem:[#allocation65_spill] sm:$0xff] %v7048_v52  ;;  %11455 = vst [vmem:[#allocation66_spill] sm:$0xff] %v7050_v55  ;;  %3056 = vperm.xlu1 %5641, %v2882_v43   ;;  %3051 = vperm.xlu0 %5640, %v2881_v44   ;;  %v5808_v52 = vld [vmem:[%s10972_s1 + $0x1b4] ss:$8 sps:$4 sm:$0xff]   ;;  %v7074_v43 = vpop.f32.mrf.mxu0  ;;  %v7116_v6 = vpop.f32.mrf.mxu1 }
 0x123   : > { %v5810_v55 = vld [vmem:[%s10972_s1 + $0x3b4] ss:$8 sps:$4 sm:$0xff]   ;;  %11462 = vst [vmem:[#allocation73_spill] sm:$0xff] %v7116_v6 }
 0x124   : > { %2235 = vmatmul.mubr.bf16.gmra.mxu0 %v5806_v49  ;;  %2555 = vmatmul.mubr.bf16.gmra.mxu1 %v5807_v61  ;;  %v7080_v32 = vpop.f32.mrf.mxu0  ;;  %v2889_v6 = vld [vmem:[%s10974_s3 + $0x90] sm:$0xff]  ;;  %v7132_v41 = vpop.f32.mrf.mxu1 }
 0x125   : > { %v7076_v44 = vpop.permute.xlu1 %1059  ;;  %v7078_v25 = vpop.permute.xlu0 %1054  ;;  %2244 = vmatprep.mubr.bf16.mxu0 %v5808_v52  ;;  %2564 = vmatprep.mubr.bf16.mxu1 %v5810_v55  ;;  %v2888_v52 = vld [vmem:[%s10974_s3 + $0x88] sm:$0xff]  ;;  %v2887_v55 = vld [vmem:[%s10974_s3 + $0x80] sm:$0xff]  ;;  %11465 = vst [vmem:[#allocation76_spill] sm:$0xff] %v7132_v41 }
 0x126   : > { %11457 = vst [vmem:[#allocation68_spill] sm:$0xff] %v7076_v44  ;;  %11458 = vst [vmem:[#allocation69_spill] sm:$0xff] %v7078_v25  ;;  %3066 = vperm.xlu1 %5641, %v2884_v20   ;;  %3061 = vperm.xlu0 %5640, %v2883_v42   ;;  %v7090_v44 = vpop.f32.mrf.mxu0  ;;  %v5812_v20 = vld [vmem:[%s10972_s1 + $0x1b0] ss:$8 sps:$4 sm:$0xff]   ;;  %v7160_v41 = vpop.f32.mrf.mxu1 }
 0x127   : > { %v5813_v42 = vld [vmem:[%s10972_s1 + $0x3b0] ss:$8 sps:$4 sm:$0xff]   ;;  %11468 = vst [vmem:[#allocation79_spill] sm:$0xff] %v7160_v41 }
 0x128   : > { %v7102_v25 = vpop.f32.mrf.mxu0  ;;  %v2893_v41 = vld [vmem:[%s10974_s3 + $0xb0] sm:$0xff]  ;;  %v7176_v13 = vpop.f32.mrf.mxu1 }
 0x129   : > { %v7092_v49 = vpop.permute.xlu1 %1069  ;;  %v7094_v61 = vpop.permute.xlu0 %1064  ;;  %11471 = vst [vmem:[#allocation82_spill] sm:$0xff] %v7176_v13 }
 0x12a   : > { %11460 = vst [vmem:[#allocation71_spill] sm:$0xff] %v7092_v49  ;;  %11461 = vst [vmem:[#allocation72_spill] sm:$0xff] %v7094_v61  ;;  %3076 = vperm.xlu1 %5641, %v2886_v0   ;;  %3071 = vperm.xlu0 %5640, %v2885_v24   ;;  %v5816_v49 = vld [vmem:[%s10972_s1 + $0x1c4] ss:$8 sps:$4 sm:$0xff]   ;;  %v7118_v0 = vpop.f32.mrf.mxu0  ;;  %v7204_v13 = vpop.f32.mrf.mxu1 }
 0x12b   : > { %v5819_v61 = vld [vmem:[%s10972_s1 + $0x3c4] ss:$8 sps:$4 sm:$0xff]   ;;  %11474 = vst [vmem:[#allocation85_spill] sm:$0xff] %v7204_v13  ;;  %v2897_v13 = vld [vmem:[%s10974_s3 + $0xd0] sm:$0xff] }
 0x12c   : > { %2245 = vmatmul.mubr.bf16.gmra.mxu0 %v5812_v20  ;;  %2565 = vmatmul.mubr.bf16.gmra.mxu1 %v5813_v42  ;;  %v7124_v57 = vpop.f32.mrf.mxu0  ;;  %v7220_v54 = vpop.f32.mrf.mxu1 }
 0x12d   : > { %v7120_v24 = vpop.permute.xlu1 %1079  ;;  %v7122_v56 = vpop.permute.xlu0 %1074  ;;  %2254 = vmatprep.mubr.bf16.mxu0 %v5816_v49  ;;  %2574 = vmatprep.mubr.bf16.mxu1 %v5819_v61  ;;  %v2892_v49 = vld [vmem:[%s10974_s3 + $0xa8] sm:$0xff]  ;;  %v2891_v61 = vld [vmem:[%s10974_s3 + $0xa0] sm:$0xff]  ;;  %11477 = vst [vmem:[#allocation88_spill] sm:$0xff] %v7220_v54 }
 0x12e   : > { %11463 = vst [vmem:[#allocation74_spill] sm:$0xff] %v7120_v24  ;;  %11464 = vst [vmem:[#allocation75_spill] sm:$0xff] %v7122_v56  ;;  %3086 = vperm.xlu1 %5641, %v2888_v52   ;;  %3081 = vperm.xlu0 %5640, %v2887_v55   ;;  %v7134_v24 = vpop.f32.mrf.mxu0  ;;  %v5814_v52 = vld [vmem:[%s10972_s1 + $0x1c0] ss:$8 sps:$4 sm:$0xff]   ;;  %v7248_v54 = vpop.f32.mrf.mxu1 }
 0x12f   : > { %v5817_v55 = vld [vmem:[%s10972_s1 + $0x3c0] ss:$8 sps:$4 sm:$0xff]   ;;  %11480 = vst [vmem:[#allocation91_spill] sm:$0xff] %v7248_v54  ;;  %v2901_v54 = vld [vmem:[%s10974_s3 + $0xf0] sm:$0xff] }
 0x130   : > { %v7146_v56 = vpop.f32.mrf.mxu0  ;;  %v7264_v36 = vpop.f32.mrf.mxu1 }
 0x131   : > { %v7136_v20 = vpop.permute.xlu1 %1089  ;;  %v7138_v42 = vpop.permute.xlu0 %1084  ;;  %11483 = vst [vmem:[#allocation94_spill] sm:$0xff] %v7264_v36 }
 0x132   : > { %11466 = vst [vmem:[#allocation77_spill] sm:$0xff] %v7136_v20  ;;  %11467 = vst [vmem:[#allocation78_spill] sm:$0xff] %v7138_v42  ;;  %3096 = vperm.xlu1 %5641, %v2890_v40   ;;  %3091 = vperm.xlu0 %5640, %v2889_v6   ;;  %v5822_v20 = vld [vmem:[%s10972_s1 + $0x1d4] ss:$8 sps:$4 sm:$0xff]   ;;  %v7162_v40 = vpop.f32.mrf.mxu0 }
 0x133   : > { %v5825_v42 = vld [vmem:[%s10972_s1 + $0x3d4] ss:$8 sps:$4 sm:$0xff]  }
 0x134   : > { %2255 = vmatmul.mubr.bf16.gmra.mxu0 %v5814_v52  ;;  %2575 = vmatmul.mubr.bf16.gmra.mxu1 %v5817_v55  ;;  %v7168_v31 = vpop.f32.mrf.mxu0 }
 0x135   : > { %v7164_v6 = vpop.permute.xlu1 %1099  ;;  %v7166_v28 = vpop.permute.xlu0 %1094  ;;  %2264 = vmatprep.mubr.bf16.mxu0 %v5822_v20  ;;  %2584 = vmatprep.mubr.bf16.mxu1 %v5825_v42  ;;  %v2896_v20 = vld [vmem:[%s10974_s3 + $0xc8] sm:$0xff]  ;;  %v2895_v42 = vld [vmem:[%s10974_s3 + $0xc0] sm:$0xff] }
 0x136   : > { %11469 = vst [vmem:[#allocation80_spill] sm:$0xff] %v7164_v6  ;;  %11470 = vst [vmem:[#allocation81_spill] sm:$0xff] %v7166_v28  ;;  %3106 = vperm.xlu1 %5641, %v2892_v49   ;;  %3101 = vperm.xlu0 %5640, %v2891_v61   ;;  %v7178_v6 = vpop.f32.mrf.mxu0  ;;  %v5820_v49 = vld [vmem:[%s10972_s1 + $0x1d0] ss:$8 sps:$4 sm:$0xff]  }
 0x137   : > { %v5823_v61 = vld [vmem:[%s10972_s1 + $0x3d0] ss:$8 sps:$4 sm:$0xff]  }
 0x138   : > { %v7190_v28 = vpop.f32.mrf.mxu0 }
 0x139   : > { %v7180_v52 = vpop.permute.xlu1 %1109  ;;  %v7182_v55 = vpop.permute.xlu0 %1104 }
 0x13a   : > { %11472 = vst [vmem:[#allocation83_spill] sm:$0xff] %v7180_v52  ;;  %11473 = vst [vmem:[#allocation84_spill] sm:$0xff] %v7182_v55  ;;  %3116 = vperm.xlu1 %5641, %v2894_v8   ;;  %3111 = vperm.xlu0 %5640, %v2893_v41   ;;  %v5828_v52 = vld [vmem:[%s10972_s1 + $0x1e4] ss:$8 sps:$4 sm:$0xff]   ;;  %v7206_v8 = vpop.f32.mrf.mxu0 }
 0x13b   : > { %v5831_v55 = vld [vmem:[%s10972_s1 + $0x3e4] ss:$8 sps:$4 sm:$0xff]  }
 0x13c   : > { %2265 = vmatmul.mubr.bf16.gmra.mxu0 %v5820_v49  ;;  %2585 = vmatmul.mubr.bf16.gmra.mxu1 %v5823_v61  ;;  %v7212_v5 = vpop.f32.mrf.mxu0 }
 0x13d   : > { %v7208_v41 = vpop.permute.xlu1 %1119  ;;  %v7210_v4 = vpop.permute.xlu0 %1114  ;;  %2274 = vmatprep.mubr.bf16.mxu0 %v5828_v52  ;;  %2594 = vmatprep.mubr.bf16.mxu1 %v5831_v55  ;;  %v2900_v52 = vld [vmem:[%s10974_s3 + $0xe8] sm:$0xff]  ;;  %v2899_v55 = vld [vmem:[%s10974_s3 + $0xe0] sm:$0xff] }
 0x13e   : > { %11475 = vst [vmem:[#allocation86_spill] sm:$0xff] %v7208_v41  ;;  %11476 = vst [vmem:[#allocation87_spill] sm:$0xff] %v7210_v4  ;;  %3126 = vperm.xlu1 %5641, %v2896_v20   ;;  %3121 = vperm.xlu0 %5640, %v2895_v42   ;;  %v7222_v41 = vpop.f32.mrf.mxu0  ;;  %v5826_v20 = vld [vmem:[%s10972_s1 + $0x1e0] ss:$8 sps:$4 sm:$0xff]  }
 0x13f   : > { %v5829_v42 = vld [vmem:[%s10972_s1 + $0x3e0] ss:$8 sps:$4 sm:$0xff]  }
 0x140   : > { %v7234_v4 = vpop.f32.mrf.mxu0 }
 0x141   : > { %v7224_v49 = vpop.permute.xlu1 %1129  ;;  %v7226_v61 = vpop.permute.xlu0 %1124 }
 0x142   : > { %11478 = vst [vmem:[#allocation89_spill] sm:$0xff] %v7224_v49  ;;  %11479 = vst [vmem:[#allocation90_spill] sm:$0xff] %v7226_v61  ;;  %3136 = vperm.xlu1 %5641, %v2898_v53   ;;  %3131 = vperm.xlu0 %5640, %v2897_v13   ;;  %v5834_v49 = vld [vmem:[%s10972_s1 + $0x1f4] ss:$8 sps:$4 sm:$0xff]   ;;  %v7250_v53 = vpop.f32.mrf.mxu0 }
 0x143   : > { %v5837_v61 = vld [vmem:[%s10972_s1 + $0x3f4] ss:$8 sps:$4 sm:$0xff]  }
 0x144   : > { %2275 = vmatmul.mubr.bf16.gmra.mxu0 %v5826_v20  ;;  %2595 = vmatmul.mubr.bf16.gmra.mxu1 %v5829_v42  ;;  %v7256_v48 = vpop.f32.mrf.mxu0 }
 0x145   : > { %v7252_v13 = vpop.permute.xlu1 %1139  ;;  %v7254_v45 = vpop.permute.xlu0 %1134  ;;  %2284 = vmatprep.mubr.bf16.mxu0 %v5834_v49  ;;  %2604 = vmatprep.mubr.bf16.mxu1 %v5837_v61  ;;  %v2904_v49 = vld [vmem:[%s10974_s3 + $0x108] sm:$0xff]  ;;  %v2903_v61 = vld [vmem:[%s10974_s3 + $0x100] sm:$0xff] }
 0x146   : > { %11481 = vst [vmem:[#allocation92_spill] sm:$0xff] %v7252_v13  ;;  %11482 = vst [vmem:[#allocation93_spill] sm:$0xff] %v7254_v45  ;;  %3146 = vperm.xlu1 %5641, %v2900_v52   ;;  %3141 = vperm.xlu0 %5640, %v2899_v55   ;;  %v7266_v13 = vpop.f32.mrf.mxu0  ;;  %v5832_v52 = vld [vmem:[%s10972_s1 + $0x1f0] ss:$8 sps:$4 sm:$0xff]  }
 0x147   : > { %v5835_v55 = vld [vmem:[%s10972_s1 + $0x3f0] ss:$8 sps:$4 sm:$0xff]  }
 0x148   : > { %v7278_v45 = vpop.f32.mrf.mxu0 }
 0x149   : > { %v7268_v20 = vpop.permute.xlu1 %1149  ;;  %v7270_v42 = vpop.permute.xlu0 %1144 }
 0x14a   : > { %11484 = vst [vmem:[#allocation95_spill] sm:$0xff] %v7268_v20  ;;  %11485 = vst [vmem:[#allocation96_spill] sm:$0xff] %v7270_v42  ;;  %3156 = vperm.xlu1 %5641, %v2902_v33   ;;  %3151 = vperm.xlu0 %5640, %v2901_v54   ;;  %v7286_v20 = vpop.f32.mrf.mxu1  ;;  %v7288_v42 = vpop.f32.mrf.mxu0  ;;  %v2906_v54 = vld [vmem:[%s10974_s3 + $0x118] sm:$0xff] }
 0x14b   : > { %11486 = vst [vmem:[#allocation97_spill] sm:$0xff] %v7286_v20  ;;  %v2905_v20 = vld [vmem:[%s10974_s3 + $0x110] sm:$0xff] }
 0x14c   : > { %2285 = vmatmul.mubr.bf16.gmra.mxu0 %v5832_v52  ;;  %2605 = vmatmul.mubr.bf16.gmra.mxu1 %v5835_v55  ;;  %v7294_v33 = vpop.f32.mrf.mxu0  ;;  %v2908_v55 = vld [vmem:[%s10974_s3 + $0x128] sm:$0xff] }
 0x14d   : > { %v7290_v36 = vpop.permute.xlu1 %1159  ;;  %v7292_v29 = vpop.permute.xlu0 %1154 }
 0x14e   : > { %11487 = vst [vmem:[#allocation98_spill] sm:$0xff] %v7290_v36  ;;  %11488 = vst [vmem:[#allocation99_spill] sm:$0xff] %v7292_v29  ;;  %3166 = vperm.xlu1 %5641, %v2904_v49   ;;  %3161 = vperm.xlu0 %5640, %v2903_v61   ;;  %v7302_v30 = vpop.f32.mrf.mxu0  ;;  %v2907_v49 = vld [vmem:[%s10974_s3 + $0x120] sm:$0xff] }
 0x150   : > { %v7308_v52 = vpop.f32.mrf.mxu0 }
 0x151   : > { %v7304_v15 = vpop.permute.xlu1 %1169  ;;  %v7306_v36 = vpop.permute.xlu0 %1164 }
 0x152   : > { %11489 = vst [vmem:[#allocation100_spill] sm:$0xff] %v7304_v15  ;;  %11490 = vst [vmem:[#allocation101_spill] sm:$0xff] %v7306_v36  ;;  %3176 = vperm.xlu1 %5641, %v2906_v54   ;;  %3171 = vperm.xlu0 %5640, %v2905_v20   ;;  %v7316_v61 = vpop.f32.mrf.mxu0  ;;  %v2910_v20 = vld [vmem:[%s10974_s3 + $0x138] sm:$0xff]  ;;  %v2909_v54 = vld [vmem:[%s10974_s3 + $0x130] sm:$0xff] }
 0x154   : > { %v7322_v15 = vpop.f32.mrf.mxu0 }
 0x155   : > { %v7318_v29 = vpop.permute.xlu1 %1179  ;;  %v7320_v18 = vpop.permute.xlu0 %1174 }
 0x156   : > { %11491 = vst [vmem:[#allocation102_spill] sm:$0xff] %v7318_v29  ;;  %11492 = vst [vmem:[#allocation103_spill] sm:$0xff] %v7320_v18  ;;  %3186 = vperm.xlu1 %5641, %v2908_v55   ;;  %3181 = vperm.xlu0 %5640, %v2907_v49   ;;  %v7330_v36 = vpop.f32.mrf.mxu0  ;;  %v2912_v55 = vld [vmem:[%s10974_s3 + $0x148] sm:$0xff]  ;;  %v2911_v49 = vld [vmem:[%s10974_s3 + $0x140] sm:$0xff] }
 0x158   : > { %v7336_v29 = vpop.f32.mrf.mxu0 }
 0x159   : > { %v7332_v9 = vpop.permute.xlu1 %1189  ;;  %v7334_v12 = vpop.permute.xlu0 %1184 }
 0x15a   : > { %11493 = vst [vmem:[#allocation104_spill] sm:$0xff] %v7332_v9  ;;  %11494 = vst [vmem:[#allocation105_spill] sm:$0xff] %v7334_v12  ;;  %3196 = vperm.xlu1 %5641, %v2910_v20   ;;  %3191 = vperm.xlu0 %5640, %v2909_v54   ;;  %v7344_v18 = vpop.f32.mrf.mxu0  ;;  %v2914_v20 = vld [vmem:[%s10974_s3 + $0x158] sm:$0xff]  ;;  %v2913_v54 = vld [vmem:[%s10974_s3 + $0x150] sm:$0xff] }
 0x15b   : > { %11495 = vst [vmem:[#allocation106_spill] sm:$0xff] %v7344_v18 }
 0x15c   : > { %v7350_v9 = vpop.f32.mrf.mxu0 }
 0x15d   : > { %v7346_v62 = vpop.permute.xlu1 %1199  ;;  %v7348_v63 = vpop.permute.xlu0 %1194  ;;  %11498 = vst [vmem:[#allocation109_spill] sm:$0xff] %v7350_v9 }
 0x15e   : > { %11496 = vst [vmem:[#allocation107_spill] sm:$0xff] %v7346_v62  ;;  %11497 = vst [vmem:[#allocation108_spill] sm:$0xff] %v7348_v63  ;;  %3206 = vperm.xlu1 %5641, %v2912_v55   ;;  %3201 = vperm.xlu0 %5640, %v2911_v49   ;;  %v7358_v12 = vpop.f32.mrf.mxu0  ;;  %v2916_v55 = vld [vmem:[%s10974_s3 + $0x168] sm:$0xff]  ;;  %v2915_v49 = vld [vmem:[%s10974_s3 + $0x160] sm:$0xff] }
 0x15f   : > { %11499 = vst [vmem:[#allocation110_spill] sm:$0xff] %v7358_v12 }
 0x160   : > { %v7364_v62 = vpop.f32.mrf.mxu0 }
 0x161   : > { %v7360_v58 = vpop.permute.xlu1 %1209  ;;  %v7362_v59 = vpop.permute.xlu0 %1204  ;;  %11502 = vst [vmem:[#allocation113_spill] sm:$0xff] %v7364_v62 }
 0x162   : > { %11500 = vst [vmem:[#allocation111_spill] sm:$0xff] %v7360_v58  ;;  %11501 = vst [vmem:[#allocation112_spill] sm:$0xff] %v7362_v59  ;;  %3216 = vperm.xlu1 %5641, %v2914_v20   ;;  %3211 = vperm.xlu0 %5640, %v2913_v54   ;;  %v7372_v63 = vpop.f32.mrf.mxu0  ;;  %v2918_v20 = vld [vmem:[%s10974_s3 + $0x178] sm:$0xff]  ;;  %v2917_v54 = vld [vmem:[%s10974_s3 + $0x170] sm:$0xff] }
 0x163   : > { %11503 = vst [vmem:[#allocation114_spill] sm:$0xff] %v7372_v63 }
 0x164   : > { %v7378_v58 = vpop.f32.mrf.mxu0 }
 0x165   : > { %v7374_v9 = vpop.permute.xlu1 %1219  ;;  %v7376_v12 = vpop.permute.xlu0 %1214  ;;  %11506 = vst [vmem:[#allocation117_spill] sm:$0xff] %v7378_v58 }
 0x166   : > { %11504 = vst [vmem:[#allocation115_spill] sm:$0xff] %v7374_v9  ;;  %11505 = vst [vmem:[#allocation116_spill] sm:$0xff] %v7376_v12  ;;  %3226 = vperm.xlu1 %5641, %v2916_v55   ;;  %3221 = vperm.xlu0 %5640, %v2915_v49   ;;  %v7386_v59 = vpop.f32.mrf.mxu0  ;;  %v2920_v55 = vld [vmem:[%s10974_s3 + $0x188] sm:$0xff]  ;;  %v2919_v49 = vld [vmem:[%s10974_s3 + $0x180] sm:$0xff] }
 0x167   : > { %11507 = vst [vmem:[#allocation118_spill] sm:$0xff] %v7386_v59 }
 0x168   : > { %v7392_v9 = vpop.f32.mrf.mxu0 }
 0x169   : > { %v7388_v62 = vpop.permute.xlu1 %1229  ;;  %v7390_v63 = vpop.permute.xlu0 %1224  ;;  %11510 = vst [vmem:[#allocation121_spill] sm:$0xff] %v7392_v9 }
 0x16a   : > { %11508 = vst [vmem:[#allocation119_spill] sm:$0xff] %v7388_v62  ;;  %11509 = vst [vmem:[#allocation120_spill] sm:$0xff] %v7390_v63  ;;  %3236 = vperm.xlu1 %5641, %v2918_v20   ;;  %3231 = vperm.xlu0 %5640, %v2917_v54   ;;  %v7400_v12 = vpop.f32.mrf.mxu0  ;;  %v2922_v20 = vld [vmem:[%s10974_s3 + $0x198] sm:$0xff]  ;;  %v2921_v54 = vld [vmem:[%s10974_s3 + $0x190] sm:$0xff] }
 0x16b   : > { %11511 = vst [vmem:[#allocation122_spill] sm:$0xff] %v7400_v12 }
 0x16c   : > { %v7406_v62 = vpop.f32.mrf.mxu0 }
 0x16d   : > { %v7402_v58 = vpop.permute.xlu1 %1239  ;;  %v7404_v59 = vpop.permute.xlu0 %1234  ;;  %11514 = vst [vmem:[#allocation125_spill] sm:$0xff] %v7406_v62 }
 0x16e   : > { %11512 = vst [vmem:[#allocation123_spill] sm:$0xff] %v7402_v58  ;;  %11513 = vst [vmem:[#allocation124_spill] sm:$0xff] %v7404_v59  ;;  %3246 = vperm.xlu1 %5641, %v2920_v55   ;;  %3241 = vperm.xlu0 %5640, %v2919_v49   ;;  %v7414_v63 = vpop.f32.mrf.mxu0  ;;  %v2924_v55 = vld [vmem:[%s10974_s3 + $0x1a8] sm:$0xff]  ;;  %v2923_v49 = vld [vmem:[%s10974_s3 + $0x1a0] sm:$0xff] }
 0x16f   : > { %11515 = vst [vmem:[#allocation126_spill] sm:$0xff] %v7414_v63 }
 0x170   : > { %v7420_v58 = vpop.f32.mrf.mxu0 }
 0x171   : > { %v7416_v9 = vpop.permute.xlu1 %1249  ;;  %v7418_v12 = vpop.permute.xlu0 %1244  ;;  %11518 = vst [vmem:[#allocation129_spill] sm:$0xff] %v7420_v58 }
 0x172   : > { %11516 = vst [vmem:[#allocation127_spill] sm:$0xff] %v7416_v9  ;;  %11517 = vst [vmem:[#allocation128_spill] sm:$0xff] %v7418_v12  ;;  %3256 = vperm.xlu1 %5641, %v2922_v20   ;;  %3251 = vperm.xlu0 %5640, %v2921_v54   ;;  %v7428_v59 = vpop.f32.mrf.mxu0  ;;  %v2926_v20 = vld [vmem:[%s10974_s3 + $0x1b8] sm:$0xff]  ;;  %v2925_v54 = vld [vmem:[%s10974_s3 + $0x1b0] sm:$0xff] }
 0x173   : > { %11519 = vst [vmem:[#allocation130_spill] sm:$0xff] %v7428_v59 }
 0x174   : > { %v7434_v9 = vpop.f32.mrf.mxu0 }
 0x175   : > { %v7430_v62 = vpop.permute.xlu1 %1259  ;;  %v7432_v63 = vpop.permute.xlu0 %1254  ;;  %11522 = vst [vmem:[#allocation133_spill] sm:$0xff] %v7434_v9 }
 0x176   : > { %11520 = vst [vmem:[#allocation131_spill] sm:$0xff] %v7430_v62  ;;  %11521 = vst [vmem:[#allocation132_spill] sm:$0xff] %v7432_v63  ;;  %3266 = vperm.xlu1 %5641, %v2924_v55   ;;  %3261 = vperm.xlu0 %5640, %v2923_v49   ;;  %v7442_v12 = vpop.f32.mrf.mxu0  ;;  %v2928_v55 = vld [vmem:[%s10974_s3 + $0x1c8] sm:$0xff]  ;;  %v2927_v49 = vld [vmem:[%s10974_s3 + $0x1c0] sm:$0xff] }
 0x177   : > { %11523 = vst [vmem:[#allocation134_spill] sm:$0xff] %v7442_v12 }
 0x178   : > { %v7448_v62 = vpop.f32.mrf.mxu0 }
 0x179   : > { %v7444_v58 = vpop.permute.xlu1 %1269  ;;  %v7446_v59 = vpop.permute.xlu0 %1264  ;;  %11526 = vst [vmem:[#allocation137_spill] sm:$0xff] %v7448_v62 }
 0x17a   : > { %11524 = vst [vmem:[#allocation135_spill] sm:$0xff] %v7444_v58  ;;  %11525 = vst [vmem:[#allocation136_spill] sm:$0xff] %v7446_v59  ;;  %3276 = vperm.xlu1 %5641, %v2926_v20   ;;  %3271 = vperm.xlu0 %5640, %v2925_v54   ;;  %v7456_v63 = vpop.f32.mrf.mxu0  ;;  %v2930_v20 = vld [vmem:[%s10974_s3 + $0x1d8] sm:$0xff]  ;;  %v2929_v54 = vld [vmem:[%s10974_s3 + $0x1d0] sm:$0xff] }
 0x17b   : > { %11527 = vst [vmem:[#allocation138_spill] sm:$0xff] %v7456_v63 }
 0x17c   : > { %v7462_v58 = vpop.f32.mrf.mxu0 }
 0x17d   : > { %v7458_v9 = vpop.permute.xlu1 %1279  ;;  %v7460_v12 = vpop.permute.xlu0 %1274  ;;  %11530 = vst [vmem:[#allocation141_spill] sm:$0xff] %v7462_v58 }
 0x17e   : > { %11528 = vst [vmem:[#allocation139_spill] sm:$0xff] %v7458_v9  ;;  %11529 = vst [vmem:[#allocation140_spill] sm:$0xff] %v7460_v12  ;;  %3286 = vperm.xlu1 %5641, %v2928_v55   ;;  %3281 = vperm.xlu0 %5640, %v2927_v49   ;;  %v7470_v59 = vpop.f32.mrf.mxu0  ;;  %v7480_v55 = vadd.f32 %v6988_v7, %v6420_v3  ;;  %v7484_v49 = vadd.f32 %v6998_v21, %v6420_v3  ;;  %v2932_v12 = vld [vmem:[%s10974_s3 + $0x1e8] sm:$0xff] }
 0x17f   : > { %11531 = vst [vmem:[#allocation142_spill] sm:$0xff] %v7470_v59  ;;  %v7498_v7 = vadd.f32 %v7028_v14, %v6442_v11  ;;  %v2933_v59 = vld [vmem:[%s10974_s3 + $0x1f0] sm:$0xff]  ;;  %v7534_v14 = vadd.f32 %v7074_v43, %v6440_v10 }
 0x180   : > { %v7476_v9 = vpop.f32.mrf.mxu0  ;;  %11535 = vst [vmem:[#allocation146_spill] sm:$0xff] %v7480_v55  ;;  %11536 = vst [vmem:[#allocation147_spill] sm:$0xff] %v7484_v49  ;;  %v11551_v58 = vmax.f32 %v7484_v49, 0.0 }
 0x181   : > { %v7472_v62 = vpop.permute.xlu1 %1289  ;;  %v7474_v63 = vpop.permute.xlu0 %1284  ;;  %11534 = vst [vmem:[#allocation145_spill] sm:$0xff] %v7476_v9  ;;  %11538 = vst [vmem:[#allocation149_spill] sm:$0xff] %v7498_v7  ;;  %v7530_v9 = vadd.f32 %v7058_v60, %v6440_v10  ;;  %v2936_v10 = vld [vmem:[%s10974_s3 + $0x208] sm:$0xff] }
 0x182   : > { %11532 = vst [vmem:[#allocation143_spill] sm:$0xff] %v7472_v62  ;;  %11533 = vst [vmem:[#allocation144_spill] sm:$0xff] %v7474_v63  ;;  %3296 = vperm.xlu1 %5641, %v2930_v20   ;;  %3291 = vperm.xlu0 %5640, %v2929_v54   ;;  %v2931_v62 = vld [vmem:[%s10974_s3 + $0x1e0] sm:$0xff]  ;;  %v7494_v20 = vadd.f32 %v7012_v2, %v6442_v11  ;;  %v7500_v54 = vpop.f32.mrf.mxu0  ;;  %v2934_v2 = vld [vmem:[%s10974_s3 + $0x1f8] sm:$0xff] }
 0x183   : > { %11539 = vst [vmem:[#allocation150_spill] sm:$0xff] %v7500_v54  ;;  %11546 = vst [vmem:[#allocation157_spill] sm:$0xff] %v7530_v9 }
 0x184   : > { %11537 = vst [vmem:[#allocation148_spill] sm:$0xff] %v7494_v20  ;;  %v7506_v63 = vpop.f32.mrf.mxu0  ;;  %11547 = vst [vmem:[#allocation158_spill] sm:$0xff] %v7534_v14 }
 0x185   : > { %v7502_v3 = vpop.permute.xlu1 %1299  ;;  %v7504_v21 = vpop.permute.xlu0 %1294  ;;  %11542 = vst [vmem:[#allocation153_spill] sm:$0xff] %v7506_v63  ;;  %v11550_v63 = vmax.f32 %v7480_v55, 0.0 }
 0x186   : > { %11540 = vst [vmem:[#allocation151_spill] sm:$0xff] %v7502_v3  ;;  %11541 = vst [vmem:[#allocation152_spill] sm:$0xff] %v7504_v21  ;;  %3306 = vperm.xlu1 %5641, %v2932_v12   ;;  %3301 = vperm.xlu0 %5640, %v2931_v62   ;;  %v7517_v3 = vadd.f32 %v7036_v19, %v6418_v1  ;;  %v7521_v12 = vadd.f32 %v7046_v37, %v6418_v1  ;;  %v7523_v62 = vpop.f32.mrf.mxu0  ;;  %v11548_v21 = vmax.f32 %v7494_v20, 0.0  ;;  %v11656_v20 = vld [vmem:[#allocation10_spill] sm:$0xff] }
 0x187   : > { %11545 = vst [vmem:[#allocation156_spill] sm:$0xff] %v7523_v62  ;;  %v11549_v37 = vmax.f32 %v7498_v7, 0.0 }
 0x188   : > { %11543 = vst [vmem:[#allocation154_spill] sm:$0xff] %v7517_v3  ;;  %11544 = vst [vmem:[#allocation155_spill] sm:$0xff] %v7521_v12  ;;  %v7544_v60 = vpop.f32.mrf.mxu0  ;;  %v11092_v43 = vmax.f32 %v7517_v3, 0.0 }
 0x189   : > { %v3007_v19 = vpop.permute.xlu1 %3006  ;;  %v3002_v11 = vpop.permute.xlu0 %3001 }
 0x18a   : > { %v3641_v1 = vmul.f32 %v3007_v19, %v11548_v21  ;;  %v3642_v62 = vmul.f32 %v3007_v19, %v11549_v37  ;;  %v3639_v54 = vmul.f32 %v3002_v11, %v11550_v63  ;;  %v3640_v18 = vmul.f32 %v3002_v11, %v11551_v58  ;;  %3316 = vperm.xlu1 %5641, %v2934_v2   ;;  %v7551_v37 = vpop.f32.mrf.mxu0  ;;  %v2935_v58 = vld [vmem:[%s10974_s3 + $0x200] sm:$0xff] }
 0x18b   : > { %3311 = vperm.xlu0 %5640, %v2933_v59   ;;  %v7558_v63 = vadd.f32 %v7080_v32, %v6458_v17  ;;  %v7562_v59 = vadd.f32 %v7090_v44, %v6458_v17  ;;  %v11096_v21 = vmax.f32 %v7530_v9, 0.0  ;;  %v7574_v32 = vadd.f32 %v7102_v25, %v6456_v16  ;;  %v2938_v44 = vld [vmem:[%s10974_s3 + $0x218] sm:$0xff] }
 0x18c   : > { %v3895_v7 = vadd.f32 %v3641_v1, %v3639_v54  ;;  %v4028_v19 = vadd.f32 %v3642_v62, %v3640_v18  ;;  %v11097_v18 = vmax.f32 %v7534_v14, 0.0  ;;  %v11554_v62 = vmax.f32 %v7521_v12, 0.0  ;;  %v7570_v49 = vpop.f32.mrf.mxu0 }
 0x18d   : > { %11552 = vst [vmem:[#allocation159_spill] sm:$0xff] %v7558_v63  ;;  %11553 = vst [vmem:[#allocation160_spill] sm:$0xff] %v7562_v59  ;;  %v3017_v2 = vpop.permute.xlu1 %3016  ;;  %v3012_v11 = vpop.permute.xlu0 %3011  ;;  %v7578_v17 = vadd.f32 %v7118_v0, %v6456_v16  ;;  %v2937_v16 = vld [vmem:[%s10974_s3 + $0x210] sm:$0xff]  ;;  %v11099_v0 = vmax.f32 %v7558_v63, 0.0  ;;  %v11559_v14 = vmax.f32 %v7562_v59, 0.0  ;;  %v7648_v59 = vadd.f32 %v7190_v28, %v6482_v26  ;;  %v11644_v63 = vld [vmem:[#allocation138_spill] sm:$0xff] }
 0x18e   : > { %v3643_v54 = vmul.f32 %v3012_v11, %v11092_v43  ;;  %v3644_v1 = vmul.f32 %v3012_v11, %v11554_v62  ;;  %3326 = vperm.xlu1 %5641, %v2936_v10   ;;  %11555 = vst [vmem:[#allocation161_spill] sm:$0xff] %v7574_v32  ;;  %v7583_v43 = vpop.f32.mrf.mxu1  ;;  %v3645_v11 = vmul.f32 %v3017_v2, %v11096_v21  ;;  %v7589_v12 = vpop.f32.mrf.mxu0 }
 0x18f   : > { %11556 = vst [vmem:[#allocation162_spill] sm:$0xff] %v7578_v17  ;;  %3321 = vperm.xlu0 %5640, %v2935_v58   ;;  %v3646_v10 = vmul.f32 %v3017_v2, %v11097_v18  ;;  %v7598_v21 = vadd.f32 %v7124_v57, %v6474_v23  ;;  %v11104_v18 = vmax.f32 %v7578_v17, 0.0  ;;  %11564 = vst [vmem:[#allocation169_spill] sm:$0xff] %v7648_v59 }
 0x190   : > { %v3896_v62 = vadd.f32 %v3895_v7, %v3643_v54  ;;  %v4029_v25 = vadd.f32 %v4028_v19, %v3644_v1  ;;  %v7602_v7 = vadd.f32 %v7134_v24, %v6474_v23  ;;  %v7604_v54 = vpop.f32.mrf.mxu0  ;;  %v11101_v1 = vmax.f32 %v7574_v32, 0.0  ;;  %v2940_v23 = vld [vmem:[%s10974_s3 + $0x228] sm:$0xff]  ;;  %v11641_v32 = vld [vmem:[#allocation8_spill] sm:$0xff] }
 0x191   : > { %v3027_v3 = vpop.permute.xlu1 %3026  ;;  %v3022_v55 = vpop.permute.xlu0 %3021  ;;  %11557 = vst [vmem:[#allocation163_spill] sm:$0xff] %v7598_v21  ;;  %v7617_v24 = vadd.f32 %v7146_v56, %v6472_v22  ;;  %v2939_v56 = vld [vmem:[%s10974_s3 + $0x220] sm:$0xff] }
 0x192   : > { %11558 = vst [vmem:[#allocation164_spill] sm:$0xff] %v7602_v7  ;;  %v3897_v19 = vadd.f32 %v3896_v62, %v3645_v11  ;;  %v4030_v2 = vadd.f32 %v4029_v25, %v3646_v10  ;;  %3336 = vperm.xlu1 %5641, %v2938_v44   ;;  %v3647_v58 = vmul.f32 %v3022_v55, %v11099_v0  ;;  %v7633_v10 = vpop.f32.mrf.mxu0 }
 0x193   : > { %v3648_v57 = vmul.f32 %v3022_v55, %v11559_v14  ;;  %3331 = vperm.xlu0 %5640, %v2937_v16   ;;  %11560 = vst [vmem:[#allocation165_spill] sm:$0xff] %v7617_v24  ;;  %v7621_v44 = vadd.f32 %v7162_v40, %v6472_v22  ;;  %v7625_v11 = vadd.f32 %v7168_v31, %v6484_v27  ;;  %v7631_v14 = vpop.f32.mrf.mxu1 }
 0x194   : > { %v7629_v55 = vadd.f32 %v7178_v6, %v6484_v27  ;;  %v3649_v22 = vmul.f32 %v3027_v3, %v11101_v1  ;;  %v3650_v40 = vmul.f32 %v3027_v3, %v11104_v18  ;;  %v3898_v31 = vadd.f32 %v3897_v19, %v3647_v58  ;;  %v7644_v0 = vpop.f32.mrf.mxu0  ;;  %v2942_v19 = vld [vmem:[%s10974_s3 + $0x238] sm:$0xff] }
 0x195   : > { %11561 = vst [vmem:[#allocation166_spill] sm:$0xff] %v7621_v44  ;;  %11562 = vst [vmem:[#allocation167_spill] sm:$0xff] %v7625_v11  ;;  %v4031_v62 = vadd.f32 %v4030_v2, %v3648_v57  ;;  %v3037_v25 = vpop.permute.xlu1 %3036  ;;  %v3032_v16 = vpop.permute.xlu0 %3031  ;;  %v11102_v27 = vmax.f32 %v7598_v21, 0.0  ;;  %v11103_v6 = vmax.f32 %v7602_v7, 0.0  ;;  %v7652_v1 = vadd.f32 %v7206_v8, %v6482_v26 }
 0x196   : > { %11563 = vst [vmem:[#allocation168_spill] sm:$0xff] %v7629_v55  ;;  %3346 = vperm.xlu1 %5641, %v2940_v23   ;;  %v3899_v3 = vadd.f32 %v3898_v31, %v3649_v22  ;;  %v11108_v2 = vmax.f32 %v7617_v24, 0.0  ;;  %v11107_v57 = vmax.f32 %v7621_v44, 0.0  ;;  %v7659_v23 = vpop.f32.mrf.mxu1  ;;  %v7665_v8 = vpop.f32.mrf.mxu0  ;;  %v7674_v31 = vadd.f32 %v7212_v5, %v6506_v35  ;;  %v11626_v44 = vld [vmem:[#allocation6_spill] sm:$0xff] }
 0x197   : > { %11565 = vst [vmem:[#allocation170_spill] sm:$0xff] %v7652_v1  ;;  %v4032_v58 = vadd.f32 %v4031_v62, %v3650_v40  ;;  %3341 = vperm.xlu0 %5640, %v2939_v56   ;;  %v3651_v28 = vmul.f32 %v3032_v16, %v11102_v27  ;;  %v3652_v26 = vmul.f32 %v3032_v16, %v11103_v6  ;;  %v2941_v56 = vld [vmem:[%s10974_s3 + $0x230] sm:$0xff]  ;;  %v11111_v5 = vmax.f32 %v7648_v59, 0.0  ;;  %v11615_v59 = vld [vmem:[#allocation122_spill] sm:$0xff] }
 0x198   : > { %11566 = vst [vmem:[#allocation171_spill] sm:$0xff] %v7674_v31  ;;  %v7678_v62 = vadd.f32 %v7222_v41, %v6506_v35  ;;  %v3653_v6 = vmul.f32 %v3037_v25, %v11108_v2  ;;  %v3654_v18 = vmul.f32 %v3037_v25, %v11107_v57  ;;  %v7684_v21 = vpop.f32.mrf.mxu0  ;;  %v11110_v40 = vmax.f32 %v7652_v1, 0.0  ;;  %v2944_v25 = vld [vmem:[%s10974_s3 + $0x248] sm:$0xff]  ;;  %v11612_v1 = vld [vmem:[#allocation4_spill] sm:$0xff]  ;;  %v11629_v24 = vld [vmem:[#allocation130_spill] sm:$0xff] }
 0x199   : > { %v3047_v27 = vpop.permute.xlu1 %3046  ;;  %v3042_v16 = vpop.permute.xlu0 %3041  ;;  %v3900_v7 = vadd.f32 %v3899_v3, %v3651_v28  ;;  %v4033_v22 = vadd.f32 %v4032_v58, %v3652_v26  ;;  %v7690_v35 = vadd.f32 %v7234_v4, %v6504_v34  ;;  %v7694_v41 = vadd.f32 %v7250_v53, %v6504_v34  ;;  %v2943_v34 = vld [vmem:[%s10974_s3 + $0x240] sm:$0xff] }
 0x19a   : > { %11567 = vst [vmem:[#allocation172_spill] sm:$0xff] %v7678_v62  ;;  %3356 = vperm.xlu1 %5641, %v2942_v19   ;;  %v7699_v3 = vpop.f32.mrf.mxu1  ;;  %v11570_v28 = vmax.f32 %v7625_v11, 0.0  ;;  %v11571_v57 = vmax.f32 %v7629_v55, 0.0  ;;  %v7705_v2 = vpop.f32.mrf.mxu0 }
 0x19b   : > { %11568 = vst [vmem:[#allocation173_spill] sm:$0xff] %v7690_v35  ;;  %11569 = vst [vmem:[#allocation174_spill] sm:$0xff] %v7694_v41  ;;  %3351 = vperm.xlu0 %5640, %v2941_v56   ;;  %v3901_v58 = vadd.f32 %v3900_v7, %v3653_v6  ;;  %v4034_v19 = vadd.f32 %v4033_v22, %v3654_v18  ;;  %v7714_v7 = vadd.f32 %v7256_v48, %v6516_v39 }
 0x19c   : > { %v3655_v26 = vmul.f32 %v3042_v16, %v11570_v28  ;;  %v3656_v4 = vmul.f32 %v3042_v16, %v11571_v57  ;;  %v7718_v18 = vadd.f32 %v7266_v13, %v6516_v39  ;;  %v3657_v22 = vmul.f32 %v3047_v27, %v11111_v5  ;;  %v7724_v55 = vpop.f32.mrf.mxu0 }
 0x19d   : > { %11572 = vst [vmem:[#allocation175_spill] sm:$0xff] %v7714_v7  ;;  %v3057_v6 = vpop.permute.xlu1 %3056  ;;  %v3052_v57 = vpop.permute.xlu0 %3051  ;;  %v3658_v16 = vmul.f32 %v3047_v27, %v11110_v40  ;;  %v11114_v48 = vmax.f32 %v7690_v35, 0.0  ;;  %v11113_v56 = vmax.f32 %v7694_v41, 0.0  ;;  %v7730_v39 = vadd.f32 %v7278_v45, %v6514_v38  ;;  %v2946_v27 = vld [vmem:[%s10974_s3 + $0x258] sm:$0xff]  ;;  %v11598_v41 = vld [vmem:[#allocation2_spill] sm:$0xff] }
 0x19e   : > { %11573 = vst [vmem:[#allocation176_spill] sm:$0xff] %v7718_v18  ;;  %v3902_v28 = vadd.f32 %v3901_v58, %v3655_v26  ;;  %v4035_v53 = vadd.f32 %v4034_v19, %v3656_v4  ;;  %3366 = vperm.xlu1 %5641, %v2944_v25   ;;  %v7734_v13 = vadd.f32 %v7288_v42, %v6514_v38  ;;  %v7739_v58 = vpop.f32.mrf.mxu1  ;;  %v11576_v26 = vmax.f32 %v7674_v31, 0.0  ;;  %v7745_v5 = vpop.f32.mrf.mxu0  ;;  %v2945_v38 = vld [vmem:[%s10974_s3 + $0x250] sm:$0xff]  ;;  %v11601_v35 = vld [vmem:[#allocation114_spill] sm:$0xff] }
 0x19f   : > { %11574 = vst [vmem:[#allocation177_spill] sm:$0xff] %v7730_v39  ;;  %3361 = vperm.xlu0 %5640, %v2943_v34   ;;  %v11577_v40 = vmax.f32 %v7678_v62, 0.0 }
 0x1a0   : > { %11575 = vst [vmem:[#allocation178_spill] sm:$0xff] %v7734_v13  ;;  %v3903_v25 = vadd.f32 %v3902_v28, %v3657_v22  ;;  %v4036_v19 = vadd.f32 %v4035_v53, %v3658_v16  ;;  %v3659_v4 = vmul.f32 %v3052_v57, %v11576_v26  ;;  %v7754_v22 = vadd.f32 %v7294_v33, %v6538_v47  ;;  %v7764_v62 = vpop.f32.mrf.mxu0 }
 0x1a1   : > { %v3660_v45 = vmul.f32 %v3052_v57, %v11577_v40  ;;  %v7758_v53 = vadd.f32 %v7302_v30, %v6538_v47  ;;  %v3067_v16 = vpop.permute.xlu1 %3066  ;;  %v3062_v40 = vpop.permute.xlu0 %3061  ;;  %v3661_v57 = vmul.f32 %v3057_v6, %v11114_v48  ;;  %v3662_v28 = vmul.f32 %v3057_v6, %v11113_v56  ;;  %v2948_v6 = vld [vmem:[%s10974_s3 + $0x268] sm:$0xff] }
 0x1a2   : > { %11578 = vst [vmem:[#allocation179_spill] sm:$0xff] %v7754_v22  ;;  %v3904_v26 = vadd.f32 %v3903_v25, %v3659_v4  ;;  %3376 = vperm.xlu1 %5641, %v2946_v27   ;;  %v11118_v33 = vmax.f32 %v7730_v39, 0.0  ;;  %v11117_v34 = vmax.f32 %v7734_v13, 0.0  ;;  %v7770_v47 = vadd.f32 %v7308_v52, %v6536_v46  ;;  %v7779_v25 = vpop.f32.mrf.mxu1  ;;  %v7785_v48 = vpop.f32.mrf.mxu0 }
 0x1a3   : > { %11579 = vst [vmem:[#allocation180_spill] sm:$0xff] %v7758_v53  ;;  %v4037_v42 = vadd.f32 %v4036_v19, %v3660_v45  ;;  %v7774_v30 = vadd.f32 %v7316_v61, %v6536_v46  ;;  %3371 = vperm.xlu0 %5640, %v2945_v38   ;;  %v11582_v4 = vmax.f32 %v7714_v7, 0.0  ;;  %v11583_v56 = vmax.f32 %v7718_v18, 0.0  ;;  %v2947_v46 = vld [vmem:[%s10974_s3 + $0x260] sm:$0xff]  ;;  %v11591_v38 = vld [vmem:[#allocation3_spill] sm:$0xff] }
 0x1a4   : > { %11580 = vst [vmem:[#allocation181_spill] sm:$0xff] %v7770_v47  ;;  %v3905_v27 = vadd.f32 %v3904_v26, %v3661_v57  ;;  %v7794_v57 = vadd.f32 %v7322_v15, %v6548_v51  ;;  %v3666_v26 = vmul.f32 %v3067_v16, %v11117_v34  ;;  %v7804_v18 = vpop.f32.mrf.mxu0  ;;  %v11592_v15 = vld [vmem:[#allocation109_spill] sm:$0xff] }
 0x1a5   : > { %11581 = vst [vmem:[#allocation182_spill] sm:$0xff] %v7774_v30  ;;  %v4038_v19 = vadd.f32 %v4037_v42, %v3662_v28  ;;  %v3663_v45 = vmul.f32 %v3062_v40, %v11582_v4  ;;  %v3664_v52 = vmul.f32 %v3062_v40, %v11583_v56  ;;  %v7798_v42 = vadd.f32 %v7330_v36, %v6548_v51  ;;  %v3077_v28 = vpop.permute.xlu1 %3076  ;;  %v3072_v56 = vpop.permute.xlu0 %3071  ;;  %v11587_v36 = vld [vmem:[#allocation106_spill] sm:$0xff] }
 0x1a6   : > { %11584 = vst [vmem:[#allocation183_spill] sm:$0xff] %v7794_v57  ;;  %v3665_v40 = vmul.f32 %v3067_v16, %v11118_v33  ;;  %3386 = vperm.xlu1 %5641, %v2948_v6   ;;  %v7810_v51 = vadd.f32 %v7336_v29, %v6546_v50  ;;  %v7814_v39 = vadd.f32 %v11587_v36, %v6546_v50  ;;  %v2950_v16 = vld [vmem:[%s10974_s3 + $0x278] sm:$0xff]  ;;  %v11589_v6 = vmax.f32 %v7754_v22, 0.0  ;;  %v7825_v33 = vpop.f32.mrf.mxu0  ;;  %v2949_v50 = vld [vmem:[%s10974_s3 + $0x270] sm:$0xff] }
 0x1a7   : > { %11585 = vst [vmem:[#allocation184_spill] sm:$0xff] %v7798_v42  ;;  %v3906_v4 = vadd.f32 %v3905_v27, %v3663_v45  ;;  %v4039_v61 = vadd.f32 %v4038_v19, %v3664_v52  ;;  %3381 = vperm.xlu0 %5640, %v2947_v46   ;;  %v7819_v27 = vpop.f32.mrf.mxu1  ;;  %v11590_v45 = vmax.f32 %v7758_v53, 0.0  ;;  %v7834_v13 = vadd.f32 %v11592_v15, %v11591_v38  ;;  %v11605_v36 = vld [vmem:[#allocation5_spill] sm:$0xff] }
 0x1a8   : > { %11586 = vst [vmem:[#allocation185_spill] sm:$0xff] %v7810_v51  ;;  %11588 = vst [vmem:[#allocation106_spill] sm:$0xff] %v7814_v39  ;;  %v3667_v19 = vmul.f32 %v3072_v56, %v11589_v6  ;;  %v11594_v6 = vld [vmem:[#allocation110_spill] sm:$0xff]  ;;  %v7844_v7 = vpop.f32.mrf.mxu0  ;;  %v11606_v15 = vld [vmem:[#allocation117_spill] sm:$0xff] }
 0x1a9   : > { %v3668_v52 = vmul.f32 %v3072_v56, %v11590_v45  ;;  %v3907_v34 = vadd.f32 %v3906_v4, %v3665_v40  ;;  %v4040_v29 = vadd.f32 %v4039_v61, %v3666_v26  ;;  %11593 = vst [vmem:[#allocation3_spill] sm:$0xff] %v7834_v13  ;;  %v7838_v53 = vadd.f32 %v11594_v6, %v11591_v38  ;;  %v3087_v56 = vpop.permute.xlu1 %3086  ;;  %v3082_v61 = vpop.permute.xlu0 %3081  ;;  %v11599_v38 = vld [vmem:[#allocation113_spill] sm:$0xff] }
 0x1aa   : > { %v11596_v40 = vmax.f32 %v7770_v47, 0.0  ;;  %v11597_v4 = vmax.f32 %v7774_v30, 0.0  ;;  %3396 = vperm.xlu1 %5641, %v2950_v16   ;;  %v7850_v6 = vadd.f32 %v11599_v38, %v11598_v41  ;;  %v7854_v47 = vadd.f32 %v11601_v35, %v11598_v41  ;;  %v7865_v38 = vpop.f32.mrf.mxu0  ;;  %v2951_v35 = vld [vmem:[%s10974_s3 + $0x280] sm:$0xff] }
 0x1ab   : > { %11595 = vst [vmem:[#allocation109_spill] sm:$0xff] %v7838_v53  ;;  %v3908_v22 = vadd.f32 %v3907_v34, %v3667_v19  ;;  %v4041_v46 = vadd.f32 %v4040_v29, %v3668_v52  ;;  %3391 = vperm.xlu0 %5640, %v2949_v50   ;;  %v2952_v34 = vld [vmem:[%s10974_s3 + $0x288] sm:$0xff]  ;;  %v11603_v16 = vmax.f32 %v7794_v57, 0.0  ;;  %v11604_v52 = vmax.f32 %v7798_v42, 0.0 }
 0x1ac   : > { %v3669_v26 = vmul.f32 %v3077_v28, %v11596_v40  ;;  %v3670_v45 = vmul.f32 %v3077_v28, %v11597_v4  ;;  %11600 = vst [vmem:[#allocation110_spill] sm:$0xff] %v7850_v6  ;;  %11602 = vst [vmem:[#allocation2_spill] sm:$0xff] %v7854_v47  ;;  %v7859_v28 = vpop.f32.mrf.mxu1  ;;  %v7874_v30 = vadd.f32 %v11606_v15, %v11605_v36  ;;  %v7884_v31 = vpop.f32.mrf.mxu0  ;;  %v11619_v50 = vld [vmem:[#allocation7_spill] sm:$0xff]  ;;  %v11620_v15 = vld [vmem:[#allocation125_spill] sm:$0xff] }
 0x1ad   : > { %v3671_v19 = vmul.f32 %v3082_v61, %v11603_v16  ;;  %v3672_v29 = vmul.f32 %v3082_v61, %v11604_v52  ;;  %v11608_v16 = vld [vmem:[#allocation118_spill] sm:$0xff]  ;;  %v11610_v61 = vmax.f32 %v7810_v51, 0.0  ;;  %v7894_v51 = vadd.f32 %v11615_v59, %v11612_v1  ;;  %v2953_v59 = vld [vmem:[%s10974_s3 + $0x290] sm:$0xff] }
 0x1ae   : > { %v3909_v40 = vadd.f32 %v3908_v22, %v3669_v26  ;;  %v4042_v4 = vadd.f32 %v4041_v46, %v3670_v45  ;;  %11607 = vst [vmem:[#allocation113_spill] sm:$0xff] %v7874_v30  ;;  %v7878_v42 = vadd.f32 %v11608_v16, %v11605_v36  ;;  %v3097_v22 = vpop.permute.xlu1 %3096  ;;  %v3092_v46 = vpop.permute.xlu0 %3091  ;;  %v11611_v45 = vmax.f32 %v7814_v39, 0.0  ;;  %3406 = vperm.xlu1 %5641, %v2952_v34   ;;  %v11613_v36 = vld [vmem:[#allocation121_spill] sm:$0xff] }
 0x1af   : > { %v3673_v26 = vmul.f32 %v3087_v56, %v11610_v61  ;;  %v7890_v16 = vadd.f32 %v11613_v36, %v11612_v1  ;;  %11616 = vst [vmem:[#allocation117_spill] sm:$0xff] %v7894_v51  ;;  %3401 = vperm.xlu0 %5640, %v2951_v35   ;;  %v11617_v34 = vmax.f32 %v7834_v13, 0.0  ;;  %v7905_v36 = vpop.f32.mrf.mxu0  ;;  %v7914_v39 = vadd.f32 %v11620_v15, %v11619_v50  ;;  %v11634_v35 = vld [vmem:[#allocation9_spill] sm:$0xff] }
 0x1b0   : > { %11609 = vst [vmem:[#allocation114_spill] sm:$0xff] %v7878_v42  ;;  %v3674_v52 = vmul.f32 %v3087_v56, %v11611_v45  ;;  %v3910_v57 = vadd.f32 %v3909_v40, %v3671_v19  ;;  %v4043_v41 = vadd.f32 %v4042_v4, %v3672_v29  ;;  %v2954_v56 = vld [vmem:[%s10974_s3 + $0x298] sm:$0xff]  ;;  %v7899_v19 = vpop.f32.mrf.mxu1  ;;  %v11618_v40 = vmax.f32 %v7838_v53, 0.0 }
 0x1b1   : > { %11614 = vst [vmem:[#allocation5_spill] sm:$0xff] %v7890_v16  ;;  %v3675_v29 = vmul.f32 %v3092_v46, %v11617_v34  ;;  %11621 = vst [vmem:[#allocation118_spill] sm:$0xff] %v7914_v39  ;;  %v11622_v34 = vld [vmem:[#allocation126_spill] sm:$0xff]  ;;  %v7924_v11 = vpop.f32.mrf.mxu0  ;;  %v11635_v15 = vld [vmem:[#allocation133_spill] sm:$0xff] }
 0x1b2   : > { %v3676_v4 = vmul.f32 %v3092_v46, %v11618_v40  ;;  %v3911_v61 = vadd.f32 %v3910_v57, %v3673_v26  ;;  %v4044_v45 = vadd.f32 %v4043_v41, %v3674_v52  ;;  %v7918_v53 = vadd.f32 %v11622_v34, %v11619_v50  ;;  %v3107_v57 = vpop.permute.xlu1 %3106  ;;  %v3102_v41 = vpop.permute.xlu0 %3101  ;;  %3416 = vperm.xlu1 %5641, %v2954_v56   ;;  %v11627_v50 = vld [vmem:[#allocation129_spill] sm:$0xff] }
 0x1b3   : > { %v11624_v46 = vmax.f32 %v7850_v6, 0.0  ;;  %v11625_v52 = vmax.f32 %v7854_v47, 0.0  ;;  %v7930_v34 = vadd.f32 %v11627_v50, %v11626_v44  ;;  %v7934_v6 = vadd.f32 %v11629_v24, %v11626_v44  ;;  %3411 = vperm.xlu0 %5640, %v2953_v59   ;;  %v7945_v50 = vpop.f32.mrf.mxu0  ;;  %v2955_v24 = vld [vmem:[%s10974_s3 + $0x2a0] sm:$0xff]  ;;  %v11649_v59 = vld [vmem:[#allocation11_spill] sm:$0xff] }
 0x1b4   : > { %11623 = vst [vmem:[#allocation4_spill] sm:$0xff] %v7918_v53  ;;  %v3912_v13 = vadd.f32 %v3911_v61, %v3675_v29  ;;  %v4045_v1 = vadd.f32 %v4044_v45, %v3676_v4  ;;  %v7939_v29 = vpop.f32.mrf.mxu1  ;;  %v11632_v56 = vmax.f32 %v7874_v30, 0.0  ;;  %v11633_v61 = vmax.f32 %v7878_v42, 0.0 }
 0x1b5   : > { %v3677_v26 = vmul.f32 %v3097_v22, %v11624_v46  ;;  %v3678_v40 = vmul.f32 %v3097_v22, %v11625_v52  ;;  %11628 = vst [vmem:[#allocation121_spill] sm:$0xff] %v7930_v34  ;;  %11630 = vst [vmem:[#allocation122_spill] sm:$0xff] %v7934_v6  ;;  %v2956_v22 = vld [vmem:[%s10974_s3 + $0x2a8] sm:$0xff]  ;;  %v7954_v47 = vadd.f32 %v11635_v15, %v11634_v35  ;;  %v7964_v17 = vpop.f32.mrf.mxu0  ;;  %v11650_v15 = vld [vmem:[#allocation141_spill] sm:$0xff] }
 0x1b6   : > { %11631 = vst [vmem:[#allocation7_spill] sm:$0xff] %v7939_v29  ;;  %v3679_v4 = vmul.f32 %v3102_v41, %v11632_v56  ;;  %v3680_v45 = vmul.f32 %v3102_v41, %v11633_v61  ;;  %v11637_v56 = vld [vmem:[#allocation134_spill] sm:$0xff]  ;;  %v11639_v41 = vmax.f32 %v7890_v16, 0.0  ;;  %3426 = vperm.xlu1 %5641, %v2956_v22   ;;  %v7974_v16 = vadd.f32 %v11644_v63, %v11641_v32  ;;  %v2957_v63 = vld [vmem:[%s10974_s3 + $0x2b0] sm:$0xff] }
 0x1b7   : > { %v3913_v46 = vadd.f32 %v3912_v13, %v3677_v26  ;;  %v4046_v52 = vadd.f32 %v4045_v1, %v3678_v40  ;;  %11636 = vst [vmem:[#allocation125_spill] sm:$0xff] %v7954_v47  ;;  %v7958_v42 = vadd.f32 %v11637_v56, %v11634_v35  ;;  %v3117_v13 = vpop.permute.xlu1 %3116  ;;  %v3112_v1 = vpop.permute.xlu0 %3111  ;;  %v11640_v40 = vmax.f32 %v7894_v51, 0.0  ;;  %v11642_v35 = vld [vmem:[#allocation137_spill] sm:$0xff]  ;;  %3421 = vperm.xlu0 %5640, %v2955_v24   ;;  %v11671_v29 = vld [vmem:[#allocation12_spill] sm:$0xff] }
 0x1b8   : > { %v3681_v26 = vmul.f32 %v3107_v57, %v11639_v41  ;;  %v7970_v56 = vadd.f32 %v11642_v35, %v11641_v32  ;;  %11645 = vst [vmem:[#allocation129_spill] sm:$0xff] %v7974_v16  ;;  %v11647_v22 = vmax.f32 %v7914_v39, 0.0  ;;  %v7985_v35 = vpop.f32.mrf.mxu0  ;;  %v7994_v51 = vadd.f32 %v11650_v15, %v11649_v59  ;;  %v11664_v24 = vld [vmem:[#allocation13_spill] sm:$0xff] }
 0x1b9   : > { %11638 = vst [vmem:[#allocation126_spill] sm:$0xff] %v7958_v42  ;;  %v3682_v61 = vmul.f32 %v3107_v57, %v11640_v40  ;;  %v3914_v30 = vadd.f32 %v3913_v46, %v3679_v4  ;;  %v4047_v44 = vadd.f32 %v4046_v52, %v3680_v45  ;;  %v2958_v57 = vld [vmem:[%s10974_s3 + $0x2b8] sm:$0xff]  ;;  %v7979_v4 = vpop.f32.mrf.mxu1  ;;  %v11648_v46 = vmax.f32 %v7918_v53, 0.0 }
 0x1ba   : > { %11643 = vst [vmem:[#allocation6_spill] sm:$0xff] %v7970_v56  ;;  %11646 = vst [vmem:[#allocation130_spill] sm:$0xff] %v7979_v4  ;;  %v3683_v45 = vmul.f32 %v3112_v1, %v11647_v22  ;;  %v11652_v22 = vld [vmem:[#allocation142_spill] sm:$0xff]  ;;  %v8004_v9 = vpop.f32.mrf.mxu0  ;;  %3436 = vperm.xlu1 %5641, %v2958_v57   ;;  %v11662_v57 = vmax.f32 %v7954_v47, 0.0  ;;  %v11665_v15 = vld [vmem:[#allocation153_spill] sm:$0xff] }
 0x1bb   : > { %v3684_v52 = vmul.f32 %v3112_v1, %v11648_v46  ;;  %v3915_v41 = vadd.f32 %v3914_v30, %v3681_v26  ;;  %v4048_v40 = vadd.f32 %v4047_v44, %v3682_v61  ;;  %11651 = vst [vmem:[#allocation9_spill] sm:$0xff] %v7994_v51  ;;  %v7998_v53 = vadd.f32 %v11652_v22, %v11649_v59  ;;  %v3127_v30 = vpop.permute.xlu1 %3126  ;;  %v3122_v44 = vpop.permute.xlu0 %3121  ;;  %v11657_v59 = vld [vmem:[#allocation145_spill] sm:$0xff]  ;;  %v11659_v4 = vld [vmem:[#allocation150_spill] sm:$0xff] }
 0x1bc   : > { %v11654_v1 = vmax.f32 %v7930_v34, 0.0  ;;  %v11655_v61 = vmax.f32 %v7934_v6, 0.0  ;;  %v8010_v22 = vadd.f32 %v11657_v59, %v11656_v20  ;;  %v8014_v34 = vadd.f32 %v11659_v4, %v11656_v20  ;;  %3431 = vperm.xlu0 %5640, %v2957_v63   ;;  %v8025_v59 = vpop.f32.mrf.mxu0  ;;  %v2959_v20 = vld [vmem:[%s10974_s3 + $0x2c0] sm:$0xff]  ;;  %v11676_v63 = vld [vmem:[#allocation15_spill] sm:$0xff] }
 0x1bd   : > { %11653 = vst [vmem:[#allocation133_spill] sm:$0xff] %v7998_v53  ;;  %v3916_v39 = vadd.f32 %v3915_v41, %v3683_v45  ;;  %v4049_v32 = vadd.f32 %v4048_v40, %v3684_v52  ;;  %v8019_v45 = vpop.f32.mrf.mxu1  ;;  %v3687_v52 = vmul.f32 %v3122_v44, %v11662_v57  ;;  %v11663_v41 = vmax.f32 %v7958_v42, 0.0  ;;  %v11667_v57 = vld [vmem:[#allocation156_spill] sm:$0xff] }
 0x1be   : > { %v3685_v26 = vmul.f32 %v3117_v13, %v11654_v1  ;;  %v3686_v46 = vmul.f32 %v3117_v13, %v11655_v61  ;;  %11658 = vst [vmem:[#allocation134_spill] sm:$0xff] %v8010_v22  ;;  %11660 = vst [vmem:[#allocation8_spill] sm:$0xff] %v8014_v34  ;;  %v2960_v13 = vld [vmem:[%s10974_s3 + $0x2c8] sm:$0xff]  ;;  %v8034_v6 = vadd.f32 %v11665_v15, %v11664_v24 }
 0x1bf   : > { %11661 = vst [vmem:[#allocation137_spill] sm:$0xff] %v8019_v45  ;;  %v3688_v40 = vmul.f32 %v3122_v44, %v11663_v41  ;;  %v8038_v42 = vadd.f32 %v11667_v57, %v11664_v24  ;;  %v11669_v44 = vmax.f32 %v7970_v56, 0.0  ;;  %v8044_v45 = vpop.f32.mrf.mxu0  ;;  %3446 = vperm.xlu1 %5641, %v2960_v13   ;;  %v8050_v24 = vadd.f32 %v7544_v60, %v11671_v29  ;;  %v11859_v56 = vld [vmem:[#allocation50_spill] sm:$0xff] }
 0x1c0   : > { %v3917_v1 = vadd.f32 %v3916_v39, %v3685_v26  ;;  %v4050_v61 = vadd.f32 %v4049_v32, %v3686_v46  ;;  %11666 = vst [vmem:[#allocation138_spill] sm:$0xff] %v8034_v6  ;;  %v3137_v39 = vpop.permute.xlu1 %3136  ;;  %v3132_v32 = vpop.permute.xlu0 %3131  ;;  %v11670_v46 = vmax.f32 %v7974_v16, 0.0  ;;  %v8054_v57 = vadd.f32 %v7551_v37, %v11671_v29  ;;  %3441 = vperm.xlu0 %5640, %v2959_v20   ;;  %v2961_v37 = vld [vmem:[%s10974_s3 + $0x2d0] sm:$0xff]  ;;  %v11681_v16 = vld [vmem:[#allocation14_spill] sm:$0xff]  ;;  %v11686_v20 = vld [vmem:[#allocation17_spill] sm:$0xff] }
 0x1c1   : > { %11668 = vst [vmem:[#allocation11_spill] sm:$0xff] %v8038_v42  ;;  %v3689_v26 = vmul.f32 %v3127_v30, %v11669_v44  ;;  %11672 = vst [vmem:[#allocation141_spill] sm:$0xff] %v8050_v24  ;;  %v11674_v13 = vmax.f32 %v7994_v51, 0.0  ;;  %v8074_v15 = vadd.f32 %v7570_v49, %v11676_v63  ;;  %v8114_v49 = vadd.f32 %v7644_v0, %v11686_v20 }
 0x1c2   : > { %v3690_v41 = vmul.f32 %v3127_v30, %v11670_v46  ;;  %v3918_v47 = vadd.f32 %v3917_v1, %v3687_v52  ;;  %v4051_v4 = vadd.f32 %v4050_v61, %v3688_v40  ;;  %11673 = vst [vmem:[#allocation142_spill] sm:$0xff] %v8054_v57  ;;  %v2962_v30 = vld [vmem:[%s10974_s3 + $0x2d8] sm:$0xff]  ;;  %v8059_v52 = vpop.f32.mrf.mxu1  ;;  %v11675_v1 = vmax.f32 %v7998_v53, 0.0  ;;  %v8065_v46 = vpop.f32.mrf.mxu0 }
 0x1c3   : > { %v3691_v40 = vmul.f32 %v3132_v32, %v11674_v13  ;;  %11677 = vst [vmem:[#allocation10_spill] sm:$0xff] %v8074_v15  ;;  %v8078_v13 = vadd.f32 %v7589_v12, %v11676_v63  ;;  %3456 = vperm.xlu1 %5641, %v2962_v30   ;;  %v8090_v12 = vadd.f32 %v7604_v54, %v11681_v16  ;;  %v11684_v30 = vmax.f32 %v8034_v6, 0.0 }
 0x1c4   : > { %v3692_v61 = vmul.f32 %v3132_v32, %v11675_v1  ;;  %v3919_v44 = vadd.f32 %v3918_v47, %v3689_v26  ;;  %v4052_v60 = vadd.f32 %v4051_v4, %v3690_v41  ;;  %v3147_v47 = vpop.permute.xlu1 %3146  ;;  %v3142_v4 = vpop.permute.xlu0 %3141  ;;  %v11679_v32 = vmax.f32 %v8010_v22, 0.0  ;;  %3451 = vperm.xlu0 %5640, %v2961_v37   ;;  %11687 = vst [vmem:[#allocation153_spill] sm:$0xff] %v8114_v49  ;;  %v11696_v37 = vld [vmem:[#allocation19_spill] sm:$0xff] }
 0x1c5   : > { %11678 = vst [vmem:[#allocation145_spill] sm:$0xff] %v8078_v13  ;;  %v11680_v41 = vmax.f32 %v8014_v34, 0.0  ;;  %v8084_v51 = vpop.f32.mrf.mxu0  ;;  %11682 = vst [vmem:[#allocation150_spill] sm:$0xff] %v8090_v12  ;;  %v8094_v63 = vadd.f32 %v7633_v10, %v11681_v16  ;;  %v2963_v10 = vld [vmem:[%s10974_s3 + $0x2e0] sm:$0xff]  ;;  %v11691_v34 = vld [vmem:[#allocation16_spill] sm:$0xff]  ;;  %v8154_v0 = vadd.f32 %v7724_v55, %v11696_v37 }
 0x1c6   : > { %v3693_v26 = vmul.f32 %v3137_v39, %v11679_v32  ;;  %v3920_v53 = vadd.f32 %v3919_v44, %v3691_v40  ;;  %v4053_v29 = vadd.f32 %v4052_v60, %v3692_v61  ;;  %v8099_v40 = vpop.f32.mrf.mxu1  ;;  %v3695_v61 = vmul.f32 %v3142_v4, %v11684_v30 }
 0x1c7   : > { %v3694_v1 = vmul.f32 %v3137_v39, %v11680_v41  ;;  %11683 = vst [vmem:[#allocation13_spill] sm:$0xff] %v8094_v63  ;;  %v2964_v39 = vld [vmem:[%s10974_s3 + $0x2e8] sm:$0xff]  ;;  %v11685_v44 = vmax.f32 %v8038_v42, 0.0  ;;  %v8105_v41 = vpop.f32.mrf.mxu0  ;;  %v8118_v30 = vadd.f32 %v7665_v8, %v11686_v20  ;;  %v8130_v8 = vadd.f32 %v7684_v21, %v11691_v34  ;;  %11697 = vst [vmem:[#allocation14_spill] sm:$0xff] %v8154_v0 }
 0x1c8   : > { %v3921_v32 = vadd.f32 %v3920_v53, %v3693_v26  ;;  %v3157_v53 = vpop.permute.xlu1 %3156  ;;  %3466 = vperm.xlu1 %5641, %v2964_v39   ;;  %v8134_v20 = vadd.f32 %v7705_v2, %v11691_v34  ;;  %3461 = vperm.xlu0 %5640, %v2963_v10   ;;  %v11694_v39 = vmax.f32 %v8074_v15, 0.0  ;;  %v2965_v2 = vld [vmem:[%s10974_s3 + $0x2f0] sm:$0xff]  ;;  %v11706_v10 = vld [vmem:[#allocation21_spill] sm:$0xff] }
 0x1c9   : > { %v3696_v60 = vmul.f32 %v3142_v4, %v11685_v44  ;;  %v4054_v54 = vadd.f32 %v4053_v29, %v3694_v1  ;;  %11688 = vst [vmem:[#allocation156_spill] sm:$0xff] %v8118_v30  ;;  %v3152_v29 = vpop.permute.xlu0 %3151  ;;  %v11689_v4 = vmax.f32 %v8050_v24, 0.0  ;;  %v11690_v1 = vmax.f32 %v8054_v57, 0.0  ;;  %v8124_v6 = vpop.f32.mrf.mxu0  ;;  %11692 = vst [vmem:[#allocation12_spill] sm:$0xff] %v8130_v8  ;;  %v11701_v57 = vld [vmem:[#allocation18_spill] sm:$0xff] }
 0x1ca   : > { %v3922_v42 = vadd.f32 %v3921_v32, %v3695_v61  ;;  %11693 = vst [vmem:[#allocation15_spill] sm:$0xff] %v8134_v20  ;;  %v8139_v61 = vpop.f32.mrf.mxu1  ;;  %v11695_v32 = vmax.f32 %v8078_v13, 0.0  ;;  %v8194_v55 = vadd.f32 %v7804_v18, %v11706_v10 }
 0x1cb   : > { %v3697_v26 = vmul.f32 %v3147_v47, %v11689_v4  ;;  %v3698_v44 = vmul.f32 %v3147_v47, %v11690_v1  ;;  %v4055_v16 = vadd.f32 %v4054_v54, %v3696_v60  ;;  %v2966_v47 = vld [vmem:[%s10974_s3 + $0x2f8] sm:$0xff]  ;;  %v3699_v60 = vmul.f32 %v3152_v29, %v11694_v39  ;;  %v8145_v1 = vpop.f32.mrf.mxu0 }
 0x1cc   : > { %v3700_v54 = vmul.f32 %v3152_v29, %v11695_v32  ;;  %v8158_v39 = vadd.f32 %v7745_v5, %v11696_v37  ;;  %v11699_v29 = vmax.f32 %v8090_v12, 0.0  ;;  %3476 = vperm.xlu1 %5641, %v2966_v47   ;;  %v8170_v5 = vadd.f32 %v7764_v62, %v11701_v57  ;;  %3471 = vperm.xlu0 %5640, %v2965_v2   ;;  %v11716_v2 = vld [vmem:[#allocation23_spill] sm:$0xff] }
 0x1cd   : > { %v3923_v4 = vadd.f32 %v3922_v42, %v3697_v26  ;;  %v4056_v21 = vadd.f32 %v4055_v16, %v3698_v44  ;;  %v3167_v42 = vpop.permute.xlu1 %3166  ;;  %v3162_v16 = vpop.permute.xlu0 %3161  ;;  %v11700_v44 = vmax.f32 %v8094_v63, 0.0  ;;  %v8174_v37 = vadd.f32 %v7785_v48, %v11701_v57  ;;  %v2967_v48 = vld [vmem:[%s10974_s3 + $0x300] sm:$0xff]  ;;  %11707 = vst [vmem:[#allocation18_spill] sm:$0xff] %v8194_v55  ;;  %v11711_v63 = vld [vmem:[#allocation20_spill] sm:$0xff] }
 0x1ce   : > { %11698 = vst [vmem:[#allocation17_spill] sm:$0xff] %v8158_v39  ;;  %v3701_v26 = vmul.f32 %v3157_v53, %v11699_v29  ;;  %v8164_v15 = vpop.f32.mrf.mxu0  ;;  %11702 = vst [vmem:[#allocation16_spill] sm:$0xff] %v8170_v5  ;;  %v11704_v47 = vmax.f32 %v8114_v49, 0.0  ;;  %v8234_v18 = vadd.f32 %v7884_v31, %v11716_v2 }
 0x1cf   : > { %v3702_v32 = vmul.f32 %v3157_v53, %v11700_v44  ;;  %v3924_v13 = vadd.f32 %v3923_v4, %v3699_v60  ;;  %v4057_v34 = vadd.f32 %v4056_v21, %v3700_v54  ;;  %11703 = vst [vmem:[#allocation19_spill] sm:$0xff] %v8174_v37  ;;  %v2968_v53 = vld [vmem:[%s10974_s3 + $0x308] sm:$0xff]  ;;  %v8179_v60 = vpop.f32.mrf.mxu1  ;;  %v11705_v4 = vmax.f32 %v8118_v30, 0.0 }
 0x1d0   : > { %v3703_v54 = vmul.f32 %v3162_v16, %v11704_v47  ;;  %v8185_v44 = vpop.f32.mrf.mxu0  ;;  %v8198_v47 = vadd.f32 %v7825_v33, %v11706_v10  ;;  %3486 = vperm.xlu1 %5641, %v2968_v53   ;;  %v8210_v33 = vadd.f32 %v7844_v7, %v11711_v63  ;;  %v8214_v10 = vadd.f32 %v7865_v38, %v11711_v63  ;;  %v2969_v38 = vld [vmem:[%s10974_s3 + $0x310] sm:$0xff] }
 0x1d1   : > { %v3704_v21 = vmul.f32 %v3162_v16, %v11705_v4  ;;  %v3925_v29 = vadd.f32 %v3924_v13, %v3701_v26  ;;  %v4058_v62 = vadd.f32 %v4057_v34, %v3702_v32  ;;  %v3177_v13 = vpop.permute.xlu1 %3176  ;;  %v3172_v34 = vpop.permute.xlu0 %3171  ;;  %v11709_v16 = vmax.f32 %v8130_v8, 0.0  ;;  %3481 = vperm.xlu0 %5640, %v2967_v48   ;;  %11717 = vst [vmem:[#allocation23_spill] sm:$0xff] %v8234_v18  ;;  %v11726_v48 = vld [vmem:[#allocation25_spill] sm:$0xff] }
 0x1d2   : > { %11708 = vst [vmem:[#allocation21_spill] sm:$0xff] %v8198_v47  ;;  %v11710_v32 = vmax.f32 %v8134_v20, 0.0  ;;  %v8204_v49 = vpop.f32.mrf.mxu0  ;;  %11712 = vst [vmem:[#allocation20_spill] sm:$0xff] %v8210_v33  ;;  %v11714_v53 = vmax.f32 %v8154_v0, 0.0  ;;  %v11721_v20 = vld [vmem:[#allocation22_spill] sm:$0xff]  ;;  %v8274_v31 = vadd.f32 %v7964_v17, %v11726_v48 }
 0x1d3   : > { %v3705_v26 = vmul.f32 %v3167_v42, %v11709_v16  ;;  %v3926_v30 = vadd.f32 %v3925_v29, %v3703_v54  ;;  %v4059_v57 = vadd.f32 %v4058_v62, %v3704_v21  ;;  %11713 = vst [vmem:[#allocation186_spill] sm:$0xff] %v8214_v10  ;;  %v8219_v54 = vpop.f32.mrf.mxu1  ;;  %v11715_v29 = vmax.f32 %v8158_v39, 0.0 }
 0x1d4   : > { %v3706_v4 = vmul.f32 %v3167_v42, %v11710_v32  ;;  %v2970_v42 = vld [vmem:[%s10974_s3 + $0x318] sm:$0xff]  ;;  %v3707_v21 = vmul.f32 %v3172_v34, %v11714_v53  ;;  %v8225_v32 = vpop.f32.mrf.mxu0  ;;  %v8238_v53 = vadd.f32 %v7905_v36, %v11716_v2  ;;  %v8250_v36 = vadd.f32 %v7924_v11, %v11721_v20  ;;  %11727 = vst [vmem:[#allocation25_spill] sm:$0xff] %v8274_v31 }
 0x1d5   : > { %v3708_v62 = vmul.f32 %v3172_v34, %v11715_v29  ;;  %v3927_v16 = vadd.f32 %v3926_v30, %v3705_v26  ;;  %v3187_v30 = vpop.permute.xlu1 %3186  ;;  %v11719_v34 = vmax.f32 %v8170_v5, 0.0  ;;  %3496 = vperm.xlu1 %5641, %v2970_v42   ;;  %v8254_v2 = vadd.f32 %v7945_v50, %v11721_v20  ;;  %3491 = vperm.xlu0 %5640, %v2969_v38   ;;  %v2971_v50 = vld [vmem:[%s10974_s3 + $0x320] sm:$0xff]  ;;  %v11736_v38 = vld [vmem:[#allocation27_spill] sm:$0xff] }
 0x1d6   : > { %v4060_v7 = vadd.f32 %v4059_v57, %v3706_v4  ;;  %11718 = vst [vmem:[#allocation187_spill] sm:$0xff] %v8238_v53  ;;  %v3182_v57 = vpop.permute.xlu0 %3181  ;;  %v11720_v4 = vmax.f32 %v8174_v37, 0.0  ;;  %v8244_v0 = vpop.f32.mrf.mxu0  ;;  %11722 = vst [vmem:[#allocation22_spill] sm:$0xff] %v8250_v36  ;;  %v11724_v42 = vmax.f32 %v8194_v55, 0.0  ;;  %v11731_v37 = vld [vmem:[#allocation24_spill] sm:$0xff]  ;;  %v8314_v17 = vadd.f32 %v8044_v45, %v11736_v38 }
 0x1d7   : > { %v3709_v26 = vmul.f32 %v3177_v13, %v11719_v34  ;;  %v3928_v39 = vadd.f32 %v3927_v16, %v3707_v21  ;;  %11723 = vst [vmem:[#allocation188_spill] sm:$0xff] %v8254_v2  ;;  %v8259_v21 = vpop.f32.mrf.mxu1  ;;  %v11725_v16 = vmax.f32 %v8198_v47, 0.0 }
 0x1d8   : > { %v3710_v29 = vmul.f32 %v3177_v13, %v11720_v4  ;;  %v4061_v63 = vadd.f32 %v4060_v7, %v3708_v62  ;;  %v2972_v13 = vld [vmem:[%s10974_s3 + $0x328] sm:$0xff]  ;;  %v3711_v62 = vmul.f32 %v3182_v57, %v11724_v42  ;;  %v8265_v4 = vpop.f32.mrf.mxu0  ;;  %v8278_v42 = vadd.f32 %v7985_v35, %v11726_v48  ;;  %11737 = vst [vmem:[#allocation27_spill] sm:$0xff] %v8314_v17 }
 0x1d9   : > { %v3712_v7 = vmul.f32 %v3182_v57, %v11725_v16  ;;  %v3929_v34 = vadd.f32 %v3928_v39, %v3709_v26  ;;  %v3197_v39 = vpop.permute.xlu1 %3196  ;;  %v11729_v57 = vmax.f32 %v8210_v33, 0.0  ;;  %3506 = vperm.xlu1 %5641, %v2972_v13   ;;  %v8290_v35 = vadd.f32 %v8004_v9, %v11731_v37  ;;  %3501 = vperm.xlu0 %5640, %v2971_v50   ;;  %v11746_v50 = vld [vmem:[#allocation29_spill] sm:$0xff]  ;;  %v11807_v33 = vld [vmem:[#allocation43_spill] sm:$0xff] }
 0x1da   : > { %v4062_v11 = vadd.f32 %v4061_v63, %v3710_v29  ;;  %11728 = vst [vmem:[#allocation189_spill] sm:$0xff] %v8278_v42  ;;  %v3192_v63 = vpop.permute.xlu0 %3191  ;;  %v11730_v29 = vmax.f32 %v8214_v10, 0.0  ;;  %v8284_v55 = vpop.f32.mrf.mxu0  ;;  %v8294_v48 = vadd.f32 %v8025_v59, %v11731_v37  ;;  %v11734_v13 = vmax.f32 %v8234_v18, 0.0  ;;  %v2973_v59 = vld [vmem:[%s10974_s3 + $0x330] sm:$0xff]  ;;  %v11741_v10 = vld [vmem:[#allocation26_spill] sm:$0xff] }
 0x1db   : > { %v3713_v26 = vmul.f32 %v3187_v30, %v11729_v57  ;;  %v3930_v47 = vadd.f32 %v3929_v34, %v3711_v62  ;;  %11732 = vst [vmem:[#allocation24_spill] sm:$0xff] %v8290_v35  ;;  %v8299_v62 = vpop.f32.mrf.mxu1  ;;  %v11735_v34 = vmax.f32 %v8238_v53, 0.0  ;;  %v8354_v45 = vadd.f32 %v8124_v6, %v11746_v50 }
 0x1dc   : > { %v3714_v16 = vmul.f32 %v3187_v30, %v11730_v29  ;;  %v4063_v20 = vadd.f32 %v4062_v11, %v3712_v7  ;;  %11733 = vst [vmem:[#allocation190_spill] sm:$0xff] %v8294_v48  ;;  %v2974_v30 = vld [vmem:[%s10974_s3 + $0x338] sm:$0xff]  ;;  %v3715_v7 = vmul.f32 %v3192_v63, %v11734_v13  ;;  %v8305_v29 = vpop.f32.mrf.mxu0  ;;  %v8318_v13 = vadd.f32 %v8065_v46, %v11736_v38 }
 0x1dd   : > { %v3716_v11 = vmul.f32 %v3192_v63, %v11735_v34  ;;  %v3931_v57 = vadd.f32 %v3930_v47, %v3713_v26  ;;  %v3207_v47 = vpop.permute.xlu1 %3206  ;;  %v11739_v63 = vmax.f32 %v8250_v36, 0.0  ;;  %3516 = vperm.xlu1 %5641, %v2974_v30   ;;  %v8330_v46 = vadd.f32 %v8084_v51, %v11741_v10  ;;  %3511 = vperm.xlu0 %5640, %v2973_v59   ;;  %v11756_v59 = vld [vmem:[#allocation31_spill] sm:$0xff] }
 0x1de   : > { %v4064_v9 = vadd.f32 %v4063_v20, %v3714_v16  ;;  %11738 = vst [vmem:[#allocation191_spill] sm:$0xff] %v8318_v13  ;;  %v3202_v20 = vpop.permute.xlu0 %3201  ;;  %v11740_v16 = vmax.f32 %v8254_v2, 0.0  ;;  %v8324_v18 = vpop.f32.mrf.mxu0  ;;  %v8334_v38 = vadd.f32 %v8105_v41, %v11741_v10  ;;  %v11744_v30 = vmax.f32 %v8274_v31, 0.0  ;;  %v2975_v41 = vld [vmem:[%s10974_s3 + $0x340] sm:$0xff]  ;;  %11747 = vst [vmem:[#allocation29_spill] sm:$0xff] %v8354_v45  ;;  %v11751_v2 = vld [vmem:[#allocation28_spill] sm:$0xff] }
 0x1df   : > { %v3717_v26 = vmul.f32 %v3197_v39, %v11739_v63  ;;  %v3932_v53 = vadd.f32 %v3931_v57, %v3715_v7  ;;  %11742 = vst [vmem:[#allocation26_spill] sm:$0xff] %v8330_v46  ;;  %v8339_v7 = vpop.f32.mrf.mxu1  ;;  %v11745_v57 = vmax.f32 %v8278_v42, 0.0  ;;  %v8394_v6 = vadd.f32 %v8204_v49, %v11756_v59 }
 0x1e0   : > { %v3718_v34 = vmul.f32 %v3197_v39, %v11740_v16  ;;  %v4065_v37 = vadd.f32 %v4064_v9, %v3716_v11  ;;  %11743 = vst [vmem:[#allocation192_spill] sm:$0xff] %v8334_v38  ;;  %v2976_v39 = vld [vmem:[%s10974_s3 + $0x348] sm:$0xff]  ;;  %v3719_v11 = vmul.f32 %v3202_v20, %v11744_v30  ;;  %v8345_v16 = vpop.f32.mrf.mxu0  ;;  %v8358_v30 = vadd.f32 %v8145_v1, %v11746_v50 }
 0x1e1   : > { %v3720_v9 = vmul.f32 %v3202_v20, %v11745_v57  ;;  %v3933_v63 = vadd.f32 %v3932_v53, %v3717_v26  ;;  %v3217_v53 = vpop.permute.xlu1 %3216  ;;  %v11749_v20 = vmax.f32 %v8290_v35, 0.0  ;;  %3526 = vperm.xlu1 %5641, %v2976_v39   ;;  %v8370_v1 = vadd.f32 %v8164_v15, %v11751_v2  ;;  %3521 = vperm.xlu0 %5640, %v2975_v41   ;;  %v11766_v41 = vld [vmem:[#allocation33_spill] sm:$0xff] }
 0x1e2   : > { %v4066_v51 = vadd.f32 %v4065_v37, %v3718_v34  ;;  %11748 = vst [vmem:[#allocation193_spill] sm:$0xff] %v8358_v30  ;;  %v3212_v37 = vpop.permute.xlu0 %3211  ;;  %v11750_v34 = vmax.f32 %v8294_v48, 0.0  ;;  %v8364_v31 = vpop.f32.mrf.mxu0  ;;  %v8374_v50 = vadd.f32 %v8185_v44, %v11751_v2  ;;  %v11754_v39 = vmax.f32 %v8314_v17, 0.0  ;;  %v2977_v44 = vld [vmem:[%s10974_s3 + $0x350] sm:$0xff]  ;;  %11757 = vst [vmem:[#allocation31_spill] sm:$0xff] %v8394_v6  ;;  %v11761_v48 = vld [vmem:[#allocation30_spill] sm:$0xff] }
 0x1e3   : > { %v3721_v26 = vmul.f32 %v3207_v47, %v11749_v20  ;;  %v3934_v42 = vadd.f32 %v3933_v63, %v3719_v11  ;;  %11752 = vst [vmem:[#allocation28_spill] sm:$0xff] %v8370_v1  ;;  %v8379_v11 = vpop.f32.mrf.mxu1  ;;  %v11755_v63 = vmax.f32 %v8318_v13, 0.0  ;;  %v8434_v49 = vadd.f32 %v8284_v55, %v11766_v41 }
 0x1e4   : > { %v3722_v57 = vmul.f32 %v3207_v47, %v11750_v34  ;;  %v4067_v10 = vadd.f32 %v4066_v51, %v3720_v9  ;;  %11753 = vst [vmem:[#allocation194_spill] sm:$0xff] %v8374_v50  ;;  %v2978_v47 = vld [vmem:[%s10974_s3 + $0x358] sm:$0xff]  ;;  %v3723_v9 = vmul.f32 %v3212_v37, %v11754_v39  ;;  %v8385_v34 = vpop.f32.mrf.mxu0  ;;  %v8398_v39 = vadd.f32 %v8225_v32, %v11756_v59 }
 0x1e5   : > { %v3724_v51 = vmul.f32 %v3212_v37, %v11755_v63  ;;  %v3935_v20 = vadd.f32 %v3934_v42, %v3721_v26  ;;  %v3227_v42 = vpop.permute.xlu1 %3226  ;;  %v11759_v37 = vmax.f32 %v8330_v46, 0.0  ;;  %3536 = vperm.xlu1 %5641, %v2978_v47   ;;  %v8410_v32 = vadd.f32 %v8244_v0, %v11761_v48  ;;  %3531 = vperm.xlu0 %5640, %v2977_v44  }
 0x1e6   : > { %v4068_v15 = vadd.f32 %v4067_v10, %v3722_v57  ;;  %11758 = vst [vmem:[#allocation195_spill] sm:$0xff] %v8398_v39  ;;  %v3222_v10 = vpop.permute.xlu0 %3221  ;;  %v11760_v57 = vmax.f32 %v8334_v38, 0.0  ;;  %v8404_v17 = vpop.f32.mrf.mxu0  ;;  %v8414_v59 = vadd.f32 %v8265_v4, %v11761_v48  ;;  %v11764_v47 = vmax.f32 %v8354_v45, 0.0  ;;  %v2979_v4 = vld [vmem:[%s10974_s3 + $0x360] sm:$0xff]  ;;  %11767 = vst [vmem:[#allocation33_spill] sm:$0xff] %v8434_v49  ;;  %v11771_v38 = vld [vmem:[#allocation32_spill] sm:$0xff] }
 0x1e7   : > { %v3725_v26 = vmul.f32 %v3217_v53, %v11759_v37  ;;  %v3936_v13 = vadd.f32 %v3935_v20, %v3723_v9  ;;  %11762 = vst [vmem:[#allocation30_spill] sm:$0xff] %v8410_v32  ;;  %v8419_v9 = vpop.f32.mrf.mxu1  ;;  %v11765_v20 = vmax.f32 %v8358_v30, 0.0  ;;  %v8466_v44 = vadd.f32 %v8345_v16, %v11771_v38 }
 0x1e8   : > { %v3726_v63 = vmul.f32 %v3217_v53, %v11760_v57  ;;  %v4069_v2 = vadd.f32 %v4068_v15, %v3724_v51  ;;  %11763 = vst [vmem:[#allocation196_spill] sm:$0xff] %v8414_v59  ;;  %v2980_v53 = vld [vmem:[%s10974_s3 + $0x368] sm:$0xff]  ;;  %v3727_v51 = vmul.f32 %v3222_v10, %v11764_v47  ;;  %v8425_v57 = vpop.f32.mrf.mxu0  ;;  %v8438_v47 = vadd.f32 %v8305_v29, %v11766_v41  ;;  %v2982_v41 = vld [vmem:[%s10974_s3 + $0x378] sm:$0xff] }
 0x1e9   : > { %v3728_v15 = vmul.f32 %v3222_v10, %v11765_v20  ;;  %v3937_v37 = vadd.f32 %v3936_v13, %v3725_v26  ;;  %v3237_v13 = vpop.permute.xlu1 %3236  ;;  %v11769_v10 = vmax.f32 %v8370_v1, 0.0  ;;  %3546 = vperm.xlu1 %5641, %v2980_v53   ;;  %v8448_v29 = vadd.f32 %v8324_v18, %v11771_v38  ;;  %3541 = vperm.xlu0 %5640, %v2979_v4   ;;  %v2981_v18 = vld [vmem:[%s10974_s3 + $0x370] sm:$0xff] }
 0x1ea   : > { %v4070_v0 = vadd.f32 %v4069_v2, %v3726_v63  ;;  %11768 = vst [vmem:[#allocation197_spill] sm:$0xff] %v8438_v47  ;;  %v3232_v2 = vpop.permute.xlu0 %3231  ;;  %v11770_v63 = vmax.f32 %v8374_v50, 0.0  ;;  %v2236_v45 = vpop.f32.mrf.mxu0  ;;  %v11774_v53 = vmax.f32 %v8398_v39, 0.0  ;;  %11775 = vst [vmem:[#allocation198_spill] sm:$0xff] %v8466_v44 }
 0x1eb   : > { %v3729_v26 = vmul.f32 %v3227_v42, %v11769_v10  ;;  %v3938_v30 = vadd.f32 %v3937_v37, %v3727_v51  ;;  %11772 = vst [vmem:[#allocation32_spill] sm:$0xff] %v8448_v29  ;;  %v8453_v10 = vpop.f32.mrf.mxu1 }
 0x1ec   : > { %v3730_v20 = vmul.f32 %v3227_v42, %v11770_v63  ;;  %v4071_v48 = vadd.f32 %v4070_v0, %v3728_v15  ;;  %v11773_v42 = vmax.f32 %v8394_v6, 0.0  ;;  %v3732_v15 = vmul.f32 %v3232_v2, %v11774_v53  ;;  %v2238_v63 = vpop.f32.mrf.mxu0  ;;  %v11776_v6 = vld [vmem:[#allocation35_spill] sm:$0xff] }
 0x1ed   : > { %v3939_v37 = vadd.f32 %v3938_v30, %v3729_v26  ;;  %3556 = vperm.xlu1 %5641, %v2982_v41   ;;  %v8479_v38 = vadd.f32 %v8385_v34, %v11776_v6  ;;  %3551 = vperm.xlu0 %5640, %v2981_v18   ;;  %v8484_v16 = vpop.f32.mrf.mxu1  ;;  %v11193_v34 = vmax.f32 %v8466_v44, 0.0 }
 0x1ee   : > { %v3731_v51 = vmul.f32 %v3232_v2, %v11773_v42  ;;  %v4072_v0 = vadd.f32 %v4071_v48, %v3730_v20  ;;  %v8470_v42 = vadd.f32 %v8364_v31, %v11776_v6  ;;  %v3247_v2 = vpop.permute.xlu1 %3246  ;;  %v3242_v30 = vpop.permute.xlu0 %3241  ;;  %v11778_v48 = vmax.f32 %v8410_v32, 0.0  ;;  %v2984_v31 = vld [vmem:[%s10974_s3 + $0x388] sm:$0xff]  ;;  %v2983_v6 = vld [vmem:[%s10974_s3 + $0x380] sm:$0xff] }
 0x1ef   : > { %v11779_v20 = vmax.f32 %v8414_v59, 0.0  ;;  %v2240_v50 = vpop.f32.mrf.mxu0  ;;  %11780 = vst [vmem:[#allocation199_spill] sm:$0xff] %v8479_v38  ;;  %v11783_v59 = vmax.f32 %v8448_v29, 0.0 }
 0x1f0   : > { %11777 = vst [vmem:[#allocation35_spill] sm:$0xff] %v8470_v42  ;;  %v3733_v26 = vmul.f32 %v3237_v13, %v11778_v48  ;;  %v3940_v39 = vadd.f32 %v3939_v37, %v3731_v51  ;;  %v4073_v4 = vadd.f32 %v4072_v0, %v3732_v15  ;;  %v11781_v48 = vmax.f32 %v8434_v49, 0.0 }
 0x1f1   : > { %v3734_v53 = vmul.f32 %v3237_v13, %v11779_v20  ;;  %v11782_v51 = vmax.f32 %v8438_v47, 0.0  ;;  %v2242_v0 = vpop.f32.mrf.mxu0  ;;  %v11195_v55 = vmax.f32 %v8470_v42, 0.0  ;;  %v3737_v49 = vmul.f32 %v3247_v2, %v11783_v59  ;;  %3566 = vperm.xlu1 %5641, %v2984_v31   ;;  %3561 = vperm.xlu0 %5640, %v2983_v6  }
 0x1f2   : > { %v3735_v13 = vmul.f32 %v3242_v30, %v11781_v48  ;;  %v3941_v41 = vadd.f32 %v3940_v39, %v3733_v26  ;;  %v3257_v18 = vpop.permute.xlu1 %3256  ;;  %v3252_v20 = vpop.permute.xlu0 %3251  ;;  %v11197_v39 = vmax.f32 %v8479_v38, 0.0  ;;  %v3738_v26 = vmul.f32 %v3247_v2, %v11193_v34  ;;  %v11787_v2 = vld [vmem:[#allocation37_spill] sm:$0xff] }
 0x1f3   : > { %v3736_v15 = vmul.f32 %v3242_v30, %v11782_v51  ;;  %v4074_v37 = vadd.f32 %v4073_v4, %v3734_v53  ;;  %v2246_v47 = vpop.f32.mrf.mxu0  ;;  %v11784_v4 = vld [vmem:[#allocation34_spill] sm:$0xff]  ;;  %v2986_v53 = vld [vmem:[%s10974_s3 + $0x398] sm:$0xff]  ;;  %v8507_v51 = vpop.f32.mrf.mxu1  ;;  %v3739_v59 = vmul.f32 %v3252_v20, %v11195_v55 }
 0x1f4   : > { %v3942_v48 = vadd.f32 %v3941_v41, %v3735_v13  ;;  %v8500_v30 = vadd.f32 %v8404_v17, %v11784_v4  ;;  %v2985_v17 = vld [vmem:[%s10974_s3 + $0x390] sm:$0xff]  ;;  %v8519_v41 = vadd.f32 %v2236_v45, %v11787_v2  ;;  %v2988_v45 = vld [vmem:[%s10974_s3 + $0x3a8] sm:$0xff] }
 0x1f5   : > { %v4075_v32 = vadd.f32 %v4074_v37, %v3736_v15  ;;  %v2248_v13 = vpop.f32.mrf.mxu0  ;;  %v8516_v15 = vadd.f32 %v8425_v57, %v11784_v4  ;;  %v3740_v37 = vmul.f32 %v3252_v20, %v11197_v39  ;;  %3576 = vperm.xlu1 %5641, %v2986_v53   ;;  %3571 = vperm.xlu0 %5640, %v2985_v17   ;;  %v8530_v57 = vpop.f32.mrf.mxu1  ;;  %v11790_v17 = vld [vmem:[#allocation36_spill] sm:$0xff] }
 0x1f6   : > { %11785 = vst [vmem:[#allocation34_spill] sm:$0xff] %v8500_v30  ;;  %v3943_v31 = vadd.f32 %v3942_v48, %v3737_v49  ;;  %11788 = vst [vmem:[#allocation37_spill] sm:$0xff] %v8519_v41  ;;  %v3267_v34 = vpop.permute.xlu1 %3266  ;;  %v3262_v42 = vpop.permute.xlu0 %3261  ;;  %v11202_v49 = vmax.f32 %v8500_v30, 0.0  ;;  %v8525_v48 = vadd.f32 %v2238_v63, %v11787_v2  ;;  %v8542_v2 = vadd.f32 %v2240_v50, %v11790_v17 }
 0x1f7   : > { %11786 = vst [vmem:[#allocation200_spill] sm:$0xff] %v8516_v15  ;;  %v4076_v6 = vadd.f32 %v4075_v32, %v3738_v26  ;;  %v2250_v55 = vpop.f32.mrf.mxu0  ;;  %v2987_v32 = vld [vmem:[%s10974_s3 + $0x3a0] sm:$0xff]  ;;  %v11203_v20 = vmax.f32 %v8516_v15, 0.0  ;;  %v11204_v26 = vmax.f32 %v8519_v41, 0.0  ;;  %v8555_v50 = vadd.f32 %v2242_v0, %v11790_v17 }
 0x1f8   : > { %11789 = vst [vmem:[#allocation201_spill] sm:$0xff] %v8525_v48  ;;  %v3944_v44 = vadd.f32 %v3943_v31, %v3739_v59  ;;  %v3741_v63 = vmul.f32 %v3257_v18, %v11202_v49  ;;  %11791 = vst [vmem:[#allocation36_spill] sm:$0xff] %v8542_v2  ;;  %v11208_v38 = vmax.f32 %v8525_v48, 0.0  ;;  %v2989_v49 = vld [vmem:[%s10974_s3 + $0x3b0] sm:$0xff]  ;;  %v11209_v41 = vmax.f32 %v8542_v2, 0.0 }
 0x1f9   : > { %v2252_v4 = vpop.f32.mrf.mxu0  ;;  %v4077_v53 = vadd.f32 %v4076_v6, %v3740_v37  ;;  %3586 = vperm.xlu1 %5641, %v2988_v45   ;;  %v3742_v29 = vmul.f32 %v3257_v18, %v11203_v20  ;;  %v3743_v1 = vmul.f32 %v3262_v42, %v11204_v26  ;;  %3581 = vperm.xlu0 %5640, %v2987_v32   ;;  %v2990_v37 = vld [vmem:[%s10974_s3 + $0x3b8] sm:$0xff]  ;;  %v8552_v6 = vpop.f32.mrf.mxu1  ;;  %v11793_v18 = vld [vmem:[#allocation39_spill] sm:$0xff]  ;;  %v11799_v2 = vmax.f32 %v8555_v50, 0.0 }
 0x1fa   : > { %v8539_v59 = vpop.permute.xlu1 %3276  ;;  %v3272_v31 = vpop.permute.xlu0 %3271  ;;  %v3945_v46 = vadd.f32 %v3944_v44, %v3741_v63  ;;  %11792 = vst [vmem:[#allocation202_spill] sm:$0xff] %v8555_v50  ;;  %v8561_v20 = vadd.f32 %v2246_v47, %v11793_v18  ;;  %v3744_v44 = vmul.f32 %v3262_v42, %v11208_v38  ;;  %v8571_v0 = vadd.f32 %v2248_v13, %v11793_v18  ;;  %v2992_v47 = vld [vmem:[%s10974_s3 + $0x3c8] sm:$0xff]  ;;  %v2991_v13 = vld [vmem:[%s10974_s3 + $0x3c0] sm:$0xff] }
 0x1fb   : > { %v2256_v39 = vpop.f32.mrf.mxu0  ;;  %v4078_v32 = vadd.f32 %v4077_v53, %v3742_v29  ;;  %v8576_v48 = vpop.f32.mrf.mxu1  ;;  %v3745_v42 = vmul.f32 %v3267_v34, %v11209_v41  ;;  %v3746_v30 = vmul.f32 %v3267_v34, %v11799_v2  ;;  %v11812_v50 = vld [vmem:[#allocation42_spill] sm:$0xff] }
 0x1fc   : > { %11794 = vst [vmem:[#allocation39_spill] sm:$0xff] %v8561_v20  ;;  %11795 = vst [vmem:[#allocation203_spill] sm:$0xff] %v8571_v0  ;;  %v3946_v15 = vadd.f32 %v3945_v46, %v3743_v1  ;;  %v11796_v1 = vld [vmem:[#allocation38_spill] sm:$0xff]  ;;  %v11803_v34 = vmax.f32 %v8571_v0, 0.0 }
 0x1fd   : > { %v2258_v45 = vpop.f32.mrf.mxu0  ;;  %3596 = vperm.xlu1 %5641, %v2990_v37   ;;  %3591 = vperm.xlu0 %5640, %v2989_v49   ;;  %v11214_v37 = vmax.f32 %v8561_v20, 0.0  ;;  %v4079_v46 = vadd.f32 %v4078_v32, %v3744_v44  ;;  %v8586_v49 = vadd.f32 %v2250_v55, %v11796_v1  ;;  %v8589_v18 = vadd.f32 %v2252_v4, %v11796_v1  ;;  %v11800_v55 = vld [vmem:[#allocation41_spill] sm:$0xff]  ;;  %v8609_v41 = vpop.f32.mrf.mxu1 }
 0x1fe   : > { %v8565_v63 = vpop.permute.xlu1 %3286  ;;  %v8567_v26 = vpop.permute.xlu0 %3281  ;;  %v3947_v32 = vadd.f32 %v3946_v15, %v3745_v42  ;;  %v8601_v36 = vadd.f32 %v2256_v39, %v11800_v55  ;;  %v8604_v4 = vadd.f32 %v2258_v45, %v11800_v55  ;;  %v2994_v1 = vld [vmem:[%s10974_s3 + $0x3d8] sm:$0xff]  ;;  %v3748_v2 = vmul.f32 %v3272_v31, %v11803_v34  ;;  %v2993_v15 = vld [vmem:[%s10974_s3 + $0x3d0] sm:$0xff] }
 0x1ff   : > { %v2260_v17 = vpop.f32.mrf.mxu0  ;;  %11797 = vst [vmem:[#allocation38_spill] sm:$0xff] %v8586_v49  ;;  %11798 = vst [vmem:[#allocation204_spill] sm:$0xff] %v8589_v18  ;;  %v3747_v44 = vmul.f32 %v3272_v31, %v11214_v37  ;;  %v4080_v42 = vadd.f32 %v4079_v46, %v3746_v30  ;;  %v2996_v30 = vld [vmem:[%s10974_s3 + $0x3e8] sm:$0xff]  ;;  %v2995_v46 = vld [vmem:[%s10974_s3 + $0x3e0] sm:$0xff] }
 0x200   : > { %11801 = vst [vmem:[#allocation41_spill] sm:$0xff] %v8601_v36  ;;  %11802 = vst [vmem:[#allocation205_spill] sm:$0xff] %v8604_v4 }
 0x201   : > { %v2262_v53 = vpop.f32.mrf.mxu0  ;;  %3606 = vperm.xlu1 %5641, %v2992_v47   ;;  %3601 = vperm.xlu0 %5640, %v2991_v13   ;;  %v11804_v13 = vld [vmem:[#allocation40_spill] sm:$0xff]  ;;  %v3948_v34 = vadd.f32 %v3947_v32, %v3747_v44  ;;  %v8642_v44 = vpop.f32.mrf.mxu1  ;;  %v11810_v32 = vmax.f32 %v8586_v49, 0.0 }
 0x202   : > { %v8591_v38 = vpop.permute.xlu1 %3296  ;;  %v8593_v29 = vpop.permute.xlu0 %3291  ;;  %v8619_v55 = vadd.f32 %v2260_v17, %v11804_v13  ;;  %v8626_v0 = vadd.f32 %v2262_v53, %v11804_v13  ;;  %v4081_v13 = vadd.f32 %v4080_v42, %v3748_v2  ;;  %v11816_v2 = vmax.f32 %v8604_v4, 0.0 }
 0x203   : > { %v2266_v35 = vpop.f32.mrf.mxu0  ;;  %v8679_v4 = vpop.f32.mrf.mxu1 }
 0x204   : > { %11805 = vst [vmem:[#allocation40_spill] sm:$0xff] %v8619_v55  ;;  %11806 = vst [vmem:[#allocation206_spill] sm:$0xff] %v8626_v0  ;;  %v8631_v45 = vadd.f32 %v2266_v35, %v11807_v33  ;;  %v3749_v35 = vmul.f32 %v8539_v59, %v11810_v32  ;;  %v3752_v42 = vmul.f32 %v8567_v26, %v11816_v2 }
 0x205   : > { %v2268_v47 = vpop.f32.mrf.mxu0  ;;  %3616 = vperm.xlu1 %5641, %v2994_v1   ;;  %3611 = vperm.xlu0 %5640, %v2993_v15   ;;  %v11811_v1 = vmax.f32 %v8589_v18, 0.0  ;;  %v11815_v18 = vmax.f32 %v8601_v36, 0.0  ;;  %v11824_v36 = vld [vmem:[#allocation44_spill] sm:$0xff] }
 0x206   : > { %v8621_v37 = vpop.permute.xlu1 %3306  ;;  %v8623_v20 = vpop.permute.xlu0 %3301  ;;  %11808 = vst [vmem:[#allocation43_spill] sm:$0xff] %v8631_v45  ;;  %v8637_v17 = vadd.f32 %v2268_v47, %v11807_v33 }
 0x207   : > { %v2270_v31 = vpop.f32.mrf.mxu0  ;;  %v3750_v15 = vmul.f32 %v8539_v59, %v11811_v1  ;;  %v3751_v59 = vmul.f32 %v8567_v26, %v11815_v18  ;;  %v3949_v1 = vadd.f32 %v3948_v34, %v3749_v35  ;;  %v2997_v18 = vld [vmem:[%s10974_s3 + $0x3f0] sm:$0xff]  ;;  %v11819_v34 = vmax.f32 %v8619_v55, 0.0 }
 0x208   : > { %11809 = vst [vmem:[#allocation207_spill] sm:$0xff] %v8637_v17  ;;  %v8655_v5 = vadd.f32 %v2270_v31, %v11812_v50 }
 0x209   : > { %v2272_v53 = vpop.f32.mrf.mxu0  ;;  %3626 = vperm.xlu1 %5641, %v2996_v30   ;;  %3621 = vperm.xlu0 %5640, %v2995_v46   ;;  %v4082_v26 = vadd.f32 %v4081_v13, %v3750_v15  ;;  %v3753_v46 = vmul.f32 %v8565_v63, %v11819_v34  ;;  %v3950_v13 = vadd.f32 %v3949_v1, %v3751_v59  ;;  %v11822_v34 = vmax.f32 %v8631_v45, 0.0  ;;  %v11852_v45 = vld [vmem:[#allocation51_spill] sm:$0xff] }
 0x20a   : > { %v8651_v33 = vpop.permute.xlu1 %3316  ;;  %11813 = vst [vmem:[#allocation42_spill] sm:$0xff] %v8655_v5  ;;  %v8658_v8 = vadd.f32 %v2272_v53, %v11812_v50  ;;  %v8660_v49 = vpop.permute.xlu0 %3311  ;;  %v2998_v50 = vld [vmem:[%s10974_s3 + $0x3f8] sm:$0xff] }
 0x20b   : > { %v2276_v32 = vpop.f32.mrf.mxu0  ;;  %v11817_v53 = vld [vmem:[#allocation45_spill] sm:$0xff]  ;;  %v4083_v55 = vadd.f32 %v4082_v26, %v3752_v42  ;;  %v3951_v59 = vadd.f32 %v3950_v13, %v3753_v46  ;;  %v11827_v26 = vmax.f32 %v8655_v5, 0.0 }
 0x20c   : > { %11814 = vst [vmem:[#allocation208_spill] sm:$0xff] %v8658_v8  ;;  %v8674_v30 = vadd.f32 %v2276_v32, %v11817_v53  ;;  %v11821_v32 = vmax.f32 %v8626_v0, 0.0 }
 0x20d   : > { %v2278_v39 = vpop.f32.mrf.mxu0  ;;  %3636 = vperm.xlu1 %5641, %v2998_v50   ;;  %3631 = vperm.xlu0 %5640, %v2997_v18   ;;  %v8707_v50 = vpop.f32.mrf.mxu1 }
 0x20e   : > { %11818 = vst [vmem:[#allocation45_spill] sm:$0xff] %v8674_v30  ;;  %v8685_v35 = vadd.f32 %v2278_v39, %v11817_v53  ;;  %v8687_v2 = vpop.permute.xlu1 %3326  ;;  %v3754_v31 = vmul.f32 %v8565_v63, %v11821_v32  ;;  %v8694_v12 = vpop.permute.xlu0 %3321  ;;  %v3755_v39 = vmul.f32 %v8593_v29, %v11822_v34  ;;  %v11823_v53 = vmax.f32 %v8637_v17, 0.0 }
 0x20f   : > { %v2280_v15 = vpop.f32.mrf.mxu0  ;;  %v11828_v34 = vmax.f32 %v8658_v8, 0.0  ;;  %v6007_v63 = vmov 1   ;;  %v11829_v13 = vmax.f32 %v8674_v30, 0.0 }
 0x210   : > { %11820 = vst [vmem:[#allocation209_spill] sm:$0xff] %v8685_v35  ;;  %v3756_v0 = vmul.f32 %v8593_v29, %v11823_v53  ;;  %v8705_v47 = vadd.f32 %v2280_v15, %v11824_v36  ;;  %v4084_v18 = vadd.f32 %v4083_v55, %v3754_v31  ;;  %v3757_v29 = vmul.f32 %v8591_v38, %v11827_v26  ;;  %v5854_v55 = vld [vmem:[%s10974_s3 + $0x8] sm:$0xff] }
 0x211   : > { %v2282_v24 = vpop.f32.mrf.mxu0  ;;  %v3758_v53 = vmul.f32 %v8591_v38, %v11828_v34  ;;  %5643 = vset.pattern.permute.xlu1 %v6007_v63  ;;  %v3952_v46 = vadd.f32 %v3951_v59, %v3755_v39  ;;  %5642 = vset.pattern.permute.xlu0 %v6007_v63  ;;  %v3759_v38 = vmul.f32 %v8623_v20, %v11829_v13  ;;  %v11830_v26 = vmax.f32 %v8685_v35, 0.0  ;;  %v11831_v39 = vld [vmem:[#allocation47_spill] sm:$0xff]  ;;  %v5855_v63 = vld [vmem:[%s10974_s3] sm:$0xff] }
 0x212   : > { %11825 = vst [vmem:[#allocation44_spill] sm:$0xff] %v8705_v47  ;;  %v8710_v42 = vadd.f32 %v2282_v24, %v11824_v36  ;;  %v8712_v1 = vpop.permute.xlu1 %3336  ;;  %v8720_v15 = vpop.permute.xlu0 %3331  ;;  %4166 = vperm.xlu1 %5643, %v5854_v55   ;;  %v4085_v31 = vadd.f32 %v4084_v18, %v3756_v0  ;;  %4162 = vperm.xlu0 %5642, %v5855_v63   ;;  %v11834_v35 = vmax.f32 %v8705_v47, 0.0 }
 0x213   : > { %v2286_v32 = vpop.f32.mrf.mxu0  ;;  %v3760_v34 = vmul.f32 %v8623_v20, %v11830_v26  ;;  %v8739_v24 = vpop.f32.mrf.mxu1  ;;  %v3953_v55 = vadd.f32 %v3952_v46, %v3757_v29  ;;  %v5856_v29 = vld [vmem:[%s10974_s3 + $0x10] sm:$0xff] }
 0x214   : > { %11826 = vst [vmem:[#allocation210_spill] sm:$0xff] %v8710_v42  ;;  %v8734_v59 = vadd.f32 %v2286_v32, %v11831_v39  ;;  %v4086_v13 = vadd.f32 %v4085_v31, %v3758_v53  ;;  %v3761_v30 = vmul.f32 %v8621_v37, %v11834_v35  ;;  %v11835_v63 = vmax.f32 %v8710_v42, 0.0  ;;  %v11836_v53 = vld [vmem:[#allocation49_spill] sm:$0xff]  ;;  %v11837_v46 = vld [vmem:[#allocation56_spill] sm:$0xff] }
 0x215   : > { %v2288_v36 = vpop.f32.mrf.mxu0  ;;  %v8761_v31 = vadd.f32 %v11837_v46, %v11836_v53  ;;  %v3954_v35 = vadd.f32 %v3953_v55, %v3759_v38  ;;  %v11847_v55 = vld [vmem:[#allocation48_spill] sm:$0xff] }
 0x216   : > { %11832 = vst [vmem:[#allocation47_spill] sm:$0xff] %v8734_v59  ;;  %v8742_v0 = vadd.f32 %v2288_v36, %v11831_v39  ;;  %v8744_v18 = vpop.permute.xlu1 %3346  ;;  %v8747_v26 = vpop.permute.xlu0 %3341  ;;  %v3762_v8 = vmul.f32 %v8621_v37, %v11835_v63  ;;  %4170 = vperm.xlu1 %5643, %v5856_v29   ;;  %v11839_v39 = vld [vmem:[#allocation57_spill] sm:$0xff]  ;;  %v4087_v47 = vadd.f32 %v4086_v13, %v3760_v34  ;;  %v11842_v29 = vmax.f32 %v8734_v59, 0.0  ;;  %v11848_v13 = vld [vmem:[#allocation60_spill] sm:$0xff] }
 0x217   : > { %v2290_v32 = vpop.f32.mrf.mxu0  ;;  %11838 = vst [vmem:[#allocation49_spill] sm:$0xff] %v8761_v31  ;;  %v8765_v20 = vadd.f32 %v11839_v39, %v11836_v53  ;;  %v5857_v37 = vld [vmem:[%s10974_s3 + $0x18] sm:$0xff]  ;;  %v8770_v36 = vpop.f32.mrf.mxu1  ;;  %v11844_v53 = vld [vmem:[#allocation46_spill] sm:$0xff] }
 0x218   : > { %11833 = vst [vmem:[#allocation211_spill] sm:$0xff] %v8742_v0  ;;  %4174 = vperm.xlu0 %5642, %v5857_v37   ;;  %11841 = vst [vmem:[#allocation57_spill] sm:$0xff] %v8770_v36  ;;  %v3763_v42 = vmul.f32 %v8660_v49, %v11842_v29  ;;  %v11843_v46 = vmax.f32 %v8742_v0, 0.0  ;;  %v8779_v39 = vadd.f32 %v2290_v32, %v11844_v53  ;;  %v11850_v59 = vld [vmem:[#allocation61_spill] sm:$0xff] }
 0x219   : > { %11840 = vst [vmem:[#allocation56_spill] sm:$0xff] %v8765_v20  ;;  %v2292_v63 = vpop.f32.mrf.mxu0  ;;  %v8788_v37 = vadd.f32 %v11848_v13, %v11847_v55  ;;  %v8792_v17 = vadd.f32 %v11850_v59, %v11847_v55  ;;  %v3955_v0 = vadd.f32 %v3954_v35, %v3761_v30  ;;  %v11853_v59 = vld [vmem:[#allocation64_spill] sm:$0xff]  ;;  %v11855_v30 = vld [vmem:[#allocation67_spill] sm:$0xff]  ;;  %v8814_v35 = vpop.f32.mrf.mxu1 }
 0x21a   : > { %v3764_v5 = vmul.f32 %v8660_v49, %v11843_v46  ;;  %11845 = vst [vmem:[#allocation46_spill] sm:$0xff] %v8779_v39  ;;  %v8782_v38 = vadd.f32 %v2292_v63, %v11844_v53  ;;  %v8784_v34 = vpop.permute.xlu1 %3356  ;;  %v8794_v29 = vpop.permute.xlu0 %3351  ;;  %v4088_v49 = vadd.f32 %v4087_v47, %v3762_v8  ;;  %v11241_v32 = vmax.f32 %v8779_v39, 0.0  ;;  %v5858_v63 = vld [vmem:[%s10974_s3 + $0x20] sm:$0xff]  ;;  %v5859_v47 = vld [vmem:[%s10974_s3 + $0x28] sm:$0xff]  ;;  %11857 = vst [vmem:[#allocation64_spill] sm:$0xff] %v8814_v35 }
 0x21b   : > { %11849 = vst [vmem:[#allocation48_spill] sm:$0xff] %v8788_v37  ;;  %11851 = vst [vmem:[#allocation60_spill] sm:$0xff] %v8792_v17  ;;  %4178 = vperm.xlu1 %5643, %v5858_v63   ;;  %v8805_v55 = vadd.f32 %v11853_v59, %v11852_v45  ;;  %v8809_v8 = vadd.f32 %v11855_v30, %v11852_v45  ;;  %v3956_v63 = vadd.f32 %v3955_v0, %v3763_v42  ;;  %v11866_v39 = vld [vmem:[#allocation76_spill] sm:$0xff] }
 0x21c   : > { %11846 = vst [vmem:[#allocation212_spill] sm:$0xff] %v8782_v38  ;;  %4182 = vperm.xlu0 %5642, %v5859_v47   ;;  %v4089_v46 = vadd.f32 %v4088_v49, %v3764_v5  ;;  %v3765_v13 = vmul.f32 %v8651_v33, %v11241_v32  ;;  %v11858_v59 = vmax.f32 %v8782_v38, 0.0  ;;  %v11860_v47 = vld [vmem:[#allocation70_spill] sm:$0xff]  ;;  %v11862_v5 = vld [vmem:[#allocation73_spill] sm:$0xff]  ;;  %v11863_v49 = vmax.f32 %v8761_v31, 0.0 }
 0x21d   : > { %11854 = vst [vmem:[#allocation61_spill] sm:$0xff] %v8805_v55  ;;  %11856 = vst [vmem:[#allocation51_spill] sm:$0xff] %v8809_v8  ;;  %v8828_v36 = vadd.f32 %v11860_v47, %v11859_v56  ;;  %v8832_v42 = vadd.f32 %v11862_v5, %v11859_v56  ;;  %v5860_v47 = vld [vmem:[%s10974_s3 + $0x30] sm:$0xff]  ;;  %v11865_v38 = vld [vmem:[#allocation53_spill] sm:$0xff] }
 0x21e   : > { %v3766_v53 = vmul.f32 %v8651_v33, %v11858_v59  ;;  %v8822_v22 = vpop.permute.xlu1 %3366  ;;  %v8834_v0 = vpop.permute.xlu0 %3361  ;;  %v3767_v33 = vmul.f32 %v8694_v12, %v11863_v49  ;;  %v11864_v59 = vmax.f32 %v8765_v20, 0.0  ;;  %v3957_v45 = vadd.f32 %v3956_v63, %v3765_v13  ;;  %v11867_v49 = vld [vmem:[#allocation79_spill] sm:$0xff]  ;;  %v11871_v56 = vld [vmem:[#allocation52_spill] sm:$0xff] }
 0x21f   : > { %11861 = vst [vmem:[#allocation67_spill] sm:$0xff] %v8828_v36  ;;  %4186 = vperm.xlu1 %5643, %v5860_v47   ;;  %v8849_v31 = vadd.f32 %v11866_v39, %v11865_v38  ;;  %v8853_v20 = vadd.f32 %v11867_v49, %v11865_v38  ;;  %v11870_v63 = vmax.f32 %v8792_v17, 0.0  ;;  %v11877_v49 = vld [vmem:[#allocation55_spill] sm:$0xff]  ;;  %v11878_v38 = vld [vmem:[#allocation88_spill] sm:$0xff] }
 0x220   : > { %v3768_v32 = vmul.f32 %v8694_v12, %v11864_v59  ;;  %v4090_v30 = vadd.f32 %v4089_v46, %v3766_v53  ;;  %v5861_v12 = vld [vmem:[%s10974_s3 + $0x38] sm:$0xff]  ;;  %v8858_v46 = vpop.f32.mrf.mxu1  ;;  %v11869_v53 = vmax.f32 %v8788_v37, 0.0  ;;  %v3958_v59 = vadd.f32 %v3957_v45, %v3767_v33 }
 0x221   : > { %4190 = vperm.xlu0 %5642, %v5861_v12   ;;  %11868 = vst [vmem:[#allocation50_spill] sm:$0xff] %v8858_v46  ;;  %v3770_v39 = vmul.f32 %v8687_v2, %v11870_v63  ;;  %v11872_v12 = vld [vmem:[#allocation82_spill] sm:$0xff]  ;;  %v11874_v37 = vld [vmem:[#allocation85_spill] sm:$0xff]  ;;  %v11876_v45 = vmax.f32 %v8809_v8, 0.0 }
 0x222   : > { %v3769_v13 = vmul.f32 %v8687_v2, %v11869_v53  ;;  %v4091_v47 = vadd.f32 %v4090_v30, %v3768_v32  ;;  %v8866_v5 = vpop.permute.xlu1 %3376  ;;  %v8872_v35 = vadd.f32 %v11872_v12, %v11871_v56  ;;  %v8876_v46 = vadd.f32 %v11874_v37, %v11871_v56  ;;  %v8878_v53 = vpop.permute.xlu0 %3371  ;;  %v5862_v12 = vld [vmem:[%s10974_s3 + $0x40] sm:$0xff] }
 0x223   : > { %v11875_v2 = vmax.f32 %v8805_v55, 0.0  ;;  %v3772_v30 = vmul.f32 %v8720_v15, %v11876_v45  ;;  %4194 = vperm.xlu1 %5643, %v5862_v12   ;;  %v8893_v55 = vadd.f32 %v11878_v38, %v11877_v49  ;;  %v11883_v37 = vld [vmem:[#allocation54_spill] sm:$0xff] }
 0x224   : > { %11873 = vst [vmem:[#allocation70_spill] sm:$0xff] %v8872_v35  ;;  %v3959_v33 = vadd.f32 %v3958_v59, %v3769_v13  ;;  %v4092_v63 = vadd.f32 %v4091_v47, %v3770_v39  ;;  %v8902_v13 = vpop.f32.mrf.mxu1  ;;  %v11881_v39 = vmax.f32 %v8828_v36, 0.0  ;;  %v11882_v47 = vmax.f32 %v8832_v42, 0.0  ;;  %v11886_v36 = vld [vmem:[#allocation97_spill] sm:$0xff] }
 0x225   : > { %v3771_v32 = vmul.f32 %v8720_v15, %v11875_v2  ;;  %v11879_v2 = vld [vmem:[#allocation91_spill] sm:$0xff]  ;;  %11880 = vst [vmem:[#allocation73_spill] sm:$0xff] %v8902_v13  ;;  %v8920_v13 = vadd.f32 %v11886_v36, %v11883_v37  ;;  %v11895_v36 = vld [vmem:[#allocation58_spill] sm:$0xff] }
 0x226   : > { %v8897_v8 = vadd.f32 %v11879_v2, %v11877_v49  ;;  %v5863_v15 = vld [vmem:[%s10974_s3 + $0x48] sm:$0xff]  ;;  %v3773_v59 = vmul.f32 %v8712_v1, %v11881_v39  ;;  %v3774_v38 = vmul.f32 %v8712_v1, %v11882_v47  ;;  %v4093_v12 = vadd.f32 %v4092_v63, %v3772_v30  ;;  %v8910_v56 = vpop.permute.xlu1 %3386  ;;  %v8922_v39 = vpop.permute.xlu0 %3381 }
 0x227   : > { %4198 = vperm.xlu0 %5642, %v5863_v15   ;;  %v3960_v45 = vadd.f32 %v3959_v33, %v3771_v32  ;;  %v11884_v15 = vld [vmem:[#allocation94_spill] sm:$0xff]  ;;  %11887 = vst [vmem:[#allocation76_spill] sm:$0xff] %v8920_v13  ;;  %v11888_v1 = vmax.f32 %v8849_v31, 0.0  ;;  %v11889_v30 = vmax.f32 %v8853_v20, 0.0  ;;  %v11890_v2 = vld [vmem:[#allocation59_spill] sm:$0xff] }
 0x228   : > { %v8916_v17 = vadd.f32 %v11884_v15, %v11883_v37  ;;  %v4094_v47 = vadd.f32 %v4093_v12, %v3774_v38  ;;  %v5864_v15 = vld [vmem:[%s10974_s3 + $0x50] sm:$0xff]  ;;  %v8937_v49 = vadd.f32 %v7583_v43, %v11890_v2  ;;  %v11893_v38 = vmax.f32 %v8872_v35, 0.0 }
 0x229   : > { %v3775_v32 = vmul.f32 %v8747_v26, %v11888_v1  ;;  %v3776_v33 = vmul.f32 %v8747_v26, %v11889_v30  ;;  %v3961_v63 = vadd.f32 %v3960_v45, %v3773_v59  ;;  %4202 = vperm.xlu1 %5643, %v5864_v15   ;;  %v8941_v1 = vadd.f32 %v7631_v14, %v11890_v2  ;;  %v5865_v26 = vld [vmem:[%s10974_s3 + $0x58] sm:$0xff]  ;;  %v8946_v59 = vpop.f32.mrf.mxu1  ;;  %v11900_v2 = vld [vmem:[#allocation63_spill] sm:$0xff] }
 0x22a   : > { %11885 = vst [vmem:[#allocation53_spill] sm:$0xff] %v8916_v17  ;;  %11891 = vst [vmem:[#allocation79_spill] sm:$0xff] %v8937_v49  ;;  %v3777_v45 = vmul.f32 %v8744_v18, %v11893_v38  ;;  %v11894_v12 = vmax.f32 %v8876_v46, 0.0  ;;  %v8954_v37 = vpop.permute.xlu1 %3396  ;;  %v8964_v35 = vadd.f32 %v7699_v3, %v11895_v36  ;;  %v8966_v38 = vpop.permute.xlu0 %3391  ;;  %v8981_v14 = vadd.f32 %v7739_v58, %v11900_v2  ;;  %v11905_v3 = vld [vmem:[#allocation62_spill] sm:$0xff] }
 0x22b   : > { %11892 = vst [vmem:[#allocation52_spill] sm:$0xff] %v8941_v1  ;;  %4206 = vperm.xlu0 %5642, %v5865_v26   ;;  %v3962_v30 = vadd.f32 %v3961_v63, %v3775_v32  ;;  %v4095_v15 = vadd.f32 %v4094_v47, %v3776_v33  ;;  %v8960_v26 = vadd.f32 %v7659_v23, %v11895_v36  ;;  %v11899_v33 = vmax.f32 %v8897_v8, 0.0  ;;  %v5866_v23 = vld [vmem:[%s10974_s3 + $0x60] sm:$0xff] }
 0x22c   : > { %v3778_v43 = vmul.f32 %v8744_v18, %v11894_v12  ;;  %11897 = vst [vmem:[#allocation85_spill] sm:$0xff] %v8964_v35  ;;  %v11898_v18 = vmax.f32 %v8893_v55, 0.0  ;;  %11901 = vst [vmem:[#allocation55_spill] sm:$0xff] %v8981_v14 }
 0x22d   : > { %11896 = vst [vmem:[#allocation82_spill] sm:$0xff] %v8960_v26  ;;  %v3780_v63 = vmul.f32 %v8794_v29, %v11899_v33  ;;  %v3963_v47 = vadd.f32 %v3962_v30, %v3777_v45  ;;  %4210 = vperm.xlu1 %5643, %v5866_v23   ;;  %v8990_v45 = vpop.f32.mrf.mxu1 }
 0x22e   : > { %v3779_v32 = vmul.f32 %v8794_v29, %v11898_v18  ;;  %v4096_v12 = vadd.f32 %v4095_v15, %v3778_v43  ;;  %v8985_v18 = vadd.f32 %v7779_v25, %v11900_v2  ;;  %v5867_v29 = vld [vmem:[%s10974_s3 + $0x68] sm:$0xff]  ;;  %v11903_v43 = vmax.f32 %v8916_v17, 0.0  ;;  %v8998_v36 = vpop.permute.xlu1 %3406  ;;  %v11910_v2 = vld [vmem:[#allocation66_spill] sm:$0xff] }
 0x22f   : > { %4214 = vperm.xlu0 %5642, %v5867_v29   ;;  %v11904_v15 = vmax.f32 %v8920_v13, 0.0  ;;  %v9004_v29 = vadd.f32 %v7819_v27, %v11905_v3  ;;  %v9008_v17 = vadd.f32 %v7859_v28, %v11905_v3  ;;  %v5868_v27 = vld [vmem:[%s10974_s3 + $0x70] sm:$0xff]  ;;  %v9025_v25 = vadd.f32 %v7899_v19, %v11910_v2  ;;  %v11916_v28 = vld [vmem:[#allocation65_spill] sm:$0xff] }
 0x230   : > { %11902 = vst [vmem:[#allocation88_spill] sm:$0xff] %v8985_v18  ;;  %v3781_v30 = vmul.f32 %v8784_v34, %v11903_v43  ;;  %v3964_v33 = vadd.f32 %v3963_v47, %v3779_v32  ;;  %v4097_v23 = vadd.f32 %v4096_v12, %v3780_v63  ;;  %v9010_v43 = vpop.permute.xlu0 %3401  ;;  %v11909_v63 = vmax.f32 %v8941_v1, 0.0 }
 0x231   : > { %v3782_v58 = vmul.f32 %v8784_v34, %v11904_v15  ;;  %11906 = vst [vmem:[#allocation91_spill] sm:$0xff] %v9004_v29  ;;  %11907 = vst [vmem:[#allocation54_spill] sm:$0xff] %v9008_v17  ;;  %v11908_v34 = vmax.f32 %v8937_v49, 0.0  ;;  %4218 = vperm.xlu1 %5643, %v5868_v27  }
 0x232   : > { %v3784_v47 = vmul.f32 %v8834_v0, %v11909_v63  ;;  %v3965_v12 = vadd.f32 %v3964_v33, %v3781_v30  ;;  %11911 = vst [vmem:[#allocation94_spill] sm:$0xff] %v9025_v25  ;;  %v9034_v30 = vpop.f32.mrf.mxu1  ;;  %v9042_v3 = vpop.permute.xlu1 %3416 }
 0x233   : > { %v3783_v32 = vmul.f32 %v8834_v0, %v11908_v34  ;;  %v4098_v15 = vadd.f32 %v4097_v23, %v3782_v58  ;;  %v11912_v34 = vld [vmem:[#allocation7_spill] sm:$0xff]  ;;  %v5869_v0 = vld [vmem:[%s10974_s3 + $0x78] sm:$0xff]  ;;  %v11914_v58 = vmax.f32 %v8960_v26, 0.0  ;;  %v11915_v23 = vmax.f32 %v8964_v35, 0.0 }
 0x234   : > { %v9029_v1 = vadd.f32 %v11912_v34, %v11910_v2  ;;  %4222 = vperm.xlu0 %5642, %v5869_v0   ;;  %v11917_v0 = vld [vmem:[#allocation130_spill] sm:$0xff]  ;;  %v11919_v26 = vld [vmem:[#allocation137_spill] sm:$0xff] }
 0x235   : > { %v3785_v33 = vmul.f32 %v8822_v22, %v11914_v58  ;;  %v3786_v19 = vmul.f32 %v8822_v22, %v11915_v23  ;;  %v3966_v63 = vadd.f32 %v3965_v12, %v3783_v32  ;;  %v4099_v27 = vadd.f32 %v4098_v15, %v3784_v47  ;;  %v9054_v58 = vpop.permute.xlu0 %3411  ;;  %v11923_v34 = vld [vmem:[#allocation69_spill] sm:$0xff] }
 0x236   : > { %11913 = vst [vmem:[#allocation97_spill] sm:$0xff] %v9029_v1  ;;  %v9048_v49 = vadd.f32 %v11917_v0, %v11916_v28  ;;  %v9052_v13 = vadd.f32 %v11919_v26, %v11916_v28  ;;  %v11921_v22 = vmax.f32 %v8981_v14, 0.0  ;;  %v11922_v47 = vmax.f32 %v8985_v18, 0.0  ;;  %v5870_v0 = vld [vmem:[%s10974_s3 + $0x80] sm:$0xff]  ;;  %v9086_v28 = vpop.permute.xlu1 %3426  ;;  %v11928_v26 = vld [vmem:[#allocation68_spill] sm:$0xff] }
 0x237   : > { %v3967_v15 = vadd.f32 %v3966_v63, %v3785_v33  ;;  %v4100_v23 = vadd.f32 %v4099_v27, %v3786_v19  ;;  %4226 = vperm.xlu1 %5643, %v5870_v0   ;;  %v9069_v2 = vadd.f32 %v8059_v52, %v11923_v34  ;;  %v9078_v33 = vpop.f32.mrf.mxu1  ;;  %v11926_v19 = vmax.f32 %v9004_v29, 0.0 }
 0x238   : > { %11918 = vst [vmem:[#allocation59_spill] sm:$0xff] %v9048_v49  ;;  %11920 = vst [vmem:[#allocation58_spill] sm:$0xff] %v9052_v13  ;;  %v3787_v32 = vmul.f32 %v8878_v53, %v11921_v22  ;;  %v3788_v12 = vmul.f32 %v8878_v53, %v11922_v47  ;;  %v9073_v22 = vadd.f32 %v8099_v40, %v11923_v34  ;;  %v5871_v53 = vld [vmem:[%s10974_s3 + $0x88] sm:$0xff]  ;;  %v11927_v27 = vmax.f32 %v9008_v17, 0.0  ;;  %v11933_v34 = vld [vmem:[#allocation72_spill] sm:$0xff] }
 0x239   : > { %11924 = vst [vmem:[#allocation63_spill] sm:$0xff] %v9069_v2  ;;  %4230 = vperm.xlu0 %5642, %v5871_v53   ;;  %v3789_v63 = vmul.f32 %v8866_v5, %v11926_v19  ;;  %v9092_v53 = vadd.f32 %v8139_v61, %v11928_v26  ;;  %v9096_v29 = vadd.f32 %v8179_v60, %v11928_v26  ;;  %v9098_v19 = vpop.permute.xlu0 %3421  ;;  %v5872_v61 = vld [vmem:[%s10974_s3 + $0x90] sm:$0xff]  ;;  %v11938_v60 = vld [vmem:[#allocation71_spill] sm:$0xff] }
 0x23a   : > { %11925 = vst [vmem:[#allocation62_spill] sm:$0xff] %v9073_v22  ;;  %v3790_v52 = vmul.f32 %v8866_v5, %v11927_v27  ;;  %v3968_v47 = vadd.f32 %v3967_v15, %v3787_v32  ;;  %v4101_v0 = vadd.f32 %v4100_v23, %v3788_v12  ;;  %v11931_v5 = vmax.f32 %v9025_v25, 0.0  ;;  %v9130_v26 = vpop.permute.xlu1 %3436 }
 0x23b   : > { %11929 = vst [vmem:[#allocation66_spill] sm:$0xff] %v9092_v53  ;;  %11930 = vst [vmem:[#allocation7_spill] sm:$0xff] %v9096_v29  ;;  %v11932_v12 = vmax.f32 %v9029_v1, 0.0  ;;  %4234 = vperm.xlu1 %5643, %v5872_v61   ;;  %v9113_v40 = vadd.f32 %v8219_v54, %v11933_v34 }
 0x23c   : > { %v3791_v32 = vmul.f32 %v8922_v39, %v11931_v5  ;;  %v3969_v23 = vadd.f32 %v3968_v47, %v3789_v63  ;;  %v4102_v27 = vadd.f32 %v4101_v0, %v3790_v52  ;;  %v9117_v5 = vadd.f32 %v8259_v21, %v11933_v34  ;;  %v9122_v63 = vpop.f32.mrf.mxu1  ;;  %v11943_v34 = vld [vmem:[#allocation75_spill] sm:$0xff] }
 0x23d   : > { %v3792_v15 = vmul.f32 %v8922_v39, %v11932_v12  ;;  %11934 = vst [vmem:[#allocation65_spill] sm:$0xff] %v9113_v40  ;;  %v5873_v39 = vld [vmem:[%s10974_s3 + $0x98] sm:$0xff]  ;;  %v11936_v52 = vmax.f32 %v9048_v49, 0.0  ;;  %v11937_v0 = vmax.f32 %v9052_v13, 0.0  ;;  %v9140_v49 = vadd.f32 %v8339_v7, %v11938_v60  ;;  %v11948_v7 = vld [vmem:[#allocation74_spill] sm:$0xff] }
 0x23e   : > { %11935 = vst [vmem:[#allocation130_spill] sm:$0xff] %v9117_v5  ;;  %4238 = vperm.xlu0 %5642, %v5873_v39   ;;  %v3970_v12 = vadd.f32 %v3969_v23, %v3791_v32  ;;  %v9136_v39 = vadd.f32 %v8299_v62, %v11938_v60  ;;  %v5874_v62 = vld [vmem:[%s10974_s3 + $0xa0] sm:$0xff]  ;;  %v9157_v21 = vadd.f32 %v8379_v11, %v11943_v34  ;;  %v9174_v60 = vpop.permute.xlu1 %3446 }
 0x23f   : > { %v3793_v47 = vmul.f32 %v8910_v56, %v11936_v52  ;;  %v3794_v54 = vmul.f32 %v8910_v56, %v11937_v0  ;;  %v4103_v61 = vadd.f32 %v4102_v27, %v3792_v15  ;;  %11940 = vst [vmem:[#allocation69_spill] sm:$0xff] %v9140_v49  ;;  %v9142_v52 = vpop.permute.xlu0 %3431  ;;  %v11941_v56 = vmax.f32 %v9069_v2, 0.0  ;;  %4242 = vperm.xlu1 %5643, %v5874_v62  }
 0x240   : > { %11939 = vst [vmem:[#allocation137_spill] sm:$0xff] %v9136_v39  ;;  %v11942_v15 = vmax.f32 %v9073_v22, 0.0  ;;  %11944 = vst [vmem:[#allocation68_spill] sm:$0xff] %v9157_v21 }
 0x241   : > { %v3795_v32 = vmul.f32 %v8966_v38, %v11941_v56  ;;  %v3971_v27 = vadd.f32 %v3970_v12, %v3793_v47  ;;  %v4104_v0 = vadd.f32 %v4103_v61, %v3794_v54  ;;  %v9161_v56 = vadd.f32 %v8419_v9, %v11943_v34  ;;  %v9166_v47 = vpop.f32.mrf.mxu1  ;;  %v11953_v34 = vld [vmem:[#allocation78_spill] sm:$0xff] }
 0x242   : > { %v3796_v23 = vmul.f32 %v8966_v38, %v11942_v15  ;;  %v5875_v38 = vld [vmem:[%s10974_s3 + $0xa8] sm:$0xff]  ;;  %v11946_v54 = vmax.f32 %v9092_v53, 0.0  ;;  %v11947_v61 = vmax.f32 %v9096_v29, 0.0  ;;  %v9184_v53 = vadd.f32 %v8484_v16, %v11948_v7  ;;  %v11958_v16 = vld [vmem:[#allocation77_spill] sm:$0xff] }
 0x243   : > { %11945 = vst [vmem:[#allocation72_spill] sm:$0xff] %v9161_v56  ;;  %4246 = vperm.xlu0 %5642, %v5875_v38   ;;  %v3972_v15 = vadd.f32 %v3971_v27, %v3795_v32  ;;  %v9180_v38 = vadd.f32 %v8453_v10, %v11948_v7  ;;  %v5876_v10 = vld [vmem:[%s10974_s3 + $0xb0] sm:$0xff]  ;;  %v9201_v9 = vadd.f32 %v8507_v51, %v11953_v34  ;;  %v9218_v7 = vpop.permute.xlu1 %3456 }
 0x244   : > { %v3797_v12 = vmul.f32 %v8954_v37, %v11946_v54  ;;  %v3798_v11 = vmul.f32 %v8954_v37, %v11947_v61  ;;  %v4105_v62 = vadd.f32 %v4104_v0, %v3796_v23  ;;  %11950 = vst [vmem:[#allocation75_spill] sm:$0xff] %v9184_v53  ;;  %v9186_v54 = vpop.permute.xlu0 %3441  ;;  %v11951_v37 = vmax.f32 %v9113_v40, 0.0  ;;  %4250 = vperm.xlu1 %5643, %v5876_v10  }
 0x245   : > { %11949 = vst [vmem:[#allocation71_spill] sm:$0xff] %v9180_v38  ;;  %v11952_v23 = vmax.f32 %v9117_v5, 0.0  ;;  %11954 = vst [vmem:[#allocation74_spill] sm:$0xff] %v9201_v9 }
 0x246   : > { %v3799_v32 = vmul.f32 %v9010_v43, %v11951_v37  ;;  %v3973_v0 = vadd.f32 %v3972_v15, %v3797_v12  ;;  %v4106_v61 = vadd.f32 %v4105_v62, %v3798_v11  ;;  %v9205_v37 = vadd.f32 %v8530_v57, %v11953_v34  ;;  %v9210_v12 = vpop.f32.mrf.mxu1  ;;  %v11963_v34 = vld [vmem:[#allocation81_spill] sm:$0xff] }
 0x247   : > { %v3800_v27 = vmul.f32 %v9010_v43, %v11952_v23  ;;  %v5877_v43 = vld [vmem:[%s10974_s3 + $0xb8] sm:$0xff]  ;;  %v11956_v11 = vmax.f32 %v9136_v39, 0.0  ;;  %v11957_v62 = vmax.f32 %v9140_v49, 0.0  ;;  %v9228_v39 = vadd.f32 %v8576_v48, %v11958_v16  ;;  %v11968_v48 = vld [vmem:[#allocation80_spill] sm:$0xff] }
 0x248   : > { %11955 = vst [vmem:[#allocation78_spill] sm:$0xff] %v9205_v37  ;;  %4254 = vperm.xlu0 %5642, %v5877_v43   ;;  %v3974_v23 = vadd.f32 %v3973_v0, %v3799_v32  ;;  %v9224_v43 = vadd.f32 %v8552_v6, %v11958_v16  ;;  %v5878_v6 = vld [vmem:[%s10974_s3 + $0xc0] sm:$0xff]  ;;  %v9245_v57 = vadd.f32 %v8609_v41, %v11963_v34  ;;  %v9262_v16 = vpop.permute.xlu1 %3466 }
 0x249   : > { %v3801_v15 = vmul.f32 %v8998_v36, %v11956_v11  ;;  %v3802_v51 = vmul.f32 %v8998_v36, %v11957_v62  ;;  %v4107_v10 = vadd.f32 %v4106_v61, %v3800_v27  ;;  %11960 = vst [vmem:[#allocation213_spill] sm:$0xff] %v9228_v39  ;;  %v9230_v11 = vpop.permute.xlu0 %3451  ;;  %v11961_v36 = vmax.f32 %v9157_v21, 0.0  ;;  %4258 = vperm.xlu1 %5643, %v5878_v6  }
 0x24a   : > { %11959 = vst [vmem:[#allocation77_spill] sm:$0xff] %v9224_v43  ;;  %v11962_v27 = vmax.f32 %v9161_v56, 0.0  ;;  %11964 = vst [vmem:[#allocation81_spill] sm:$0xff] %v9245_v57 }
 0x24b   : > { %v3803_v32 = vmul.f32 %v9054_v58, %v11961_v36  ;;  %v3975_v61 = vadd.f32 %v3974_v23, %v3801_v15  ;;  %v4108_v62 = vadd.f32 %v4107_v10, %v3802_v51  ;;  %v9249_v36 = vadd.f32 %v8642_v44, %v11963_v34  ;;  %v9254_v15 = vpop.f32.mrf.mxu1  ;;  %v11973_v34 = vld [vmem:[#allocation84_spill] sm:$0xff] }
 0x24c   : > { %v3804_v0 = vmul.f32 %v9054_v58, %v11962_v27  ;;  %v5879_v58 = vld [vmem:[%s10974_s3 + $0xc8] sm:$0xff]  ;;  %v11966_v51 = vmax.f32 %v9180_v38, 0.0  ;;  %v11967_v10 = vmax.f32 %v9184_v53, 0.0  ;;  %v9272_v38 = vadd.f32 %v8707_v50, %v11968_v48 }
 0x24d   : > { %11965 = vst [vmem:[#allocation214_spill] sm:$0xff] %v9249_v36  ;;  %4262 = vperm.xlu0 %5642, %v5879_v58   ;;  %v3976_v27 = vadd.f32 %v3975_v61, %v3803_v32  ;;  %v9268_v58 = vadd.f32 %v8679_v4, %v11968_v48  ;;  %v5880_v4 = vld [vmem:[%s10974_s3 + $0xd0] sm:$0xff]  ;;  %v9289_v44 = vadd.f32 %v8739_v24, %v11973_v34  ;;  %v9306_v48 = vpop.permute.xlu1 %3476  ;;  %v11979_v50 = vld [vmem:[#allocation83_spill] sm:$0xff] }
 0x24e   : > { %v3805_v23 = vmul.f32 %v9042_v3, %v11966_v51  ;;  %v3806_v41 = vmul.f32 %v9042_v3, %v11967_v10  ;;  %v4109_v6 = vadd.f32 %v4108_v62, %v3804_v0  ;;  %11970 = vst [vmem:[#allocation215_spill] sm:$0xff] %v9272_v38  ;;  %v9274_v51 = vpop.permute.xlu0 %3461  ;;  %v11971_v3 = vmax.f32 %v9201_v9, 0.0  ;;  %4266 = vperm.xlu1 %5643, %v5880_v4  }
 0x24f   : > { %11969 = vst [vmem:[#allocation80_spill] sm:$0xff] %v9268_v58  ;;  %v11972_v0 = vmax.f32 %v9205_v37, 0.0  ;;  %11974 = vst [vmem:[#allocation84_spill] sm:$0xff] %v9289_v44 }
 0x250   : > { %v3807_v32 = vmul.f32 %v9098_v19, %v11971_v3  ;;  %v3977_v62 = vadd.f32 %v3976_v27, %v3805_v23  ;;  %v4110_v10 = vadd.f32 %v4109_v6, %v3806_v41  ;;  %v11975_v3 = vld [vmem:[#allocation57_spill] sm:$0xff]  ;;  %v9298_v23 = vpop.f32.mrf.mxu1  ;;  %v11977_v41 = vmax.f32 %v9224_v43, 0.0  ;;  %v11982_v43 = vld [vmem:[#allocation50_spill] sm:$0xff] }
 0x251   : > { %v3808_v61 = vmul.f32 %v9098_v19, %v11972_v0  ;;  %v9293_v37 = vadd.f32 %v11975_v3, %v11973_v34  ;;  %v5881_v19 = vld [vmem:[%s10974_s3 + $0xd8] sm:$0xff]  ;;  %v11978_v6 = vmax.f32 %v9228_v39, 0.0  ;;  %v9316_v53 = vadd.f32 %v11982_v43, %v11979_v50  ;;  %v11986_v3 = vld [vmem:[#allocation87_spill] sm:$0xff]  ;;  %v11992_v43 = vld [vmem:[#allocation86_spill] sm:$0xff] }
 0x252   : > { %4270 = vperm.xlu0 %5642, %v5881_v19   ;;  %v3809_v27 = vmul.f32 %v9086_v28, %v11977_v41  ;;  %v3978_v0 = vadd.f32 %v3977_v62, %v3807_v32  ;;  %v11980_v19 = vld [vmem:[#allocation64_spill] sm:$0xff]  ;;  %v9318_v41 = vpop.permute.xlu0 %3471  ;;  %v11987_v34 = vld [vmem:[#allocation73_spill] sm:$0xff] }
 0x253   : > { %11976 = vst [vmem:[#allocation57_spill] sm:$0xff] %v9293_v37  ;;  %v3810_v24 = vmul.f32 %v9086_v28, %v11978_v6  ;;  %v4111_v4 = vadd.f32 %v4110_v10, %v3808_v61  ;;  %v9312_v9 = vadd.f32 %v11980_v19, %v11979_v50  ;;  %11983 = vst [vmem:[#allocation64_spill] sm:$0xff] %v9316_v53  ;;  %v11984_v28 = vmax.f32 %v9245_v57, 0.0  ;;  %v5882_v19 = vld [vmem:[%s10974_s3 + $0xe0] sm:$0xff]  ;;  %v9348_v50 = vpop.permute.xlu1 %3486 }
 0x254   : > { %v11985_v61 = vmax.f32 %v9249_v36, 0.0  ;;  %v3979_v10 = vadd.f32 %v3978_v0, %v3809_v27  ;;  %4274 = vperm.xlu1 %5643, %v5882_v19   ;;  %v9333_v57 = vadd.f32 %v11987_v34, %v11986_v3  ;;  %v2450_v27 = vpop.f32.mrf.mxu1 }
 0x255   : > { %11981 = vst [vmem:[#allocation83_spill] sm:$0xff] %v9312_v9  ;;  %v3811_v32 = vmul.f32 %v9142_v52, %v11984_v28  ;;  %v4112_v6 = vadd.f32 %v4111_v4, %v3810_v24  ;;  %v9337_v28 = vadd.f32 %v8946_v59, %v11986_v3  ;;  %v11990_v24 = vmax.f32 %v9268_v58, 0.0  ;;  %v11997_v3 = vld [vmem:[#allocation90_spill] sm:$0xff] }
 0x256   : > { %v3812_v62 = vmul.f32 %v9142_v52, %v11985_v61  ;;  %11988 = vst [vmem:[#allocation50_spill] sm:$0xff] %v9333_v57  ;;  %v5883_v52 = vld [vmem:[%s10974_s3 + $0xe8] sm:$0xff]  ;;  %v11991_v4 = vmax.f32 %v9272_v38, 0.0  ;;  %v9358_v58 = vadd.f32 %v9034_v30, %v11992_v43  ;;  %v9375_v59 = vadd.f32 %v9078_v33, %v11997_v3  ;;  %v12002_v30 = vld [vmem:[#allocation89_spill] sm:$0xff] }
 0x257   : > { %11989 = vst [vmem:[#allocation87_spill] sm:$0xff] %v9337_v28  ;;  %4278 = vperm.xlu0 %5642, %v5883_v52   ;;  %v3813_v0 = vmul.f32 %v9130_v26, %v11990_v24  ;;  %v3980_v34 = vadd.f32 %v3979_v10, %v3811_v32  ;;  %v9354_v52 = vadd.f32 %v8990_v45, %v11992_v43  ;;  %v9360_v24 = vpop.permute.xlu0 %3481  ;;  %v5884_v45 = vld [vmem:[%s10974_s3 + $0xf0] sm:$0xff]  ;;  %v9390_v43 = vpop.permute.xlu1 %3496  ;;  %v12049_v38 = vld [vmem:[#allocation147_spill] sm:$0xff] }
 0x258   : > { %v3814_v61 = vmul.f32 %v9130_v26, %v11991_v4  ;;  %v4113_v19 = vadd.f32 %v4112_v6, %v3812_v62  ;;  %11994 = vst [vmem:[#allocation86_spill] sm:$0xff] %v9358_v58  ;;  %v11995_v26 = vmax.f32 %v9289_v44, 0.0  ;;  %v11996_v62 = vmax.f32 %v9293_v37, 0.0  ;;  %4282 = vperm.xlu1 %5643, %v5884_v45   ;;  %11998 = vst [vmem:[#allocation90_spill] sm:$0xff] %v9375_v59  ;;  %v5916_v37 = vld [vmem:[%s10974_s3 + $0x1f0] sm:$0xff] }
 0x259   : > { %11993 = vst [vmem:[#allocation73_spill] sm:$0xff] %v9354_v52  ;;  %v3981_v6 = vadd.f32 %v3980_v34, %v3813_v0  ;;  %v2452_v0 = vpop.f32.mrf.mxu1 }
 0x25a   : > { %v3815_v32 = vmul.f32 %v9186_v54, %v11995_v26  ;;  %v3816_v10 = vmul.f32 %v9186_v54, %v11996_v62  ;;  %v4114_v4 = vadd.f32 %v4113_v19, %v3814_v61  ;;  %v9379_v26 = vadd.f32 %v9122_v63, %v11997_v3  ;;  %v5885_v54 = vld [vmem:[%s10974_s3 + $0xf8] sm:$0xff] }
 0x25b   : > { %4286 = vperm.xlu0 %5642, %v5885_v54   ;;  %v12000_v61 = vmax.f32 %v9312_v9, 0.0  ;;  %v12001_v19 = vmax.f32 %v9316_v53, 0.0  ;;  %v9396_v54 = vadd.f32 %v9166_v47, %v12002_v30  ;;  %v9400_v9 = vadd.f32 %v9210_v12, %v12002_v30  ;;  %v5886_v47 = vld [vmem:[%s10974_s3 + $0x100] sm:$0xff]  ;;  %v12007_v3 = vld [vmem:[#allocation93_spill] sm:$0xff]  ;;  %v9432_v30 = vpop.permute.xlu1 %3506  ;;  %v12012_v12 = vld [vmem:[#allocation92_spill] sm:$0xff] }
 0x25c   : > { %11999 = vst [vmem:[#allocation216_spill] sm:$0xff] %v9379_v26  ;;  %v3982_v33 = vadd.f32 %v3981_v6, %v3815_v32  ;;  %v4115_v45 = vadd.f32 %v4114_v4, %v3816_v10  ;;  %v12006_v10 = vmax.f32 %v9337_v28, 0.0  ;;  %4290 = vperm.xlu1 %5643, %v5886_v47   ;;  %v9417_v63 = vadd.f32 %v9254_v15, %v12007_v3 }
 0x25d   : > { %v3817_v34 = vmul.f32 %v9174_v60, %v12000_v61  ;;  %v3818_v62 = vmul.f32 %v9174_v60, %v12001_v19  ;;  %12003 = vst [vmem:[#allocation89_spill] sm:$0xff] %v9396_v54  ;;  %12004 = vst [vmem:[#allocation217_spill] sm:$0xff] %v9400_v9  ;;  %v9402_v61 = vpop.permute.xlu0 %3491  ;;  %v12005_v60 = vmax.f32 %v9333_v57, 0.0  ;;  %v9437_v28 = vadd.f32 %v2450_v27, %v12012_v12  ;;  %v5888_v27 = vld [vmem:[%s10974_s3 + $0x110] sm:$0xff]  ;;  %v12045_v57 = vld [vmem:[#allocation149_spill] sm:$0xff] }
 0x25e   : > { %v3820_v6 = vmul.f32 %v9230_v11, %v12006_v10  ;;  %12008 = vst [vmem:[#allocation93_spill] sm:$0xff] %v9417_v63 }
 0x25f   : > { %v3819_v32 = vmul.f32 %v9230_v11, %v12005_v60  ;;  %v3983_v4 = vadd.f32 %v3982_v33, %v3817_v34  ;;  %v4116_v19 = vadd.f32 %v4115_v45, %v3818_v62  ;;  %v9421_v60 = vadd.f32 %v9298_v23, %v12007_v3  ;;  %v5887_v11 = vld [vmem:[%s10974_s3 + $0x108] sm:$0xff]  ;;  %v2456_v34 = vpop.f32.mrf.mxu1  ;;  %12013 = vst [vmem:[#allocation92_spill] sm:$0xff] %v9437_v28 }
 0x260   : > { %4294 = vperm.xlu0 %5642, %v5887_v11   ;;  %v12010_v62 = vmax.f32 %v9354_v52, 0.0  ;;  %v12011_v45 = vmax.f32 %v9358_v58, 0.0  ;;  %v11271_v23 = vmax.f32 %v9396_v54, 0.0  ;;  %v9440_v11 = vadd.f32 %v2452_v0, %v12012_v12  ;;  %4298 = vperm.xlu1 %5643, %v5888_v27  }
 0x261   : > { %12009 = vst [vmem:[#allocation218_spill] sm:$0xff] %v9421_v60  ;;  %v3984_v15 = vadd.f32 %v3983_v4, %v3819_v32  ;;  %v4117_v47 = vadd.f32 %v4116_v19, %v3820_v6  ;;  %v9442_v52 = vpop.permute.xlu0 %3501  ;;  %v12016_v32 = vmax.f32 %v9379_v26, 0.0  ;;  %v11277_v0 = vmax.f32 %v9417_v63, 0.0 }
 0x262   : > { %v3821_v33 = vmul.f32 %v9218_v7, %v12010_v62  ;;  %v3822_v10 = vmul.f32 %v9218_v7, %v12011_v45  ;;  %12014 = vst [vmem:[#allocation219_spill] sm:$0xff] %v9440_v11  ;;  %v12015_v62 = vmax.f32 %v9375_v59, 0.0  ;;  %v12017_v45 = vld [vmem:[#allocation96_spill] sm:$0xff]  ;;  %v11275_v27 = vmax.f32 %v9440_v11, 0.0 }
 0x263   : > { %v3824_v6 = vmul.f32 %v9274_v51, %v12016_v32  ;;  %v9456_v3 = vadd.f32 %v2456_v34, %v12017_v45  ;;  %v9467_v32 = vpop.permute.xlu1 %3516  ;;  %v11276_v34 = vmax.f32 %v9437_v28, 0.0 }
 0x264   : > { %v3823_v7 = vmul.f32 %v9274_v51, %v12015_v62  ;;  %v3985_v4 = vadd.f32 %v3984_v15, %v3821_v33  ;;  %v4118_v19 = vadd.f32 %v4117_v47, %v3822_v10  ;;  %v5889_v62 = vld [vmem:[%s10974_s3 + $0x118] sm:$0xff]  ;;  %v3825_v51 = vmul.f32 %v9262_v16, %v11271_v23 }
 0x265   : > { %12018 = vst [vmem:[#allocation96_spill] sm:$0xff] %v9456_v3  ;;  %4302 = vperm.xlu0 %5642, %v5889_v62   ;;  %v12019_v33 = vmax.f32 %v9400_v9, 0.0  ;;  %v9471_v12 = vpop.permute.xlu0 %3511  ;;  %v3827_v62 = vmul.f32 %v9318_v41, %v11277_v0  ;;  %v12020_v23 = vmax.f32 %v9421_v60, 0.0  ;;  %v9561_v0 = vpop.f32.mrf.mxu1 }
 0x266   : > { %v3986_v15 = vadd.f32 %v3985_v4, %v3823_v7  ;;  %v4119_v47 = vadd.f32 %v4118_v19, %v3824_v6  ;;  %v5890_v7 = vld [vmem:[%s10974_s3 + $0x120] sm:$0xff]  ;;  %v11274_v6 = vmax.f32 %v9456_v3, 0.0  ;;  %v5891_v4 = vld [vmem:[%s10974_s3 + $0x128] sm:$0xff]  ;;  %v3829_v19 = vmul.f32 %v9306_v48, %v11276_v34 }
 0x267   : > { %v3826_v10 = vmul.f32 %v9262_v16, %v12019_v33  ;;  %v3828_v9 = vmul.f32 %v9318_v41, %v12020_v23  ;;  %4306 = vperm.xlu1 %5643, %v5890_v7   ;;  %v3830_v41 = vmul.f32 %v9306_v48, %v11275_v27  ;;  %v9492_v33 = vpop.permute.xlu1 %3526  ;;  %v5903_v34 = vld [vmem:[%s10974_s3 + $0x188] sm:$0xff]  ;;  %v9573_v28 = vpop.f32.mrf.mxu1 }
 0x268   : > { %v3987_v54 = vadd.f32 %v3986_v15, %v3825_v51  ;;  %v3831_v15 = vmul.f32 %v9360_v24, %v11274_v6  ;;  %v5901_v6 = vld [vmem:[%s10974_s3 + $0x178] sm:$0xff] }
 0x269   : > { %v4120_v16 = vadd.f32 %v4119_v47, %v3826_v10  ;;  %4310 = vperm.xlu0 %5642, %v5891_v4   ;;  %v9494_v10 = vpop.permute.xlu0 %3521  ;;  %v5892_v4 = vld [vmem:[%s10974_s3 + $0x130] sm:$0xff]  ;;  %v9585_v63 = vpop.f32.mrf.mxu1 }
 0x26a   : > { %v3988_v23 = vadd.f32 %v3987_v54, %v3827_v62 }
 0x26b   : > { %v4121_v51 = vadd.f32 %v4120_v16, %v3828_v9  ;;  %4314 = vperm.xlu1 %5643, %v5892_v4   ;;  %v5893_v9 = vld [vmem:[%s10974_s3 + $0x138] sm:$0xff]  ;;  %v9509_v54 = vpop.permute.xlu1 %3536  ;;  %v5894_v16 = vld [vmem:[%s10974_s3 + $0x140] sm:$0xff] }
 0x26c   : > { %v3989_v47 = vadd.f32 %v3988_v23, %v3829_v19  ;;  %12021 = vst [vmem:[#allocation220_spill] sm:$0xff] %v9509_v54  ;;  %v5895_v19 = vld [vmem:[%s10974_s3 + $0x148] sm:$0xff] }
 0x26d   : > { %v9499_v7 = vadd.f32 %v4121_v51, %v3830_v41  ;;  %4318 = vperm.xlu0 %5642, %v5893_v9   ;;  %v9511_v62 = vpop.permute.xlu0 %3531  ;;  %v5896_v51 = vld [vmem:[%s10974_s3 + $0x150] sm:$0xff]  ;;  %v5898_v9 = vld [vmem:[%s10974_s3 + $0x160] sm:$0xff] }
 0x26e   : > { %v9507_v48 = vadd.f32 %v3989_v47, %v3831_v15  ;;  %12022 = vst [vmem:[#allocation221_spill] sm:$0xff] %v9511_v62  ;;  %v5897_v15 = vld [vmem:[%s10974_s3 + $0x158] sm:$0xff] }
 0x26f   : > { %4322 = vperm.xlu1 %5643, %v5894_v16   ;;  %v9519_v41 = vpop.permute.xlu1 %3546  ;;  %v5899_v16 = vld [vmem:[%s10974_s3 + $0x168] sm:$0xff] }
 0x270   : > { %12023 = vst [vmem:[#allocation222_spill] sm:$0xff] %v9519_v41 }
 0x271   : > { %4326 = vperm.xlu0 %5642, %v5895_v19   ;;  %v9521_v23 = vpop.permute.xlu0 %3541 }
 0x272   : > { %12024 = vst [vmem:[#allocation223_spill] sm:$0xff] %v9521_v23 }
 0x273   : > { %4330 = vperm.xlu1 %5643, %v5896_v51   ;;  %v9529_v47 = vpop.permute.xlu1 %3556 }
 0x274   : > { %12025 = vst [vmem:[#allocation224_spill] sm:$0xff] %v9529_v47 }
 0x275   : > { %4334 = vperm.xlu0 %5642, %v5897_v15   ;;  %v9531_v4 = vpop.permute.xlu0 %3551  ;;  %v5900_v15 = vld [vmem:[%s10974_s3 + $0x170] sm:$0xff] }
 0x276   : > { %12026 = vst [vmem:[#allocation225_spill] sm:$0xff] %v9531_v4 }
 0x277   : > { %4338 = vperm.xlu1 %5643, %v5898_v9   ;;  %v9539_v19 = vpop.permute.xlu1 %3566 }
 0x278   : > { %12027 = vst [vmem:[#allocation226_spill] sm:$0xff] %v9539_v19 }
 0x279   : > { %4342 = vperm.xlu0 %5642, %v5899_v16   ;;  %v9541_v51 = vpop.permute.xlu0 %3561  ;;  %v5902_v16 = vld [vmem:[%s10974_s3 + $0x180] sm:$0xff] }
 0x27a   : > { %12028 = vst [vmem:[#allocation227_spill] sm:$0xff] %v9541_v51  ;;  %v12051_v51 = vld [vmem:[#allocation154_spill] sm:$0xff] }
 0x27b   : > { %4346 = vperm.xlu1 %5643, %v5900_v15   ;;  %v9549_v9 = vpop.permute.xlu1 %3576  ;;  %v12052_v39 = vmax.f32 %v12051_v51, 0.0 }
 0x27c   : > { %12029 = vst [vmem:[#allocation228_spill] sm:$0xff] %v9549_v9 }
 0x27d   : > { %4350 = vperm.xlu0 %5642, %v5901_v6   ;;  %v9551_v27 = vpop.permute.xlu0 %3571  ;;  %v5904_v6 = vld [vmem:[%s10974_s3 + $0x190] sm:$0xff] }
 0x27e   : > { %12030 = vst [vmem:[#allocation229_spill] sm:$0xff] %v9551_v27  ;;  %v12046_v27 = vmax.f32 %v12045_v57, 0.0 }
 0x27f   : > { %4354 = vperm.xlu1 %5643, %v5902_v16   ;;  %v9559_v15 = vpop.permute.xlu1 %3586  ;;  %v5905_v16 = vld [vmem:[%s10974_s3 + $0x198] sm:$0xff] }
 0x280   : > { %12031 = vst [vmem:[#allocation230_spill] sm:$0xff] %v9559_v15  ;;  %v5906_v15 = vld [vmem:[%s10974_s3 + $0x1a0] sm:$0xff] }
 0x281   : > { %4358 = vperm.xlu0 %5642, %v5903_v34   ;;  %v9563_v3 = vpop.permute.xlu0 %3581 }
 0x282   : > { %12032 = vst [vmem:[#allocation231_spill] sm:$0xff] %v9563_v3  ;;  %v9597_v3 = vpop.f32.mrf.mxu1 }
 0x283   : > { %4362 = vperm.xlu1 %5643, %v5904_v6   ;;  %v9571_v11 = vpop.permute.xlu1 %3596  ;;  %v5907_v6 = vld [vmem:[%s10974_s3 + $0x1a8] sm:$0xff] }
 0x284   : > { %12033 = vst [vmem:[#allocation232_spill] sm:$0xff] %v9571_v11  ;;  %v5908_v11 = vld [vmem:[%s10974_s3 + $0x1b0] sm:$0xff]  ;;  %v9609_v26 = vpop.f32.mrf.mxu1 }
 0x285   : > { %4366 = vperm.xlu0 %5642, %v5905_v16   ;;  %v9575_v34 = vpop.permute.xlu0 %3591 }
 0x286   : > { %12034 = vst [vmem:[#allocation233_spill] sm:$0xff] %v9575_v34  ;;  %v9621_v59 = vpop.f32.mrf.mxu1 }
 0x287   : > { %4370 = vperm.xlu1 %5643, %v5906_v15   ;;  %v9583_v60 = vpop.permute.xlu1 %3606  ;;  %v5909_v15 = vld [vmem:[%s10974_s3 + $0x1b8] sm:$0xff] }
 0x288   : > { %12035 = vst [vmem:[#allocation234_spill] sm:$0xff] %v9583_v60  ;;  %v5910_v60 = vld [vmem:[%s10974_s3 + $0x1c0] sm:$0xff] }
 0x289   : > { %4374 = vperm.xlu0 %5642, %v5907_v6   ;;  %v9587_v16 = vpop.permute.xlu0 %3601 }
 0x28a   : > { %12036 = vst [vmem:[#allocation235_spill] sm:$0xff] %v9587_v16 }
 0x28b   : > { %4378 = vperm.xlu1 %5643, %v5908_v11   ;;  %v9595_v34 = vpop.permute.xlu1 %3616  ;;  %v5911_v11 = vld [vmem:[%s10974_s3 + $0x1c8] sm:$0xff] }
 0x28c   : > { %12037 = vst [vmem:[#allocation236_spill] sm:$0xff] %v9595_v34  ;;  %v5912_v34 = vld [vmem:[%s10974_s3 + $0x1d0] sm:$0xff] }
 0x28d   : > { %4382 = vperm.xlu0 %5642, %v5909_v15   ;;  %v9599_v6 = vpop.permute.xlu0 %3611 }
 0x28e   : > { %12038 = vst [vmem:[#allocation237_spill] sm:$0xff] %v9599_v6 }
 0x28f   : > { %4386 = vperm.xlu1 %5643, %v5910_v60   ;;  %v9607_v16 = vpop.permute.xlu1 %3626  ;;  %v5913_v60 = vld [vmem:[%s10974_s3 + $0x1d8] sm:$0xff] }
 0x290   : > { %12039 = vst [vmem:[#allocation238_spill] sm:$0xff] %v9607_v16  ;;  %v5914_v16 = vld [vmem:[%s10974_s3 + $0x1e0] sm:$0xff] }
 0x291   : > { %4390 = vperm.xlu0 %5642, %v5911_v11   ;;  %v9611_v15 = vpop.permute.xlu0 %3621 }
 0x292   : > { %12040 = vst [vmem:[#allocation239_spill] sm:$0xff] %v9611_v15  ;;  %v9631_v15 = vpop.f32.mrf.mxu1 }
 0x293   : > { %4394 = vperm.xlu1 %5643, %v5912_v34   ;;  %v9619_v6 = vpop.permute.xlu1 %3636  ;;  %v5915_v34 = vld [vmem:[%s10974_s3 + $0x1e8] sm:$0xff] }
 0x294   : > { %12041 = vst [vmem:[#allocation240_spill] sm:$0xff] %v9619_v6 }
 0x295   : > { %4398 = vperm.xlu0 %5642, %v5913_v60   ;;  %v9623_v11 = vpop.permute.xlu0 %3631  ;;  %v12043_v60 = vld [vmem:[#allocation148_spill] sm:$0xff] }
 0x296   : > { %12042 = vst [vmem:[#allocation241_spill] sm:$0xff] %v9623_v11  ;;  %v12044_v58 = vmax.f32 %v12043_v60, 0.0  ;;  %v5917_v60 = vld [vmem:[%s10974_s3 + $0x1f8] sm:$0xff] }
 0x297   : > { %4402 = vperm.xlu1 %5643, %v5914_v16   ;;  %v4167_v9 = vpop.permute.xlu1 %4166  ;;  %v12047_v16 = vld [vmem:[#allocation146_spill] sm:$0xff] }
 0x298   : > { %v4675_v6 = vmul.f32 %v4167_v9, %v12044_v58  ;;  %v4676_v53 = vmul.f32 %v4167_v9, %v12046_v27  ;;  %v12048_v44 = vmax.f32 %v12047_v16, 0.0  ;;  %v9647_v58 = vpop.f32.mrf.mxu1 }
 0x299   : > { %4406 = vperm.xlu0 %5642, %v5915_v34   ;;  %v4163_v11 = vpop.permute.xlu0 %4162  ;;  %v12050_v34 = vmax.f32 %v12049_v38, 0.0  ;;  %v5918_v38 = vld [vmem:[%s10974_s3 + $0x200] sm:$0xff] }
 0x29a   : > { %v4673_v19 = vmul.f32 %v4163_v11, %v12048_v44 }
 0x29b   : > { %4410 = vperm.xlu1 %5643, %v5916_v37   ;;  %v4674_v36 = vmul.f32 %v4163_v11, %v12050_v34  ;;  %v4171_v9 = vpop.permute.xlu1 %4170  ;;  %v12053_v37 = vld [vmem:[#allocation155_spill] sm:$0xff] }
 0x29c   : > { %v4929_v57 = vadd.f32 %v4675_v6, %v4673_v19  ;;  %v4677_v47 = vmul.f32 %v4171_v9, %v12052_v39  ;;  %v12054_v56 = vmax.f32 %v12053_v37, 0.0  ;;  %v5919_v11 = vld [vmem:[%s10974_s3 + $0x208] sm:$0xff]  ;;  %v12057_v39 = vld [vmem:[#allocation158_spill] sm:$0xff] }
 0x29d   : > { %4414 = vperm.xlu0 %5642, %v5917_v60   ;;  %v5062_v27 = vadd.f32 %v4676_v53, %v4674_v36  ;;  %v4175_v44 = vpop.permute.xlu0 %4174  ;;  %v12055_v36 = vld [vmem:[#allocation157_spill] sm:$0xff]  ;;  %v12058_v34 = vmax.f32 %v12057_v39, 0.0 }
 0x29e   : > { %v4678_v16 = vmul.f32 %v4171_v9, %v12054_v56  ;;  %v4930_v19 = vadd.f32 %v4929_v57, %v4677_v47  ;;  %v12056_v6 = vmax.f32 %v12055_v36, 0.0  ;;  %v9663_v56 = vpop.f32.mrf.mxu1 }
 0x29f   : > { %4418 = vperm.xlu1 %5643, %v5918_v38   ;;  %v4680_v60 = vmul.f32 %v4175_v44, %v12058_v34  ;;  %v4179_v9 = vpop.permute.xlu1 %4178  ;;  %v5920_v38 = vld [vmem:[%s10974_s3 + $0x210] sm:$0xff] }
 0x2a0   : > { %v5063_v53 = vadd.f32 %v5062_v27, %v4678_v16  ;;  %v4679_v51 = vmul.f32 %v4175_v44, %v12056_v6  ;;  %v12061_v27 = vld [vmem:[#allocation160_spill] sm:$0xff]  ;;  %v5921_v44 = vld [vmem:[%s10974_s3 + $0x218] sm:$0xff]  ;;  %v9675_v6 = vpop.f32.mrf.mxu1 }
 0x2a1   : > { %4422 = vperm.xlu0 %5642, %v5919_v11   ;;  %v4183_v4 = vpop.permute.xlu0 %4182  ;;  %v12059_v11 = vld [vmem:[#allocation159_spill] sm:$0xff]  ;;  %v12062_v16 = vmax.f32 %v12061_v27, 0.0 }
 0x2a2   : > { %v4931_v37 = vadd.f32 %v4930_v19, %v4679_v51  ;;  %v5064_v21 = vadd.f32 %v5063_v53, %v4680_v60  ;;  %v12060_v47 = vmax.f32 %v12059_v11, 0.0  ;;  %v12063_v51 = vld [vmem:[#allocation161_spill] sm:$0xff]  ;;  %v12065_v60 = vld [vmem:[#allocation162_spill] sm:$0xff] }
 0x2a3   : > { %4426 = vperm.xlu1 %5643, %v5920_v38   ;;  %v4682_v36 = vmul.f32 %v4179_v9, %v12062_v16  ;;  %v12064_v39 = vmax.f32 %v12063_v51, 0.0  ;;  %v12066_v38 = vmax.f32 %v12065_v60, 0.0  ;;  %v4187_v11 = vpop.permute.xlu1 %4186  ;;  %v12071_v51 = vld [vmem:[#allocation165_spill] sm:$0xff] }
 0x2a4   : > { %v4681_v57 = vmul.f32 %v4179_v9, %v12060_v47  ;;  %v12067_v47 = vld [vmem:[#allocation163_spill] sm:$0xff]  ;;  %v12069_v9 = vld [vmem:[#allocation164_spill] sm:$0xff] }
 0x2a5   : > { %4430 = vperm.xlu0 %5642, %v5921_v44   ;;  %v5065_v53 = vadd.f32 %v5064_v21, %v4682_v36  ;;  %v4683_v34 = vmul.f32 %v4183_v4, %v12064_v39  ;;  %v4684_v49 = vmul.f32 %v4183_v4, %v12066_v38  ;;  %v12068_v5 = vmax.f32 %v12067_v47, 0.0  ;;  %v4191_v41 = vpop.permute.xlu0 %4190  ;;  %v5922_v44 = vld [vmem:[%s10974_s3 + $0x220] sm:$0xff]  ;;  %v9691_v4 = vpop.f32.mrf.mxu1 }
 0x2a6   : > { %v4932_v19 = vadd.f32 %v4931_v37, %v4681_v57  ;;  %v12070_v16 = vmax.f32 %v12069_v9, 0.0  ;;  %v5923_v57 = vld [vmem:[%s10974_s3 + $0x228] sm:$0xff]  ;;  %v12072_v39 = vmax.f32 %v12071_v51, 0.0  ;;  %v12073_v38 = vld [vmem:[#allocation166_spill] sm:$0xff] }
 0x2a7   : > { %v4685_v27 = vmul.f32 %v4187_v11, %v12068_v5  ;;  %4434 = vperm.xlu1 %5643, %v5922_v44   ;;  %v5066_v37 = vadd.f32 %v5065_v53, %v4684_v49  ;;  %v4195_v9 = vpop.permute.xlu1 %4194  ;;  %v12077_v49 = vld [vmem:[#allocation168_spill] sm:$0xff] }
 0x2a8   : > { %v4686_v40 = vmul.f32 %v4187_v11, %v12070_v16  ;;  %v4933_v21 = vadd.f32 %v4932_v19, %v4683_v34  ;;  %v4687_v60 = vmul.f32 %v4191_v41, %v12072_v39  ;;  %v12074_v11 = vmax.f32 %v12073_v38, 0.0  ;;  %v12075_v16 = vld [vmem:[#allocation167_spill] sm:$0xff]  ;;  %v12079_v39 = vld [vmem:[#allocation169_spill] sm:$0xff] }
 0x2a9   : > { %4438 = vperm.xlu0 %5642, %v5923_v57   ;;  %v12076_v44 = vmax.f32 %v12075_v16, 0.0  ;;  %v12078_v53 = vmax.f32 %v12077_v49, 0.0  ;;  %v4199_v29 = vpop.permute.xlu0 %4198  ;;  %v5924_v57 = vld [vmem:[%s10974_s3 + $0x230] sm:$0xff]  ;;  %v12080_v38 = vmax.f32 %v12079_v39, 0.0 }
 0x2aa   : > { %v4934_v36 = vadd.f32 %v4933_v21, %v4685_v27  ;;  %v5067_v5 = vadd.f32 %v5066_v37, %v4686_v40  ;;  %v4688_v47 = vmul.f32 %v4191_v41, %v12074_v11  ;;  %v5925_v21 = vld [vmem:[%s10974_s3 + $0x238] sm:$0xff]  ;;  %v9707_v41 = vpop.f32.mrf.mxu1 }
 0x2ab   : > { %v4689_v19 = vmul.f32 %v4195_v9, %v12076_v44  ;;  %v4690_v34 = vmul.f32 %v4195_v9, %v12078_v53  ;;  %4442 = vperm.xlu1 %5643, %v5924_v57   ;;  %v4691_v11 = vmul.f32 %v4199_v29, %v12080_v38  ;;  %v12081_v9 = vld [vmem:[#allocation170_spill] sm:$0xff]  ;;  %v4203_v49 = vpop.permute.xlu1 %4202  ;;  %v12083_v53 = vld [vmem:[#allocation171_spill] sm:$0xff]  ;;  %v12087_v38 = vld [vmem:[#allocation173_spill] sm:$0xff] }
 0x2ac   : > { %v4935_v40 = vadd.f32 %v4934_v36, %v4687_v60  ;;  %v5068_v27 = vadd.f32 %v5067_v5, %v4688_v47  ;;  %v12082_v16 = vmax.f32 %v12081_v9, 0.0  ;;  %v12084_v57 = vmax.f32 %v12083_v53, 0.0  ;;  %v12085_v5 = vld [vmem:[#allocation172_spill] sm:$0xff] }
 0x2ad   : > { %4446 = vperm.xlu0 %5642, %v5925_v21   ;;  %v12086_v60 = vmax.f32 %v12085_v5, 0.0  ;;  %v4207_v22 = vpop.permute.xlu0 %4206  ;;  %v5926_v21 = vld [vmem:[%s10974_s3 + $0x240] sm:$0xff]  ;;  %v12088_v9 = vmax.f32 %v12087_v38, 0.0 }
 0x2ae   : > { %v4936_v37 = vadd.f32 %v4935_v40, %v4689_v19  ;;  %v5069_v51 = vadd.f32 %v5068_v27, %v4690_v34  ;;  %v4692_v44 = vmul.f32 %v4199_v29, %v12082_v16  ;;  %v4693_v36 = vmul.f32 %v4203_v49, %v12084_v57  ;;  %v5927_v40 = vld [vmem:[%s10974_s3 + $0x248] sm:$0xff]  ;;  %v9723_v29 = vpop.f32.mrf.mxu1 }
 0x2af   : > { %v4694_v47 = vmul.f32 %v4203_v49, %v12086_v60  ;;  %4450 = vperm.xlu1 %5643, %v5926_v21   ;;  %v4695_v16 = vmul.f32 %v4207_v22, %v12088_v9  ;;  %v12089_v49 = vld [vmem:[#allocation174_spill] sm:$0xff]  ;;  %v4211_v5 = vpop.permute.xlu1 %4210  ;;  %v12091_v60 = vld [vmem:[#allocation175_spill] sm:$0xff]  ;;  %v12095_v9 = vld [vmem:[#allocation177_spill] sm:$0xff] }
 0x2b0   : > { %v4937_v19 = vadd.f32 %v4936_v37, %v4691_v11  ;;  %v5070_v34 = vadd.f32 %v5069_v51, %v4692_v44  ;;  %v12090_v53 = vmax.f32 %v12089_v49, 0.0  ;;  %v12092_v21 = vmax.f32 %v12091_v60, 0.0  ;;  %v12093_v51 = vld [vmem:[#allocation176_spill] sm:$0xff] }
 0x2b1   : > { %4454 = vperm.xlu0 %5642, %v5927_v40   ;;  %v12094_v11 = vmax.f32 %v12093_v51, 0.0  ;;  %v4215_v2 = vpop.permute.xlu0 %4214  ;;  %v5928_v40 = vld [vmem:[%s10974_s3 + $0x250] sm:$0xff]  ;;  %v12096_v49 = vmax.f32 %v12095_v9, 0.0 }
 0x2b2   : > { %v4938_v27 = vadd.f32 %v4937_v19, %v4693_v36  ;;  %v5071_v39 = vadd.f32 %v5070_v34, %v4694_v47  ;;  %v4696_v57 = vmul.f32 %v4207_v22, %v12090_v53  ;;  %v4697_v37 = vmul.f32 %v4211_v5, %v12092_v21  ;;  %v5929_v19 = vld [vmem:[%s10974_s3 + $0x258] sm:$0xff]  ;;  %v9739_v22 = vpop.f32.mrf.mxu1 }
 0x2b3   : > { %v4698_v44 = vmul.f32 %v4211_v5, %v12094_v11  ;;  %4458 = vperm.xlu1 %5643, %v5928_v40   ;;  %v4699_v53 = vmul.f32 %v4215_v2, %v12096_v49  ;;  %v12097_v5 = vld [vmem:[#allocation178_spill] sm:$0xff]  ;;  %v4219_v51 = vpop.permute.xlu1 %4218  ;;  %v12099_v11 = vld [vmem:[#allocation179_spill] sm:$0xff]  ;;  %v12103_v49 = vld [vmem:[#allocation181_spill] sm:$0xff] }
 0x2b4   : > { %v4939_v36 = vadd.f32 %v4938_v27, %v4695_v16  ;;  %v5072_v47 = vadd.f32 %v5071_v39, %v4696_v57  ;;  %v12098_v60 = vmax.f32 %v12097_v5, 0.0  ;;  %v12100_v40 = vmax.f32 %v12099_v11, 0.0  ;;  %v12101_v39 = vld [vmem:[#allocation180_spill] sm:$0xff] }
 0x2b5   : > { %4462 = vperm.xlu0 %5642, %v5929_v19   ;;  %v12102_v16 = vmax.f32 %v12101_v39, 0.0  ;;  %v4223_v23 = vpop.permute.xlu0 %4222  ;;  %v5930_v19 = vld [vmem:[%s10974_s3 + $0x260] sm:$0xff]  ;;  %v12104_v5 = vmax.f32 %v12103_v49, 0.0 }
 0x2b6   : > { %v4940_v34 = vadd.f32 %v4939_v36, %v4697_v37  ;;  %v5073_v38 = vadd.f32 %v5072_v47, %v4698_v44  ;;  %v4700_v21 = vmul.f32 %v4215_v2, %v12098_v60  ;;  %v4701_v27 = vmul.f32 %v4219_v51, %v12100_v40  ;;  %v5931_v36 = vld [vmem:[%s10974_s3 + $0x268] sm:$0xff]  ;;  %v9755_v2 = vpop.f32.mrf.mxu1 }
 0x2b7   : > { %v4702_v57 = vmul.f32 %v4219_v51, %v12102_v16  ;;  %4466 = vperm.xlu1 %5643, %v5930_v19   ;;  %v4703_v60 = vmul.f32 %v4223_v23, %v12104_v5  ;;  %v12105_v51 = vld [vmem:[#allocation182_spill] sm:$0xff]  ;;  %v4227_v39 = vpop.permute.xlu1 %4226  ;;  %v12107_v16 = vld [vmem:[#allocation183_spill] sm:$0xff]  ;;  %v12111_v5 = vld [vmem:[#allocation185_spill] sm:$0xff] }
 0x2b8   : > { %v4941_v37 = vadd.f32 %v4940_v34, %v4699_v53  ;;  %v5074_v44 = vadd.f32 %v5073_v38, %v4700_v21  ;;  %v12106_v11 = vmax.f32 %v12105_v51, 0.0  ;;  %v12108_v19 = vmax.f32 %v12107_v16, 0.0  ;;  %v12109_v38 = vld [vmem:[#allocation184_spill] sm:$0xff] }
 0x2b9   : > { %4470 = vperm.xlu0 %5642, %v5931_v36   ;;  %v12110_v53 = vmax.f32 %v12109_v38, 0.0  ;;  %v4231_v13 = vpop.permute.xlu0 %4230  ;;  %v5932_v36 = vld [vmem:[%s10974_s3 + $0x270] sm:$0xff]  ;;  %v12112_v51 = vmax.f32 %v12111_v5, 0.0 }
 0x2ba   : > { %v4942_v47 = vadd.f32 %v4941_v37, %v4701_v27  ;;  %v5075_v9 = vadd.f32 %v5074_v44, %v4702_v57  ;;  %v4704_v40 = vmul.f32 %v4223_v23, %v12106_v11  ;;  %v4705_v34 = vmul.f32 %v4227_v39, %v12108_v19  ;;  %v5933_v37 = vld [vmem:[%s10974_s3 + $0x278] sm:$0xff]  ;;  %v9771_v23 = vpop.f32.mrf.mxu1 }
 0x2bb   : > { %v4706_v21 = vmul.f32 %v4227_v39, %v12110_v53  ;;  %4474 = vperm.xlu1 %5643, %v5932_v36   ;;  %v4707_v11 = vmul.f32 %v4231_v13, %v12112_v51  ;;  %v12113_v39 = vld [vmem:[#allocation106_spill] sm:$0xff]  ;;  %v4235_v38 = vpop.permute.xlu1 %4234  ;;  %v12115_v53 = vld [vmem:[#allocation3_spill] sm:$0xff] }
 0x2bc   : > { %v4943_v27 = vadd.f32 %v4942_v47, %v4703_v60  ;;  %v5076_v57 = vadd.f32 %v5075_v9, %v4704_v40  ;;  %v12114_v16 = vmax.f32 %v12113_v39, 0.0  ;;  %v12116_v36 = vmax.f32 %v12115_v53, 0.0  ;;  %v12117_v9 = vld [vmem:[#allocation109_spill] sm:$0xff]  ;;  %v12119_v51 = vld [vmem:[#allocation110_spill] sm:$0xff] }
 0x2bd   : > { %4478 = vperm.xlu0 %5642, %v5933_v37   ;;  %v12118_v60 = vmax.f32 %v12117_v9, 0.0  ;;  %v4239_v1 = vpop.permute.xlu0 %4238  ;;  %v5934_v37 = vld [vmem:[%s10974_s3 + $0x280] sm:$0xff]  ;;  %v12120_v39 = vmax.f32 %v12119_v51, 0.0 }
 0x2be   : > { %v4944_v44 = vadd.f32 %v4943_v27, %v4705_v34  ;;  %v5077_v49 = vadd.f32 %v5076_v57, %v4706_v21  ;;  %v4708_v19 = vmul.f32 %v4231_v13, %v12114_v16  ;;  %v4709_v47 = vmul.f32 %v4235_v38, %v12116_v36  ;;  %v5935_v27 = vld [vmem:[%s10974_s3 + $0x288] sm:$0xff]  ;;  %v9787_v13 = vpop.f32.mrf.mxu1 }
 0x2bf   : > { %v4710_v40 = vmul.f32 %v4235_v38, %v12118_v60  ;;  %4482 = vperm.xlu1 %5643, %v5934_v37   ;;  %v4711_v16 = vmul.f32 %v4239_v1, %v12120_v39  ;;  %v12121_v38 = vld [vmem:[#allocation2_spill] sm:$0xff]  ;;  %v4243_v9 = vpop.permute.xlu1 %4242  ;;  %v12123_v60 = vld [vmem:[#allocation113_spill] sm:$0xff] }
 0x2c0   : > { %v4945_v34 = vadd.f32 %v4944_v44, %v4707_v11  ;;  %v5078_v21 = vadd.f32 %v5077_v49, %v4708_v19  ;;  %v12122_v53 = vmax.f32 %v12121_v38, 0.0  ;;  %v12124_v37 = vmax.f32 %v12123_v60, 0.0  ;;  %v12125_v49 = vld [vmem:[#allocation114_spill] sm:$0xff]  ;;  %v12127_v39 = vld [vmem:[#allocation5_spill] sm:$0xff] }
 0x2c1   : > { %4486 = vperm.xlu0 %5642, %v5935_v27   ;;  %v12126_v11 = vmax.f32 %v12125_v49, 0.0  ;;  %v4247_v25 = vpop.permute.xlu0 %4246  ;;  %v5936_v27 = vld [vmem:[%s10974_s3 + $0x290] sm:$0xff]  ;;  %v12128_v38 = vmax.f32 %v12127_v39, 0.0 }
 0x2c2   : > { %v4946_v57 = vadd.f32 %v4945_v34, %v4709_v47  ;;  %v5079_v5 = vadd.f32 %v5078_v21, %v4710_v40  ;;  %v4712_v36 = vmul.f32 %v4239_v1, %v12122_v53  ;;  %v4713_v44 = vmul.f32 %v4243_v9, %v12124_v37  ;;  %v5937_v34 = vld [vmem:[%s10974_s3 + $0x298] sm:$0xff]  ;;  %v9803_v1 = vpop.f32.mrf.mxu1 }
 0x2c3   : > { %v4714_v19 = vmul.f32 %v4243_v9, %v12126_v11  ;;  %4490 = vperm.xlu1 %5643, %v5936_v27   ;;  %v4715_v53 = vmul.f32 %v4247_v25, %v12128_v38  ;;  %v12129_v9 = vld [vmem:[#allocation117_spill] sm:$0xff]  ;;  %v4251_v49 = vpop.permute.xlu1 %4250  ;;  %v12131_v11 = vld [vmem:[#allocation118_spill] sm:$0xff] }
 0x2c4   : > { %v4947_v47 = vadd.f32 %v4946_v57, %v4711_v16  ;;  %v5080_v40 = vadd.f32 %v5079_v5, %v4712_v36  ;;  %v12130_v60 = vmax.f32 %v12129_v9, 0.0  ;;  %v12132_v27 = vmax.f32 %v12131_v11, 0.0  ;;  %v12133_v5 = vld [vmem:[#allocation4_spill] sm:$0xff]  ;;  %v12135_v38 = vld [vmem:[#allocation121_spill] sm:$0xff] }
 0x2c5   : > { %4494 = vperm.xlu0 %5642, %v5937_v34   ;;  %v12134_v16 = vmax.f32 %v12133_v5, 0.0  ;;  %v4255_v54 = vpop.permute.xlu0 %4254  ;;  %v5938_v34 = vld [vmem:[%s10974_s3 + $0x2a0] sm:$0xff]  ;;  %v12136_v9 = vmax.f32 %v12135_v38, 0.0 }
 0x2c6   : > { %v4948_v21 = vadd.f32 %v4947_v47, %v4713_v44  ;;  %v5081_v51 = vadd.f32 %v5080_v40, %v4714_v19  ;;  %v4716_v37 = vmul.f32 %v4247_v25, %v12130_v60  ;;  %v4717_v57 = vmul.f32 %v4251_v49, %v12132_v27  ;;  %v5939_v47 = vld [vmem:[%s10974_s3 + $0x2a8] sm:$0xff]  ;;  %v9819_v25 = vpop.f32.mrf.mxu1 }
 0x2c7   : > { %v4718_v36 = vmul.f32 %v4251_v49, %v12134_v16  ;;  %4498 = vperm.xlu1 %5643, %v5938_v34   ;;  %v4719_v60 = vmul.f32 %v4255_v54, %v12136_v9  ;;  %v12137_v49 = vld [vmem:[#allocation122_spill] sm:$0xff]  ;;  %v4259_v5 = vpop.permute.xlu1 %4258  ;;  %v12139_v16 = vld [vmem:[#allocation125_spill] sm:$0xff] }
 0x2c8   : > { %v4949_v44 = vadd.f32 %v4948_v21, %v4715_v53  ;;  %v5082_v19 = vadd.f32 %v5081_v51, %v4716_v37  ;;  %v12138_v11 = vmax.f32 %v12137_v49, 0.0  ;;  %v12140_v34 = vmax.f32 %v12139_v16, 0.0  ;;  %v12141_v51 = vld [vmem:[#allocation126_spill] sm:$0xff] }
 0x2c9   : > { %4502 = vperm.xlu0 %5642, %v5939_v47   ;;  %v12142_v53 = vmax.f32 %v12141_v51, 0.0  ;;  %v4263_v17 = vpop.permute.xlu0 %4262  ;;  %v5940_v47 = vld [vmem:[%s10974_s3 + $0x2b0] sm:$0xff]  ;;  %v12143_v9 = vld [vmem:[#allocation6_spill] sm:$0xff] }
 0x2ca   : > { %v4950_v40 = vadd.f32 %v4949_v44, %v4717_v57  ;;  %v5083_v39 = vadd.f32 %v5082_v19, %v4718_v36  ;;  %v4720_v27 = vmul.f32 %v4255_v54, %v12138_v11  ;;  %v4721_v21 = vmul.f32 %v4259_v5, %v12140_v34  ;;  %v5941_v44 = vld [vmem:[%s10974_s3 + $0x2b8] sm:$0xff]  ;;  %v9835_v54 = vpop.f32.mrf.mxu1 }
 0x2cb   : > { %v4722_v37 = vmul.f32 %v4259_v5, %v12142_v53  ;;  %4506 = vperm.xlu1 %5643, %v5940_v47   ;;  %v12144_v49 = vmax.f32 %v12143_v9, 0.0  ;;  %v12145_v5 = vld [vmem:[#allocation129_spill] sm:$0xff]  ;;  %v4267_v51 = vpop.permute.xlu1 %4266 }
 0x2cc   : > { %v4951_v57 = vadd.f32 %v4950_v40, %v4719_v60  ;;  %v5084_v36 = vadd.f32 %v5083_v39, %v4720_v27  ;;  %v12146_v16 = vmax.f32 %v12145_v5, 0.0  ;;  %v12147_v53 = vld [vmem:[#allocation9_spill] sm:$0xff] }
 0x2cd   : > { %4510 = vperm.xlu0 %5642, %v5941_v44   ;;  %v4723_v11 = vmul.f32 %v4263_v17, %v12144_v49  ;;  %v12148_v47 = vmax.f32 %v12147_v53, 0.0  ;;  %v12149_v39 = vld [vmem:[#allocation133_spill] sm:$0xff]  ;;  %v4271_v18 = vpop.permute.xlu0 %4270  ;;  %v5942_v44 = vld [vmem:[%s10974_s3 + $0x2c0] sm:$0xff] }
 0x2ce   : > { %v4952_v19 = vadd.f32 %v4951_v57, %v4721_v21  ;;  %v5085_v38 = vadd.f32 %v5084_v36, %v4722_v37  ;;  %v4724_v34 = vmul.f32 %v4263_v17, %v12146_v16  ;;  %v12150_v60 = vmax.f32 %v12149_v39, 0.0  ;;  %v5943_v57 = vld [vmem:[%s10974_s3 + $0x2c8] sm:$0xff]  ;;  %v9851_v17 = vpop.f32.mrf.mxu1  ;;  %v12151_v49 = vld [vmem:[#allocation134_spill] sm:$0xff] }
 0x2cf   : > { %v4725_v40 = vmul.f32 %v4267_v51, %v12148_v47  ;;  %4514 = vperm.xlu1 %5643, %v5942_v44   ;;  %v12152_v5 = vmax.f32 %v12151_v49, 0.0  ;;  %v4275_v39 = vpop.permute.xlu1 %4274 }
 0x2d0   : > { %v4726_v27 = vmul.f32 %v4267_v51, %v12150_v60  ;;  %v4953_v21 = vadd.f32 %v4952_v19, %v4723_v11  ;;  %v5086_v37 = vadd.f32 %v5085_v38, %v4724_v34  ;;  %v12153_v51 = vld [vmem:[#allocation8_spill] sm:$0xff]  ;;  %v12155_v60 = vld [vmem:[#allocation138_spill] sm:$0xff]  ;;  %v12157_v38 = vld [vmem:[#allocation11_spill] sm:$0xff] }
 0x2d1   : > { %4518 = vperm.xlu0 %5642, %v5943_v57   ;;  %v4727_v16 = vmul.f32 %v4271_v18, %v12152_v5  ;;  %v12154_v53 = vmax.f32 %v12153_v51, 0.0  ;;  %v12156_v44 = vmax.f32 %v12155_v60, 0.0  ;;  %v12158_v11 = vmax.f32 %v12157_v38, 0.0  ;;  %v5944_v57 = vld [vmem:[%s10974_s3 + $0x2d0] sm:$0xff]  ;;  %v12159_v5 = vld [vmem:[#allocation141_spill] sm:$0xff] }
 0x2d2   : > { %v4954_v36 = vadd.f32 %v4953_v21, %v4725_v40  ;;  %v5087_v9 = vadd.f32 %v5086_v37, %v4726_v27  ;;  %v4279_v14 = vpop.permute.xlu0 %4278  ;;  %v5945_v21 = vld [vmem:[%s10974_s3 + $0x2d8] sm:$0xff]  ;;  %v12160_v51 = vmax.f32 %v12159_v5, 0.0 }
 0x2d3   : > { %v4728_v47 = vmul.f32 %v4271_v18, %v12154_v53  ;;  %v4729_v19 = vmul.f32 %v4275_v39, %v12156_v44  ;;  %v4730_v34 = vmul.f32 %v4275_v39, %v12158_v11  ;;  %4522 = vperm.xlu1 %5643, %v5944_v57   ;;  %v9867_v18 = vpop.f32.mrf.mxu1  ;;  %v12161_v39 = vld [vmem:[#allocation142_spill] sm:$0xff]  ;;  %v4283_v38 = vpop.permute.xlu1 %4282 }
 0x2d4   : > { %v4955_v40 = vadd.f32 %v4954_v36, %v4727_v16  ;;  %v4731_v53 = vmul.f32 %v4279_v14, %v12160_v51  ;;  %v12162_v60 = vmax.f32 %v12161_v39, 0.0  ;;  %v12163_v11 = vld [vmem:[#allocation10_spill] sm:$0xff] }
 0x2d5   : > { %v5088_v27 = vadd.f32 %v5087_v9, %v4728_v47  ;;  %4526 = vperm.xlu0 %5642, %v5945_v21   ;;  %v12164_v57 = vmax.f32 %v12163_v11, 0.0  ;;  %v12165_v9 = vld [vmem:[#allocation145_spill] sm:$0xff]  ;;  %v5946_v21 = vld [vmem:[%s10974_s3 + $0x2e0] sm:$0xff] }
 0x2d6   : > { %v4956_v37 = vadd.f32 %v4955_v40, %v4729_v19  ;;  %v4732_v44 = vmul.f32 %v4279_v14, %v12162_v60  ;;  %v12166_v16 = vmax.f32 %v12165_v9, 0.0  ;;  %v4287_v62 = vpop.permute.xlu0 %4286  ;;  %v5947_v40 = vld [vmem:[%s10974_s3 + $0x2e8] sm:$0xff]  ;;  %v9883_v14 = vpop.f32.mrf.mxu1  ;;  %v12168_v51 = vld [vmem:[#allocation150_spill] sm:$0xff] }
 0x2d7   : > { %v5089_v49 = vadd.f32 %v5088_v27, %v4730_v34  ;;  %v4733_v36 = vmul.f32 %v4283_v38, %v12164_v57  ;;  %4530 = vperm.xlu1 %5643, %v5946_v21   ;;  %12167 = vst [vmem:[#allocation148_spill] sm:$0xff] %v9883_v14  ;;  %v12169_v39 = vmax.f32 %v12168_v51, 0.0  ;;  %v4291_v9 = vpop.permute.xlu1 %4290 }
 0x2d8   : > { %v4734_v47 = vmul.f32 %v4283_v38, %v12166_v16  ;;  %v4957_v19 = vadd.f32 %v4956_v37, %v4731_v53  ;;  %v12170_v38 = vld [vmem:[#allocation13_spill] sm:$0xff] }
 0x2d9   : > { %v5090_v34 = vadd.f32 %v5089_v49, %v4732_v44  ;;  %4534 = vperm.xlu0 %5642, %v5947_v40   ;;  %v4735_v60 = vmul.f32 %v4287_v62, %v12169_v39  ;;  %v12171_v11 = vmax.f32 %v12170_v38, 0.0  ;;  %v12172_v16 = vld [vmem:[#allocation153_spill] sm:$0xff]  ;;  %v12174_v49 = vld [vmem:[#allocation156_spill] sm:$0xff] }
 0x2da   : > { %v4958_v27 = vadd.f32 %v4957_v19, %v4733_v36  ;;  %v12173_v21 = vmax.f32 %v12172_v16, 0.0  ;;  %v12175_v53 = vmax.f32 %v12174_v49, 0.0  ;;  %v5948_v40 = vld [vmem:[%s10974_s3 + $0x2f0] sm:$0xff]  ;;  %v5949_v19 = vld [vmem:[%s10974_s3 + $0x2f8] sm:$0xff] }
 0x2db   : > { %v5091_v5 = vadd.f32 %v5090_v34, %v4734_v47  ;;  %v4736_v57 = vmul.f32 %v4287_v62, %v12171_v11  ;;  %v4295_v35 = vpop.permute.xlu0 %4294  ;;  %4538 = vperm.xlu1 %5643, %v5948_v40   ;;  %v9899_v62 = vpop.f32.mrf.mxu1  ;;  %v12177_v39 = vld [vmem:[#allocation12_spill] sm:$0xff] }
 0x2dc   : > { %v4737_v37 = vmul.f32 %v4291_v9, %v12173_v21  ;;  %v4738_v44 = vmul.f32 %v4291_v9, %v12175_v53  ;;  %v4959_v36 = vadd.f32 %v4958_v27, %v4735_v60  ;;  %12176 = vst [vmem:[#allocation149_spill] sm:$0xff] %v9899_v62  ;;  %v12178_v38 = vmax.f32 %v12177_v39, 0.0  ;;  %v12179_v9 = vld [vmem:[#allocation15_spill] sm:$0xff]  ;;  %v4299_v49 = vpop.permute.xlu1 %4298  ;;  %v12181_v53 = vld [vmem:[#allocation14_spill] sm:$0xff] }
 0x2dd   : > { %v5092_v47 = vadd.f32 %v5091_v5, %v4736_v57  ;;  %4542 = vperm.xlu0 %5642, %v5949_v19   ;;  %v12180_v16 = vmax.f32 %v12179_v9, 0.0  ;;  %v12182_v40 = vmax.f32 %v12181_v53, 0.0  ;;  %v12183_v5 = vld [vmem:[#allocation17_spill] sm:$0xff]  ;;  %v5950_v19 = vld [vmem:[%s10974_s3 + $0x300] sm:$0xff] }
 0x2de   : > { %v4960_v34 = vadd.f32 %v4959_v36, %v4737_v37  ;;  %v4739_v11 = vmul.f32 %v4295_v35, %v12178_v38  ;;  %v12184_v60 = vmax.f32 %v12183_v5, 0.0  ;;  %v5951_v36 = vld [vmem:[%s10974_s3 + $0x308] sm:$0xff]  ;;  %v12186_v38 = vld [vmem:[#allocation16_spill] sm:$0xff] }
 0x2df   : > { %v5093_v51 = vadd.f32 %v5092_v47, %v4738_v44  ;;  %v4740_v21 = vmul.f32 %v4295_v35, %v12180_v16  ;;  %v4741_v27 = vmul.f32 %v4299_v49, %v12182_v40  ;;  %4546 = vperm.xlu1 %5643, %v5950_v19   ;;  %v9915_v35 = vpop.f32.mrf.mxu1  ;;  %v12187_v9 = vmax.f32 %v12186_v38, 0.0 }
 0x2e0   : > { %v4742_v57 = vmul.f32 %v4299_v49, %v12184_v60  ;;  %v4303_v14 = vpop.permute.xlu0 %4302  ;;  %v4961_v37 = vadd.f32 %v4960_v34, %v4739_v11  ;;  %12185 = vst [vmem:[#allocation146_spill] sm:$0xff] %v9915_v35  ;;  %v12188_v49 = vld [vmem:[#allocation19_spill] sm:$0xff]  ;;  %v12190_v60 = vld [vmem:[#allocation18_spill] sm:$0xff] }
 0x2e1   : > { %v5094_v44 = vadd.f32 %v5093_v51, %v4740_v21  ;;  %4550 = vperm.xlu0 %5642, %v5951_v36   ;;  %v4743_v16 = vmul.f32 %v4303_v14, %v12187_v9  ;;  %v12189_v53 = vmax.f32 %v12188_v49, 0.0  ;;  %v12191_v19 = vmax.f32 %v12190_v60, 0.0  ;;  %v12192_v51 = vld [vmem:[#allocation21_spill] sm:$0xff]  ;;  %v5952_v36 = vld [vmem:[%s10974_s3 + $0x310] sm:$0xff] }
 0x2e2   : > { %v4962_v47 = vadd.f32 %v4961_v37, %v4741_v27  ;;  %v4307_v5 = vpop.permute.xlu1 %4306  ;;  %v12193_v11 = vmax.f32 %v12192_v51, 0.0  ;;  %v5953_v37 = vld [vmem:[%s10974_s3 + $0x318] sm:$0xff]  ;;  %v12195_v9 = vld [vmem:[#allocation20_spill] sm:$0xff] }
 0x2e3   : > { %v5095_v39 = vadd.f32 %v5094_v44, %v4742_v57  ;;  %v4744_v40 = vmul.f32 %v4303_v14, %v12189_v53  ;;  %v4745_v34 = vmul.f32 %v4307_v5, %v12191_v19  ;;  %4554 = vperm.xlu1 %5643, %v5952_v36   ;;  %v9931_v14 = vpop.f32.mrf.mxu1  ;;  %v12196_v49 = vmax.f32 %v12195_v9, 0.0 }
 0x2e4   : > { %v4746_v21 = vmul.f32 %v4307_v5, %v12193_v11  ;;  %v4311_v62 = vpop.permute.xlu0 %4310  ;;  %v4963_v27 = vadd.f32 %v4962_v47, %v4743_v16  ;;  %12194 = vst [vmem:[#allocation147_spill] sm:$0xff] %v9931_v14  ;;  %v12197_v5 = vld [vmem:[#allocation186_spill] sm:$0xff]  ;;  %v12199_v11 = vld [vmem:[#allocation23_spill] sm:$0xff] }
 0x2e5   : > { %v5096_v57 = vadd.f32 %v5095_v39, %v4744_v40  ;;  %4558 = vperm.xlu0 %5642, %v5953_v37   ;;  %v4747_v53 = vmul.f32 %v4311_v62, %v12196_v49  ;;  %v12198_v60 = vmax.f32 %v12197_v5, 0.0  ;;  %v12200_v36 = vmax.f32 %v12199_v11, 0.0  ;;  %v12201_v39 = vld [vmem:[#allocation187_spill] sm:$0xff]  ;;  %v5954_v37 = vld [vmem:[%s10974_s3 + $0x320] sm:$0xff] }
 0x2e6   : > { %v4964_v44 = vadd.f32 %v4963_v27, %v4745_v34  ;;  %v4315_v51 = vpop.permute.xlu1 %4314  ;;  %v12202_v16 = vmax.f32 %v12201_v39, 0.0  ;;  %v5955_v27 = vld [vmem:[%s10974_s3 + $0x328] sm:$0xff]  ;;  %v12204_v49 = vld [vmem:[#allocation22_spill] sm:$0xff] }
 0x2e7   : > { %v5097_v38 = vadd.f32 %v5096_v57, %v4746_v21  ;;  %v4748_v19 = vmul.f32 %v4311_v62, %v12198_v60  ;;  %v4749_v47 = vmul.f32 %v4315_v51, %v12200_v36  ;;  %4562 = vperm.xlu1 %5643, %v5954_v37   ;;  %v9947_v62 = vpop.f32.mrf.mxu1  ;;  %v12205_v5 = vmax.f32 %v12204_v49, 0.0 }
 0x2e8   : > { %v4750_v40 = vmul.f32 %v4315_v51, %v12202_v16  ;;  %v4319_v35 = vpop.permute.xlu0 %4318  ;;  %v4965_v34 = vadd.f32 %v4964_v44, %v4747_v53  ;;  %12203 = vst [vmem:[#allocation154_spill] sm:$0xff] %v9947_v62  ;;  %v12206_v51 = vld [vmem:[#allocation188_spill] sm:$0xff]  ;;  %v12208_v16 = vld [vmem:[#allocation25_spill] sm:$0xff] }
 0x2e9   : > { %v5098_v21 = vadd.f32 %v5097_v38, %v4748_v19  ;;  %4566 = vperm.xlu0 %5642, %v5955_v27   ;;  %v4751_v60 = vmul.f32 %v4319_v35, %v12205_v5  ;;  %v12207_v11 = vmax.f32 %v12206_v51, 0.0  ;;  %v12209_v37 = vmax.f32 %v12208_v16, 0.0  ;;  %v12210_v38 = vld [vmem:[#allocation189_spill] sm:$0xff]  ;;  %v5956_v27 = vld [vmem:[%s10974_s3 + $0x330] sm:$0xff] }
 0x2ea   : > { %v4966_v57 = vadd.f32 %v4965_v34, %v4749_v47  ;;  %v4323_v39 = vpop.permute.xlu1 %4322  ;;  %v12211_v53 = vmax.f32 %v12210_v38, 0.0  ;;  %v5957_v34 = vld [vmem:[%s10974_s3 + $0x338] sm:$0xff]  ;;  %v12213_v5 = vld [vmem:[#allocation24_spill] sm:$0xff] }
 0x2eb   : > { %v5099_v9 = vadd.f32 %v5098_v21, %v4750_v40  ;;  %v4752_v36 = vmul.f32 %v4319_v35, %v12207_v11  ;;  %v4753_v44 = vmul.f32 %v4323_v39, %v12209_v37  ;;  %4570 = vperm.xlu1 %5643, %v5956_v27   ;;  %v9963_v35 = vpop.f32.mrf.mxu1  ;;  %v12214_v51 = vmax.f32 %v12213_v5, 0.0 }
 0x2ec   : > { %v4754_v19 = vmul.f32 %v4323_v39, %v12211_v53  ;;  %v4327_v14 = vpop.permute.xlu0 %4326  ;;  %v4967_v47 = vadd.f32 %v4966_v57, %v4751_v60  ;;  %12212 = vst [vmem:[#allocation155_spill] sm:$0xff] %v9963_v35  ;;  %v12215_v39 = vld [vmem:[#allocation190_spill] sm:$0xff]  ;;  %v12217_v53 = vld [vmem:[#allocation27_spill] sm:$0xff] }
 0x2ed   : > { %v5100_v40 = vadd.f32 %v5099_v9, %v4752_v36  ;;  %4574 = vperm.xlu0 %5642, %v5957_v34   ;;  %v4755_v11 = vmul.f32 %v4327_v14, %v12214_v51  ;;  %v12216_v16 = vmax.f32 %v12215_v39, 0.0  ;;  %v12218_v27 = vmax.f32 %v12217_v53, 0.0  ;;  %v12219_v9 = vld [vmem:[#allocation191_spill] sm:$0xff]  ;;  %v5958_v34 = vld [vmem:[%s10974_s3 + $0x340] sm:$0xff] }
 0x2ee   : > { %v4968_v21 = vadd.f32 %v4967_v47, %v4753_v44  ;;  %v4331_v38 = vpop.permute.xlu1 %4330  ;;  %v12220_v60 = vmax.f32 %v12219_v9, 0.0  ;;  %v5959_v47 = vld [vmem:[%s10974_s3 + $0x348] sm:$0xff]  ;;  %v12222_v51 = vld [vmem:[#allocation26_spill] sm:$0xff] }
 0x2ef   : > { %v5101_v49 = vadd.f32 %v5100_v40, %v4754_v19  ;;  %v4756_v37 = vmul.f32 %v4327_v14, %v12216_v16  ;;  %v4757_v57 = vmul.f32 %v4331_v38, %v12218_v27  ;;  %4578 = vperm.xlu1 %5643, %v5958_v34   ;;  %v9979_v14 = vpop.f32.mrf.mxu1  ;;  %v12223_v39 = vmax.f32 %v12222_v51, 0.0 }
 0x2f0   : > { %v4758_v36 = vmul.f32 %v4331_v38, %v12220_v60  ;;  %v4335_v62 = vpop.permute.xlu0 %4334  ;;  %v4969_v44 = vadd.f32 %v4968_v21, %v4755_v11  ;;  %12221 = vst [vmem:[#allocation157_spill] sm:$0xff] %v9979_v14  ;;  %v12224_v38 = vld [vmem:[#allocation192_spill] sm:$0xff]  ;;  %v12226_v60 = vld [vmem:[#allocation29_spill] sm:$0xff] }
 0x2f1   : > { %v5102_v19 = vadd.f32 %v5101_v49, %v4756_v37  ;;  %4582 = vperm.xlu0 %5642, %v5959_v47   ;;  %v4759_v16 = vmul.f32 %v4335_v62, %v12223_v39  ;;  %v12225_v53 = vmax.f32 %v12224_v38, 0.0  ;;  %v12227_v34 = vmax.f32 %v12226_v60, 0.0  ;;  %v12228_v49 = vld [vmem:[#allocation193_spill] sm:$0xff]  ;;  %v5960_v47 = vld [vmem:[%s10974_s3 + $0x350] sm:$0xff] }
 0x2f2   : > { %v4970_v40 = vadd.f32 %v4969_v44, %v4757_v57  ;;  %v4339_v9 = vpop.permute.xlu1 %4338  ;;  %v12229_v11 = vmax.f32 %v12228_v49, 0.0  ;;  %v5961_v44 = vld [vmem:[%s10974_s3 + $0x358] sm:$0xff]  ;;  %v12231_v39 = vld [vmem:[#allocation28_spill] sm:$0xff] }
 0x2f3   : > { %v5103_v5 = vadd.f32 %v5102_v19, %v4758_v36  ;;  %v4760_v27 = vmul.f32 %v4335_v62, %v12225_v53  ;;  %v4761_v21 = vmul.f32 %v4339_v9, %v12227_v34  ;;  %4586 = vperm.xlu1 %5643, %v5960_v47   ;;  %v9995_v62 = vpop.f32.mrf.mxu1  ;;  %v12232_v38 = vmax.f32 %v12231_v39, 0.0 }
 0x2f4   : > { %v4762_v37 = vmul.f32 %v4339_v9, %v12229_v11  ;;  %v4343_v35 = vpop.permute.xlu0 %4342  ;;  %v4971_v57 = vadd.f32 %v4970_v40, %v4759_v16  ;;  %12230 = vst [vmem:[#allocation158_spill] sm:$0xff] %v9995_v62  ;;  %v12233_v9 = vld [vmem:[#allocation194_spill] sm:$0xff]  ;;  %v12235_v11 = vld [vmem:[#allocation31_spill] sm:$0xff] }
 0x2f5   : > { %v5104_v36 = vadd.f32 %v5103_v5, %v4760_v27  ;;  %4590 = vperm.xlu0 %5642, %v5961_v44   ;;  %v4763_v53 = vmul.f32 %v4343_v35, %v12232_v38  ;;  %v12234_v60 = vmax.f32 %v12233_v9, 0.0  ;;  %v12236_v47 = vmax.f32 %v12235_v11, 0.0  ;;  %v12237_v5 = vld [vmem:[#allocation195_spill] sm:$0xff]  ;;  %v5962_v44 = vld [vmem:[%s10974_s3 + $0x360] sm:$0xff] }
 0x2f6   : > { %v4972_v19 = vadd.f32 %v4971_v57, %v4761_v21  ;;  %v4347_v49 = vpop.permute.xlu1 %4346  ;;  %v12238_v16 = vmax.f32 %v12237_v5, 0.0  ;;  %v5963_v57 = vld [vmem:[%s10974_s3 + $0x368] sm:$0xff]  ;;  %v12240_v38 = vld [vmem:[#allocation30_spill] sm:$0xff] }
 0x2f7   : > { %v5105_v51 = vadd.f32 %v5104_v36, %v4762_v37  ;;  %v4764_v34 = vmul.f32 %v4343_v35, %v12234_v60  ;;  %v4765_v40 = vmul.f32 %v4347_v49, %v12236_v47  ;;  %4594 = vperm.xlu1 %5643, %v5962_v44   ;;  %v10011_v35 = vpop.f32.mrf.mxu1  ;;  %v12241_v9 = vmax.f32 %v12240_v38, 0.0 }
 0x2f8   : > { %v4766_v27 = vmul.f32 %v4347_v49, %v12238_v16  ;;  %v4351_v14 = vpop.permute.xlu0 %4350  ;;  %v4973_v21 = vadd.f32 %v4972_v19, %v4763_v53  ;;  %12239 = vst [vmem:[#allocation159_spill] sm:$0xff] %v10011_v35  ;;  %v12242_v49 = vld [vmem:[#allocation196_spill] sm:$0xff]  ;;  %v12244_v16 = vld [vmem:[#allocation33_spill] sm:$0xff] }
 0x2f9   : > { %v5106_v37 = vadd.f32 %v5105_v51, %v4764_v34  ;;  %4598 = vperm.xlu0 %5642, %v5963_v57   ;;  %v4767_v60 = vmul.f32 %v4351_v14, %v12241_v9  ;;  %v12243_v11 = vmax.f32 %v12242_v49, 0.0  ;;  %v12245_v44 = vmax.f32 %v12244_v16, 0.0  ;;  %v12246_v51 = vld [vmem:[#allocation197_spill] sm:$0xff]  ;;  %v5964_v57 = vld [vmem:[%s10974_s3 + $0x370] sm:$0xff] }
 0x2fa   : > { %v4974_v36 = vadd.f32 %v4973_v21, %v4765_v40  ;;  %v4355_v5 = vpop.permute.xlu1 %4354  ;;  %v12247_v53 = vmax.f32 %v12246_v51, 0.0  ;;  %v5965_v21 = vld [vmem:[%s10974_s3 + $0x378] sm:$0xff]  ;;  %v12249_v9 = vld [vmem:[#allocation32_spill] sm:$0xff] }
 0x2fb   : > { %v5107_v39 = vadd.f32 %v5106_v37, %v4766_v27  ;;  %v4768_v47 = vmul.f32 %v4351_v14, %v12243_v11  ;;  %v4769_v19 = vmul.f32 %v4355_v5, %v12245_v44  ;;  %4602 = vperm.xlu1 %5643, %v5964_v57   ;;  %v10027_v14 = vpop.f32.mrf.mxu1  ;;  %v12250_v49 = vmax.f32 %v12249_v9, 0.0 }
 0x2fc   : > { %v4770_v34 = vmul.f32 %v4355_v5, %v12247_v53  ;;  %v4359_v62 = vpop.permute.xlu0 %4358  ;;  %v4975_v40 = vadd.f32 %v4974_v36, %v4767_v60  ;;  %12248 = vst [vmem:[#allocation160_spill] sm:$0xff] %v10027_v14  ;;  %v12251_v5 = vld [vmem:[#allocation198_spill] sm:$0xff]  ;;  %v12253_v53 = vld [vmem:[#allocation35_spill] sm:$0xff] }
 0x2fd   : > { %v5108_v27 = vadd.f32 %v5107_v39, %v4768_v47  ;;  %4606 = vperm.xlu0 %5642, %v5965_v21   ;;  %v4771_v11 = vmul.f32 %v4359_v62, %v12250_v49  ;;  %v12252_v16 = vmax.f32 %v12251_v5, 0.0  ;;  %v12254_v57 = vmax.f32 %v12253_v53, 0.0  ;;  %v12255_v39 = vld [vmem:[#allocation199_spill] sm:$0xff]  ;;  %v5966_v21 = vld [vmem:[%s10974_s3 + $0x380] sm:$0xff]  ;;  %v12259_v53 = vld [vmem:[#allocation200_spill] sm:$0xff] }
 0x2fe   : > { %v4976_v37 = vadd.f32 %v4975_v40, %v4769_v19  ;;  %v4363_v51 = vpop.permute.xlu1 %4362  ;;  %v12256_v60 = vmax.f32 %v12255_v39, 0.0  ;;  %v5967_v40 = vld [vmem:[%s10974_s3 + $0x388] sm:$0xff]  ;;  %v12257_v5 = vld [vmem:[#allocation34_spill] sm:$0xff] }
 0x2ff   : > { %v5109_v38 = vadd.f32 %v5108_v27, %v4770_v34  ;;  %v4772_v44 = vmul.f32 %v4359_v62, %v12252_v16  ;;  %v4773_v36 = vmul.f32 %v4363_v51, %v12254_v57  ;;  %4610 = vperm.xlu1 %5643, %v5966_v21   ;;  %v10045_v62 = vadd.f32 %v9561_v0, %v12017_v45  ;;  %v10047_v27 = vpop.f32.mrf.mxu1  ;;  %v5968_v0 = vld [vmem:[%s10974_s3 + $0x390] sm:$0xff] }
 0x300   : > { %v4774_v47 = vmul.f32 %v4363_v51, %v12256_v60  ;;  %v4367_v35 = vpop.permute.xlu0 %4366  ;;  %v4977_v19 = vadd.f32 %v4976_v37, %v4771_v11  ;;  %v12258_v16 = vmax.f32 %v12257_v5, 0.0  ;;  %v12260_v57 = vmax.f32 %v12259_v53, 0.0  ;;  %v12261_v11 = vld [vmem:[#allocation37_spill] sm:$0xff] }
 0x301   : > { %v5110_v34 = vadd.f32 %v5109_v38, %v4772_v44  ;;  %4614 = vperm.xlu0 %5642, %v5967_v40   ;;  %v12262_v44 = vmax.f32 %v12261_v11, 0.0  ;;  %v12263_v60 = vld [vmem:[#allocation201_spill] sm:$0xff] }
 0x302   : > { %v4978_v9 = vadd.f32 %v4977_v19, %v4773_v36  ;;  %v4775_v51 = vmul.f32 %v4367_v35, %v12258_v16  ;;  %v4776_v37 = vmul.f32 %v4367_v35, %v12260_v57  ;;  %v4371_v38 = vpop.permute.xlu1 %4370  ;;  %v12264_v21 = vmax.f32 %v12263_v60, 0.0  ;;  %v12265_v19 = vld [vmem:[#allocation95_spill] sm:$0xff]  ;;  %v10072_v16 = vpop.f32.mrf.mxu1 }
 0x303   : > { %v5111_v49 = vadd.f32 %v5110_v34, %v4774_v47  ;;  %v4777_v39 = vmul.f32 %v4371_v38, %v12262_v44  ;;  %4618 = vperm.xlu1 %5643, %v5968_v0   ;;  %v5969_v47 = vld [vmem:[%s10974_s3 + $0x398] sm:$0xff]  ;;  %v11332_v35 = vmax.f32 %v10045_v62, 0.0  ;;  %v10066_v34 = vadd.f32 %v9573_v28, %v12265_v19  ;;  %12266 = vst [vmem:[#allocation161_spill] sm:$0xff] %v10072_v16  ;;  %v12271_v60 = vld [vmem:[#allocation39_spill] sm:$0xff] }
 0x304   : > { %v4778_v40 = vmul.f32 %v4371_v38, %v12264_v21  ;;  %v4375_v14 = vpop.permute.xlu0 %4374  ;;  %v4979_v45 = vadd.f32 %v4978_v9, %v4775_v51  ;;  %v10070_v5 = vadd.f32 %v9585_v63, %v12265_v19  ;;  %v12272_v21 = vmax.f32 %v12271_v60, 0.0  ;;  %v12273_v63 = vld [vmem:[#allocation203_spill] sm:$0xff] }
 0x305   : > { %v5112_v36 = vadd.f32 %v5111_v49, %v4776_v37  ;;  %4622 = vperm.xlu0 %5642, %v5969_v47   ;;  %v12267_v49 = vld [vmem:[#allocation36_spill] sm:$0xff]  ;;  %v12269_v37 = vld [vmem:[#allocation202_spill] sm:$0xff]  ;;  %v3832_v28 = vmul.f32 %v9360_v24, %v11332_v35  ;;  %v12274_v47 = vmax.f32 %v12273_v63, 0.0 }
 0x306   : > { %v4980_v53 = vadd.f32 %v4979_v45, %v4777_v39  ;;  %v12268_v51 = vmax.f32 %v12267_v49, 0.0  ;;  %v12270_v38 = vmax.f32 %v12269_v37, 0.0  ;;  %v4379_v44 = vpop.permute.xlu1 %4378  ;;  %v5970_v39 = vld [vmem:[%s10974_s3 + $0x3a0] sm:$0xff]  ;;  %v5971_v49 = vld [vmem:[%s10974_s3 + $0x3a8] sm:$0xff]  ;;  %v11330_v37 = vmax.f32 %v10070_v5, 0.0 }
 0x307   : > { %v5113_v9 = vadd.f32 %v5112_v36, %v4778_v40  ;;  %v4781_v0 = vmul.f32 %v4379_v44, %v12272_v21  ;;  %v4782_v19 = vmul.f32 %v4379_v44, %v12274_v47  ;;  %4626 = vperm.xlu1 %5643, %v5970_v39   ;;  %v12275_v40 = vld [vmem:[#allocation99_spill] sm:$0xff]  ;;  %v10102_v44 = vpop.f32.mrf.mxu1  ;;  %v12276_v21 = vld [vmem:[#allocation38_spill] sm:$0xff] }
 0x308   : > { %v4779_v57 = vmul.f32 %v4375_v14, %v12268_v51  ;;  %v4780_v11 = vmul.f32 %v4375_v14, %v12270_v38  ;;  %v4383_v16 = vpop.permute.xlu0 %4382  ;;  %v10090_v14 = vadd.f32 %v9597_v3, %v12275_v40  ;;  %v10094_v45 = vadd.f32 %v9609_v26, %v12275_v40 }
 0x309   : > { %4630 = vperm.xlu0 %5642, %v5971_v49   ;;  %v11331_v51 = vmax.f32 %v10066_v34, 0.0  ;;  %v4123_v38 = vadd.f32 %v9499_v7, %v3832_v28  ;;  %v12277_v26 = vmax.f32 %v12276_v21, 0.0  ;;  %v3834_v39 = vmul.f32 %v9348_v50, %v11330_v37  ;;  %v12280_v7 = vld [vmem:[#allocation41_spill] sm:$0xff]  ;;  %v12287_v37 = vld [vmem:[#allocation206_spill] sm:$0xff] }
 0x30a   : > { %v4981_v24 = vadd.f32 %v4980_v53, %v4779_v57  ;;  %v5114_v36 = vadd.f32 %v5113_v9, %v4780_v11  ;;  %v12278_v53 = vld [vmem:[#allocation204_spill] sm:$0xff]  ;;  %v4387_v11 = vpop.permute.xlu1 %4386  ;;  %v12281_v28 = vmax.f32 %v12280_v7, 0.0  ;;  %v11336_v49 = vmax.f32 %v10090_v14, 0.0 }
 0x30b   : > { %v4783_v63 = vmul.f32 %v4383_v16, %v12277_v26  ;;  %v12279_v9 = vmax.f32 %v12278_v53, 0.0  ;;  %v3833_v47 = vmul.f32 %v9348_v50, %v11331_v51  ;;  %v11335_v21 = vmax.f32 %v10094_v45, 0.0  ;;  %v5973_v50 = vld [vmem:[%s10974_s3 + $0x3b8] sm:$0xff] }
 0x30c   : > { %v4982_v3 = vadd.f32 %v4981_v24, %v4781_v0  ;;  %v5115_v60 = vadd.f32 %v5114_v36, %v4782_v19  ;;  %v4785_v40 = vmul.f32 %v4387_v11, %v12281_v28  ;;  %v12282_v0 = vld [vmem:[#allocation205_spill] sm:$0xff]  ;;  %v4391_v36 = vpop.permute.xlu0 %4390 }
 0x30d   : > { %v4784_v57 = vmul.f32 %v4383_v16, %v12279_v9  ;;  %v12283_v19 = vmax.f32 %v12282_v0, 0.0  ;;  %v5972_v16 = vld [vmem:[%s10974_s3 + $0x3b0] sm:$0xff]  ;;  %4638 = vperm.xlu0 %5642, %v5973_v50   ;;  %v12284_v9 = vld [vmem:[#allocation98_spill] sm:$0xff]  ;;  %v3991_v28 = vadd.f32 %v9507_v48, %v3833_v47  ;;  %v4124_v0 = vadd.f32 %v4123_v38, %v3834_v39  ;;  %v12291_v39 = vld [vmem:[#allocation207_spill] sm:$0xff] }
 0x30e   : > { %4634 = vperm.xlu1 %5643, %v5972_v16   ;;  %v4983_v26 = vadd.f32 %v4982_v3, %v4783_v63  ;;  %v10132_v7 = vadd.f32 %v9631_v15, %v12284_v9  ;;  %v12285_v63 = vld [vmem:[#allocation40_spill] sm:$0xff]  ;;  %v12288_v50 = vmax.f32 %v12287_v37, 0.0  ;;  %v4395_v35 = vpop.permute.xlu1 %4394  ;;  %v3836_v48 = vmul.f32 %v9402_v61, %v11335_v21  ;;  %v12289_v15 = vld [vmem:[#allocation43_spill] sm:$0xff]  ;;  %v5974_v37 = vld [vmem:[%s10974_s3 + $0x3c0] sm:$0xff] }
 0x30f   : > { %v4786_v24 = vmul.f32 %v4387_v11, %v12283_v19  ;;  %v5116_v53 = vadd.f32 %v5115_v60, %v4784_v57  ;;  %v10128_v11 = vadd.f32 %v9621_v59, %v12284_v9  ;;  %v10135_v19 = vpop.f32.mrf.mxu1  ;;  %v12286_v57 = vmax.f32 %v12285_v63, 0.0 }
 0x310   : > { %v4984_v3 = vadd.f32 %v4983_v26, %v4785_v40  ;;  %v4788_v51 = vmul.f32 %v4391_v36, %v12288_v50  ;;  %v3835_v59 = vmul.f32 %v9402_v61, %v11336_v49  ;;  %v12290_v38 = vmax.f32 %v12289_v15, 0.0  ;;  %v4399_v26 = vpop.permute.xlu0 %4398 }
 0x311   : > { %v5117_v60 = vadd.f32 %v5116_v53, %v4786_v24  ;;  %v4787_v16 = vmul.f32 %v4391_v36, %v12286_v57  ;;  %v12292_v40 = vmax.f32 %v12291_v39, 0.0  ;;  %v12293_v36 = vld [vmem:[#allocation101_spill] sm:$0xff]  ;;  %v11334_v57 = vmax.f32 %v10128_v11, 0.0  ;;  %v10167_v39 = vpop.f32.mrf.mxu1 }
 0x312   : > { %v4789_v47 = vmul.f32 %v4395_v35, %v12290_v38  ;;  %4642 = vperm.xlu1 %5643, %v5974_v37   ;;  %v10156_v53 = vadd.f32 %v9647_v58, %v12293_v36  ;;  %v10160_v9 = vadd.f32 %v9663_v56, %v12293_v36  ;;  %v11333_v50 = vmax.f32 %v10132_v7, 0.0  ;;  %v12294_v37 = vld [vmem:[#allocation42_spill] sm:$0xff] }
 0x313   : > { %v4790_v24 = vmul.f32 %v4395_v35, %v12292_v40  ;;  %v4985_v61 = vadd.f32 %v4984_v3, %v4787_v16  ;;  %v5118_v63 = vadd.f32 %v5117_v60, %v4788_v51  ;;  %v5975_v35 = vld [vmem:[%s10974_s3 + $0x3c8] sm:$0xff]  ;;  %v3992_v15 = vadd.f32 %v3991_v28, %v3835_v59  ;;  %v12296_v3 = vld [vmem:[#allocation208_spill] sm:$0xff]  ;;  %v4403_v16 = vpop.permute.xlu1 %4402 }
 0x314   : > { %4646 = vperm.xlu0 %5642, %v5975_v35   ;;  %v4125_v38 = vadd.f32 %v4124_v0, %v3836_v48  ;;  %v12295_v56 = vmax.f32 %v12294_v37, 0.0  ;;  %v12297_v51 = vmax.f32 %v12296_v3, 0.0  ;;  %v3837_v35 = vmul.f32 %v9390_v43, %v11334_v57  ;;  %v12298_v0 = vld [vmem:[#allocation45_spill] sm:$0xff]  ;;  %v12305_v57 = vld [vmem:[#allocation210_spill] sm:$0xff] }
 0x315   : > { %v4986_v58 = vadd.f32 %v4985_v61, %v4789_v47  ;;  %v5119_v40 = vadd.f32 %v5118_v63, %v4790_v24  ;;  %v3838_v28 = vmul.f32 %v9390_v43, %v11333_v50  ;;  %v12299_v59 = vmax.f32 %v12298_v0, 0.0  ;;  %v12300_v47 = vld [vmem:[#allocation209_spill] sm:$0xff]  ;;  %v4407_v63 = vpop.permute.xlu0 %4406  ;;  %v12302_v0 = vld [vmem:[#allocation100_spill] sm:$0xff] }
 0x316   : > { %v4791_v36 = vmul.f32 %v4399_v26, %v12295_v56  ;;  %v4792_v60 = vmul.f32 %v4399_v26, %v12297_v51  ;;  %v12301_v24 = vmax.f32 %v12300_v47, 0.0  ;;  %v5976_v26 = vld [vmem:[%s10974_s3 + $0x3d0] sm:$0xff]  ;;  %v11340_v37 = vmax.f32 %v10156_v53, 0.0  ;;  %v5977_v43 = vld [vmem:[%s10974_s3 + $0x3d8] sm:$0xff] }
 0x317   : > { %v4793_v48 = vmul.f32 %v4403_v16, %v12299_v59  ;;  %4650 = vperm.xlu1 %5643, %v5976_v26   ;;  %v11339_v56 = vmax.f32 %v10160_v9, 0.0  ;;  %v10197_v59 = vadd.f32 %v9691_v4, %v12302_v0  ;;  %v3993_v47 = vadd.f32 %v3992_v15, %v3837_v35  ;;  %v10199_v26 = vpop.f32.mrf.mxu1  ;;  %v4411_v49 = vpop.permute.xlu1 %4410  ;;  %v12307_v15 = vld [vmem:[#allocation47_spill] sm:$0xff] }
 0x318   : > { %v4794_v61 = vmul.f32 %v4403_v16, %v12301_v24  ;;  %v4987_v3 = vadd.f32 %v4986_v58, %v4791_v36  ;;  %v5120_v51 = vadd.f32 %v5119_v40, %v4792_v60  ;;  %4654 = vperm.xlu0 %5642, %v5977_v43   ;;  %v10193_v16 = vadd.f32 %v9675_v6, %v12302_v0  ;;  %v12303_v40 = vld [vmem:[#allocation44_spill] sm:$0xff] }
 0x319   : > { %v4126_v24 = vadd.f32 %v4125_v38, %v3838_v28  ;;  %v12304_v36 = vmax.f32 %v12303_v40, 0.0  ;;  %v12306_v21 = vmax.f32 %v12305_v57, 0.0  ;;  %v3839_v6 = vmul.f32 %v9442_v52, %v11340_v37  ;;  %v12309_v28 = vld [vmem:[#allocation211_spill] sm:$0xff] }
 0x31a   : > { %v4988_v50 = vadd.f32 %v4987_v3, %v4793_v48  ;;  %v5121_v58 = vadd.f32 %v5120_v51, %v4794_v61  ;;  %v3840_v4 = vmul.f32 %v9442_v52, %v11339_v56  ;;  %v12308_v38 = vmax.f32 %v12307_v15, 0.0  ;;  %v4415_v3 = vpop.permute.xlu0 %4414  ;;  %v12311_v57 = vld [vmem:[#allocation103_spill] sm:$0xff] }
 0x31b   : > { %v4795_v60 = vmul.f32 %v4407_v63, %v12304_v36  ;;  %v4796_v43 = vmul.f32 %v4407_v63, %v12306_v21  ;;  %v12310_v48 = vmax.f32 %v12309_v28, 0.0  ;;  %v5978_v21 = vld [vmem:[%s10974_s3 + $0x3e0] sm:$0xff]  ;;  %v10220_v63 = vadd.f32 %v9707_v41, %v12311_v57  ;;  %v10231_v28 = vpop.f32.mrf.mxu1 }
 0x31c   : > { %v4797_v35 = vmul.f32 %v4411_v49, %v12308_v38  ;;  %4658 = vperm.xlu1 %5643, %v5978_v21   ;;  %v10224_v51 = vadd.f32 %v9723_v29, %v12311_v57  ;;  %v11338_v40 = vmax.f32 %v10193_v16, 0.0  ;;  %v11337_v36 = vmax.f32 %v10197_v59, 0.0  ;;  %v12312_v21 = vld [vmem:[#allocation46_spill] sm:$0xff] }
 0x31d   : > { %v4798_v61 = vmul.f32 %v4411_v49, %v12310_v48  ;;  %v4989_v52 = vadd.f32 %v4988_v50, %v4795_v60  ;;  %v5122_v0 = vadd.f32 %v5121_v58, %v4796_v43  ;;  %v5979_v49 = vld [vmem:[%s10974_s3 + $0x3e8] sm:$0xff]  ;;  %v3994_v15 = vadd.f32 %v3993_v47, %v3839_v6  ;;  %v12314_v50 = vld [vmem:[#allocation212_spill] sm:$0xff]  ;;  %v4419_v43 = vpop.permute.xlu1 %4418 }
 0x31e   : > { %4662 = vperm.xlu0 %5642, %v5979_v49   ;;  %v4127_v38 = vadd.f32 %v4126_v24, %v3840_v4  ;;  %v12313_v29 = vmax.f32 %v12312_v21, 0.0  ;;  %v12315_v58 = vmax.f32 %v12314_v50, 0.0  ;;  %v3841_v49 = vmul.f32 %v9432_v30, %v11338_v40  ;;  %v12316_v24 = vld [vmem:[#allocation49_spill] sm:$0xff]  ;;  %v12323_v40 = vld [vmem:[#allocation60_spill] sm:$0xff] }
 0x31f   : > { %v4990_v41 = vadd.f32 %v4989_v52, %v4797_v35  ;;  %v5123_v48 = vadd.f32 %v5122_v0, %v4798_v61  ;;  %v3842_v47 = vmul.f32 %v9432_v30, %v11337_v36  ;;  %v12317_v6 = vmax.f32 %v12316_v24, 0.0  ;;  %v12318_v35 = vld [vmem:[#allocation56_spill] sm:$0xff]  ;;  %v4423_v0 = vpop.permute.xlu0 %4422  ;;  %v5981_v30 = vld [vmem:[%s10974_s3 + $0x3f8] sm:$0xff]  ;;  %v12320_v24 = vld [vmem:[#allocation102_spill] sm:$0xff] }
 0x320   : > { %v4799_v57 = vmul.f32 %v4415_v3, %v12313_v29  ;;  %v4800_v60 = vmul.f32 %v4415_v3, %v12315_v58  ;;  %v12319_v61 = vmax.f32 %v12318_v35, 0.0  ;;  %v5980_v3 = vld [vmem:[%s10974_s3 + $0x3f0] sm:$0xff]  ;;  %v11350_v21 = vmax.f32 %v10220_v63, 0.0 }
 0x321   : > { %v4801_v4 = vmul.f32 %v4419_v43, %v12317_v6  ;;  %4666 = vperm.xlu1 %5643, %v5980_v3   ;;  %v11349_v29 = vmax.f32 %v10224_v51, 0.0  ;;  %v10261_v6 = vadd.f32 %v9755_v2, %v12320_v24  ;;  %v3995_v35 = vadd.f32 %v3994_v15, %v3841_v49  ;;  %v12321_v3 = vld [vmem:[#allocation48_spill] sm:$0xff]  ;;  %v4427_v37 = vpop.permute.xlu1 %4426 }
 0x322   : > { %v4802_v52 = vmul.f32 %v4419_v43, %v12319_v61  ;;  %v4991_v50 = vadd.f32 %v4990_v41, %v4799_v57  ;;  %v5124_v58 = vadd.f32 %v5123_v48, %v4800_v60  ;;  %4670 = vperm.xlu0 %5642, %v5981_v30   ;;  %v10257_v43 = vadd.f32 %v9739_v22, %v12320_v24  ;;  %v5215_v41 = vld [vmem:[%s10975_s4 + $0x1] sm:$0x1]  ;;  %v10266_v48 = vpop.f32.mrf.mxu1 }
 0x323   : > { %v4128_v61 = vadd.f32 %v4127_v38, %v3842_v47  ;;  %v12322_v30 = vmax.f32 %v12321_v3, 0.0  ;;  %v12324_v22 = vmax.f32 %v12323_v40, 0.0  ;;  %v3843_v2 = vmul.f32 %v9471_v12, %v11350_v21  ;;  %v12325_v38 = vld [vmem:[#allocation61_spill] sm:$0xff] }
 0x324   : > { %v4992_v57 = vadd.f32 %v4991_v50, %v4801_v4  ;;  %v5125_v60 = vadd.f32 %v5124_v58, %v4802_v52  ;;  %v3844_v15 = vmul.f32 %v9471_v12, %v11349_v29  ;;  %v12326_v49 = vmax.f32 %v12325_v38, 0.0  ;;  %v12327_v4 = vld [vmem:[#allocation51_spill] sm:$0xff]  ;;  %v4431_v58 = vpop.permute.xlu0 %4430  ;;  %v12330_v40 = vld [vmem:[#allocation105_spill] sm:$0xff] }
 0x325   : > { %v4803_v36 = vmul.f32 %v4423_v0, %v12322_v30  ;;  %v4804_v56 = vmul.f32 %v4423_v0, %v12324_v22  ;;  %v12328_v52 = vmax.f32 %v12327_v4, 0.0  ;;  %v12329_v24 = vmov 0   ;;  %v5195_v4 = vld [vmem:[%s10975_s4] sm:$0x1] }
 0x326   : > { %v4805_v47 = vmul.f32 %v4427_v37, %v12326_v49  ;;  %5644 = vset.pattern.permute.xlu1 %v12329_v24  ;;  %v10285_v0 = vadd.f32 %v9771_v23, %v12330_v40  ;;  %v10289_v3 = vadd.f32 %v9787_v13, %v12330_v40  ;;  %v11342_v12 = vmax.f32 %v10257_v43, 0.0  ;;  %5645 = vset.pattern.permute.xlu0 %v12329_v24  ;;  %v10297_v23 = vpop.f32.mrf.mxu1  ;;  %v12331_v40 = vld [vmem:[#allocation67_spill] sm:$0xff] }
 0x327   : > { %v4806_v50 = vmul.f32 %v4427_v37, %v12328_v52  ;;  %v4993_v30 = vadd.f32 %v4992_v57, %v4803_v36  ;;  %v5126_v22 = vadd.f32 %v5125_v60, %v4804_v56  ;;  %5218 = vperm.xlu1 %5644, %v5215_v41   ;;  %v11341_v38 = vmax.f32 %v10261_v6, 0.0  ;;  %v4435_v60 = vpop.permute.xlu1 %4434 }
 0x328   : > { %v3996_v49 = vadd.f32 %v3995_v35, %v3843_v2  ;;  %v4129_v37 = vadd.f32 %v4128_v61, %v3844_v15  ;;  %v12332_v36 = vmax.f32 %v12331_v40, 0.0  ;;  %v12333_v41 = vmax.f32 %v8832_v42, 0.0  ;;  %v4439_v24 = vpop.permute.xlu0 %4438  ;;  %v12336_v40 = vld [vmem:[#allocation104_spill] sm:$0xff] }
 0x329   : > { %v4994_v52 = vadd.f32 %v4993_v30, %v4805_v47  ;;  %v5127_v13 = vadd.f32 %v5126_v22, %v4806_v50  ;;  %v3845_v35 = vmul.f32 %v9467_v32, %v11342_v12  ;;  %v3846_v61 = vmul.f32 %v9467_v32, %v11341_v38 }
 0x32a   : > { %v4807_v56 = vmul.f32 %v4431_v58, %v12332_v36  ;;  %v4808_v57 = vmul.f32 %v4431_v58, %v12333_v41  ;;  %v12334_v2 = vmax.f32 %v8849_v31, 0.0  ;;  %v12335_v47 = vmax.f32 %v8853_v20, 0.0  ;;  %v10323_v20 = vpop.f32.mrf.mxu1 }
 0x32b   : > { %v11348_v30 = vmax.f32 %v10285_v0, 0.0  ;;  %v11347_v42 = vmax.f32 %v10289_v3, 0.0  ;;  %5198 = vperm.xlu1 %5644, %v5195_v4   ;;  %v10317_v36 = vadd.f32 %v9803_v1, %v12336_v40  ;;  %v10321_v32 = vadd.f32 %v9819_v25, %v12336_v40 }
 0x32c   : > { %v4809_v15 = vmul.f32 %v4435_v60, %v12334_v2  ;;  %v4810_v50 = vmul.f32 %v4435_v60, %v12335_v47  ;;  %v4995_v58 = vadd.f32 %v4994_v52, %v4807_v56  ;;  %v5128_v22 = vadd.f32 %v5127_v13, %v4808_v57  ;;  %v12338_v47 = vld [vmem:[#allocation70_spill] sm:$0xff]  ;;  %v4443_v13 = vpop.permute.xlu1 %4442 }
 0x32d   : > { %12337 = vst [vmem:[#allocation162_spill] sm:$0xff] %v10321_v32  ;;  %v3997_v31 = vadd.f32 %v3996_v49, %v3845_v35  ;;  %v4130_v41 = vadd.f32 %v4129_v37, %v3846_v61  ;;  %v12339_v38 = vmax.f32 %v12338_v47, 0.0  ;;  %v12340_v52 = vmax.f32 %v8876_v46, 0.0  ;;  %v4447_v35 = vpop.permute.xlu0 %4446  ;;  %v12346_v47 = vld [vmem:[#allocation53_spill] sm:$0xff] }
 0x32e   : > { %v4996_v60 = vadd.f32 %v4995_v58, %v4809_v15  ;;  %v5129_v2 = vadd.f32 %v5128_v22, %v4810_v50  ;;  %v3847_v1 = vmul.f32 %v9494_v10, %v11348_v30  ;;  %v3848_v25 = vmul.f32 %v9494_v10, %v11347_v42  ;;  %v10349_v22 = vpop.f32.mrf.mxu1  ;;  %v12374_v30 = vld [vmem:[#allocation54_spill] sm:$0xff] }
 0x32f   : > { %v4811_v12 = vmul.f32 %v4439_v24, %v12339_v38  ;;  %v4812_v4 = vmul.f32 %v4439_v24, %v12340_v52  ;;  %v12341_v49 = vmax.f32 %v8893_v55, 0.0  ;;  %v12342_v56 = vmax.f32 %v8897_v8, 0.0  ;;  %v12343_v38 = vld [vmem:[#allocation108_spill] sm:$0xff] }
 0x330   : > { %v10341_v46 = vadd.f32 %v9835_v54, %v12343_v38  ;;  %v10345_v61 = vadd.f32 %v9851_v17, %v12343_v38  ;;  %v11344_v24 = vmax.f32 %v10317_v36, 0.0  ;;  %v11343_v10 = vmax.f32 %v10321_v32, 0.0  ;;  %v4451_v17 = vpop.permute.xlu1 %4450 }
 0x331   : > { %v4813_v37 = vmul.f32 %v4443_v13, %v12341_v49  ;;  %v4814_v57 = vmul.f32 %v4443_v13, %v12342_v56  ;;  %v4997_v15 = vadd.f32 %v4996_v60, %v4811_v12  ;;  %v5130_v50 = vadd.f32 %v5129_v2, %v4812_v4  ;;  %v12348_v13 = vld [vmem:[#allocation76_spill] sm:$0xff] }
 0x332   : > { %12344 = vst [vmem:[#allocation163_spill] sm:$0xff] %v10341_v46  ;;  %12345 = vst [vmem:[#allocation164_spill] sm:$0xff] %v10345_v61  ;;  %v3998_v55 = vadd.f32 %v3997_v31, %v3847_v1  ;;  %v4131_v58 = vadd.f32 %v4130_v41, %v3848_v25  ;;  %v12347_v52 = vmax.f32 %v12346_v47, 0.0  ;;  %v12349_v49 = vmax.f32 %v12348_v13, 0.0  ;;  %v12350_v41 = vld [vmem:[#allocation79_spill] sm:$0xff]  ;;  %v12352_v4 = vld [vmem:[#allocation52_spill] sm:$0xff] }
 0x333   : > { %v4998_v8 = vadd.f32 %v4997_v15, %v4813_v37  ;;  %v5131_v40 = vadd.f32 %v5130_v50, %v4814_v57  ;;  %v3849_v12 = vmul.f32 %v9492_v33, %v11344_v24  ;;  %v3850_v31 = vmul.f32 %v9492_v33, %v11343_v10  ;;  %v4455_v37 = vpop.permute.xlu0 %4454  ;;  %v12354_v50 = vld [vmem:[#allocation107_spill] sm:$0xff]  ;;  %v12360_v24 = vld [vmem:[#allocation85_spill] sm:$0xff] }
 0x334   : > { %v4815_v54 = vmul.f32 %v4447_v35, %v12347_v52  ;;  %v4816_v56 = vmul.f32 %v4447_v35, %v12349_v49  ;;  %v12351_v60 = vmax.f32 %v12350_v41, 0.0  ;;  %v12353_v1 = vmax.f32 %v12352_v4, 0.0  ;;  %v12356_v52 = vld [vmem:[#allocation148_spill] sm:$0xff]  ;;  %v10375_v41 = vpop.f32.mrf.mxu1  ;;  %v12358_v4 = vld [vmem:[#allocation82_spill] sm:$0xff] }
 0x335   : > { %v11345_v57 = vmax.f32 %v10341_v46, 0.0  ;;  %v11346_v35 = vmax.f32 %v10345_v61, 0.0  ;;  %v10369_v47 = vadd.f32 %v9867_v18, %v12354_v50  ;;  %v10373_v33 = vadd.f32 %v12356_v52, %v12354_v50  ;;  %v12362_v18 = vld [vmem:[#allocation221_spill] sm:$0xff]  ;;  %v12367_v50 = vld [vmem:[#allocation112_spill] sm:$0xff] }
 0x336   : > { %v4817_v2 = vmul.f32 %v4451_v17, %v12351_v60  ;;  %v4818_v25 = vmul.f32 %v4451_v17, %v12353_v1  ;;  %v4999_v38 = vadd.f32 %v4998_v8, %v4815_v54  ;;  %v5132_v15 = vadd.f32 %v5131_v40, %v4816_v56  ;;  %v4459_v54 = vpop.permute.xlu1 %4458  ;;  %v12368_v52 = vld [vmem:[#allocation149_spill] sm:$0xff] }
 0x337   : > { %12355 = vst [vmem:[#allocation165_spill] sm:$0xff] %v10369_v47  ;;  %12357 = vst [vmem:[#allocation166_spill] sm:$0xff] %v10373_v33  ;;  %v3999_v13 = vadd.f32 %v3998_v55, %v3849_v12  ;;  %v4132_v49 = vadd.f32 %v4131_v58, %v3850_v31  ;;  %v12359_v1 = vmax.f32 %v12358_v4, 0.0  ;;  %v12361_v8 = vmax.f32 %v12360_v24, 0.0  ;;  %v12363_v58 = vld [vmem:[#allocation55_spill] sm:$0xff] }
 0x338   : > { %v5000_v17 = vadd.f32 %v4999_v38, %v4817_v2  ;;  %v5133_v60 = vadd.f32 %v5132_v15, %v4818_v25  ;;  %v3851_v56 = vmul.f32 %v12362_v18, %v11345_v57  ;;  %v3852_v55 = vmul.f32 %v12362_v18, %v11346_v35  ;;  %v12365_v2 = vld [vmem:[#allocation88_spill] sm:$0xff]  ;;  %v4463_v15 = vpop.permute.xlu0 %4462  ;;  %v10401_v35 = vpop.f32.mrf.mxu1 }
 0x339   : > { %v4819_v10 = vmul.f32 %v4455_v37, %v12359_v1  ;;  %v4820_v40 = vmul.f32 %v4455_v37, %v12361_v8  ;;  %v12364_v12 = vmax.f32 %v12363_v58, 0.0  ;;  %v12366_v25 = vmax.f32 %v12365_v2, 0.0  ;;  %v12370_v37 = vld [vmem:[#allocation146_spill] sm:$0xff] }
 0x33a   : > { %v10393_v24 = vadd.f32 %v12368_v52, %v12367_v50  ;;  %v10397_v4 = vadd.f32 %v12370_v37, %v12367_v50  ;;  %v11352_v57 = vmax.f32 %v10369_v47, 0.0  ;;  %v11351_v18 = vmax.f32 %v10373_v33, 0.0  ;;  %v4467_v50 = vpop.permute.xlu1 %4466  ;;  %v12381_v37 = vld [vmem:[#allocation111_spill] sm:$0xff] }
 0x33b   : > { %v4821_v31 = vmul.f32 %v4459_v54, %v12364_v12  ;;  %v4822_v38 = vmul.f32 %v4459_v54, %v12366_v25  ;;  %v5001_v1 = vadd.f32 %v5000_v17, %v4819_v10  ;;  %v5134_v8 = vadd.f32 %v5133_v60, %v4820_v40  ;;  %v12372_v25 = vld [vmem:[#allocation91_spill] sm:$0xff]  ;;  %v12376_v10 = vld [vmem:[#allocation220_spill] sm:$0xff] }
 0x33c   : > { %12369 = vst [vmem:[#allocation167_spill] sm:$0xff] %v10393_v24  ;;  %12371 = vst [vmem:[#allocation168_spill] sm:$0xff] %v10397_v4  ;;  %v4000_v58 = vadd.f32 %v3999_v13, %v3851_v56  ;;  %v4133_v12 = vadd.f32 %v4132_v49, %v3852_v55  ;;  %v12373_v42 = vmax.f32 %v12372_v25, 0.0  ;;  %v12375_v29 = vmax.f32 %v12374_v30, 0.0  ;;  %v12377_v49 = vld [vmem:[#allocation94_spill] sm:$0xff]  ;;  %v12379_v56 = vld [vmem:[#allocation97_spill] sm:$0xff] }
 0x33d   : > { %v5002_v54 = vadd.f32 %v5001_v1, %v4821_v31  ;;  %v5135_v2 = vadd.f32 %v5134_v8, %v4822_v38  ;;  %v3853_v17 = vmul.f32 %v12376_v10, %v11352_v57  ;;  %v3854_v13 = vmul.f32 %v12376_v10, %v11351_v18  ;;  %v4471_v38 = vpop.permute.xlu0 %4470  ;;  %v12382_v1 = vld [vmem:[#allocation147_spill] sm:$0xff]  ;;  %v12384_v25 = vld [vmem:[#allocation154_spill] sm:$0xff]  ;;  %v10427_v18 = vpop.f32.mrf.mxu1 }
 0x33e   : > { %v4823_v52 = vmul.f32 %v4463_v15, %v12373_v42  ;;  %v4824_v21 = vmul.f32 %v4463_v15, %v12375_v29  ;;  %v12378_v60 = vmax.f32 %v12377_v49, 0.0  ;;  %v12380_v55 = vmax.f32 %v12379_v56, 0.0  ;;  %v12388_v29 = vld [vmem:[#allocation58_spill] sm:$0xff]  ;;  %v12404_v47 = vld [vmem:[#allocation7_spill] sm:$0xff] }
 0x33f   : > { %v10421_v8 = vadd.f32 %v12382_v1, %v12381_v37  ;;  %v10425_v10 = vadd.f32 %v12384_v25, %v12381_v37  ;;  %v4001_v49 = vadd.f32 %v4000_v58, %v3853_v17  ;;  %v12391_v1 = vld [vmem:[#allocation223_spill] sm:$0xff]  ;;  %v12392_v37 = vmax.f32 %v10397_v4, 0.0 }
 0x340   : > { %v4825_v40 = vmul.f32 %v4467_v50, %v12378_v60  ;;  %v4826_v31 = vmul.f32 %v4467_v50, %v12380_v55  ;;  %v5003_v30 = vadd.f32 %v5002_v54, %v4823_v52  ;;  %v5136_v15 = vadd.f32 %v5135_v2, %v4824_v21  ;;  %v12386_v55 = vld [vmem:[#allocation59_spill] sm:$0xff]  ;;  %v4475_v2 = vpop.permute.xlu1 %4474 }
 0x341   : > { %12383 = vst [vmem:[#allocation169_spill] sm:$0xff] %v10421_v8  ;;  %12385 = vst [vmem:[#allocation170_spill] sm:$0xff] %v10425_v10  ;;  %v4134_v60 = vadd.f32 %v4133_v12, %v3854_v13  ;;  %v12387_v57 = vmax.f32 %v12386_v55, 0.0  ;;  %v12389_v54 = vmax.f32 %v12388_v29, 0.0  ;;  %v12390_v52 = vmax.f32 %v10393_v24, 0.0  ;;  %v12393_v12 = vld [vmem:[#allocation63_spill] sm:$0xff] }
 0x342   : > { %v5004_v50 = vadd.f32 %v5003_v30, %v4825_v40  ;;  %v5137_v56 = vadd.f32 %v5136_v15, %v4826_v31  ;;  %v3856_v58 = vmul.f32 %v12391_v1, %v12392_v37  ;;  %v12394_v17 = vmax.f32 %v12393_v12, 0.0  ;;  %v12395_v40 = vld [vmem:[#allocation62_spill] sm:$0xff]  ;;  %v4479_v15 = vpop.permute.xlu0 %4478  ;;  %v12398_v25 = vld [vmem:[#allocation155_spill] sm:$0xff] }
 0x343   : > { %v4827_v42 = vmul.f32 %v4471_v38, %v12387_v57  ;;  %v4828_v21 = vmul.f32 %v4471_v38, %v12389_v54  ;;  %v3855_v33 = vmul.f32 %v12391_v1, %v12390_v52  ;;  %v12396_v31 = vmax.f32 %v12395_v40, 0.0  ;;  %v12397_v57 = vld [vmem:[#allocation116_spill] sm:$0xff]  ;;  %v12400_v38 = vld [vmem:[#allocation157_spill] sm:$0xff] }
 0x344   : > { %v4829_v13 = vmul.f32 %v4475_v2, %v12394_v17  ;;  %v10445_v29 = vadd.f32 %v12398_v25, %v12397_v57  ;;  %v10449_v55 = vadd.f32 %v12400_v38, %v12397_v57  ;;  %v11360_v4 = vmax.f32 %v10421_v8, 0.0  ;;  %v10453_v17 = vpop.f32.mrf.mxu1  ;;  %v4483_v57 = vpop.permute.xlu1 %4482  ;;  %v12411_v38 = vld [vmem:[#allocation115_spill] sm:$0xff] }
 0x345   : > { %v4830_v30 = vmul.f32 %v4475_v2, %v12396_v31  ;;  %v5005_v54 = vadd.f32 %v5004_v50, %v4827_v42  ;;  %v5138_v52 = vadd.f32 %v5137_v56, %v4828_v21  ;;  %v11359_v1 = vmax.f32 %v10425_v10, 0.0  ;;  %v12402_v31 = vld [vmem:[#allocation66_spill] sm:$0xff] }
 0x346   : > { %12399 = vst [vmem:[#allocation171_spill] sm:$0xff] %v10445_v29  ;;  %12401 = vst [vmem:[#allocation172_spill] sm:$0xff] %v10449_v55  ;;  %v4002_v37 = vadd.f32 %v4001_v49, %v3855_v33  ;;  %v4135_v12 = vadd.f32 %v4134_v60, %v3856_v58  ;;  %v12403_v24 = vmax.f32 %v12402_v31, 0.0  ;;  %v12405_v61 = vmax.f32 %v12404_v47, 0.0  ;;  %v12406_v42 = vld [vmem:[#allocation222_spill] sm:$0xff]  ;;  %v12407_v49 = vld [vmem:[#allocation65_spill] sm:$0xff] }
 0x347   : > { %v5006_v2 = vadd.f32 %v5005_v54, %v4829_v13  ;;  %v5139_v40 = vadd.f32 %v5138_v52, %v4830_v30  ;;  %v3857_v50 = vmul.f32 %v12406_v42, %v11360_v4  ;;  %v3858_v33 = vmul.f32 %v12406_v42, %v11359_v1  ;;  %v12409_v21 = vld [vmem:[#allocation130_spill] sm:$0xff]  ;;  %v4487_v30 = vpop.permute.xlu0 %4486  ;;  %v12413_v31 = vld [vmem:[#allocation159_spill] sm:$0xff]  ;;  %v10479_v1 = vpop.f32.mrf.mxu1 }
 0x348   : > { %v4831_v25 = vmul.f32 %v4479_v15, %v12403_v24  ;;  %v4832_v46 = vmul.f32 %v4479_v15, %v12405_v61  ;;  %v12408_v60 = vmax.f32 %v12407_v49, 0.0  ;;  %v12410_v58 = vmax.f32 %v12409_v21, 0.0  ;;  %v12412_v54 = vld [vmem:[#allocation158_spill] sm:$0xff]  ;;  %v12417_v61 = vld [vmem:[#allocation69_spill] sm:$0xff] }
 0x349   : > { %v10473_v52 = vadd.f32 %v12412_v54, %v12411_v38  ;;  %v10477_v42 = vadd.f32 %v12413_v31, %v12411_v38  ;;  %v4003_v49 = vadd.f32 %v4002_v37, %v3857_v50  ;;  %v12420_v54 = vld [vmem:[#allocation225_spill] sm:$0xff]  ;;  %v12421_v38 = vmax.f32 %v10449_v55, 0.0  ;;  %v12427_v31 = vld [vmem:[#allocation160_spill] sm:$0xff] }
 0x34a   : > { %v4833_v56 = vmul.f32 %v4483_v57, %v12408_v60  ;;  %v4834_v13 = vmul.f32 %v4483_v57, %v12410_v58  ;;  %v5007_v47 = vadd.f32 %v5006_v2, %v4831_v25  ;;  %v5140_v15 = vadd.f32 %v5139_v40, %v4832_v46  ;;  %v12415_v58 = vld [vmem:[#allocation137_spill] sm:$0xff]  ;;  %v4491_v40 = vpop.permute.xlu1 %4490 }
 0x34b   : > { %12414 = vst [vmem:[#allocation173_spill] sm:$0xff] %v10477_v42  ;;  %v4136_v60 = vadd.f32 %v4135_v12, %v3858_v33  ;;  %v12416_v4 = vmax.f32 %v12415_v58, 0.0  ;;  %v12418_v2 = vmax.f32 %v12417_v61, 0.0  ;;  %v12419_v25 = vmax.f32 %v10445_v29, 0.0  ;;  %v12422_v12 = vld [vmem:[#allocation68_spill] sm:$0xff]  ;;  %v12432_v29 = vld [vmem:[#allocation75_spill] sm:$0xff] }
 0x34c   : > { %v5008_v57 = vadd.f32 %v5007_v47, %v4833_v56  ;;  %v5141_v21 = vadd.f32 %v5140_v15, %v4834_v13  ;;  %v3860_v37 = vmul.f32 %v12420_v54, %v12421_v38  ;;  %v12423_v50 = vmax.f32 %v12422_v12, 0.0  ;;  %v12424_v56 = vld [vmem:[#allocation72_spill] sm:$0xff]  ;;  %v4495_v15 = vpop.permute.xlu0 %4494 }
 0x34d   : > { %v4835_v24 = vmul.f32 %v4487_v30, %v12416_v4  ;;  %v4836_v46 = vmul.f32 %v4487_v30, %v12418_v2  ;;  %v3859_v10 = vmul.f32 %v12420_v54, %v12419_v25  ;;  %v12425_v13 = vmax.f32 %v12424_v56, 0.0  ;;  %v12426_v4 = vld [vmem:[#allocation120_spill] sm:$0xff] }
 0x34e   : > { %v4837_v33 = vmul.f32 %v4491_v40, %v12423_v50  ;;  %v10497_v61 = vadd.f32 %v12427_v31, %v12426_v4  ;;  %v10501_v30 = vadd.f32 %v10047_v27, %v12426_v4  ;;  %v11367_v25 = vmax.f32 %v10473_v52, 0.0  ;;  %v10505_v50 = vpop.f32.mrf.mxu1  ;;  %v4499_v27 = vpop.permute.xlu1 %4498  ;;  %v12439_v4 = vld [vmem:[#allocation119_spill] sm:$0xff] }
 0x34f   : > { %v4838_v47 = vmul.f32 %v4491_v40, %v12425_v13  ;;  %v5009_v58 = vadd.f32 %v5008_v57, %v4835_v24  ;;  %v5142_v2 = vadd.f32 %v5141_v21, %v4836_v46  ;;  %v11366_v54 = vmax.f32 %v10477_v42, 0.0  ;;  %v12430_v13 = vld [vmem:[#allocation71_spill] sm:$0xff]  ;;  %v12434_v24 = vld [vmem:[#allocation224_spill] sm:$0xff]  ;;  %v12437_v46 = vld [vmem:[#allocation78_spill] sm:$0xff] }
 0x350   : > { %12428 = vst [vmem:[#allocation174_spill] sm:$0xff] %v10497_v61  ;;  %12429 = vst [vmem:[#allocation175_spill] sm:$0xff] %v10501_v30  ;;  %v4004_v38 = vadd.f32 %v4003_v49, %v3859_v10  ;;  %v4137_v12 = vadd.f32 %v4136_v60, %v3860_v37  ;;  %v12431_v55 = vmax.f32 %v12430_v13, 0.0  ;;  %v12433_v8 = vmax.f32 %v12432_v29, 0.0  ;;  %v12435_v49 = vld [vmem:[#allocation74_spill] sm:$0xff] }
 0x351   : > { %v5010_v40 = vadd.f32 %v5009_v58, %v4837_v33  ;;  %v5143_v56 = vadd.f32 %v5142_v2, %v4838_v47  ;;  %v3861_v57 = vmul.f32 %v12434_v24, %v11367_v25  ;;  %v3862_v10 = vmul.f32 %v12434_v24, %v11366_v54  ;;  %v4503_v47 = vpop.permute.xlu0 %4502  ;;  %v12440_v58 = vld [vmem:[#allocation161_spill] sm:$0xff] }
 0x352   : > { %v4839_v31 = vmul.f32 %v4495_v15, %v12431_v55  ;;  %v4840_v32 = vmul.f32 %v4495_v15, %v12433_v8  ;;  %v12436_v60 = vmax.f32 %v12435_v49, 0.0  ;;  %v12438_v37 = vmax.f32 %v12437_v46, 0.0  ;;  %v12443_v8 = vld [vmem:[#allocation213_spill] sm:$0xff] }
 0x353   : > { %v11368_v55 = vmax.f32 %v10497_v61, 0.0  ;;  %v10525_v2 = vadd.f32 %v12440_v58, %v12439_v4  ;;  %v10529_v13 = vadd.f32 %v10102_v44, %v12439_v4  ;;  %v4005_v24 = vadd.f32 %v4004_v38, %v3861_v57 }
 0x354   : > { %v4841_v21 = vmul.f32 %v4499_v27, %v12436_v60  ;;  %v4842_v33 = vmul.f32 %v4499_v27, %v12438_v37  ;;  %v5011_v29 = vadd.f32 %v5010_v40, %v4839_v31  ;;  %v5144_v15 = vadd.f32 %v5143_v56, %v4840_v32  ;;  %v10531_v60 = vpop.f32.mrf.mxu1  ;;  %v12441_v37 = vld [vmem:[#allocation77_spill] sm:$0xff]  ;;  %v4507_v56 = vpop.permute.xlu1 %4506  ;;  %v12445_v31 = vld [vmem:[#allocation227_spill] sm:$0xff] }
 0x355   : > { %v4138_v49 = vadd.f32 %v4137_v12, %v3862_v10  ;;  %v12442_v54 = vmax.f32 %v12441_v37, 0.0  ;;  %v12444_v40 = vmax.f32 %v12443_v8, 0.0  ;;  %v3863_v58 = vmul.f32 %v12445_v31, %v11368_v55  ;;  %v12447_v12 = vld [vmem:[#allocation81_spill] sm:$0xff] }
 0x356   : > { %v5012_v27 = vadd.f32 %v5011_v29, %v4841_v21  ;;  %v5145_v46 = vadd.f32 %v5144_v15, %v4842_v33  ;;  %v12446_v44 = vmax.f32 %v10501_v30, 0.0  ;;  %v12448_v57 = vmax.f32 %v12447_v12, 0.0  ;;  %v12449_v21 = vld [vmem:[#allocation214_spill] sm:$0xff]  ;;  %v4511_v15 = vpop.permute.xlu0 %4510  ;;  %v12456_v30 = vld [vmem:[#allocation215_spill] sm:$0xff] }
 0x357   : > { %v4843_v25 = vmul.f32 %v4503_v47, %v12442_v54  ;;  %v4844_v32 = vmul.f32 %v4503_v47, %v12444_v40  ;;  %v12450_v33 = vmax.f32 %v12449_v21, 0.0  ;;  %v12451_v54 = vld [vmem:[#allocation124_spill] sm:$0xff]  ;;  %v11373_v40 = vmax.f32 %v10525_v2, 0.0 }
 0x358   : > { %v3864_v38 = vmul.f32 %v12445_v31, %v12446_v44  ;;  %v4845_v10 = vmul.f32 %v4507_v56, %v12448_v57  ;;  %v10549_v8 = vadd.f32 %v10135_v19, %v12451_v54  ;;  %v10553_v47 = vadd.f32 %v10167_v39, %v12451_v54  ;;  %v10557_v57 = vpop.f32.mrf.mxu1  ;;  %v4515_v39 = vpop.permute.xlu1 %4514  ;;  %v12463_v54 = vld [vmem:[#allocation123_spill] sm:$0xff] }
 0x359   : > { %v4846_v29 = vmul.f32 %v4507_v56, %v12450_v33  ;;  %v5013_v4 = vadd.f32 %v5012_v27, %v4843_v25  ;;  %v5146_v37 = vadd.f32 %v5145_v46, %v4844_v32  ;;  %v11372_v31 = vmax.f32 %v10529_v13, 0.0  ;;  %v12454_v33 = vld [vmem:[#allocation80_spill] sm:$0xff]  ;;  %v12458_v25 = vld [vmem:[#allocation226_spill] sm:$0xff] }
 0x35a   : > { %12452 = vst [vmem:[#allocation176_spill] sm:$0xff] %v10549_v8  ;;  %12453 = vst [vmem:[#allocation177_spill] sm:$0xff] %v10553_v47  ;;  %v4006_v44 = vadd.f32 %v4005_v24, %v3863_v58  ;;  %v4139_v12 = vadd.f32 %v4138_v49, %v3864_v38  ;;  %v12455_v55 = vmax.f32 %v12454_v33, 0.0  ;;  %v12457_v61 = vmax.f32 %v12456_v30, 0.0  ;;  %v12459_v49 = vld [vmem:[#allocation84_spill] sm:$0xff]  ;;  %v12461_v58 = vld [vmem:[#allocation57_spill] sm:$0xff] }
 0x35b   : > { %v5014_v56 = vadd.f32 %v5013_v4, %v4845_v10  ;;  %v5147_v21 = vadd.f32 %v5146_v37, %v4846_v29  ;;  %v3865_v27 = vmul.f32 %v12458_v25, %v11373_v40  ;;  %v3866_v24 = vmul.f32 %v12458_v25, %v11372_v31  ;;  %v4519_v29 = vpop.permute.xlu0 %4518  ;;  %v12466_v40 = vld [vmem:[#allocation64_spill] sm:$0xff] }
 0x35c   : > { %v4847_v19 = vmul.f32 %v4511_v15, %v12455_v55  ;;  %v4848_v42 = vmul.f32 %v4511_v15, %v12457_v61  ;;  %v12460_v46 = vmax.f32 %v12459_v49, 0.0  ;;  %v12462_v38 = vmax.f32 %v12461_v58, 0.0  ;;  %v10583_v49 = vpop.f32.mrf.mxu1  ;;  %v12464_v58 = vld [vmem:[#allocation83_spill] sm:$0xff] }
 0x35d   : > { %v11375_v55 = vmax.f32 %v10549_v8, 0.0  ;;  %v11374_v61 = vmax.f32 %v10553_v47, 0.0  ;;  %v10577_v4 = vadd.f32 %v10199_v26, %v12463_v54  ;;  %v10581_v37 = vadd.f32 %v10231_v28, %v12463_v54  ;;  %v12468_v26 = vld [vmem:[#allocation229_spill] sm:$0xff] }
 0x35e   : > { %v4849_v32 = vmul.f32 %v4515_v39, %v12460_v46  ;;  %v4850_v10 = vmul.f32 %v4515_v39, %v12462_v38  ;;  %v5015_v30 = vadd.f32 %v5014_v56, %v4847_v19  ;;  %v5148_v15 = vadd.f32 %v5147_v21, %v4848_v42  ;;  %v4523_v21 = vpop.permute.xlu1 %4522 }
 0x35f   : > { %v4007_v33 = vadd.f32 %v4006_v44, %v3865_v27  ;;  %v4140_v25 = vadd.f32 %v4139_v12, %v3866_v24  ;;  %v12465_v38 = vmax.f32 %v12464_v58, 0.0  ;;  %v12467_v56 = vmax.f32 %v12466_v40, 0.0  ;;  %v12469_v44 = vld [vmem:[#allocation50_spill] sm:$0xff]  ;;  %v12471_v24 = vld [vmem:[#allocation87_spill] sm:$0xff] }
 0x360   : > { %v5016_v39 = vadd.f32 %v5015_v30, %v4849_v32  ;;  %v5149_v46 = vadd.f32 %v5148_v15, %v4850_v10  ;;  %v3867_v19 = vmul.f32 %v12468_v26, %v11375_v55  ;;  %v3868_v28 = vmul.f32 %v12468_v26, %v11374_v61  ;;  %v4527_v30 = vpop.permute.xlu0 %4526  ;;  %v12473_v15 = vld [vmem:[#allocation128_spill] sm:$0xff]  ;;  %v12478_v55 = vld [vmem:[#allocation86_spill] sm:$0xff] }
 0x361   : > { %v4851_v31 = vmul.f32 %v4519_v29, %v12465_v38  ;;  %v4852_v42 = vmul.f32 %v4519_v29, %v12467_v56  ;;  %v12470_v12 = vmax.f32 %v12469_v44, 0.0  ;;  %v12472_v32 = vmax.f32 %v12471_v24, 0.0 }
 0x362   : > { %v10601_v40 = vadd.f32 %v10266_v48, %v12473_v15  ;;  %v10605_v29 = vadd.f32 %v10297_v23, %v12473_v15  ;;  %v11379_v38 = vmax.f32 %v10577_v4, 0.0  ;;  %v11378_v56 = vmax.f32 %v10581_v37, 0.0  ;;  %v4531_v23 = vpop.permute.xlu1 %4530  ;;  %v12485_v15 = vld [vmem:[#allocation127_spill] sm:$0xff] }
 0x363   : > { %v4853_v27 = vmul.f32 %v4523_v21, %v12470_v12  ;;  %v4854_v10 = vmul.f32 %v4523_v21, %v12472_v32  ;;  %v5017_v54 = vadd.f32 %v5016_v39, %v4851_v31  ;;  %v5150_v58 = vadd.f32 %v5149_v46, %v4852_v42  ;;  %v10609_v12 = vpop.f32.mrf.mxu1  ;;  %v12476_v32 = vld [vmem:[#allocation73_spill] sm:$0xff]  ;;  %v12480_v31 = vld [vmem:[#allocation228_spill] sm:$0xff] }
 0x364   : > { %12474 = vst [vmem:[#allocation178_spill] sm:$0xff] %v10601_v40  ;;  %12475 = vst [vmem:[#allocation179_spill] sm:$0xff] %v10605_v29  ;;  %v4008_v26 = vadd.f32 %v4007_v33, %v3867_v19  ;;  %v4141_v44 = vadd.f32 %v4140_v25, %v3868_v28  ;;  %v12477_v61 = vmax.f32 %v12476_v32, 0.0  ;;  %v12479_v47 = vmax.f32 %v12478_v55, 0.0  ;;  %v12481_v25 = vld [vmem:[#allocation90_spill] sm:$0xff]  ;;  %v12483_v19 = vld [vmem:[#allocation216_spill] sm:$0xff] }
 0x365   : > { %v5018_v21 = vadd.f32 %v5017_v54, %v4853_v27  ;;  %v5151_v24 = vadd.f32 %v5150_v58, %v4854_v10  ;;  %v3869_v39 = vmul.f32 %v12480_v31, %v11379_v38  ;;  %v3870_v33 = vmul.f32 %v12480_v31, %v11378_v56  ;;  %v4535_v10 = vpop.permute.xlu0 %4534  ;;  %v12488_v38 = vld [vmem:[#allocation217_spill] sm:$0xff] }
 0x366   : > { %v4855_v48 = vmul.f32 %v4527_v30, %v12477_v61  ;;  %v4856_v8 = vmul.f32 %v4527_v30, %v12479_v47  ;;  %v12482_v46 = vmax.f32 %v12481_v25, 0.0  ;;  %v12484_v28 = vmax.f32 %v12483_v19, 0.0  ;;  %v10635_v25 = vpop.f32.mrf.mxu1  ;;  %v12486_v19 = vld [vmem:[#allocation89_spill] sm:$0xff] }
 0x367   : > { %v11381_v61 = vmax.f32 %v10601_v40, 0.0  ;;  %v11380_v47 = vmax.f32 %v10605_v29, 0.0  ;;  %v10629_v54 = vadd.f32 %v10323_v20, %v12485_v15  ;;  %v10633_v58 = vadd.f32 %v10349_v22, %v12485_v15  ;;  %v12490_v20 = vld [vmem:[#allocation231_spill] sm:$0xff] }
 0x368   : > { %v4857_v42 = vmul.f32 %v4531_v23, %v12482_v46  ;;  %v4858_v27 = vmul.f32 %v4531_v23, %v12484_v28  ;;  %v5019_v55 = vadd.f32 %v5018_v21, %v4855_v48  ;;  %v5152_v30 = vadd.f32 %v5151_v24, %v4856_v8  ;;  %v4539_v24 = vpop.permute.xlu1 %4538 }
 0x369   : > { %v4009_v32 = vadd.f32 %v4008_v26, %v3869_v39  ;;  %v4142_v31 = vadd.f32 %v4141_v44, %v3870_v33  ;;  %v12487_v28 = vmax.f32 %v12486_v19, 0.0  ;;  %v12489_v21 = vmax.f32 %v12488_v38, 0.0  ;;  %v12491_v26 = vld [vmem:[#allocation93_spill] sm:$0xff]  ;;  %v12493_v33 = vld [vmem:[#allocation218_spill] sm:$0xff] }
 0x36a   : > { %v5020_v23 = vadd.f32 %v5019_v55, %v4857_v42  ;;  %v5153_v46 = vadd.f32 %v5152_v30, %v4858_v27  ;;  %v3871_v48 = vmul.f32 %v12490_v20, %v11381_v61  ;;  %v3872_v22 = vmul.f32 %v12490_v20, %v11380_v47  ;;  %v4543_v55 = vpop.permute.xlu0 %4542  ;;  %v12495_v30 = vld [vmem:[#allocation132_spill] sm:$0xff]  ;;  %v12498_v61 = vld [vmem:[#allocation219_spill] sm:$0xff] }
 0x36b   : > { %v4859_v56 = vmul.f32 %v4535_v10, %v12487_v28  ;;  %v4860_v8 = vmul.f32 %v4535_v10, %v12489_v21  ;;  %v12492_v44 = vmax.f32 %v12491_v26, 0.0  ;;  %v12494_v42 = vmax.f32 %v12493_v33, 0.0 }
 0x36c   : > { %v10653_v38 = vadd.f32 %v10375_v41, %v12495_v30  ;;  %v10657_v10 = vadd.f32 %v10401_v35, %v12495_v30  ;;  %v2849_v28 = vmax.f32 %v10629_v54, 0.0  ;;  %v2850_v21 = vmax.f32 %v10633_v58, 0.0  ;;  %v4547_v35 = vpop.permute.xlu1 %4546 }
 0x36d   : > { %v4861_v39 = vmul.f32 %v4539_v24, %v12492_v44  ;;  %v4862_v27 = vmul.f32 %v4539_v24, %v12494_v42  ;;  %v5021_v15 = vadd.f32 %v5020_v23, %v4859_v56  ;;  %v5154_v19 = vadd.f32 %v5153_v46, %v4860_v8  ;;  %v10661_v44 = vpop.f32.mrf.mxu1  ;;  %v12496_v42 = vld [vmem:[#allocation92_spill] sm:$0xff]  ;;  %v12500_v56 = vld [vmem:[#allocation230_spill] sm:$0xff] }
 0x36e   : > { %v4010_v20 = vadd.f32 %v4009_v32, %v3871_v48  ;;  %v4143_v26 = vadd.f32 %v4142_v31, %v3872_v22  ;;  %v12497_v47 = vmax.f32 %v12496_v42, 0.0  ;;  %v12499_v29 = vmax.f32 %v12498_v61, 0.0  ;;  %v12501_v31 = vld [vmem:[#allocation96_spill] sm:$0xff] }
 0x36f   : > { %v5022_v24 = vadd.f32 %v5021_v15, %v4861_v39  ;;  %v5155_v33 = vadd.f32 %v5154_v19, %v4862_v27  ;;  %v3873_v23 = vmul.f32 %v12500_v56, %v2849_v28  ;;  %v3874_v32 = vmul.f32 %v12500_v56, %v2850_v21  ;;  %v4551_v39 = vpop.permute.xlu0 %4550  ;;  %v10687_v56 = vpop.f32.mrf.mxu1 }
 0x370   : > { %v4863_v41 = vmul.f32 %v4543_v55, %v12497_v47  ;;  %v4864_v40 = vmul.f32 %v4543_v55, %v12499_v29  ;;  %v12502_v46 = vmax.f32 %v12501_v31, 0.0  ;;  %v12503_v48 = vmax.f32 %v10045_v62, 0.0  ;;  %v12504_v55 = vld [vmem:[#allocation131_spill] sm:$0xff] }
 0x371   : > { %v2851_v47 = vmax.f32 %v10653_v38, 0.0  ;;  %v2852_v29 = vmax.f32 %v10657_v10, 0.0  ;;  %v10681_v30 = vadd.f32 %v10427_v18, %v12504_v55  ;;  %v10685_v15 = vadd.f32 %v10453_v17, %v12504_v55  ;;  %v12507_v18 = vld [vmem:[#allocation233_spill] sm:$0xff] }
 0x372   : > { %v4865_v8 = vmul.f32 %v4547_v35, %v12502_v46  ;;  %v4866_v22 = vmul.f32 %v4547_v35, %v12503_v48  ;;  %v5023_v61 = vadd.f32 %v5022_v24, %v4863_v41  ;;  %v5156_v27 = vadd.f32 %v5155_v33, %v4864_v40  ;;  %v4555_v33 = vpop.permute.xlu1 %4554 }
 0x373   : > { %v4011_v19 = vadd.f32 %v4010_v20, %v3873_v23  ;;  %v4144_v42 = vadd.f32 %v4143_v26, %v3874_v32  ;;  %v12505_v31 = vmax.f32 %v10066_v34, 0.0  ;;  %v12506_v24 = vmax.f32 %v10070_v5, 0.0  ;;  %v4559_v34 = vpop.permute.xlu0 %4558 }
 0x374   : > { %v5024_v62 = vadd.f32 %v5023_v61, %v4865_v8  ;;  %v5157_v35 = vadd.f32 %v5156_v27, %v4866_v22  ;;  %v3875_v41 = vmul.f32 %v12507_v18, %v2851_v47  ;;  %v3876_v17 = vmul.f32 %v12507_v18, %v2852_v29  ;;  %v12510_v8 = vld [vmem:[#allocation136_spill] sm:$0xff] }
 0x375   : > { %v4867_v46 = vmul.f32 %v4551_v39, %v12505_v31  ;;  %v4868_v40 = vmul.f32 %v4551_v39, %v12506_v24  ;;  %v12508_v20 = vmax.f32 %v10090_v14, 0.0  ;;  %v12509_v23 = vmax.f32 %v10094_v45, 0.0  ;;  %v10713_v31 = vpop.f32.mrf.mxu1 }
 0x376   : > { %v10705_v5 = vadd.f32 %v10479_v1, %v12510_v8  ;;  %v10709_v48 = vadd.f32 %v10505_v50, %v12510_v8  ;;  %v2853_v61 = vmax.f32 %v10681_v30, 0.0  ;;  %v2854_v27 = vmax.f32 %v10685_v15, 0.0  ;;  %v4563_v50 = vpop.permute.xlu1 %4562 }
 0x377   : > { %v4869_v26 = vmul.f32 %v4555_v33, %v12508_v20  ;;  %v4870_v32 = vmul.f32 %v4555_v33, %v12509_v23  ;;  %v5025_v22 = vadd.f32 %v5024_v62, %v4867_v46  ;;  %v5158_v39 = vadd.f32 %v5157_v35, %v4868_v40  ;;  %v12513_v62 = vld [vmem:[#allocation232_spill] sm:$0xff] }
 0x378   : > { %v4012_v14 = vadd.f32 %v4011_v19, %v3875_v41  ;;  %v4145_v55 = vadd.f32 %v4144_v42, %v3876_v17  ;;  %v12511_v33 = vmax.f32 %v10128_v11, 0.0  ;;  %v12512_v18 = vmax.f32 %v10132_v7, 0.0  ;;  %v4567_v11 = vpop.permute.xlu0 %4566 }
 0x379   : > { %v5026_v45 = vadd.f32 %v5025_v22, %v4869_v26  ;;  %v5159_v24 = vadd.f32 %v5158_v39, %v4870_v32  ;;  %v3877_v35 = vmul.f32 %v12513_v62, %v2853_v61  ;;  %v3878_v19 = vmul.f32 %v12513_v62, %v2854_v27  ;;  %v12516_v32 = vld [vmem:[#allocation135_spill] sm:$0xff]  ;;  %v10739_v39 = vpop.f32.mrf.mxu1 }
 0x37a   : > { %v4871_v1 = vmul.f32 %v4559_v34, %v12511_v33  ;;  %v4872_v20 = vmul.f32 %v4559_v34, %v12512_v18  ;;  %v12514_v42 = vmax.f32 %v10156_v53, 0.0  ;;  %v12515_v40 = vmax.f32 %v10160_v9, 0.0 }
 0x37b   : > { %v2855_v17 = vmax.f32 %v10705_v5, 0.0  ;;  %v2856_v7 = vmax.f32 %v10709_v48, 0.0  ;;  %v10733_v34 = vadd.f32 %v10531_v60, %v12516_v32  ;;  %v10737_v8 = vadd.f32 %v10557_v57, %v12516_v32  ;;  %v12519_v60 = vld [vmem:[#allocation235_spill] sm:$0xff] }
 0x37c   : > { %v4873_v46 = vmul.f32 %v4563_v50, %v12514_v42  ;;  %v4874_v41 = vmul.f32 %v4563_v50, %v12515_v40  ;;  %v5027_v26 = vadd.f32 %v5026_v45, %v4871_v1  ;;  %v5160_v23 = vadd.f32 %v5159_v24, %v4872_v20  ;;  %v4571_v1 = vpop.permute.xlu1 %4570 }
 0x37d   : > { %v4013_v53 = vadd.f32 %v4012_v14, %v3877_v35  ;;  %v4146_v22 = vadd.f32 %v4145_v55, %v3878_v19  ;;  %v12517_v18 = vmax.f32 %v10193_v16, 0.0  ;;  %v12518_v45 = vmax.f32 %v10197_v59, 0.0  ;;  %v4575_v16 = vpop.permute.xlu0 %4574  ;;  %v12522_v19 = vld [vmem:[#allocation140_spill] sm:$0xff] }
 0x37e   : > { %v5028_v9 = vadd.f32 %v5027_v26, %v4873_v46  ;;  %v5161_v33 = vadd.f32 %v5160_v23, %v4874_v41  ;;  %v3879_v20 = vmul.f32 %v12519_v60, %v2855_v17  ;;  %v3880_v57 = vmul.f32 %v12519_v60, %v2856_v7  ;;  %v2602_v23 = vpop.f32.mrf.mxu1 }
 0x37f   : > { %v4875_v50 = vmul.f32 %v4567_v11, %v12517_v18  ;;  %v4876_v24 = vmul.f32 %v4567_v11, %v12518_v45  ;;  %v12520_v14 = vmax.f32 %v10220_v63, 0.0  ;;  %v12521_v62 = vmax.f32 %v10224_v51, 0.0 }
 0x380   : > { %v10757_v59 = vadd.f32 %v10583_v49, %v12522_v19  ;;  %v10761_v42 = vadd.f32 %v10609_v12, %v12522_v19  ;;  %v2857_v41 = vmax.f32 %v10733_v34, 0.0  ;;  %v2858_v11 = vmax.f32 %v10737_v8, 0.0  ;;  %v4579_v60 = vpop.permute.xlu1 %4578  ;;  %v12525_v12 = vld [vmem:[#allocation234_spill] sm:$0xff]  ;;  %v2606_v19 = vpop.f32.mrf.mxu1 }
 0x381   : > { %v4877_v55 = vmul.f32 %v4571_v1, %v12520_v14  ;;  %v4878_v35 = vmul.f32 %v4571_v1, %v12521_v62  ;;  %v5029_v46 = vadd.f32 %v5028_v9, %v4875_v50  ;;  %v5162_v40 = vadd.f32 %v5161_v33, %v4876_v24 }
 0x382   : > { %v4014_v63 = vadd.f32 %v4013_v53, %v3879_v20  ;;  %v4147_v26 = vadd.f32 %v4146_v22, %v3880_v57  ;;  %v12523_v18 = vmax.f32 %v10257_v43, 0.0  ;;  %v12524_v49 = vmax.f32 %v10261_v6, 0.0  ;;  %v4583_v43 = vpop.permute.xlu0 %4582 }
 0x383   : > { %v5030_v51 = vadd.f32 %v5029_v46, %v4877_v55  ;;  %v5163_v32 = vadd.f32 %v5162_v40, %v4878_v35  ;;  %v3881_v9 = vmul.f32 %v12525_v12, %v2857_v41  ;;  %v3882_v33 = vmul.f32 %v12525_v12, %v2858_v11  ;;  %v12528_v55 = vld [vmem:[#allocation139_spill] sm:$0xff]  ;;  %v12535_v12 = vld [vmem:[#allocation164_spill] sm:$0xff] }
 0x384   : > { %v4879_v45 = vmul.f32 %v4575_v16, %v12523_v18  ;;  %v4880_v1 = vmul.f32 %v4575_v16, %v12524_v49  ;;  %v12526_v53 = vmax.f32 %v10285_v0, 0.0  ;;  %v12527_v50 = vmax.f32 %v10289_v3, 0.0  ;;  %v12530_v49 = vld [vmem:[#allocation162_spill] sm:$0xff] }
 0x385   : > { %v11387_v20 = vmax.f32 %v10757_v59, 0.0  ;;  %v11384_v6 = vmax.f32 %v10761_v42, 0.0  ;;  %v10783_v62 = vadd.f32 %v10635_v25, %v12528_v55  ;;  %v10787_v35 = vadd.f32 %v10661_v44, %v12528_v55  ;;  %v12532_v25 = vld [vmem:[#allocation237_spill] sm:$0xff] }
 0x386   : > { %v4881_v22 = vmul.f32 %v4579_v60, %v12526_v53  ;;  %v4882_v24 = vmul.f32 %v4579_v60, %v12527_v50  ;;  %v5031_v57 = vadd.f32 %v5030_v51, %v4879_v45  ;;  %v5164_v14 = vadd.f32 %v5163_v32, %v4880_v1  ;;  %v4587_v32 = vpop.permute.xlu1 %4586  ;;  %v12537_v53 = vld [vmem:[#allocation144_spill] sm:$0xff] }
 0x387   : > { %v4015_v0 = vadd.f32 %v4014_v63, %v3881_v9  ;;  %v4148_v16 = vadd.f32 %v4147_v26, %v3882_v33  ;;  %v12529_v40 = vmax.f32 %v10317_v36, 0.0  ;;  %v12531_v60 = vmax.f32 %v12530_v49, 0.0  ;;  %v12533_v63 = vld [vmem:[#allocation163_spill] sm:$0xff]  ;;  %v4591_v36 = vpop.permute.xlu0 %4590  ;;  %v2608_v49 = vpop.f32.mrf.mxu1 }
 0x388   : > { %v5032_v3 = vadd.f32 %v5031_v57, %v4881_v22  ;;  %v5165_v46 = vadd.f32 %v5164_v14, %v4882_v24  ;;  %v3883_v45 = vmul.f32 %v12532_v25, %v11387_v20  ;;  %v3884_v44 = vmul.f32 %v12532_v25, %v11384_v6  ;;  %v12538_v25 = vld [vmem:[#allocation165_spill] sm:$0xff] }
 0x389   : > { %v4883_v18 = vmul.f32 %v4583_v43, %v12529_v40  ;;  %v4884_v51 = vmul.f32 %v4583_v43, %v12531_v60  ;;  %v12534_v26 = vmax.f32 %v12533_v63, 0.0  ;;  %v12536_v9 = vmax.f32 %v12535_v12, 0.0 }
 0x38a   : > { %v10805_v22 = vadd.f32 %v10687_v56, %v12537_v53  ;;  %v10809_v50 = vadd.f32 %v10713_v31, %v12537_v53  ;;  %v11386_v57 = vmax.f32 %v10783_v62, 0.0  ;;  %v11385_v14 = vmax.f32 %v10787_v35, 0.0  ;;  %v12540_v56 = vld [vmem:[#allocation166_spill] sm:$0xff]  ;;  %v4595_v6 = vpop.permute.xlu1 %4594  ;;  %v12542_v31 = vld [vmem:[#allocation236_spill] sm:$0xff] }
 0x38b   : > { %v4885_v1 = vmul.f32 %v4587_v32, %v12534_v26  ;;  %v4886_v33 = vmul.f32 %v4587_v32, %v12536_v9  ;;  %v5033_v24 = vadd.f32 %v5032_v3, %v4883_v18  ;;  %v5166_v43 = vadd.f32 %v5165_v46, %v4884_v51  ;;  %v12545_v51 = vld [vmem:[#allocation168_spill] sm:$0xff] }
 0x38c   : > { %v4016_v55 = vadd.f32 %v4015_v0, %v3883_v45  ;;  %v4149_v40 = vadd.f32 %v4148_v16, %v3884_v44  ;;  %v12539_v63 = vmax.f32 %v12538_v25, 0.0  ;;  %v12541_v12 = vmax.f32 %v12540_v56, 0.0  ;;  %v12543_v0 = vld [vmem:[#allocation167_spill] sm:$0xff] }
 0x38d   : > { %v5034_v60 = vadd.f32 %v5033_v24, %v4885_v1  ;;  %v5167_v32 = vadd.f32 %v5166_v43, %v4886_v33  ;;  %v3885_v3 = vmul.f32 %v12542_v31, %v11386_v57  ;;  %v3886_v46 = vmul.f32 %v12542_v31, %v11385_v14  ;;  %v4599_v1 = vpop.permute.xlu0 %4598  ;;  %v12547_v43 = vld [vmem:[#allocation143_spill] sm:$0xff]  ;;  %v2610_v31 = vpop.f32.mrf.mxu1  ;;  %v12550_v14 = vld [vmem:[#allocation170_spill] sm:$0xff] }
 0x38e   : > { %v4887_v26 = vmul.f32 %v4591_v36, %v12539_v63  ;;  %v4888_v9 = vmul.f32 %v4591_v36, %v12541_v12  ;;  %v12544_v16 = vmax.f32 %v12543_v0, 0.0  ;;  %v12546_v45 = vmax.f32 %v12545_v51, 0.0 }
 0x38f   : > { %v11389_v33 = vmax.f32 %v10805_v22, 0.0  ;;  %v11388_v36 = vmax.f32 %v10809_v50, 0.0  ;;  %v10831_v25 = vadd.f32 %v10739_v39, %v12547_v43  ;;  %v10834_v63 = vadd.f32 %v2602_v23, %v12547_v43 }
 0x390   : > { %v4889_v18 = vmul.f32 %v4595_v6, %v12544_v16  ;;  %v4890_v44 = vmul.f32 %v4595_v6, %v12546_v45  ;;  %v5035_v53 = vadd.f32 %v5034_v60, %v4887_v26  ;;  %v5168_v24 = vadd.f32 %v5167_v32, %v4888_v9  ;;  %v12548_v6 = vld [vmem:[#allocation169_spill] sm:$0xff]  ;;  %v4603_v60 = vpop.permute.xlu1 %4602  ;;  %v12552_v32 = vld [vmem:[#allocation239_spill] sm:$0xff]  ;;  %v12555_v9 = vld [vmem:[#allocation172_spill] sm:$0xff] }
 0x391   : > { %v4017_v56 = vadd.f32 %v4016_v55, %v3885_v3  ;;  %v4150_v12 = vadd.f32 %v4149_v40, %v3886_v46  ;;  %v12549_v51 = vmax.f32 %v12548_v6, 0.0  ;;  %v12551_v57 = vmax.f32 %v12550_v14, 0.0  ;;  %v12553_v55 = vld [vmem:[#allocation171_spill] sm:$0xff] }
 0x392   : > { %v5036_v0 = vadd.f32 %v5035_v53, %v4889_v18  ;;  %v5169_v16 = vadd.f32 %v5168_v24, %v4890_v44  ;;  %v3887_v39 = vmul.f32 %v12552_v32, %v11389_v33  ;;  %v3888_v23 = vmul.f32 %v12552_v32, %v11388_v36  ;;  %v4607_v18 = vpop.permute.xlu0 %4606  ;;  %v12557_v44 = vld [vmem:[#allocation152_spill] sm:$0xff]  ;;  %v2612_v32 = vpop.f32.mrf.mxu1 }
 0x393   : > { %v4891_v45 = vmul.f32 %v4599_v1, %v12549_v51  ;;  %v4892_v20 = vmul.f32 %v4599_v1, %v12551_v57  ;;  %v12554_v40 = vmax.f32 %v12553_v55, 0.0  ;;  %v12556_v3 = vmax.f32 %v12555_v9, 0.0 }
 0x394   : > { %v10851_v53 = vadd.f32 %v2606_v19, %v12557_v44  ;;  %v10854_v57 = vadd.f32 %v2608_v49, %v12557_v44  ;;  %v2865_v24 = vmax.f32 %v10831_v25, 0.0  ;;  %v11390_v43 = vmax.f32 %v10834_v63, 0.0  ;;  %v4611_v33 = vpop.permute.xlu1 %4610  ;;  %v12561_v49 = vld [vmem:[#allocation238_spill] sm:$0xff] }
 0x395   : > { %v4893_v26 = vmul.f32 %v4603_v60, %v12554_v40  ;;  %v4894_v46 = vmul.f32 %v4603_v60, %v12556_v3  ;;  %v5037_v14 = vadd.f32 %v5036_v0, %v4891_v45  ;;  %v5170_v1 = vadd.f32 %v5169_v16, %v4892_v20  ;;  %v12559_v3 = vld [vmem:[#allocation173_spill] sm:$0xff]  ;;  %v12564_v45 = vld [vmem:[#allocation175_spill] sm:$0xff] }
 0x396   : > { %v4018_v6 = vadd.f32 %v4017_v56, %v3887_v39  ;;  %v4151_v51 = vadd.f32 %v4150_v12, %v3888_v23  ;;  %v12558_v60 = vmax.f32 %v10473_v52, 0.0  ;;  %v12560_v19 = vmax.f32 %v12559_v3, 0.0  ;;  %v12562_v56 = vld [vmem:[#allocation174_spill] sm:$0xff]  ;;  %v4615_v52 = vpop.permute.xlu0 %4614 }
 0x397   : > { %v5038_v55 = vadd.f32 %v5037_v14, %v4893_v26  ;;  %v5171_v40 = vadd.f32 %v5170_v1, %v4894_v46  ;;  %v3889_v20 = vmul.f32 %v12561_v49, %v2865_v24  ;;  %v3890_v0 = vmul.f32 %v12561_v49, %v11390_v43  ;;  %v12566_v14 = vld [vmem:[#allocation151_spill] sm:$0xff] }
 0x398   : > { %v4895_v9 = vmul.f32 %v4607_v18, %v12558_v60  ;;  %v4896_v36 = vmul.f32 %v4607_v18, %v12560_v19  ;;  %v12563_v12 = vmax.f32 %v12562_v56, 0.0  ;;  %v12565_v39 = vmax.f32 %v12564_v45, 0.0  ;;  %v4619_v43 = vpop.permute.xlu1 %4618 }
 0x399   : > { %v2867_v26 = vmax.f32 %v10851_v53, 0.0  ;;  %v2868_v46 = vmax.f32 %v10854_v57, 0.0  ;;  %v10875_v1 = vadd.f32 %v2610_v31, %v12566_v14  ;;  %v10878_v60 = vadd.f32 %v2612_v32, %v12566_v14  ;;  %v12570_v32 = vld [vmem:[#allocation176_spill] sm:$0xff] }
 0x39a   : > { %v4897_v16 = vmul.f32 %v4611_v33, %v12563_v12  ;;  %v4898_v23 = vmul.f32 %v4611_v33, %v12565_v39  ;;  %v5039_v18 = vadd.f32 %v5038_v55, %v4895_v9  ;;  %v5172_v44 = vadd.f32 %v5171_v40, %v4896_v36  ;;  %v12569_v36 = vld [vmem:[#allocation241_spill] sm:$0xff] }
 0x39b   : > { %v4019_v3 = vadd.f32 %v4018_v6, %v3889_v20  ;;  %v4152_v19 = vadd.f32 %v4151_v51, %v3890_v0  ;;  %v12567_v12 = vmax.f32 %v10525_v2, 0.0  ;;  %v12568_v45 = vmax.f32 %v10529_v13, 0.0  ;;  %v12572_v40 = vld [vmem:[#allocation177_spill] sm:$0xff]  ;;  %v4623_v2 = vpop.permute.xlu0 %4622 }
 0x39c   : > { %v5040_v49 = vadd.f32 %v5039_v18, %v4897_v16  ;;  %v5173_v56 = vadd.f32 %v5172_v44, %v4898_v23  ;;  %v3891_v55 = vmul.f32 %v12569_v36, %v2867_v26  ;;  %v3892_v31 = vmul.f32 %v12569_v36, %v2868_v46 }
 0x39d   : > { %v4899_v33 = vmul.f32 %v4615_v52, %v12567_v12  ;;  %v4900_v39 = vmul.f32 %v4615_v52, %v12568_v45  ;;  %v12571_v6 = vmax.f32 %v12570_v32, 0.0  ;;  %v12573_v9 = vmax.f32 %v12572_v40, 0.0 }
 0x39e   : > { %v2869_v13 = vmax.f32 %v10875_v1, 0.0  ;;  %v2870_v23 = vmax.f32 %v10878_v60, 0.0  ;;  %v4020_v52 = vadd.f32 %v4019_v3, %v3891_v55  ;;  %v4153_v18 = vadd.f32 %v4152_v19, %v3892_v31 }
 0x39f   : > { %v4901_v51 = vmul.f32 %v4619_v43, %v12571_v6  ;;  %v4902_v20 = vmul.f32 %v4619_v43, %v12573_v9  ;;  %v5041_v0 = vadd.f32 %v5040_v49, %v4899_v33  ;;  %v5174_v16 = vadd.f32 %v5173_v56, %v4900_v39  ;;  %v4627_v6 = vpop.permute.xlu1 %4626  ;;  %v12576_v43 = vld [vmem:[#allocation240_spill] sm:$0xff]  ;;  %v12577_v33 = vld [vmem:[#allocation178_spill] sm:$0xff]  ;;  %v12579_v39 = vld [vmem:[#allocation179_spill] sm:$0xff] }
 0x3a0   : > { %v12574_v12 = vmax.f32 %v10577_v4, 0.0  ;;  %v12575_v36 = vmax.f32 %v10581_v37, 0.0  ;;  %v3893_v49 = vmul.f32 %v12576_v43, %v2869_v13  ;;  %v3894_v56 = vmul.f32 %v12576_v43, %v2870_v23  ;;  %v4631_v4 = vpop.permute.xlu0 %4630 }
 0x3a1   : > { %v5042_v44 = vadd.f32 %v5041_v0, %v4901_v51  ;;  %v5175_v14 = vadd.f32 %v5174_v16, %v4902_v20  ;;  %v12578_v3 = vmax.f32 %v12577_v33, 0.0  ;;  %v12580_v55 = vmax.f32 %v12579_v39, 0.0 }
 0x3a2   : > { %v4903_v45 = vmul.f32 %v4623_v2, %v12574_v12  ;;  %v4904_v32 = vmul.f32 %v4623_v2, %v12575_v36  ;;  %v4021_v37 = vadd.f32 %v4020_v52, %v3893_v49  ;;  %v4154_v9 = vadd.f32 %v4153_v18, %v3894_v56 }
 0x3a3   : > { %v4905_v19 = vmul.f32 %v4627_v6, %v12578_v3  ;;  %v4906_v31 = vmul.f32 %v4627_v6, %v12580_v55  ;;  %v4907_v0 = vmul.f32 %v4631_v4, %v2849_v28  ;;  %v4908_v16 = vmul.f32 %v4631_v4, %v2850_v21  ;;  %v4635_v12 = vpop.permute.xlu1 %4634 }
 0x3a4   : > { %v5043_v51 = vadd.f32 %v5042_v44, %v4903_v45  ;;  %v5176_v40 = vadd.f32 %v5175_v14, %v4904_v32  ;;  %v4909_v36 = vmul.f32 %v4635_v12, %v2851_v47  ;;  %v4910_v6 = vmul.f32 %v4635_v12, %v2852_v29  ;;  %v4639_v43 = vpop.permute.xlu0 %4638 }
 0x3a5   : > { %v4022_v52 = vrot.slane %v4021_v37, 4  ;;  %v4155_v18 = vrot.slane %v4154_v9, 4  ;;  %v4911_v54 = vmul.f32 %v4639_v43, %v2853_v61  ;;  %v4912_v58 = vmul.f32 %v4639_v43, %v2854_v27 }
 0x3a6   : > { %v5044_v20 = vadd.f32 %v5043_v51, %v4905_v19  ;;  %v5177_v2 = vadd.f32 %v5176_v40, %v4906_v31  ;;  %v12581_v5 = vmax.f32 %v10757_v59, 0.0  ;;  %v12582_v48 = vmax.f32 %v10761_v42, 0.0 }
 0x3a7   : > { %v4643_v28 = vpop.permute.xlu1 %4642  ;;  %v4023_v49 = vadd.f32 %v4022_v52, %v4021_v37  ;;  %v4156_v56 = vadd.f32 %v4155_v18, %v4154_v9  ;;  %v12583_v34 = vmax.f32 %v10783_v62, 0.0  ;;  %v12584_v8 = vmax.f32 %v10787_v35, 0.0 }
 0x3a8   : > { %v5045_v44 = vadd.f32 %v5044_v20, %v4907_v0  ;;  %v5178_v14 = vadd.f32 %v5177_v2, %v4908_v16  ;;  %v4913_v38 = vmul.f32 %v4643_v28, %v2855_v17  ;;  %v4914_v10 = vmul.f32 %v4643_v28, %v2856_v7  ;;  %v4647_v21 = vpop.permute.xlu0 %4646 }
 0x3a9   : > { %v4915_v30 = vmul.f32 %v4647_v21, %v2857_v41  ;;  %v4916_v15 = vmul.f32 %v4647_v21, %v2858_v11  ;;  %v4024_v55 = vrot.slane %v4023_v49, 2  ;;  %v4157_v31 = vrot.slane %v4156_v56, 2 }
 0x3aa   : > { %v5046_v45 = vadd.f32 %v5045_v44, %v4909_v36  ;;  %v5179_v32 = vadd.f32 %v5178_v14, %v4910_v6  ;;  %v12585_v59 = vmax.f32 %v10805_v22, 0.0  ;;  %v12586_v42 = vmax.f32 %v10809_v50, 0.0 }
 0x3ab   : > { %v4651_v61 = vpop.permute.xlu1 %4650  ;;  %v4025_v16 = vadd.f32 %v4024_v55, %v4023_v49  ;;  %v4158_v12 = vadd.f32 %v4157_v31, %v4156_v56  ;;  %v12587_v35 = vmax.f32 %v10834_v63, 0.0  ;;  %v6008_v31 = vmov 1966171168  }
 0x3ac   : > { %v5047_v47 = vadd.f32 %v5046_v45, %v4911_v54  ;;  %v5180_v29 = vadd.f32 %v5179_v32, %v4912_v58  ;;  %v4917_v27 = vmul.f32 %v4651_v61, %v12581_v5  ;;  %v4918_v17 = vmul.f32 %v4651_v61, %v12582_v48  ;;  %v4655_v7 = vpop.permute.xlu0 %4654 }
 0x3ad   : > { %v4919_v41 = vmul.f32 %v4655_v7, %v12583_v34  ;;  %v4920_v11 = vmul.f32 %v4655_v7, %v12584_v8  ;;  %v4026_v45 = vrot.slane %v4025_v16, 1  ;;  %v4159_v32 = vrot.slane %v4158_v12, 1 }
 0x3ae   : > { %v5048_v33 = vadd.f32 %v5047_v47, %v4913_v38  ;;  %v5181_v3 = vadd.f32 %v5180_v29, %v4914_v10 }
 0x3af   : > { %v4659_v40 = vpop.permute.xlu1 %4658  ;;  %v4027_v57 = vadd.f32 %v4026_v45, %v4025_v16 }
 0x3b0   : > { %v5049_v19 = vadd.f32 %v5048_v33, %v4915_v30  ;;  %v5182_v39 = vadd.f32 %v5181_v3, %v4916_v15  ;;  %v4921_v37 = vmul.f32 %v4659_v40, %v12585_v59  ;;  %v4922_v9 = vmul.f32 %v4659_v40, %v12586_v42  ;;  %v4663_v20 = vpop.permute.xlu0 %4662 }
 0x3b1   : > { %v4923_v62 = vmul.f32 %v4663_v20, %v2865_v24  ;;  %v4924_v43 = vmul.f32 %v4663_v20, %v12587_v35 }
 0x3b2   : > { %v5050_v4 = vadd.f32 %v5049_v19, %v4917_v27  ;;  %v5183_v51 = vadd.f32 %v5182_v39, %v4918_v17 }
 0x3b3   : > { %v4667_v44 = vpop.permute.xlu1 %4666 }
 0x3b4   : > { %v5051_v2 = vadd.f32 %v5050_v4, %v4919_v41  ;;  %v5184_v0 = vadd.f32 %v5183_v51, %v4920_v11  ;;  %v4925_v22 = vmul.f32 %v4667_v44, %v2867_v26  ;;  %v4926_v50 = vmul.f32 %v4667_v44, %v2868_v46  ;;  %v4671_v14 = vpop.permute.xlu0 %4670 }
 0x3b5   : > { %v4927_v25 = vmul.f32 %v4671_v14, %v2869_v13  ;;  %v4928_v63 = vmul.f32 %v4671_v14, %v2870_v23  ;;  %v4160_v46 = vadd.f32 %v4159_v32, %v4158_v12  ;;  %v5239_v4 = vunpack.c.l.s4 %v6008_v31 }
 0x3b6   : > { %v5052_v36 = vadd.f32 %v5051_v2, %v4921_v37  ;;  %v5185_v6 = vadd.f32 %v5184_v0, %v4922_v9  ;;  %v5241_v51 = vlaneseq }
 0x3b7   : > { %v5219_v24 = vpop.permute.xlu1 %5218  ;;  %v5240_v11 = vunpack.c.0.s8 %v5239_v4 }
 0x3b8   : > { %v5053_v52 = vadd.f32 %v5052_v36, %v4923_v62  ;;  %v5186_v18 = vadd.f32 %v5185_v6, %v4924_v43  ;;  %v5242_v40 = vshrl.u32 %v5241_v51, 7  ;;  %vm5255_vm0 = vcmp.lt.s32.totalorder %v5241_v51, 256 }
 0x3ba   : > { %v5054_v54 = vadd.f32 %v5053_v52, %v4925_v22  ;;  %v5187_v58 = vadd.f32 %v5186_v18, %v4926_v50  ;;  %v5243_v42 = vsub.s32 %v5240_v11, %v5242_v40 }
 0x3bb   : > { %v5199_v10 = vpop.permute.xlu1 %5198 }
 0x3bc   : > { %v5055_v28 = vadd.f32 %v5054_v54, %v4927_v25  ;;  %v5188_v53 = vadd.f32 %v5187_v58, %v4928_v63  ;;  %v5201_v29 = vadd.f32 %v5199_v10, %v4027_v57  ;;  %v5202_v49 = vadd.f32 %v5199_v10, %v4160_v46 }
 0x3be   : > { %v5056_v26 = vrot.slane %v5055_v28, 4  ;;  %v5189_v38 = vrot.slane %v5188_v53, 4  ;;  %v5570_v3 = vmul.f32 -1.442695, %v5201_v29  ;;  %v5571_v1 = vmul.f32 -1.442695, %v5202_v49 }
 0x3c0   : > { %v5057_v21 = vadd.f32 %v5056_v26, %v5055_v28  ;;  %v5190_v47 = vadd.f32 %v5189_v38, %v5188_v53  ;;  %5838 = vpow2.f32 %v5570_v3 }
 0x3c1   : > { %5840 = vpow2.f32 %v5571_v1 }
 0x3c2   : > { %v5058_v56 = vrot.slane %v5057_v21, 2  ;;  %v5191_v33 = vrot.slane %v5190_v47, 2 }
 0x3c4   : > { %v5059_v13 = vadd.f32 %v5058_v56, %v5057_v21  ;;  %v5192_v30 = vadd.f32 %v5191_v33, %v5190_v47 }
 0x3c6   : > { %v5060_v60 = vrot.slane %v5059_v13, 1  ;;  %v5193_v23 = vrot.slane %v5192_v30, 1 }
 0x3c8   : > { %v5061_v15 = vadd.f32 %v5060_v60, %v5059_v13  ;;  %v5194_v61 = vadd.f32 %v5193_v23, %v5192_v30 }
 0x3ca   : > { %v5221_v5 = vadd.f32 %v5219_v24, %v5061_v15  ;;  %v5222_v27 = vadd.f32 %v5219_v24, %v5194_v61 }
 0x3cc   : > { %v5572_v48 = vmul.f32 -1.442695, %v5221_v5  ;;  %v5573_v17 = vmul.f32 -1.442695, %v5222_v27 }
 0x3cd   : > { %v5839_v7 = vpop.eup %5838 }
 0x3ce   : > { %5842 = vpow2.f32 %v5572_v48  ;;  %v5841_v19 = vpop.eup %5840  ;;  %v5209_v39 = vadd.f32 1.0, %v5839_v7 }
 0x3cf   : > { %5844 = vpow2.f32 %v5573_v17  ;;  %v5210_v55 = vadd.f32 1.0, %v5841_v19 }
 0x3d0   : > { %5846 = vrcp.f32 %v5209_v39 }
 0x3d1   : > { %5848 = vrcp.f32 %v5210_v55 }
 0x3db   : > { %v5843_v34 = vpop.eup %5842 }
 0x3dc   : > { %v5845_v41 = vpop.eup %5844  ;;  %v5229_v8 = vadd.f32 1.0, %v5843_v34 }
 0x3dd   : > { %v5230_v59 = vadd.f32 1.0, %v5845_v41  ;;  %v5847_v37 = vpop.eup %5846 }
 0x3de   : > { %5850 = vrcp.f32 %v5229_v8  ;;  %v5849_v9 = vpop.eup %5848 }
 0x3df   : > { %5852 = vrcp.f32 %v5230_v59  ;;  %v5237_v20 = vcombine.low %v5847_v37, %v5849_v9 }
 0x3e1   : > { %v5244_v2 = vrot.slane %v5237_v20, %v5243_v42 }
 0x3e3   : > { %v5251_v0 = vrot.slane %v5244_v2, %v5243_v42 }
 0x3e5   : > { %5257 = vst.msk [vmem:[%s301_s19] ss:$2 sm:$0x3] %vm5255_vm0, %v5251_v0 }
 0x3eb   : > { %v5851_v16 = vpop.eup %5850 }
 0x3ec   : > { %v5853_v12 = vpop.eup %5852  ;;  %v5290_v36 = vsel %vm5289_vm1, %v5851_v16, -inf }
 0x3ed   : > { %v5260_v6 = vcombine.low %v5851_v16, %v5853_v12  ;;  %v5291_v62 = vsel %vm5289_vm1, %v5853_v12, -inf }
 0x3ee   : > { %v5292_v35 = vmax.f32 %v5290_v36, %v5291_v62 }
 0x3ef   : > { %v5267_v43 = vrot.slane %v5260_v6, %v5243_v42 }
 0x3f0   : > { %5293 = vmax.xlane.f32.xlu0 %v5292_v35 }
 0x3f1   : > { %v5274_v44 = vrot.slane %v5267_v43, %v5243_v42 }
 0x3f3   : > { %5574 = vst.msk [vmem:[%s301_s19 + $0x1] ss:$2 sm:$0x3] %vm5255_vm0, %v5274_v44 }
 0x479   : > { %v5294_v22 = vpop.xlane.xlu0 %5293 }
 0x47a   : > { %v5295_v50 = vrot.slane %v5294_v22, 4 }
 0x47c   : > { %v5296_v14 = vmax.f32 %v5294_v22, %v5295_v50 }
 0x47e   : > { %v5297_v52 = vrot.slane %v5296_v14, 2 }
 0x480   : > { %v5298_v18 = vmax.f32 %v5296_v14, %v5297_v52 }
 0x482   : > { %v5299_v45 = vrot.slane %v5298_v18, 1 }
 0x484   : > { %v5300_v32 = vmax.f32 %v5298_v18, %v5299_v45 }
 0x486   : > { %5611 = vpush %v5300_v32 }
 0x4b7   : > { %s5612_s28 = spop %5611 }
 0x4b8   : > { %v5302_v54 = vstv %s5612_s28 }
 0x4b9   : > { %5303 = vst [vmem:[%s309_s27] sm:$0xff] %v5302_v54 }
 0x4ba PF: > { %s17_s23 = sadd.s32 1, %s6004_s23   ;;  %s12588_s21 = smov %s6000_s22 }
 0x4bb   : > { %p14_p5 = scmp.ge.s32.totalorder %s17_s23, 4   ;;  %s12589_s22 = smov %s12591_s24 }
 0x4bd   :  { %16 = sbr.rel (!%p14_p5) target bundleno = 2 (0x2), region = 83 }

</bundles_post_ra>
